<compile_context>
chip_gen: v5e
topology: v5e:2x2
jax: 0.10.0
libtpu: 0.0.40
codegen_flags: <defaults>
</compile_context>

<pallas_src>
import numpy as np

import jax
import jax.numpy as jnp
from jax.experimental import pallas as pl
from jax.experimental.pallas import tpu as pltpu

LEAKY_SLOPE = 0.2
BN_EPS = 1e-5
VMEM_LIMIT = 32 * 1024 * 1024
ROWS_PER_IMG = 56            # 7 x 8 width-padded conv2 output grid
PAT_K = 384                  # 16 taps * 17 (16 patch pixels + ones) = 272 -> 384
FC_K = ROWS_PER_IMG * 128    # 7168 padded fc1 input features (6272 useful)


# ----------------------------------------------------------------------------
# Kernel 1: fused conv1 + LeakyReLU + conv2 (+ BN2d partial statistics)
# ----------------------------------------------------------------------------
def _conv_kernel(pat_ref, w1_ref, w2_ref, z_ref, st_ref):
    # pat_ref: (tb*56, 384) bf16   packed conv1 patches per conv2 output pos
    # w1_ref : (384, 1024) bf16    block-diagonal conv1 weight (+bias rows)
    # w2_ref : (1024, 128) bf16    conv2 weight, row = tap*64 + in_channel
    # z_ref  : (tb*56, 128) bf16   conv2 pre-BN output (7x8 padded grid)
    # st_ref : (8, 128) f32        rows 0/1 = per-tile [sum, sum^2], rest 0
    y1 = jnp.dot(pat_ref[...], w1_ref[...],
                 preferred_element_type=jnp.float32)          # (tb*56, 1024)
    y1 = jnp.where(y1 > 0, y1, LEAKY_SLOPE * y1)
    acc = jnp.dot(y1.astype(jnp.bfloat16), w2_ref[...],
                  preferred_element_type=jnp.float32)         # (tb*56, 128)
    z_ref[...] = acc.astype(z_ref.dtype)

    # BatchNorm2d partial batch statistics over the 49 valid positions per
    # image.  Row layout is b*56 + oh*8 + ow, so a row is valid iff row%8 < 7.
    rows = jax.lax.broadcasted_iota(jnp.int32, acc.shape, 0)
    am = jnp.where((rows & 7) < 7, acc, 0.0)
    s1 = jnp.sum(am, axis=0, keepdims=True)                   # (1, 128)
    s2 = jnp.sum(am * am, axis=0, keepdims=True)              # (1, 128)
    rid = jax.lax.broadcasted_iota(jnp.int32, st_ref.shape, 0)
    st_ref[...] = jnp.where(rid == 0, s1, jnp.where(rid == 1, s2, 0.0))


def conv_stage(pat, w1blk, w2flat, batch, tb):
    nb = batch // tb
    return pl.pallas_call(
        _conv_kernel,
        out_shape=(
            jax.ShapeDtypeStruct((batch * ROWS_PER_IMG, 128), jnp.bfloat16),
            jax.ShapeDtypeStruct((nb * 8, 128), jnp.float32),
        ),
        grid_spec=pltpu.PrefetchScalarGridSpec(
            num_scalar_prefetch=0,
            grid=(nb,),
            in_specs=[
                pl.BlockSpec((tb * ROWS_PER_IMG, PAT_K), lambda i: (i, 0)),
                pl.BlockSpec((PAT_K, 1024), lambda i: (0, 0)),
                pl.BlockSpec((1024, 128), lambda i: (0, 0)),
            ],
            out_specs=[
                pl.BlockSpec((tb * ROWS_PER_IMG, 128), lambda i: (i, 0)),
                pl.BlockSpec((8, 128), lambda i: (i, 0)),
            ],
        ),
        compiler_params=pltpu.CompilerParams(
            dimension_semantics=("parallel",),
            vmem_limit_bytes=VMEM_LIMIT,
        ),
    )(pat, w1blk, w2flat)


# ----------------------------------------------------------------------------
# Kernel 2: BN2d+LeakyReLU (on the fly) + fc1 (bf16) + BN1d + LeakyReLU + fc2
# ----------------------------------------------------------------------------
def _fc_kernel(x_ref, sc_ref, sh_ref, w1_ref, g3_ref, b3_ref, w2_ref,
               o_ref, acc_ref):
    k = pl.program_id(1)

    @pl.when(k == 0)
    def _():
        acc_ref[...] = jnp.zeros_like(acc_ref)

    # conv2 BatchNorm (precomputed scale/shift) + LeakyReLU, applied per K tile
    xin = x_ref[...].astype(jnp.float32) * sc_ref[...] + sh_ref[...]
    xin = jnp.where(xin > 0, xin, LEAKY_SLOPE * xin)
    acc_ref[...] += jnp.dot(xin.astype(jnp.bfloat16), w1_ref[...],
                            preferred_element_type=jnp.float32)

    @pl.when(k == pl.num_programs(1) - 1)
    def _():
        h = acc_ref[...]                                   # (B, block_n) f32
        mean = jnp.mean(h, axis=0, keepdims=True)          # BN1d batch stats
        var = jnp.mean((h - mean) ** 2, axis=0, keepdims=True)
        h = (h - mean) * jax.lax.rsqrt(var + BN_EPS)
        h = h * g3_ref[...] + b3_ref[...]
        h = jnp.where(h > 0, h, LEAKY_SLOPE * h)
        # folded fc2 (1024 -> 1, zero-padded to 128 lanes): this N block's part
        o_ref[...] = jnp.dot(h, w2_ref[...], preferred_element_type=jnp.float32)


def fc_stage(xfc, scale, shift, w1k, g3, b3, w2k, batch,
             block_k=1792, block_n=1024):
    kdim = xfc.shape[1]
    ndim = w1k.shape[1]
    nk = kdim // block_k
    nn = ndim // block_n
    return pl.pallas_call(
        _fc_kernel,
        out_shape=jax.ShapeDtypeStruct((batch, nn * 128), jnp.float32),
        grid_spec=pltpu.PrefetchScalarGridSpec(
            num_scalar_prefetch=0,
            grid=(nn, nk),
            in_specs=[
                pl.BlockSpec((batch, block_k), lambda n, k: (0, k)),
                pl.BlockSpec((1, block_k), lambda n, k: (0, k)),
                pl.BlockSpec((1, block_k), lambda n, k: (0, k)),
                pl.BlockSpec((block_k, block_n), lambda n, k: (k, n)),
                pl.BlockSpec((1, block_n), lambda n, k: (0, n)),
                pl.BlockSpec((1, block_n), lambda n, k: (0, n)),
                pl.BlockSpec((block_n, 128), lambda n, k: (n, 0)),
            ],
            out_specs=pl.BlockSpec((batch, 128), lambda n, k: (0, n)),
            scratch_shapes=[pltpu.VMEM((batch, block_n), jnp.float32)],
        ),
        compiler_params=pltpu.CompilerParams(
            dimension_semantics=("parallel", "arbitrary"),
            vmem_limit_bytes=VMEM_LIMIT,
        ),
    )(xfc, scale, shift, w1k, g3, b3, w2k)


# ----------------------------------------------------------------------------
# Wrapper-side layout plumbing (pure XLA / numpy, no compute hoisting)
# ----------------------------------------------------------------------------
def _pick_tb(batch):
    """Largest batch tile (<=16) dividing `batch`, preferring >=2 grid steps."""
    cands = [d for d in (16, 8, 4, 2, 1) if batch % d == 0]
    for d in cands:
        if batch // d >= 2:
            return d
    return cands[0]


def _fc_block_n():
    """fc1 N-block size: nn=1 on single-TC chips, nn=2 on dual-TC v7x."""
    try:
        kind = jax.devices()[0].device_kind.lower()
    except Exception:
        kind = ""
    return 512 if "v7" in kind else 1024


def build_conv1_patches(x_nchw):
    """Packed conv1 patches per conv2 output position: (B*56, 384) bf16.

    Row b*56 + oh2*8 + ow2 holds, for each conv2 tap t=kh2*4+kw2, the
    augmented (16 pixels + ones) conv1 patch whose conv1 evaluation equals the
    zero-padded conv1 activation y1p[2*oh2+kh2, 2*ow2+kw2], packed into columns
    [t*17, (t+1)*17).  Padded positions have all-zero patches (including the
    ones slot), so conv1+bias evaluates to exactly zero there, matching conv2's
    zero padding.  Columns 272..383 are lane padding.
    """
    B = x_nchw.shape[0]
    x = jnp.transpose(x_nchw, (0, 2, 3, 1))                  # (B,28,28,1)
    xp = jnp.pad(x, ((0, 0), (1, 1), (1, 1), (0, 0)))        # (B,30,30,1)
    cols = [xp[:, kh:kh + 28:2, kw:kw + 28:2, 0]
            for kh in range(4) for kw in range(4)]
    patches = jnp.stack(cols, axis=-1)                       # (B,14,14,16)
    patches = jnp.concatenate(
        [patches, jnp.ones(patches.shape[:3] + (1,), patches.dtype)], axis=-1)
    pp = jnp.pad(patches, ((0, 0), (1, 1), (1, 3), (0, 0)))  # (B,16,18,17)
    phases = [pp[:, kh:kh + 14:2, kw:kw + 16:2, :]
              for kh in range(4) for kw in range(4)]         # each (B,7,8,17)
    pat = jnp.stack(phases, axis=3)                          # (B,7,8,16,17)
    pat = pat.reshape(B, 7, 8, 272)
    pat = jnp.pad(pat, ((0, 0), (0, 0), (0, 0), (0, PAT_K - 272)))
    return pat.reshape(B * ROWS_PER_IMG, PAT_K).astype(jnp.bfloat16)


def init_params(key):
    # Deterministic synthetic init (DCGAN-style: N(0, 0.02) weights, zero bias,
    # BN gamma=1 / beta=0).  Layouts: conv OIHW, linear (in, out) with the fc1
    # "in" axis in PyTorch's view(-1, 128*7*7) order.
    ks = jax.random.split(key, 4)
    std = 0.02
    return dict(
        conv1_w=jax.random.normal(ks[0], (64, 1, 4, 4), jnp.float32) * std,
        conv1_b=jnp.zeros((64,), jnp.float32),
        conv2_w=jax.random.normal(ks[1], (128, 64, 4, 4), jnp.float32) * std,
        conv2_b=jnp.zeros((128,), jnp.float32),   # unused: cancelled by BN2d
        bn2_g=jnp.ones((128,), jnp.float32),
        bn2_b=jnp.zeros((128,), jnp.float32),
        fc1_w=jax.random.normal(ks[2], (128 * 7 * 7, 1024), jnp.float32) * std,
        fc1_b=jnp.zeros((1024,), jnp.float32),    # unused: cancelled by BN1d
        bn3_g=jnp.ones((1024,), jnp.float32),
        bn3_b=jnp.zeros((1024,), jnp.float32),
        fc2_w=jax.random.normal(ks[3], (1024, 1), jnp.float32) * std,
        fc2_b=jnp.zeros((1,), jnp.float32),
    )


def prepare_params(p):
    """One-time (outside the per-step forward) kernel-ready weight layouts."""
    conv1_w = np.asarray(p["conv1_w"], np.float32)           # (64,1,4,4)
    conv1_b = np.asarray(p["conv1_b"], np.float32)           # (64,)
    conv2_w = np.asarray(p["conv2_w"], np.float32)           # (128,64,4,4)
    fc1_w = np.asarray(p["fc1_w"], np.float32)               # (6272,1024)
    fc2_w = np.asarray(p["fc2_w"], np.float32)               # (1024,1)

    # conv1 weight rows in kh*4+kw patch order plus a bias row -> (17, 64)
    w1mat = np.concatenate(
        [conv1_w.reshape(64, 16).T, conv1_b.reshape(1, 64)], axis=0)
    # block-diagonal conv1 weight: tap t reads patch cols [t*17,(t+1)*17) and
    # writes y1 cols [t*64,(t+1)*64).  Rows 272..383 are lane padding (zero).
    w1blk = np.zeros((PAT_K, 1024), np.float32)
    for t in range(16):
        w1blk[t * 17:(t + 1) * 17, t * 64:(t + 1) * 64] = w1mat

    # conv2 weight flattened to (16*64, 128): row = (kh*4+kw)*64 + in_channel
    w2flat = np.transpose(conv2_w, (2, 3, 1, 0)).reshape(16 * 64, 128)

    # fc1 weight permuted to the conv kernel's output layout: 7x8 spatial grid
    # (width padded to 8), channel-minor.  Rows at padded positions MUST be
    # zero: those z rows become nonzero (bn_shift) after BN2d+LeakyReLU and the
    # zero weight rows are what cancels them.
    oh = np.arange(7)[:, None, None]
    ow = np.arange(8)[None, :, None]
    oc = np.arange(128)[None, None, :]
    valid = np.broadcast_to(ow < 7, (7, 8, 128))             # (7,8,128)
    src = oc * 49 + oh * 7 + ow                              # PyTorch c*49+h*7+w
    src = np.where(valid, src, 0).reshape(-1)                # (7168,)
    w1k = fc1_w[src, :]                                      # (7168, 1024)
    w1k = np.where(valid.reshape(-1, 1), w1k, 0.0)

    # fc2 weight zero-padded from (1024, 1) to 128 lanes (kept f32: tiny)
    # TODO(synk): optional fp8 (v7x) / int8 (v5e/v6e) compression of w1k.
    w2k = np.zeros((1024, 128), np.float32)
    w2k[:, 0] = fc2_w[:, 0]

    return dict(
        w1blk=jnp.asarray(w1blk, jnp.bfloat16),
        w2flat=jnp.asarray(w2flat, jnp.bfloat16),
        w1k=jnp.asarray(w1k, jnp.bfloat16),
        w2k=jnp.asarray(w2k, jnp.float32),
        bn2_g=p["bn2_g"], bn2_b=p["bn2_b"],
        g3=p["bn3_g"].reshape(1, 1024), b3=p["bn3_b"].reshape(1, 1024),
        fc2_b=p["fc2_b"],
    )


@jax.jit
def discriminator_forward(x_nchw, kp):
    B = x_nchw.shape[0]
    tb = _pick_tb(B)
    nb = B // tb

    pat = build_conv1_patches(x_nchw)                        # (B*56, 384) bf16
    z, stats = conv_stage(pat, kp["w1blk"], kp["w2flat"], B, tb)

    # finalize BatchNorm2d batch statistics (training mode, biased variance).
    # NOTE: E[x^2]-E[x]^2 in f32; the clamp guards tiny negative variance.
    stats = stats.reshape(nb, 8, 128)
    cnt = jnp.float32(B * 49)
    mean = stats[:, 0, :].sum(axis=0) / cnt
    var = jnp.maximum(stats[:, 1, :].sum(axis=0) / cnt - mean * mean, 0.0)
    bn_scale = kp["bn2_g"] * jax.lax.rsqrt(var + BN_EPS)
    bn_shift = kp["bn2_b"] - mean * bn_scale
    scale_full = jnp.tile(bn_scale, ROWS_PER_IMG).reshape(1, FC_K)
    shift_full = jnp.tile(bn_shift, ROWS_PER_IMG).reshape(1, FC_K)

    xfc = z.reshape(B, FC_K)                                 # free reshape
    parts = fc_stage(xfc, scale_full, shift_full, kp["w1k"],
                     kp["g3"], kp["b3"], kp["w2k"], B,
                     block_n=_fc_block_n())                  # (B, nn*128)

    logit = parts.reshape(B, -1, 128).sum(axis=1)[:, 0:1] + kp["fc2_b"][0]
    return jax.nn.sigmoid(logit)


if __name__ == "__main__":
    key = jax.random.PRNGKey(0)
    pkey, xkey = jax.random.split(key)
    params = init_params(pkey)
    kparams = prepare_params(params)
    # Architecture fixes spatial size: 28x28 -> 14x14 -> 7x7 (view(-1, 128*7*7))
    x = jax.random.normal(xkey, (2, 1, 28, 28), jnp.float32)
    out = discriminator_forward(x, kparams)
    jax.block_until_ready(out)
    assert out.shape == (2, 1)
    assert bool(jnp.all(jnp.isfinite(out)))
    assert bool(jnp.all((out > 0.0) & (out < 1.0)))
    print("KERNEL_OK")
</pallas_src>

<mosaic_0001>
module attributes {stable_mosaic.version = 11 : i64} {
  func.func @_conv_kernel(%arg0: i32, %arg1: memref<56x384xbf16, #tpu.memory_space<vmem>>, %arg2: memref<384x1024xbf16, #tpu.memory_space<vmem>>, %arg3: memref<1024x128xbf16, #tpu.memory_space<vmem>>, %arg4: memref<56x128xbf16, #tpu.memory_space<vmem>>, %arg5: memref<8x128xf32, #tpu.memory_space<vmem>>) attributes {dimension_semantics = [#tpu.dimension_semantics<parallel>], iteration_bounds = array<i64: 2>, scalar_prefetch = 0 : i64, scratch_operands = 0 : i64, tpu.core_type = #tpu.core_type<tc>, window_params = [{transform_indices = @transform_0, window_bounds = array<i64: 56, 384>}, {pipeline_mode = #tpu.pipeline_mode<synchronous>, transform_indices = @transform_1, window_bounds = array<i64: 384, 1024>}, {pipeline_mode = #tpu.pipeline_mode<synchronous>, transform_indices = @transform_2, window_bounds = array<i64: 1024, 128>}, {transform_indices = @transform_3, window_bounds = array<i64: 56, 128>}, {transform_indices = @transform_4, window_bounds = array<i64: 8, 128>}]} {
    %c0 = arith.constant 0 : index
    %c0_0 = arith.constant 0 : index
    %0 = vector.load %arg1[%c0, %c0_0] : memref<56x384xbf16, #tpu.memory_space<vmem>>, vector<56x384xbf16>
    %c0_1 = arith.constant 0 : index
    %c0_2 = arith.constant 0 : index
    %1 = vector.load %arg2[%c0_1, %c0_2] : memref<384x1024xbf16, #tpu.memory_space<vmem>>, vector<384x1024xbf16>
    %cst = arith.constant dense<0.000000e+00> : vector<56x1024xf32>
    %2 = tpu.matmul %0, %1, %cst {dimension_numbers = #tpu.dot_dimension_numbers<[1], [0], [0], [1], [0, 0, 1, 1], [], []>} : vector<56x384xbf16>, vector<384x1024xbf16>, vector<56x1024xf32> -> vector<56x1024xf32>
    %cst_3 = arith.constant 0.000000e+00 : f32
    %3 = vector.broadcast %cst_3 : f32 to vector<56x1024xf32>
    %4 = arith.cmpf ogt, %2, %3 : vector<56x1024xf32>
    %cst_4 = arith.constant 2.000000e-01 : f32
    %5 = vector.broadcast %cst_4 : f32 to vector<56x1024xf32>
    %6 = arith.mulf %5, %2 : vector<56x1024xf32>
    %7 = arith.select %4, %2, %6 : vector<56x1024xi1>, vector<56x1024xf32>
    %8 = arith.truncf %7 : vector<56x1024xf32> to vector<56x1024xbf16>
    %c0_5 = arith.constant 0 : index
    %c0_6 = arith.constant 0 : index
    %9 = vector.load %arg3[%c0_5, %c0_6] : memref<1024x128xbf16, #tpu.memory_space<vmem>>, vector<1024x128xbf16>
    %cst_7 = arith.constant dense<0.000000e+00> : vector<56x128xf32>
    %10 = tpu.matmul %8, %9, %cst_7 {dimension_numbers = #tpu.dot_dimension_numbers<[1], [0], [0], [1], [0, 0, 1, 1], [], []>} : vector<56x1024xbf16>, vector<1024x128xbf16>, vector<56x128xf32> -> vector<56x128xf32>
    %11 = arith.truncf %10 : vector<56x128xf32> to vector<56x128xbf16>
    %c0_8 = arith.constant 0 : index
    %c0_9 = arith.constant 0 : index
    %12 = vector.load %arg4[%c0_8, %c0_9] : memref<56x128xbf16, #tpu.memory_space<vmem>>, vector<56x128xbf16>
    tpu.vector_store %arg4[%c0_8, %c0_9], %11 {strides = array<i32>} : memref<56x128xbf16, #tpu.memory_space<vmem>>, vector<56x128xbf16>,
    %13 = tpu.iota {dimensions = array<i32: 0>} : vector<56x128xi32>
    %c7_i32 = arith.constant 7 : i32
    %14 = vector.broadcast %c7_i32 : i32 to vector<56x128xi32>
    %15 = arith.andi %13, %14 : vector<56x128xi32>
    %c7_i32_10 = arith.constant 7 : i32
    %16 = vector.broadcast %c7_i32_10 : i32 to vector<56x128xi32>
    %17 = arith.cmpi slt, %15, %16 : vector<56x128xi32>
    %cst_11 = arith.constant 0.000000e+00 : f32
    %18 = vector.broadcast %cst_11 : f32 to vector<56x128xf32>
    %19 = arith.select %17, %10, %18 : vector<56x128xi1>, vector<56x128xf32>
    %cst_12 = arith.constant dense<0.000000e+00> : vector<128xf32>
    %20 = vector.multi_reduction <add>, %19, %cst_12 [0] : vector<56x128xf32> to vector<128xf32>
    %21 = vector.shape_cast %20 : vector<128xf32> to vector<1x128xf32>
    %22 = arith.mulf %19, %19 : vector<56x128xf32>
    %cst_13 = arith.constant dense<0.000000e+00> : vector<128xf32>
    %23 = vector.multi_reduction <add>, %22, %cst_13 [0] : vector<56x128xf32> to vector<128xf32>
    %24 = vector.shape_cast %23 : vector<128xf32> to vector<1x128xf32>
    %25 = tpu.iota {dimensions = array<i32: 0>} : vector<8x128xi32>
    %c0_i32 = arith.constant 0 : i32
    %26 = vector.broadcast %c0_i32 : i32 to vector<8x128xi32>
    %27 = arith.cmpi eq, %25, %26 : vector<8x128xi32>
    %c1_i32 = arith.constant 1 : i32
    %28 = vector.broadcast %c1_i32 : i32 to vector<8x128xi32>
    %29 = arith.cmpi eq, %25, %28 : vector<8x128xi32>
    %cst_14 = arith.constant 0.000000e+00 : f32
    %30 = vector.shape_cast %24 : vector<1x128xf32> to vector<1x128xf32>
    %31 = vector.broadcast %30 : vector<1x128xf32> to vector<8x128xf32>
    %32 = vector.broadcast %cst_14 : f32 to vector<8x128xf32>
    %33 = arith.select %29, %31, %32 : vector<8x128xi1>, vector<8x128xf32>
    %34 = vector.shape_cast %21 : vector<1x128xf32> to vector<1x128xf32>
    %35 = vector.broadcast %34 : vector<1x128xf32> to vector<8x128xf32>
    %36 = arith.select %27, %35, %33 : vector<8x128xi1>, vector<8x128xf32>
    %c0_15 = arith.constant 0 : index
    %c0_16 = arith.constant 0 : index
    %37 = vector.load %arg5[%c0_15, %c0_16] : memref<8x128xf32, #tpu.memory_space<vmem>>, vector<8x128xf32>
    tpu.vector_store %arg5[%c0_15, %c0_16], %36 {strides = array<i32>} : memref<8x128xf32, #tpu.memory_space<vmem>>, vector<8x128xf32>,
    return
  }
  func.func @transform_0(%arg0: i32) -> (i32, i32) {
    %c0_i32 = arith.constant 0 : i32
    %c0_i32_0 = arith.constant 0 : i32
    return %arg0, %c0_i32 : i32, i32
  }
  func.func @transform_1(%arg0: i32) -> (i32, i32) {
    %c0_i32 = arith.constant 0 : i32
    %c0_i32_0 = arith.constant 0 : i32
    %c0_i32_1 = arith.constant 0 : i32
    return %c0_i32, %c0_i32_0 : i32, i32
  }
  func.func @transform_2(%arg0: i32) -> (i32, i32) {
    %c0_i32 = arith.constant 0 : i32
    %c0_i32_0 = arith.constant 0 : i32
    %c0_i32_1 = arith.constant 0 : i32
    return %c0_i32, %c0_i32_0 : i32, i32
  }
  func.func @transform_3(%arg0: i32) -> (i32, i32) {
    %c0_i32 = arith.constant 0 : i32
    %c0_i32_0 = arith.constant 0 : i32
    return %arg0, %c0_i32 : i32, i32
  }
  func.func @transform_4(%arg0: i32) -> (i32, i32) {
    %c0_i32 = arith.constant 0 : i32
    %c0_i32_0 = arith.constant 0 : i32
    return %arg0, %c0_i32 : i32, i32
  }
}

module attributes {stable_mosaic.version = 11 : i64} {
  func.func @_fc_kernel(%arg0: i32, %arg1: i32, %arg2: memref<2x1792xbf16, #tpu.memory_space<vmem>>, %arg3: memref<1x1792xf32, #tpu.memory_space<vmem>>, %arg4: memref<1x1792xf32, #tpu.memory_space<vmem>>, %arg5: memref<1792x1024xbf16, #tpu.memory_space<vmem>>, %arg6: memref<1x1024xf32, #tpu.memory_space<vmem>>, %arg7: memref<1x1024xf32, #tpu.memory_space<vmem>>, %arg8: memref<1024x128xf32, #tpu.memory_space<vmem>>, %arg9: memref<2x128xf32, #tpu.memory_space<vmem>>, %arg10: memref<2x1024xf32, #tpu.memory_space<vmem>>) attributes {dimension_semantics = [#tpu.dimension_semantics<parallel>, #tpu.dimension_semantics<arbitrary>], iteration_bounds = array<i64: 1, 4>, scalar_prefetch = 0 : i64, scratch_operands = 1 : i64, tpu.core_type = #tpu.core_type<tc>, window_params = [{transform_indices = @transform_0, window_bounds = array<i64: 2, 1792>}, {transform_indices = @transform_1, window_bounds = array<i64: 1, 1792>}, {transform_indices = @transform_2, window_bounds = array<i64: 1, 1792>}, {transform_indices = @transform_3, window_bounds = array<i64: 1792, 1024>}, {transform_indices = @transform_4, window_bounds = array<i64: 1, 1024>}, {transform_indices = @transform_5, window_bounds = array<i64: 1, 1024>}, {transform_indices = @transform_6, window_bounds = array<i64: 1024, 128>}, {transform_indices = @transform_7, window_bounds = array<i64: 2, 128>}]} {
    %c0_i32 = arith.constant 0 : i32
    %0 = arith.cmpi eq, %arg1, %c0_i32 : i32
    %1 = arith.extui %0 : i1 to i32
    %c0_i32_0 = arith.constant 0 : i32
    %2 = arith.cmpi ne, %1, %c0_i32_0 : i32
    scf.if %2 {
      %cst_15 = arith.constant 0.000000e+00 : f32
      %25 = vector.broadcast %cst_15 : f32 to vector<2x1024xf32>
      %c0_16 = arith.constant 0 : index
      %c0_17 = arith.constant 0 : index
      %26 = vector.load %arg10[%c0_16, %c0_17] : memref<2x1024xf32, #tpu.memory_space<vmem>>, vector<2x1024xf32>
      tpu.vector_store %arg10[%c0_16, %c0_17], %25 {strides = array<i32>} : memref<2x1024xf32, #tpu.memory_space<vmem>>, vector<2x1024xf32>,
    } else {
    }
    %c0 = arith.constant 0 : index
    %c0_1 = arith.constant 0 : index
    %3 = vector.load %arg2[%c0, %c0_1] : memref<2x1792xbf16, #tpu.memory_space<vmem>>, vector<2x1792xbf16>
    %4 = arith.extf %3 : vector<2x1792xbf16> to vector<2x1792xf32>
    %c0_2 = arith.constant 0 : index
    %c0_3 = arith.constant 0 : index
    %5 = vector.load %arg3[%c0_2, %c0_3] : memref<1x1792xf32, #tpu.memory_space<vmem>>, vector<1x1792xf32>
    %6 = vector.broadcast %5 : vector<1x1792xf32> to vector<2x1792xf32>
    %7 = arith.mulf %4, %6 : vector<2x1792xf32>
    %c0_4 = arith.constant 0 : index
    %c0_5 = arith.constant 0 : index
    %8 = vector.load %arg4[%c0_4, %c0_5] : memref<1x1792xf32, #tpu.memory_space<vmem>>, vector<1x1792xf32>
    %9 = vector.broadcast %8 : vector<1x1792xf32> to vector<2x1792xf32>
    %10 = arith.addf %7, %9 : vector<2x1792xf32>
    %cst = arith.constant 0.000000e+00 : f32
    %11 = vector.broadcast %cst : f32 to vector<2x1792xf32>
    %12 = arith.cmpf ogt, %10, %11 : vector<2x1792xf32>
    %cst_6 = arith.constant 2.000000e-01 : f32
    %13 = vector.broadcast %cst_6 : f32 to vector<2x1792xf32>
    %14 = arith.mulf %13, %10 : vector<2x1792xf32>
    %15 = arith.select %12, %10, %14 : vector<2x1792xi1>, vector<2x1792xf32>
    %c0_7 = arith.constant 0 : index
    %c0_8 = arith.constant 0 : index
    %16 = vector.load %arg10[%c0_7, %c0_8] : memref<2x1024xf32, #tpu.memory_space<vmem>>, vector<2x1024xf32>
    %17 = arith.truncf %15 : vector<2x1792xf32> to vector<2x1792xbf16>
    %c0_9 = arith.constant 0 : index
    %c0_10 = arith.constant 0 : index
    %18 = vector.load %arg5[%c0_9, %c0_10] : memref<1792x1024xbf16, #tpu.memory_space<vmem>>, vector<1792x1024xbf16>
    %cst_11 = arith.constant dense<0.000000e+00> : vector<2x1024xf32>
    %19 = tpu.matmul %17, %18, %cst_11 {dimension_numbers = #tpu.dot_dimension_numbers<[1], [0], [0], [1], [0, 0, 1, 1], [], []>} : vector<2x1792xbf16>, vector<1792x1024xbf16>, vector<2x1024xf32> -> vector<2x1024xf32>
    %20 = arith.addf %16, %19 : vector<2x1024xf32>
    %c0_12 = arith.constant 0 : index
    %c0_13 = arith.constant 0 : index
    %21 = vector.load %arg10[%c0_12, %c0_13] : memref<2x1024xf32, #tpu.memory_space<vmem>>, vector<2x1024xf32>
    tpu.vector_store %arg10[%c0_12, %c0_13], %20 {strides = array<i32>} : memref<2x1024xf32, #tpu.memory_space<vmem>>, vector<2x1024xf32>,
    %c3_i32 = arith.constant 3 : i32
    %22 = arith.cmpi eq, %arg1, %c3_i32 : i32
    %23 = arith.extui %22 : i1 to i32
    %c0_i32_14 = arith.constant 0 : i32
    %24 = arith.cmpi ne, %23, %c0_i32_14 : i32
    scf.if %24 {
      %c0_15 = arith.constant 0 : index
      %c0_16 = arith.constant 0 : index
      %25 = vector.load %arg10[%c0_15, %c0_16] : memref<2x1024xf32, #tpu.memory_space<vmem>>, vector<2x1024xf32>
      %cst_17 = arith.constant dense<0.000000e+00> : vector<1024xf32>
      %26 = vector.multi_reduction <add>, %25, %cst_17 [0] : vector<2x1024xf32> to vector<1024xf32>
      %27 = vector.shape_cast %26 : vector<1024xf32> to vector<1x1024xf32>
      %cst_18 = arith.constant 2.000000e+00 : f32
      %28 = vector.broadcast %cst_18 : f32 to vector<1x1024xf32>
      %29 = arith.divf %27, %28 : vector<1x1024xf32>
      %30 = vector.broadcast %29 : vector<1x1024xf32> to vector<2x1024xf32>
      %31 = arith.subf %25, %30 : vector<2x1024xf32>
      %32 = arith.mulf %31, %31 : vector<2x1024xf32>
      %cst_19 = arith.constant dense<0.000000e+00> : vector<1024xf32>
      %33 = vector.multi_reduction <add>, %32, %cst_19 [0] : vector<2x1024xf32> to vector<1024xf32>
      %34 = vector.shape_cast %33 : vector<1024xf32> to vector<1x1024xf32>
      %cst_20 = arith.constant 2.000000e+00 : f32
      %35 = vector.broadcast %cst_20 : f32 to vector<1x1024xf32>
      %36 = arith.divf %34, %35 : vector<1x1024xf32>
      %37 = vector.broadcast %29 : vector<1x1024xf32> to vector<2x1024xf32>
      %38 = arith.subf %25, %37 : vector<2x1024xf32>
      %cst_21 = arith.constant 9.99999974E-6 : f32
      %39 = vector.broadcast %cst_21 : f32 to vector<1x1024xf32>
      %40 = arith.addf %36, %39 : vector<1x1024xf32>
      %41 = math.rsqrt %40 : vector<1x1024xf32>
      %42 = vector.broadcast %41 : vector<1x1024xf32> to vector<2x1024xf32>
      %43 = arith.mulf %38, %42 : vector<2x1024xf32>
      %c0_22 = arith.constant 0 : index
      %c0_23 = arith.constant 0 : index
      %44 = vector.load %arg6[%c0_22, %c0_23] : memref<1x1024xf32, #tpu.memory_space<vmem>>, vector<1x1024xf32>
      %45 = vector.broadcast %44 : vector<1x1024xf32> to vector<2x1024xf32>
      %46 = arith.mulf %43, %45 : vector<2x1024xf32>
      %c0_24 = arith.constant 0 : index
      %c0_25 = arith.constant 0 : index
      %47 = vector.load %arg7[%c0_24, %c0_25] : memref<1x1024xf32, #tpu.memory_space<vmem>>, vector<1x1024xf32>
      %48 = vector.broadcast %47 : vector<1x1024xf32> to vector<2x1024xf32>
      %49 = arith.addf %46, %48 : vector<2x1024xf32>
      %cst_26 = arith.constant 0.000000e+00 : f32
      %50 = vector.broadcast %cst_26 : f32 to vector<2x1024xf32>
      %51 = arith.cmpf ogt, %49, %50 : vector<2x1024xf32>
      %cst_27 = arith.constant 2.000000e-01 : f32
      %52 = vector.broadcast %cst_27 : f32 to vector<2x1024xf32>
      %53 = arith.mulf %52, %49 : vector<2x1024xf32>
      %54 = arith.select %51, %49, %53 : vector<2x1024xi1>, vector<2x1024xf32>
      %c0_28 = arith.constant 0 : index
      %c0_29 = arith.constant 0 : index
      %55 = vector.load %arg8[%c0_28, %c0_29] : memref<1024x128xf32, #tpu.memory_space<vmem>>, vector<1024x128xf32>
      %cst_30 = arith.constant dense<0.000000e+00> : vector<2x128xf32>
      %56 = tpu.matmul %54, %55, %cst_30 {dimension_numbers = #tpu.dot_dimension_numbers<[1], [0], [0], [1], [0, 0, 1, 1], [], []>} : vector<2x1024xf32>, vector<1024x128xf32>, vector<2x128xf32> -> vector<2x128xf32>
      %c0_31 = arith.constant 0 : index
      %c0_32 = arith.constant 0 : index
      %57 = vector.load %arg9[%c0_31, %c0_32] : memref<2x128xf32, #tpu.memory_space<vmem>>, vector<2x128xf32>
      tpu.vector_store %arg9[%c0_31, %c0_32], %56 {strides = array<i32>} : memref<2x128xf32, #tpu.memory_space<vmem>>, vector<2x128xf32>,
    } else {
    }
    return
  }
  func.func @transform_0(%arg0: i32, %arg1: i32) -> (i32, i32) {
    %c0_i32 = arith.constant 0 : i32
    %c0_i32_0 = arith.constant 0 : i32
    return %c0_i32, %arg1 : i32, i32
  }
  func.func @transform_1(%arg0: i32, %arg1: i32) -> (i32, i32) {
    %c0_i32 = arith.constant 0 : i32
    %c0_i32_0 = arith.constant 0 : i32
    return %c0_i32, %arg1 : i32, i32
  }
  func.func @transform_2(%arg0: i32, %arg1: i32) -> (i32, i32) {
    %c0_i32 = arith.constant 0 : i32
    %c0_i32_0 = arith.constant 0 : i32
    return %c0_i32, %arg1 : i32, i32
  }
  func.func @transform_3(%arg0: i32, %arg1: i32) -> (i32, i32) {
    %c0_i32 = arith.constant 0 : i32
    return %arg1, %arg0 : i32, i32
  }
  func.func @transform_4(%arg0: i32, %arg1: i32) -> (i32, i32) {
    %c0_i32 = arith.constant 0 : i32
    %c0_i32_0 = arith.constant 0 : i32
    return %c0_i32, %arg0 : i32, i32
  }
  func.func @transform_5(%arg0: i32, %arg1: i32) -> (i32, i32) {
    %c0_i32 = arith.constant 0 : i32
    %c0_i32_0 = arith.constant 0 : i32
    return %c0_i32, %arg0 : i32, i32
  }
  func.func @transform_6(%arg0: i32, %arg1: i32) -> (i32, i32) {
    %c0_i32 = arith.constant 0 : i32
    %c0_i32_0 = arith.constant 0 : i32
    return %arg0, %c0_i32 : i32, i32
  }
  func.func @transform_7(%arg0: i32, %arg1: i32) -> (i32, i32) {
    %c0_i32 = arith.constant 0 : i32
    %c0_i32_0 = arith.constant 0 : i32
    return %c0_i32, %arg0 : i32, i32
  }
}

</mosaic_0001>

<bundles_post_ra>
// kernel: tile.13
= control target key start
LH: loop header
LB: loop body
LE: loop exit
PB: predicated region body
PF: predicated region fallthrough
CT: control target
= control target key end

     0   :  { %s58_s0 = inlined_call_operand.vmem [shape: f32[128], index: 0, kind: input, shape index: {}]   ;;  %s59_s1 = inlined_call_operand.vmem [shape: f32[56,128], index: 1, kind: output, shape index: {}]  }
   0x1   :  { %v4_v0 = vld [vmem:[%s58_s0] ss:$0 sm:$0xff] }
   0x2   :  { %5 = vst [vmem:[%s59_s1] sm:$0xff] %v4_v0 }
   0x3   :  { %18 = vst [vmem:[%s59_s1 + $0x8] sm:$0xff] %v4_v0 }
   0x4   :  { %19 = vst [vmem:[%s59_s1 + $0x10] sm:$0xff] %v4_v0 }
   0x5   :  { %20 = vst [vmem:[%s59_s1 + $0x18] sm:$0xff] %v4_v0 }
   0x6   :  { %21 = vst [vmem:[%s59_s1 + $0x20] sm:$0xff] %v4_v0 }
   0x7   :  { %22 = vst [vmem:[%s59_s1 + $0x28] sm:$0xff] %v4_v0 }
   0x8   :  { %23 = vst [vmem:[%s59_s1 + $0x30] sm:$0xff] %v4_v0 }

// kernel: discriminator_forward.2
= control target key start
LH: loop header
LB: loop body
LE: loop exit
PB: predicated region body
PF: predicated region fallthrough
CT: control target
= control target key end

     0   :  { %10 = vsyncpa [#allocation3], 0  ;;  %s5301_s0 = inlined_call_operand.vmem [shape: bf16[112,384], index: 0, kind: input, shape index: {}]   ;;  %s5302_s1 = inlined_call_operand.hbm [shape: bf16[384,1024], index: 1, kind: input, shape index: {}]   ;;  %s5303_s2 = inlined_call_operand.hbm [shape: bf16[1024,128], index: 2, kind: input, shape index: {}]   ;;  %s5304_s3 = inlined_call_operand.vmem [shape: bf16[112,128], index: 3, kind: output, shape index: {0}]   ;;  %s5305_s4 = inlined_call_operand.vmem [shape: f32[16,128], index: 4, kind: output, shape index: {1}]  }
   0x1   :  { %11 = vsyncpa [#allocation5], 0  ;;  %s4767_s15 = smov 0  }
   0x2 LB: > { %s153_s18 = sshll.u32 %s5302_s1, 4  ;;  %s4776_s19 = sadd.s32 4294967295, %s4734_s15   ;;  %s4734_s15 = sphi %s4767_s15, %s17_s15   ;;  %s154_s18 = int_to_ptr.hbm [resolvable:$true] %s153_s18 }
   0x3   : > { %p3272_p0 = scmp.ge.s32.totalorder %s4734_s15, 1  ;;  %p142_p1 = scmp.lt.s32.totalorder %s4734_s15, 3 }
   0x4   : > { %p4642_p2 = scmp.eq.s32.totalorder %s4776_s19, 0  ;;  %s4736_s21 = smov [#allocation2]  }
   0x5   : > { %p4781_p3 = pnand %p3272_p0, %p142_p1  ;;  %s155_s22 = sshll.u32 %s4736_s21, 4  ;;  %s156_s22 = int_to_ptr.vmem [resolvable:$true] %s155_s22 }
   0x6   : > { %s167_s25 = sshll.u32 %s5303_s2, 4  ;;  %s4737_s26 = smov [#allocation4]   ;;  %s168_s25 = int_to_ptr.hbm [resolvable:$true] %s167_s25 }
   0x7   : > { %p4635_p4 = pneg %p4781_p3  ;;  %s169_s27 = sshll.u32 %s4737_s26, 4  ;;  %s170_s27 = int_to_ptr.vmem [resolvable:$true] %s169_s27 }
   0x8   : > { %s4738_s28 = smov 512   ;;  %s4739_s29 = smov 32  }
   0x9   : > { %p4636_p5 = pnand %p4642_p2, %p4635_p4  ;;  %s4740_s30 = smov 64  }
   0xa   : > { %s4741_s5 = smov 4   ;;  %195 = sbr.rel (%p4781_p3) target bundleno = 742 (0x2e6), region = 32 }
   0xb   : > { %4638 = dma.hbm_to_vmem [thread:$0]  (!%p4636_p5), %s154_s18, 24576, %s156_s22, [#allocation3], %s4738_s28, %s4738_s28, %s4739_s29  }
   0xc   : > { %4641 = dma.hbm_to_vmem [thread:$0]  (!%p4636_p5), %s168_s25, 8192, %s170_s27, [#allocation5], %s4740_s30, %s4740_s30, %s4741_s5  }
   0xf   : > { %4725 = dma.done.wait (%p4642_p2), [#allocation3], 24576  }
  0x10   : > { %4727 = vsyncadd (%p4642_p2), [#allocation3], 4294942720 }
  0x11   : > { %4729 = dma.done.wait (%p4642_p2), [#allocation5], 8192  }
  0x12   : > { %4731 = vsyncadd (%p4642_p2), [#allocation5], 4294959104  ;;  %s232_s6 = smul.u32 7, %s4776_s19  ;;  %v3544_v0 = vld [vmem:[#allocation2 + $0x1c0] sm:$0xf]  ;;  %p245_p7 = scmp.lt.s32.totalorder %s4776_s19, 1 }
  0x13   : > { %v4413_v1 = vld [vmem:[#allocation2 + $0x1dc] sm:$0xf0]  ;;  %v4409_v9 = vld [vmem:[#allocation2 + $0x1c4] sm:$0xf] }
  0x14   : > { %v3800_v2 = vld [vmem:[#allocation2 + $0x3c0] sm:$0xf]  ;;  %v3545_v3 = vor.u32 %v4413_v1, %v3544_v0  ;;  %v3546_v10 = vld [vmem:[#allocation2 + $0x1e0] sm:$0xf0]  ;;  %p4805_p6 = scmp.lt.s32.totalorder %s232_s6, 13  ;;  %s5317_s19 = smov (!%p245_p7, %s4776_s19), 1 }
  0x15   : > { %v4477_v4 = vld [vmem:[#allocation2 + $0x3dc] sm:$0xf0]  ;;  %v3549_v12 = vor.u32 %v4409_v9, %v3546_v10  ;;  %v4401_v20 = vld [vmem:[#allocation2 + $0x184] sm:$0xf]  ;;  %s3281_s17 = sshll.u32 %s5317_s19, 3 }
  0x16   : > { %v4056_v5 = vld [vmem:[#allocation2 + $0x5c0] sm:$0xf]  ;;  %v3801_v7 = vor.u32 %v4477_v4, %v3800_v2  ;;  %1474 = vmatpush.bf16.msra.mxu0 %v3545_v3  ;;  %v3514_v22 = vld [vmem:[#allocation2 + $0x1a0] sm:$0xf0]  ;;  %s5315_s6 = smov (!%p4805_p6, %s232_s6), 13  ;;  %s248_s21 = scalar_lea.vmem %s5305_s4, %s3281_s17 }
  0x17   : > { %v4541_v6 = vld [vmem:[#allocation2 + $0x5dc] sm:$0xf0]  ;;  %1558 = vmatpush.bf16.msra.mxu3 %v3549_v12  ;;  %v3517_v25 = vor.u32 %v4401_v20, %v3514_v22  ;;  %v4393_v31 = vld [vmem:[#allocation2 + $0x144] sm:$0xf]  ;;  %s4626_s8 = smul.u32 12, %s5315_s6  ;;  %s3280_s12 = sshll.u32 %s5315_s6, 2 }
  0x18   : > { %v4057_v8 = vor.u32 %v4541_v6, %v4056_v5  ;;  %v3512_v11 = vld [vmem:[#allocation2 + $0x180] sm:$0xf]  ;;  %1502 = vmatpush.bf16.msra.mxu1 %v3801_v7  ;;  %v3482_v32 = vld [vmem:[#allocation2 + $0x160] sm:$0xf0]  ;;  %s5277_s16 = scalar_lea.vmem %s5304_s3, %s3280_s12 }
  0x19   : > { %v4405_v13 = vld [vmem:[#allocation2 + $0x19c] sm:$0xf0]  ;;  %v3485_v38 = vor.u32 %v4393_v31, %v3482_v32  ;;  %v4385_v42 = vld [vmem:[#allocation2 + $0x104] sm:$0xf]  ;;  %s4819_s11 = scalar_lea.vmem %s5301_s0, %s4626_s8  ;;  %v4414_v31 = vld [vmem:[#allocation2 + $0x1e4] sm:$0xf0] }
  0x1a   : > { %v3768_v14 = vld [vmem:[#allocation2 + $0x380] sm:$0xf]  ;;  %1530 = vmatpush.bf16.msra.mxu2 %v4057_v8  ;;  %v3513_v16 = vor.u32 %v4405_v13, %v3512_v11  ;;  %v3450_v43 = vld [vmem:[#allocation2 + $0x120] sm:$0xf0] }
  0x1b   : > { %v4469_v15 = vld [vmem:[#allocation2 + $0x39c] sm:$0xf0]  ;;  %1559 = vmatpush.bf16.msra.mxu3 %v3517_v25  ;;  %v3453_v50 = vor.u32 %v4385_v42, %v3450_v43  ;;  %v4377_v54 = vld [vmem:[#allocation2 + $0xc4] sm:$0xf] }
  0x1c   : > { %v3769_v17 = vor.u32 %v4469_v15, %v3768_v14  ;;  %v4024_v18 = vld [vmem:[#allocation2 + $0x580] sm:$0xf]  ;;  %1475 = vmatpush.bf16.msra.mxu0 %v3513_v16  ;;  %v3418_v55 = vld [vmem:[#allocation2 + $0xe0] sm:$0xf0] }
  0x1d   : > { %v4533_v19 = vld [vmem:[#allocation2 + $0x59c] sm:$0xf0]  ;;  %v3421_v62 = vor.u32 %v4377_v54, %v3418_v55  ;;  %v4369_v2 = vld [vmem:[#allocation2 + $0x84] sm:$0xf]  ;;  %v4470_v54 = vld [vmem:[#allocation2 + $0x3a4] sm:$0xf0] }
  0x1e   : > { %v4025_v21 = vor.u32 %v4533_v19, %v4024_v18  ;;  %v3480_v23 = vld [vmem:[#allocation2 + $0x140] sm:$0xf]  ;;  %1503 = vmatpush.bf16.msra.mxu1 %v3769_v17  ;;  %v3386_v3 = vld [vmem:[#allocation2 + $0xa0] sm:$0xf0] }
  0x1f   : > { %v4397_v24 = vld [vmem:[#allocation2 + $0x15c] sm:$0xf0]  ;;  %1560 = vmatpush.bf16.msra.mxu3 %v3485_v38  ;;  %v3389_v10 = vor.u32 %v4369_v2, %v3386_v3  ;;  %v4361_v14 = vld [vmem:[#allocation2 + $0x44] sm:$0xf]  ;;  %v3286_v38 = vld [vmem:[%s4819_s11 + $0xc] sm:$0xf0] }
  0x20   : > { %v3736_v26 = vld [vmem:[#allocation2 + $0x340] sm:$0xf]  ;;  %v3481_v29 = vor.u32 %v4397_v24, %v3480_v23  ;;  %1531 = vmatpush.bf16.msra.mxu2 %v4025_v21  ;;  %v3354_v15 = vld [vmem:[#allocation2 + $0x60] sm:$0xf0]  ;;  %v4462_v2 = vld [vmem:[#allocation2 + $0x364] sm:$0xf0] }
  0x21   : > { %v4461_v27 = vld [vmem:[#allocation2 + $0x35c] sm:$0xf0]  ;;  %v3357_v25 = vor.u32 %v4361_v14, %v3354_v15  ;;  %v4473_v43 = vld [vmem:[#allocation2 + $0x3c4] sm:$0xf]  ;;  %v4454_v14 = vld [vmem:[#allocation2 + $0x324] sm:$0xf0] }
  0x22   : > { %v3992_v28 = vld [vmem:[#allocation2 + $0x540] sm:$0xf]  ;;  %v3737_v33 = vor.u32 %v4461_v27, %v3736_v26  ;;  %1476 = vmatpush.bf16.msra.mxu0 %v3481_v29  ;;  %v4353_v26 = vld [vmem:[#allocation2 + $0x4] sm:$0xf]  ;;  %v4345_v29 = vld [vmem:[%s4819_s11 + $0x8] sm:$0xf0] }
  0x23   : > { %v4525_v30 = vld [vmem:[#allocation2 + $0x55c] sm:$0xf0]  ;;  %1561 = vmatpush.bf16.msra.mxu3 %v3453_v50  ;;  %v3322_v27 = vld [vmem:[#allocation2 + $0x20] sm:$0xf0]  ;;  %v4406_v50 = vld [vmem:[#allocation2 + $0x1a4] sm:$0xf0] }
  0x24   : > { %v3993_v34 = vor.u32 %v4525_v30, %v3992_v28  ;;  %v3448_v35 = vld [vmem:[#allocation2 + $0x100] sm:$0xf]  ;;  %1504 = vmatpush.bf16.msra.mxu1 %v3737_v33  ;;  %v3552_v30 = vld [vmem:[#allocation2 + $0x1c8] sm:$0xf]  ;;  %v4344_v33 = vld [vmem:[%s4819_s11 + $0x4] sm:$0xf] }
  0x25   : > { %v4389_v36 = vld [vmem:[#allocation2 + $0x11c] sm:$0xf0]  ;;  %v3553_v42 = vor.u32 %v4414_v31, %v3552_v30  ;;  %v3298_v30 = vld [vmem:[%s4819_s11 + $0x24] sm:$0xf0] }
  0x26   : > { %v3704_v37 = vld [vmem:[#allocation2 + $0x300] sm:$0xf]  ;;  %v3449_v44 = vor.u32 %v4389_v36, %v3448_v35  ;;  %1532 = vmatpush.bf16.msra.mxu2 %v3993_v34  ;;  %v3808_v34 = vld [vmem:[#allocation2 + $0x3c8] sm:$0xf] }
  0x27   : > { %v4453_v39 = vld [vmem:[#allocation2 + $0x31c] sm:$0xf0]  ;;  %1562 = vmatpush.bf16.msra.mxu3 %v3421_v62  ;;  %v4478_v35 = vld [vmem:[#allocation2 + $0x3e4] sm:$0xf0]  ;;  %v4026_v62 = vld [vmem:[#allocation2 + $0x5a0] sm:$0xf0] }
  0x28   : > { %v3960_v40 = vld [vmem:[#allocation2 + $0x500] sm:$0xf]  ;;  %v3705_v45 = vor.u32 %v4453_v39, %v3704_v37  ;;  %1477 = vmatpush.bf16.msra.mxu0 %v3449_v44  ;;  %v3292_v39 = vld [vmem:[%s4819_s11 + $0x8] sm:$0xf]  ;;  %v3802_v44 = vld [vmem:[#allocation2 + $0x3e0] sm:$0xf0] }
  0x29   : > { %v4517_v41 = vld [vmem:[#allocation2 + $0x51c] sm:$0xf0]  ;;  %v3805_v55 = vor.u32 %v4473_v43, %v3802_v44  ;;  %v4374_v43 = vld [vmem:[#allocation2 + $0xa4] sm:$0xf0] }
  0x2a   : > { %v3961_v46 = vor.u32 %v4517_v41, %v3960_v40  ;;  %v3416_v47 = vld [vmem:[#allocation2 + $0xc0] sm:$0xf]  ;;  %1505 = vmatpush.bf16.msra.mxu1 %v3705_v45  ;;  %v4346_v40 = vld [vmem:[%s4819_s11 + $0x10] sm:$0xf0]  ;;  %v3325_v41 = vor.u32 %v4353_v26, %v3322_v27  ;;  %v4537_v45 = vld [vmem:[#allocation2 + $0x5c4] sm:$0xf] }
  0x2b   : > { %v4381_v48 = vld [vmem:[#allocation2 + $0xdc] sm:$0xf0]  ;;  %1563 = vmatpush.bf16.msra.mxu3 %v3389_v10  ;;  %v3994_v10 = vld [vmem:[#allocation2 + $0x560] sm:$0xf0]  ;;  %v4382_v26 = vld [vmem:[#allocation2 + $0xe4] sm:$0xf0] }
  0x2c   : > { %v3672_v49 = vld [vmem:[#allocation2 + $0x2c0] sm:$0xf]  ;;  %v3417_v56 = vor.u32 %v4381_v48, %v3416_v47  ;;  %1533 = vmatpush.bf16.msra.mxu2 %v3961_v46  ;;  %v3809_v47 = vor.u32 %v4478_v35, %v3808_v34  ;;  %v4058_v48 = vld [vmem:[#allocation2 + $0x5e0] sm:$0xf0]  ;;  %v4347_v27 = vld [vmem:[%s4819_s11 + $0x1c] sm:$0xf] }
  0x2d   : > { %v4445_v51 = vld [vmem:[#allocation2 + $0x2dc] sm:$0xf0]  ;;  %v4845_v44 = vor.u32 %v4347_v27, %v3298_v30  ;;  %v4474_v30 = vld [vmem:[#allocation2 + $0x3cc] sm:$0xf] }
  0x2e   : > { %v3928_v52 = vld [vmem:[#allocation2 + $0x4c0] sm:$0xf]  ;;  %v3673_v57 = vor.u32 %v4445_v51, %v3672_v49  ;;  %1478 = vmatpush.bf16.msra.mxu0 %v3417_v56  ;;  %v3520_v49 = vld [vmem:[#allocation2 + $0x188] sm:$0xf]  ;;  %v4829_v51 = vor.u32 %v4344_v33, %v3286_v38  ;;  %v4061_v56 = vor.u32 %v4537_v45, %v4058_v48  ;;  %v4505_v38 = vld [vmem:[#allocation2 + $0x4c4] sm:$0xf] }
  0x2f   : > { %v4509_v53 = vld [vmem:[#allocation2 + $0x4dc] sm:$0xf0]  ;;  %1564 = vmatpush.bf16.msra.mxu3 %v3357_v25  ;;  %v3424_v25 = vld [vmem:[#allocation2 + $0xc8] sm:$0xf] }
  0x30   : > { %v3929_v58 = vor.u32 %v4509_v53, %v3928_v52  ;;  %v3384_v59 = vld [vmem:[#allocation2 + $0x80] sm:$0xf]  ;;  %1506 = vmatpush.bf16.msra.mxu1 %v3673_v57  ;;  %v4831_v52 = vor.u32 %v4346_v40, %v3292_v39  ;;  %v3776_v53 = vld [vmem:[#allocation2 + $0x388] sm:$0xf]  ;;  %v3521_v57 = vor.u32 %v4406_v50, %v3520_v49  ;;  %v3425_v35 = vor.u32 %v4382_v26, %v3424_v25 }
  0x31   : > { %v4373_v60 = vld [vmem:[#allocation2 + $0x9c] sm:$0xf0]  ;;  %v4438_v48 = vld [vmem:[#allocation2 + $0x2a4] sm:$0xf0] }
  0x32   : > { %v3640_v61 = vld [vmem:[#allocation2 + $0x280] sm:$0xf]  ;;  %v3385_v4 = vor.u32 %v4373_v60, %v3384_v59  ;;  %1534 = vmatpush.bf16.msra.mxu2 %v3929_v58  ;;  %v4465_v58 = vld [vmem:[#allocation2 + $0x384] sm:$0xf] }
  0x33   : > { %v4437_v63 = vld [vmem:[#allocation2 + $0x29c] sm:$0xf0]  ;;  %1565 = vmatpush.bf16.msra.mxu3 %v3325_v41  ;;  %v3770_v59 = vld [vmem:[#allocation2 + $0x3a0] sm:$0xf0] }
  0x34   : > { %v3896_v0 = vld [vmem:[#allocation2 + $0x480] sm:$0xf]  ;;  %v3641_v5 = vor.u32 %v4437_v63, %v3640_v61  ;;  %1479 = vmatpush.bf16.msra.mxu0 %v3385_v4  ;;  %v4529_v60 = vld [vmem:[#allocation2 + $0x584] sm:$0xf]  ;;  %v3777_v61 = vor.u32 %v4470_v54, %v3776_v53  ;;  %v3488_v63 = vld [vmem:[#allocation2 + $0x148] sm:$0xf]  ;;  %v3773_v3 = vor.u32 %v4465_v58, %v3770_v59 }
  0x35   : > { %v4501_v1 = vld [vmem:[#allocation2 + $0x49c] sm:$0xf0]  ;;  %v4029_v4 = vor.u32 %v4529_v60, %v4026_v62  ;;  %v3930_v41 = vld [vmem:[#allocation2 + $0x4e0] sm:$0xf0]  ;;  %v3360_v60 = vld [vmem:[#allocation2 + $0x48] sm:$0xf] }
  0x36   : > { %v3897_v6 = vor.u32 %v4501_v1, %v3896_v0  ;;  %v3352_v7 = vld [vmem:[#allocation2 + $0x40] sm:$0xf]  ;;  %1507 = vmatpush.bf16.msra.mxu1 %v3641_v5  ;;  %v4398_v0 = vld [vmem:[#allocation2 + $0x164] sm:$0xf0]  ;;  %v3933_v50 = vor.u32 %v4505_v38, %v3930_v41  ;;  %v4433_v54 = vld [vmem:[#allocation2 + $0x284] sm:$0xf] }
  0x37   : > { %v4365_v8 = vld [vmem:[#allocation2 + $0x5c] sm:$0xf0]  ;;  %1670 = vmatpush.bf16.msrb.mxu3 %v3809_v47  ;;  %v3744_v1 = vld [vmem:[#allocation2 + $0x348] sm:$0xf]  ;;  %v3489_v5 = vor.u32 %v4398_v0, %v3488_v63  ;;  %v3898_v58 = vld [vmem:[#allocation2 + $0x4a0] sm:$0xf0] }
  0x38   : > { %v3608_v9 = vld [vmem:[#allocation2 + $0x240] sm:$0xf]  ;;  %v3353_v16 = vor.u32 %v4365_v8, %v3352_v7  ;;  %1535 = vmatpush.bf16.msra.mxu2 %v3897_v6  ;;  %v4457_v6 = vld [vmem:[#allocation2 + $0x344] sm:$0xf]  ;;  %v3648_v47 = vld [vmem:[#allocation2 + $0x288] sm:$0xf] }
  0x39   : > { %v4429_v11 = vld [vmem:[#allocation2 + $0x25c] sm:$0xf0]  ;;  %v3738_v7 = vld [vmem:[#allocation2 + $0x360] sm:$0xf0]  ;;  %v3616_v62 = vld [vmem:[#allocation2 + $0x248] sm:$0xf] }
  0x3a   : > { %v3864_v12 = vld [vmem:[#allocation2 + $0x440] sm:$0xf]  ;;  %v3609_v20 = vor.u32 %v4429_v11, %v3608_v9  ;;  %1480 = vmatpush.bf16.msra.mxu0 %v3353_v16  ;;  %v4521_v8 = vld [vmem:[#allocation2 + $0x544] sm:$0xf]  ;;  %v3745_v9 = vor.u32 %v4462_v2, %v3744_v1  ;;  %v3456_v11 = vld [vmem:[#allocation2 + $0x108] sm:$0xf]  ;;  %v3741_v15 = vor.u32 %v4457_v6, %v3738_v7 }
  0x3b   : > { %v4493_v13 = vld [vmem:[#allocation2 + $0x45c] sm:$0xf0]  ;;  %1671 = vmatpush.bf16.msrb.mxu3 %v3777_v61  ;;  %v3296_v16 = vld [vmem:[%s4819_s11 + $0x18] sm:$0xf]  ;;  %v4366_v61 = vld [vmem:[#allocation2 + $0x64] sm:$0xf0] }
  0x3c   : > { %v3320_v17 = vld [vmem:[#allocation2] sm:$0xf]  ;;  %v3865_v21 = vor.u32 %v4493_v13, %v3864_v12  ;;  %1508 = vmatpush.bf16.msra.mxu1 %v3609_v20  ;;  %v4390_v12 = vld [vmem:[#allocation2 + $0x124] sm:$0xf0]  ;;  %v4449_v20 = vld [vmem:[#allocation2 + $0x304] sm:$0xf]  ;;  %v3361_v0 = vor.u32 %v4366_v61, %v3360_v60 }
  0x3d   : > { %v4357_v18 = vld [vmem:[#allocation2 + $0x1c] sm:$0xf0]  ;;  %v3712_v13 = vld [vmem:[#allocation2 + $0x308] sm:$0xf]  ;;  %v4425_v2 = vld [vmem:[#allocation2 + $0x244] sm:$0xf] }
  0x3e   : > { %v3576_v19 = vld [vmem:[#allocation2 + $0x200] sm:$0xf]  ;;  %v3321_v32 = vor.u32 %v4357_v18, %v3320_v17  ;;  %1536 = vmatpush.bf16.msra.mxu2 %v3865_v21  ;;  %v4348_v17 = vld [vmem:[%s4819_s11 + $0x20] sm:$0xf0]  ;;  %v3997_v18 = vor.u32 %v4521_v8, %v3994_v10  ;;  %v4430_v1 = vld [vmem:[#allocation2 + $0x264] sm:$0xf0] }
  0x3f   : > { %v4421_v22 = vld [vmem:[#allocation2 + $0x21c] sm:$0xf0]  ;;  %v3706_v21 = vld [vmem:[#allocation2 + $0x320] sm:$0xf0]  ;;  %1672 = vmatpush.bf16.msrb.mxu3 %v3745_v9  ;;  %v4843_v39 = vor.u32 %v4348_v17, %v3296_v16  ;;  %v3328_v7 = vld [vmem:[#allocation2 + $0x8] sm:$0xf] }
  0x40   : > { %v3832_v23 = vld [vmem:[#allocation2 + $0x400] sm:$0xf]  ;;  %v3577_v36 = vor.u32 %v4421_v22, %v3576_v19  ;;  %1481 = vmatpush.bf16.msra.mxu0 %v3321_v32  ;;  %v3457_v19 = vor.u32 %v4390_v12, %v3456_v11  ;;  %v4513_v22 = vld [vmem:[#allocation2 + $0x504] sm:$0xf]  ;;  %v4349_v32 = vld [vmem:[%s4819_s11 + $0x28] sm:$0xf0]  ;;  %v3709_v33 = vor.u32 %v4449_v20, %v3706_v21 }
  0x41   : > { %v4485_v24 = vld [vmem:[#allocation2 + $0x41c] sm:$0xf0]  ;;  %v3866_v6 = vld [vmem:[#allocation2 + $0x460] sm:$0xf0]  ;;  %v4358_v8 = vld [vmem:[#allocation2 + $0x24] sm:$0xf0] }
  0x42   : > { %v3284_v28 = vld [vmem:[%s4819_s11] sm:$0xf]  ;;  %v3833_v37 = vor.u32 %v4485_v24, %v3832_v23  ;;  %1509 = vmatpush.bf16.msra.mxu1 %v3577_v36  ;;  %v3713_v23 = vor.u32 %v4454_v14, %v3712_v13  ;;  %v3962_v24 = vld [vmem:[#allocation2 + $0x520] sm:$0xf0]  ;;  %v3584_v9 = vld [vmem:[#allocation2 + $0x208] sm:$0xf]  ;;  %v3329_v13 = vor.u32 %v4358_v8, %v3328_v7 }
  0x43   : > { %v4827_v46 = vor.u32 %v4345_v29, %v3284_v28  ;;  %v3680_v28 = vld [vmem:[#allocation2 + $0x2c8] sm:$0xf]  ;;  %v3304_v31 = vld [vmem:[%s4819_s11 + $0x20] sm:$0xf]  ;;  %v3965_v34 = vor.u32 %v4513_v22, %v3962_v24  ;;  %v4441_v36 = vld [vmem:[#allocation2 + $0x2c4] sm:$0xf] }
  0x44   : > { %1537 = vmatpush.bf16.msra.mxu2 %v3833_v37  ;;  %1586 = vmatpush.bf16.msrb.mxu0 %v3805_v55  ;;  %v4446_v29 = vld [vmem:[#allocation2 + $0x2e4] sm:$0xf0]  ;;  %v3674_v37 = vld [vmem:[#allocation2 + $0x2e0] sm:$0xf0]  ;;  %v4847_v45 = vor.u32 %v4349_v32, %v3304_v31  ;;  %v4351_v20 = vld [vmem:[%s4819_s11 + $0x38] sm:$0xf0] }
  0x45   : > { %1482 = vmatmul.bf16.vlgmr.msra.gmra.mxu0 %v4827_v46  ;;  %1510 = vmatmul.bf16.vlgmr.msra.gmra.mxu1 %v4829_v51  ;;  %v3681_v40 = vor.u32 %v4446_v29, %v3680_v28  ;;  %v3677_v49 = vor.u32 %v4441_v36, %v3674_v37  ;;  %v3642_v55 = vld [vmem:[#allocation2 + $0x2a0] sm:$0xf0]  ;;  %v4422_v10 = vld [vmem:[#allocation2 + $0x224] sm:$0xf0]  ;;  %v4350_v21 = vld [vmem:[%s4819_s11 + $0x34] sm:$0xf] }
  0x46   : > { %1566 = vmatmul.bf16.vlgmr.msra.gmra.mxu3 %v4827_v46  ;;  %1614 = vmatpush.bf16.msrb.mxu1 %v4061_v56  ;;  %v3649_v56 = vor.u32 %v4438_v48, %v3648_v47  ;;  %v3645_v59 = vor.u32 %v4433_v54, %v3642_v55  ;;  %v4417_v14 = vld [vmem:[#allocation2 + $0x204] sm:$0xf]  ;;  %v3585_v16 = vor.u32 %v4422_v10, %v3584_v9  ;;  %v3310_v22 = vld [vmem:[%s4819_s11 + $0x3c] sm:$0xf0]  ;;  %v3810_v31 = vld [vmem:[#allocation2 + $0x3e8] sm:$0xf0] }
  0x47   : > { %1538 = vmatmul.bf16.vlgmr.msra.gmra.mxu2 %v4831_v52  ;;  %1673 = vmatpush.bf16.msrb.mxu3 %v3713_v23  ;;  %v4481_v17 = vld [vmem:[#allocation2 + $0x404] sm:$0xf]  ;;  %v3316_v23 = vld [vmem:[%s4819_s11 + $0x38] sm:$0xf]  ;;  %v4861_v28 = vor.u32 %v4350_v21, %v3310_v22  ;;  %v4538_v32 = vld [vmem:[#allocation2 + $0x5cc] sm:$0xf] }
  0x48   : > { %1642 = vmatpush.bf16.msrb.mxu2 %v3553_v42  ;;  %1587 = vmatpush.bf16.msrb.mxu0 %v3773_v3  ;;  %v3392_v42 = vld [vmem:[#allocation2 + $0x88] sm:$0xf]  ;;  %v3610_v3 = vld [vmem:[#allocation2 + $0x260] sm:$0xf0]  ;;  %v262_v38 = vld [vmem:[%s4819_s11 + $0x50] sm:$0xf] }
  0x49   : > { %v3393_v53 = vor.u32 %v4374_v43, %v3392_v42  ;;  %v3613_v11 = vor.u32 %v4425_v2, %v3610_v3  ;;  %v4352_v24 = vld [vmem:[%s4819_s11 + $0x40] sm:$0xf0]  ;;  %v4064_v36 = vld [vmem:[#allocation2 + $0x5c8] sm:$0xf]  ;;  %v4410_v42 = vld [vmem:[#allocation2 + $0x1cc] sm:$0xf] }
  0x4a   : > { %1615 = vmatpush.bf16.msrb.mxu1 %v4029_v4  ;;  %v3617_v4 = vor.u32 %v4430_v1, %v3616_v62  ;;  %v4863_v29 = vor.u32 %v4352_v24, %v3316_v23  ;;  %v4542_v37 = vld [vmem:[#allocation2 + $0x5e4] sm:$0xf0]  ;;  %v3554_v43 = vld [vmem:[#allocation2 + $0x1e8] sm:$0xf0] }
  0x4b   : > { %1674 = vmatpush.bf16.msrb.mxu3 %v3681_v40  ;;  %v4065_v41 = vor.u32 %v4542_v37, %v4064_v36  ;;  %v4466_v47 = vld [vmem:[#allocation2 + $0x38c] sm:$0xf]  ;;  %v3557_v48 = vor.u32 %v4410_v42, %v3554_v43  ;;  %v4000_v9 = vld [vmem:[#allocation2 + $0x548] sm:$0xf] }
  0x4c   : > { %1643 = vmatpush.bf16.msrb.mxu2 %v3521_v57  ;;  %1588 = vmatpush.bf16.msrb.mxu0 %v3741_v15  ;;  %v4497_v57 = vld [vmem:[#allocation2 + $0x484] sm:$0xf]  ;;  %v3522_v60 = vld [vmem:[#allocation2 + $0x1a8] sm:$0xf0]  ;;  %v4526_v10 = vld [vmem:[#allocation2 + $0x564] sm:$0xf0] }
  0x4d   : > { %v3901_v63 = vor.u32 %v4497_v57, %v3898_v58  ;;  %v3578_v15 = vld [vmem:[#allocation2 + $0x220] sm:$0xf0]  ;;  %v4534_v57 = vld [vmem:[#allocation2 + $0x5a4] sm:$0xf0]  ;;  %v4402_v58 = vld [vmem:[#allocation2 + $0x18c] sm:$0xf] }
  0x4e   : > { %1616 = vmatpush.bf16.msrb.mxu1 %v3997_v18  ;;  %v3834_v18 = vld [vmem:[#allocation2 + $0x420] sm:$0xf0]  ;;  %v3581_v25 = vor.u32 %v4417_v14, %v3578_v15  ;;  %v3525_v62 = vor.u32 %v4402_v58, %v3522_v60  ;;  %v4002_v8 = vld [vmem:[#allocation2 + $0x568] sm:$0xf0]  ;;  %v3968_v22 = vld [vmem:[#allocation2 + $0x508] sm:$0xf] }
  0x4f   : > { %1675 = vmatpush.bf16.msrb.mxu3 %v3649_v56  ;;  %v3837_v26 = vor.u32 %v4481_v17, %v3834_v18  ;;  %v4032_v56 = vld [vmem:[#allocation2 + $0x588] sm:$0xf]  ;;  %v3490_v14 = vld [vmem:[#allocation2 + $0x168] sm:$0xf0] }
  0x50   : > { %1644 = vmatpush.bf16.msrb.mxu2 %v3489_v5  ;;  %1589 = vmatpush.bf16.msrb.mxu0 %v3709_v33  ;;  %v4489_v5 = vld [vmem:[#allocation2 + $0x444] sm:$0xf]  ;;  %v261_v33 = vld [vmem:[%s4819_s11 + $0x48] sm:$0xff] }
  0x51   : > { %v3869_v12 = vor.u32 %v4489_v5, %v3866_v6  ;;  %v487_v61 = vunpack.c.l.b16 %v261_v33  ;;  %v3746_v5 = vld [vmem:[#allocation2 + $0x368] sm:$0xf0]  ;;  %v4518_v23 = vld [vmem:[#allocation2 + $0x524] sm:$0xf0] }
  0x52   : > { %1617 = vmatpush.bf16.msrb.mxu1 %v3965_v34  ;;  %v3813_v34 = vor.u32 %v4474_v30, %v3810_v31  ;;  %v4522_v6 = vld [vmem:[#allocation2 + $0x54c] sm:$0xf]  ;;  %v3936_v36 = vld [vmem:[#allocation2 + $0x4c8] sm:$0xf] }
  0x53   : > { %1676 = vmatpush.bf16.msrb.mxu3 %v3617_v4  ;;  %v4871_v1 = vpack.c.b16 %v487_v61, %v487_v61  ;;  %v4458_v4 = vld [vmem:[#allocation2 + $0x34c] sm:$0xf]  ;;  %v4510_v37 = vld [vmem:[#allocation2 + $0x4e4] sm:$0xf0] }
  0x54   : > { %1645 = vmatpush.bf16.msrb.mxu2 %v3457_v19  ;;  %1590 = vmatpush.bf16.msrb.mxu0 %v3677_v49  ;;  %v3308_v19 = vld [vmem:[%s4819_s11 + $0x30] sm:$0xf]  ;;  %v3778_v49 = vld [vmem:[#allocation2 + $0x3a8] sm:$0xf0]  ;;  %v3749_v7 = vor.u32 %v4458_v4, %v3746_v5  ;;  %v3872_v5 = vld [vmem:[#allocation2 + $0x448] sm:$0xf] }
  0x55   : > { %1487 = vmatmul.bf16.gmra.mxu0 %v4843_v39  ;;  %1515 = vmatmul.bf16.gmra.mxu1 %v4845_v44  ;;  %v4859_v27 = vor.u32 %v4351_v20, %v3308_v19  ;;  %v3781_v54 = vor.u32 %v4466_v47, %v3778_v49  ;;  %v4450_v15 = vld [vmem:[#allocation2 + $0x30c] sm:$0xf] }
  0x56   : > { %1571 = vmatmul.bf16.gmra.mxu3 %v4843_v39  ;;  %1618 = vmatpush.bf16.msrb.mxu1 %v3933_v50  ;;  %v4530_v50 = vld [vmem:[#allocation2 + $0x58c] sm:$0xf] }
  0x57   : > { %1543 = vmatmul.bf16.gmra.mxu2 %v4847_v45  ;;  %1677 = vmatpush.bf16.msrb.mxu3 %v3585_v16  ;;  %v3714_v17 = vld [vmem:[#allocation2 + $0x328] sm:$0xf0] }
  0x58   : > { %1646 = vmatpush.bf16.msrb.mxu2 %v3425_v35  ;;  %1591 = vmatpush.bf16.msrb.mxu0 %v3645_v59  ;;  %v4066_v35 = vld [vmem:[#allocation2 + $0x5e8] sm:$0xf0]  ;;  %v4033_v59 = vor.u32 %v4534_v57, %v4032_v56  ;;  %v3717_v20 = vor.u32 %v4450_v15, %v3714_v17  ;;  %v4502_v56 = vld [vmem:[#allocation2 + $0x4a4] sm:$0xf0] }
  0x59   : > { %v4069_v40 = vor.u32 %v4538_v32, %v4066_v35  ;;  %v4514_v18 = vld [vmem:[#allocation2 + $0x50c] sm:$0xf] }
  0x5a   : > { %1619 = vmatpush.bf16.msrb.mxu1 %v3901_v63  ;;  %v488_v63 = vunpack.c.h.b16 %v261_v33  ;;  %v3970_v19 = vld [vmem:[#allocation2 + $0x528] sm:$0xf0] }
  0x5b   : > { %1782 = vmatpush.bf16.msra.mxu3 %v4069_v40  ;;  %v3973_v21 = vor.u32 %v4514_v18, %v3970_v19  ;;  %v4386_v24 = vld [vmem:[#allocation2 + $0x10c] sm:$0xf]  ;;  %v3937_v40 = vor.u32 %v4510_v37, %v3936_v36  ;;  %v3840_v18 = vld [vmem:[#allocation2 + $0x408] sm:$0xf]  ;;  %v4479_v37 = vld [vmem:[#allocation2 + $0x3ec] sm:$0xf0] }
  0x5c   : > { %1647 = vmatpush.bf16.msrb.mxu2 %v3393_v53  ;;  %1592 = vmatpush.bf16.msrb.mxu0 %v3613_v11  ;;  %v4034_v53 = vld [vmem:[#allocation2 + $0x5a8] sm:$0xf0]  ;;  %v4873_v2 = vpack.c.b16 %v488_v63, %v488_v63  ;;  %v4005_v11 = vor.u32 %v4522_v6, %v4002_v8  ;;  %v4494_v6 = vld [vmem:[#allocation2 + $0x464] sm:$0xf0] }
  0x5d   : > { %v4037_v55 = vor.u32 %v4530_v50, %v4034_v53  ;;  %v4442_v31 = vld [vmem:[#allocation2 + $0x2cc] sm:$0xf]  ;;  %v3873_v8 = vor.u32 %v4494_v6, %v3872_v5  ;;  %v4486_v19 = vld [vmem:[#allocation2 + $0x424] sm:$0xf0]  ;;  %v4463_v6 = vld [vmem:[#allocation2 + $0x36c] sm:$0xf0] }
  0x5e   : > { %1620 = vmatpush.bf16.msrb.mxu1 %v3869_v12  ;;  %v4001_v12 = vor.u32 %v4526_v10, %v4000_v9  ;;  %v3682_v32 = vld [vmem:[#allocation2 + $0x2e8] sm:$0xf0] }
  0x5f   : > { %1783 = vmatpush.bf16.msra.mxu3 %v4037_v55  ;;  %v4506_v33 = vld [vmem:[#allocation2 + $0x4cc] sm:$0xf]  ;;  %v3904_v55 = vld [vmem:[#allocation2 + $0x488] sm:$0xf] }
  0x60   : > { %1648 = vmatpush.bf16.msrb.mxu2 %v3361_v0  ;;  %1593 = vmatpush.bf16.msrb.mxu0 %v3581_v25  ;;  %v489_v0 = vunpack.c.l.b16 %v262_v38  ;;  %v3969_v25 = vor.u32 %v4518_v23, %v3968_v22  ;;  %v3938_v35 = vld [vmem:[#allocation2 + $0x4e8] sm:$0xf0]  ;;  %v3905_v58 = vor.u32 %v4502_v56, %v3904_v55  ;;  %v4471_v55 = vld [vmem:[#allocation2 + $0x3ac] sm:$0xf0] }
  0x61   : > { %v3941_v38 = vor.u32 %v4506_v33, %v3938_v35  ;;  %v3426_v42 = vld [vmem:[#allocation2 + $0xe8] sm:$0xf0]  ;;  %v3560_v33 = vld [vmem:[#allocation2 + $0x1d0] sm:$0xf] }
  0x62   : > { %1621 = vmatpush.bf16.msrb.mxu1 %v3837_v26  ;;  %v4875_v3 = vpack.c.b16 %v489_v0, %v489_v0  ;;  %v3458_v26 = vld [vmem:[#allocation2 + $0x128] sm:$0xf0]  ;;  %v3816_v35 = vld [vmem:[#allocation2 + $0x3d0] sm:$0xf] }
  0x63   : > { %1784 = vmatpush.bf16.msra.mxu3 %v4005_v11  ;;  %v3461_v30 = vor.u32 %v4386_v24, %v3458_v26  ;;  %v4434_v43 = vld [vmem:[#allocation2 + $0x28c] sm:$0xf]  ;;  %v4072_v24 = vld [vmem:[#allocation2 + $0x5d0] sm:$0xf]  ;;  %v4411_v26 = vld [vmem:[#allocation2 + $0x1d4] sm:$0xf] }
  0x64   : > { %1649 = vmatpush.bf16.msrb.mxu2 %v3329_v13  ;;  %1698 = vmatpush.bf16.msra.mxu0 %v4065_v41  ;;  %v4394_v13 = vld [vmem:[#allocation2 + $0x14c] sm:$0xf]  ;;  %v4008_v56 = vld [vmem:[#allocation2 + $0x550] sm:$0xf] }
  0x65   : > { %1492 = vmatmul.bf16.gmra.mxu0 %v4859_v27  ;;  %1520 = vmatmul.bf16.gmra.mxu1 %v4861_v28  ;;  %v3493_v16 = vor.u32 %v4394_v13, %v3490_v14  ;;  %v4378_v41 = vld [vmem:[#allocation2 + $0xcc] sm:$0xf] }
  0x66   : > { %1576 = vmatmul.bf16.gmra.mxu3 %v4859_v27  ;;  %1726 = vmatpush.bf16.msra.mxu1 %v3557_v48  ;;  %v3429_v47 = vor.u32 %v4378_v41, %v3426_v42  ;;  %v3650_v48 = vld [vmem:[#allocation2 + $0x2a8] sm:$0xf0]  ;;  %v3817_v41 = vor.u32 %v4479_v37, %v3816_v35 }
  0x67   : > { %1548 = vmatmul.bf16.gmra.mxu2 %v4863_v29  ;;  %1785 = vmatpush.bf16.msra.mxu3 %v3973_v21  ;;  %v4498_v49 = vld [vmem:[#allocation2 + $0x48c] sm:$0xf]  ;;  %v3653_v53 = vor.u32 %v4434_v43, %v3650_v48  ;;  %v3841_v21 = vor.u32 %v4486_v19, %v3840_v18  ;;  %v4403_v43 = vld [vmem:[#allocation2 + $0x194] sm:$0xf]  ;;  %v4391_v18 = vld [vmem:[#allocation2 + $0x12c] sm:$0xf0] }
  0x68   : > { %1754 = vmatpush.bf16.msra.mxu2 %v3813_v34  ;;  %1699 = vmatpush.bf16.msra.mxu0 %v4033_v59  ;;  %v3685_v34 = vor.u32 %v4442_v31, %v3682_v32  ;;  %v3906_v50 = vld [vmem:[#allocation2 + $0x4a8] sm:$0xf0]  ;;  %v3562_v31 = vld [vmem:[#allocation2 + $0x1f0] sm:$0xf0]  ;;  %v3720_v19 = vld [vmem:[#allocation2 + $0x310] sm:$0xf] }
  0x69   : > { %v4370_v57 = vld [vmem:[#allocation2 + $0x8c] sm:$0xf]  ;;  %v3565_v32 = vor.u32 %v4411_v26, %v3562_v31 }
  0x6a   : > { %1727 = vmatpush.bf16.msra.mxu1 %v3525_v62  ;;  %v3394_v59 = vld [vmem:[#allocation2 + $0xa8] sm:$0xf0] }
  0x6b   : > { %1786 = vmatpush.bf16.msra.mxu3 %v3941_v38  ;;  %v3397_v60 = vor.u32 %v4370_v57, %v3394_v59  ;;  %v4426_v61 = vld [vmem:[#allocation2 + $0x24c] sm:$0xf]  ;;  %v4040_v38 = vld [vmem:[#allocation2 + $0x590] sm:$0xf] }
  0x6c   : > { %1755 = vmatpush.bf16.msra.mxu2 %v3781_v54  ;;  %1700 = vmatpush.bf16.msra.mxu0 %v4001_v12  ;;  %v3909_v54 = vor.u32 %v4498_v49, %v3906_v50  ;;  %v3618_v62 = vld [vmem:[#allocation2 + $0x268] sm:$0xf0]  ;;  %v3528_v49 = vld [vmem:[#allocation2 + $0x190] sm:$0xf] }
  0x6d   : > { %v4490_v63 = vld [vmem:[#allocation2 + $0x44c] sm:$0xf]  ;;  %v3621_v0 = vor.u32 %v4426_v61, %v3618_v62  ;;  %v4407_v50 = vld [vmem:[#allocation2 + $0x1ac] sm:$0xf0]  ;;  %v3498_v61 = vld [vmem:[#allocation2 + $0x170] sm:$0xf0] }
  0x6e   : > { %1728 = vmatpush.bf16.msra.mxu1 %v3493_v16  ;;  %v3874_v4 = vld [vmem:[#allocation2 + $0x468] sm:$0xf0]  ;;  %v4527_v57 = vld [vmem:[#allocation2 + $0x56c] sm:$0xf0] }
  0x6f   : > { %1787 = vmatpush.bf16.msra.mxu3 %v3909_v54  ;;  %v4362_v9 = vld [vmem:[#allocation2 + $0x4c] sm:$0xf]  ;;  %v3529_v54 = vor.u32 %v4407_v50, %v3528_v49  ;;  %v4009_v59 = vor.u32 %v4527_v57, %v4008_v56  ;;  %v4503_v49 = vld [vmem:[#allocation2 + $0x4ac] sm:$0xf0]  ;;  %v4371_v50 = vld [vmem:[#allocation2 + $0x94] sm:$0xf] }
  0x70   : > { %1756 = vmatpush.bf16.msra.mxu2 %v3749_v7  ;;  %1701 = vmatpush.bf16.msra.mxu0 %v3969_v25  ;;  %v3877_v7 = vor.u32 %v4490_v63, %v3874_v4  ;;  %v3362_v10 = vld [vmem:[#allocation2 + $0x68] sm:$0xf0]  ;;  %v4543_v25 = vld [vmem:[#allocation2 + $0x5ec] sm:$0xf0] }
  0x71   : > { %v4418_v11 = vld [vmem:[#allocation2 + $0x20c] sm:$0xf]  ;;  %v3365_v12 = vor.u32 %v4362_v9, %v3362_v10  ;;  %v3496_v63 = vld [vmem:[#allocation2 + $0x150] sm:$0xf] }
  0x72   : > { %1729 = vmatpush.bf16.msra.mxu1 %v3461_v30  ;;  %v3586_v13 = vld [vmem:[#allocation2 + $0x228] sm:$0xf0]  ;;  %v4073_v30 = vor.u32 %v4543_v25, %v4072_v24  ;;  %v3752_v4 = vld [vmem:[#allocation2 + $0x350] sm:$0xf]  ;;  %v4379_v25 = vld [vmem:[#allocation2 + $0xd4] sm:$0xf] }
  0x73   : > { %v4482_v14 = vld [vmem:[#allocation2 + $0x40c] sm:$0xf]  ;;  %1788 = vmatpush.bf16.msra.mxu3 %v3877_v7  ;;  %v3589_v16 = vor.u32 %v4418_v11, %v3586_v13  ;;  %v3976_v7 = vld [vmem:[#allocation2 + $0x510] sm:$0xf]  ;;  %v3753_v9 = vor.u32 %v4463_v6, %v3752_v4  ;;  %v4387_v11 = vld [vmem:[#allocation2 + $0x114] sm:$0xf] }
  0x74   : > { %1757 = vmatpush.bf16.msra.mxu2 %v3717_v20  ;;  %1702 = vmatpush.bf16.msra.mxu0 %v3937_v40  ;;  %v3842_v15 = vld [vmem:[#allocation2 + $0x428] sm:$0xf0]  ;;  %v4535_v40 = vld [vmem:[#allocation2 + $0x5ac] sm:$0xf0] }
  0x75   : > { %1497 = vmatmul.bf16.gmra.mxu0 %v4871_v1  ;;  %1525 = vmatmul.bf16.gmra.mxu1 %v4873_v2  ;;  %v3845_v17 = vor.u32 %v4482_v14, %v3842_v15  ;;  %v4354_v20 = vld [vmem:[#allocation2 + $0xc] sm:$0xf]  ;;  %v4041_v42 = vor.u32 %v4535_v40, %v4040_v38  ;;  %v4511_v24 = vld [vmem:[#allocation2 + $0x4ec] sm:$0xf0] }
  0x76   : > { %1581 = vmatmul.bf16.gmra.mxu3 %v4871_v1  ;;  %1730 = vmatpush.bf16.msra.mxu1 %v3429_v47  ;;  %v3330_v22 = vld [vmem:[#allocation2 + $0x28] sm:$0xf0]  ;;  %v3530_v47 = vld [vmem:[#allocation2 + $0x1b0] sm:$0xf0]  ;;  %v3432_v38 = vld [vmem:[#allocation2 + $0xd0] sm:$0xf] }
  0x77   : > { %1553 = vmatmul.bf16.gmra.mxu2 %v4875_v3  ;;  %1789 = vmatpush.bf16.msra.mxu3 %v3845_v17  ;;  %v3333_v23 = vor.u32 %v4354_v20, %v3330_v22  ;;  %v3533_v48 = vor.u32 %v4403_v43, %v3530_v47  ;;  %v3464_v17 = vld [vmem:[#allocation2 + $0x110] sm:$0xf] }
  0x78   : > { %1758 = vmatpush.bf16.msra.mxu2 %v3685_v34  ;;  %1703 = vmatpush.bf16.msra.mxu0 %v3905_v58  ;;  %v4415_v34 = vld [vmem:[#allocation2 + $0x1ec] sm:$0xf0]  ;;  %v3465_v20 = vor.u32 %v4391_v18, %v3464_v17 }
  0x79   : > { %v3561_v36 = vor.u32 %v4415_v34, %v3560_v33  ;;  %v4383_v40 = vld [vmem:[#allocation2 + $0xec] sm:$0xf0] }
  0x7a   : > { %1731 = vmatpush.bf16.msra.mxu1 %v3397_v60  ;;  %v4395_v60 = vld [vmem:[#allocation2 + $0x154] sm:$0xf]  ;;  %v3433_v43 = vor.u32 %v4383_v40, %v3432_v38  ;;  %v3656_v6 = vld [vmem:[#allocation2 + $0x290] sm:$0xf] }
  0x7b   : > { %v3501_v62 = vor.u32 %v4395_v60, %v3498_v61  ;;  %v3338_v38 = vld [vmem:[#allocation2 + $0x30] sm:$0xf0] }
  0x7c   : > { %1759 = vmatpush.bf16.msra.mxu2 %v3653_v53  ;;  %1704 = vmatpush.bf16.msra.mxu0 %v3873_v8  ;;  %v3784_v53 = vld [vmem:[#allocation2 + $0x390] sm:$0xf] }
  0x7d   : > { %v3785_v58 = vor.u32 %v4471_v55, %v3784_v53  ;;  %v4519_v8 = vld [vmem:[#allocation2 + $0x52c] sm:$0xf0] }
  0x7e   : > { %1732 = vmatpush.bf16.msra.mxu1 %v3365_v12  ;;  %v3977_v10 = vor.u32 %v4519_v8, %v3976_v7  ;;  %v3466_v12 = vld [vmem:[#allocation2 + $0x130] sm:$0xf0]  ;;  %v4439_v7 = vld [vmem:[#allocation2 + $0x2ac] sm:$0xf0] }
  0x7f   : > { %v3469_v13 = vor.u32 %v4387_v11, %v3466_v12  ;;  %v3880_v12 = vld [vmem:[#allocation2 + $0x450] sm:$0xf] }
  0x80   : > { %1760 = vmatpush.bf16.msra.mxu2 %v3621_v0  ;;  %1705 = vmatpush.bf16.msra.mxu0 %v3841_v21  ;;  %v4399_v0 = vld [vmem:[#allocation2 + $0x16c] sm:$0xf0] }
  0x81   : > { %v3497_v5 = vor.u32 %v4399_v0, %v3496_v63  ;;  %v4455_v21 = vld [vmem:[#allocation2 + $0x32c] sm:$0xf0] }
  0x82   : > { %1733 = vmatpush.bf16.msra.mxu1 %v3333_v23  ;;  %v3721_v22 = vor.u32 %v4455_v21, %v3720_v19  ;;  %v3944_v23 = vld [vmem:[#allocation2 + $0x4d0] sm:$0xf] }
  0x83   : > { %v3945_v26 = vor.u32 %v4511_v24, %v3944_v23  ;;  %v3400_v0 = vld [vmem:[#allocation2 + $0x90] sm:$0xf] }
  0x84   : > { %1761 = vmatpush.bf16.msra.mxu2 %v3589_v16  ;;  %v3368_v24 = vld [vmem:[#allocation2 + $0x50] sm:$0xf] }
  0x85   : > { %1594 = vmatmul.bf16.vlgmr.msrb.gmra.mxu0 %v4829_v51  ;;  %1622 = vmatmul.bf16.vlgmr.msrb.gmra.mxu1 %v4831_v52 }
  0x86   : > { %1678 = vmatmul.bf16.vlgmr.msrb.gmra.mxu3 %v4829_v51  ;;  %1810 = vmatpush.bf16.msrb.mxu0 %v3561_v36 }
  0x87   : > { %1650 = vmatmul.bf16.vlgmr.msrb.gmra.mxu2 %v4827_v46  ;;  %1894 = vmatpush.bf16.msrb.mxu3 %v3565_v32 }
  0x88   : > { %1866 = vmatpush.bf16.msrb.mxu2 %v4073_v30  ;;  %1838 = vmatpush.bf16.msrb.mxu1 %v3817_v41  ;;  %v3434_v30 = vld [vmem:[#allocation2 + $0xf0] sm:$0xf0]  ;;  %v3688_v41 = vld [vmem:[#allocation2 + $0x2d0] sm:$0xf] }
  0x89   : > { %v3437_v32 = vor.u32 %v4379_v25, %v3434_v30  ;;  %v4367_v25 = vld [vmem:[#allocation2 + $0x6c] sm:$0xf0] }
  0x8a   : > { %1811 = vmatpush.bf16.msrb.mxu0 %v3529_v54  ;;  %v3402_v54 = vld [vmem:[#allocation2 + $0xb0] sm:$0xf0]  ;;  %v4431_v30 = vld [vmem:[#allocation2 + $0x26c] sm:$0xf0] }
  0x8b   : > { %1895 = vmatpush.bf16.msrb.mxu3 %v3533_v48  ;;  %v3912_v48 = vld [vmem:[#allocation2 + $0x490] sm:$0xf]  ;;  %v3405_v55 = vor.u32 %v4371_v50, %v3402_v54 }
  0x8c   : > { %1867 = vmatpush.bf16.msrb.mxu2 %v4041_v42  ;;  %1839 = vmatpush.bf16.msrb.mxu1 %v3785_v58  ;;  %v4447_v42 = vld [vmem:[#allocation2 + $0x2ec] sm:$0xf0]  ;;  %v3913_v53 = vor.u32 %v4503_v49, %v3912_v48 }
  0x8d   : > { %v3689_v47 = vor.u32 %v4447_v42, %v3688_v41  ;;  %v3336_v42 = vld [vmem:[#allocation2 + $0x10] sm:$0xf] }
  0x8e   : > { %1812 = vmatpush.bf16.msrb.mxu0 %v3497_v5  ;;  %v4375_v5 = vld [vmem:[#allocation2 + $0xac] sm:$0xf0] }
  0x8f   : > { %1896 = vmatpush.bf16.msrb.mxu3 %v3501_v62 }
  0x90   : > { %1868 = vmatpush.bf16.msrb.mxu2 %v4009_v59  ;;  %1840 = vmatpush.bf16.msrb.mxu1 %v3753_v9  ;;  %v3401_v9 = vor.u32 %v4375_v5, %v3400_v0  ;;  %v3568_v5 = vld [vmem:[#allocation2 + $0x1d8] sm:$0xf] }
  0x92   : > { %1813 = vmatpush.bf16.msrb.mxu0 %v3465_v20 }
  0x93   : > { %1897 = vmatpush.bf16.msrb.mxu3 %v3469_v13  ;;  %v4495_v13 = vld [vmem:[#allocation2 + $0x46c] sm:$0xf0] }
  0x94   : > { %1869 = vmatpush.bf16.msrb.mxu2 %v3977_v10  ;;  %1841 = vmatpush.bf16.msrb.mxu1 %v3721_v22  ;;  %v3657_v10 = vor.u32 %v4439_v7, %v3656_v6  ;;  %v4416_v6 = vld [vmem:[#allocation2 + $0x1f4] sm:$0xf0] }
  0x95   : > { %1599 = vmatmul.bf16.gmra.mxu0 %v4845_v44  ;;  %1627 = vmatmul.bf16.gmra.mxu1 %v4847_v45  ;;  %v3824_v7 = vld [vmem:[#allocation2 + $0x3d8] sm:$0xf] }
  0x96   : > { %1683 = vmatmul.bf16.gmra.mxu3 %v4845_v44  ;;  %1814 = vmatpush.bf16.msrb.mxu0 %v3433_v43  ;;  %v4359_v43 = vld [vmem:[#allocation2 + $0x2c] sm:$0xf0] }
  0x97   : > { %1655 = vmatmul.bf16.gmra.mxu2 %v4843_v39  ;;  %1898 = vmatpush.bf16.msrb.mxu3 %v3437_v32  ;;  %v3337_v54 = vor.u32 %v4359_v43, %v3336_v42  ;;  %v4472_v42 = vld [vmem:[#allocation2 + $0x3b4] sm:$0xf0] }
  0x98   : > { %1870 = vmatpush.bf16.msrb.mxu2 %v3945_v26  ;;  %1842 = vmatpush.bf16.msrb.mxu1 %v3689_v47  ;;  %v3624_v26 = vld [vmem:[#allocation2 + $0x250] sm:$0xf] }
  0x99   : > { %v3625_v32 = vor.u32 %v4431_v30, %v3624_v26  ;;  %v3592_v47 = vld [vmem:[#allocation2 + $0x210] sm:$0xf]  ;;  %v4539_v26 = vld [vmem:[#allocation2 + $0x5d4] sm:$0xf] }
  0x9a   : > { %1815 = vmatpush.bf16.msrb.mxu0 %v3401_v9 }
  0x9b   : > { %1899 = vmatpush.bf16.msrb.mxu3 %v3405_v55  ;;  %v4423_v55 = vld [vmem:[#allocation2 + $0x22c] sm:$0xf0] }
  0x9c   : > { %1871 = vmatpush.bf16.msrb.mxu2 %v3913_v53  ;;  %1843 = vmatpush.bf16.msrb.mxu1 %v3657_v10 }
  0xa0   : > { %1844 = vmatpush.bf16.msrb.mxu1 %v3625_v32  ;;  %v4074_v32 = vld [vmem:[#allocation2 + $0x5f0] sm:$0xf0] }
  0xa5   : > { %1604 = vmatmul.bf16.gmra.mxu0 %v4861_v28  ;;  %1632 = vmatmul.bf16.gmra.mxu1 %v4863_v29 }
  0xa6   : > { %1688 = vmatmul.bf16.gmra.mxu3 %v4861_v28 }
  0xa7   : > { %1660 = vmatmul.bf16.gmra.mxu2 %v4859_v27 }
  0xb5   : > { %1609 = vmatmul.bf16.gmra.mxu0 %v4873_v2  ;;  %1637 = vmatmul.bf16.gmra.mxu1 %v4875_v3 }
  0xb6   : > { %1693 = vmatmul.bf16.gmra.mxu3 %v4873_v2 }
  0xb7   : > { %1665 = vmatmul.bf16.gmra.mxu2 %v4871_v1 }
  0xc2   : > { %v1483_v14 = vpop.f32.mrf.mxu0  ;;  %v1511_v15 = vpop.f32.mrf.mxu1 }
  0xc3   : > { %v1512_v16 = vadd.f32 %v1511_v15, %v1483_v14  ;;  %v4363_v14 = vld [vmem:[#allocation2 + $0x54] sm:$0xf]  ;;  %v3881_v15 = vor.u32 %v4495_v13, %v3880_v12  ;;  %v3569_v13 = vor.u32 %v4416_v6, %v3568_v5 }
  0xc5   : > { %1706 = vmatmul.bf16.vlgmr.msra.gmra.mxu0 %v4831_v52  ;;  %1734 = vmatmul.bf16.vlgmr.msra.gmra.mxu1 %v4827_v46 }
  0xc6   : > { %1790 = vmatmul.bf16.vlgmr.msra.gmra.mxu3 %v4831_v52  ;;  %1872 = vmatpush.bf16.msrb.mxu2 %v3881_v15 }
  0xc7   : > { %1762 = vmatmul.bf16.vlgmr.msra.gmra.mxu2 %v4829_v51 }
  0xc9   : > { %v4901_v34 = vpop.f32.mrf.mxu3 }
  0xca   : > { %v1539_v31 = vpop.f32.mrf.mxu2  ;;  %v1485_v35 = vpop.f32.mrf.mxu0 }
  0xcb   : > { %v1540_v33 = vadd.f32 %v1539_v31, %v1512_v16  ;;  %v1513_v36 = vpop.f32.mrf.mxu1  ;;  %v3370_v16 = vld [vmem:[#allocation2 + $0x70] sm:$0xf0]  ;;  %v3369_v31 = vor.u32 %v4367_v25, %v3368_v24 }
  0xcc   : > { %v1514_v37 = vadd.f32 %v1513_v36, %v1485_v35  ;;  %v3373_v18 = vor.u32 %v4363_v14, %v3370_v16  ;;  %v4487_v35 = vld [vmem:[#allocation2 + $0x42c] sm:$0xf0]  ;;  %v4355_v36 = vld [vmem:[#allocation2 + $0x14] sm:$0xf]  ;;  %v4480_v14 = vld [vmem:[#allocation2 + $0x3f4] sm:$0xf0] }
  0xcd   : > { %v2202_v56 = vmul.f32 0.2, %v1540_v33  ;;  %vm2146_vm0 = vcmp.gt.f32.partialorder %v1540_v33, 0.0  ;;  %1816 = vmatpush.bf16.msrb.mxu0 %v3369_v31  ;;  %v3341_v40 = vor.u32 %v4355_v36, %v3338_v38  ;;  %v3825_v16 = vor.u32 %v4480_v14, %v3824_v7  ;;  %v4475_v24 = vld [vmem:[#allocation2 + $0x3d4] sm:$0xf] }
  0xce   : > { %1900 = vmatpush.bf16.msrb.mxu3 %v3373_v18  ;;  %v3818_v25 = vld [vmem:[#allocation2 + $0x3f0] sm:$0xf0]  ;;  %v4077_v38 = vor.u32 %v4539_v26, %v4074_v32  ;;  %v3760_v7 = vld [vmem:[#allocation2 + $0x358] sm:$0xf] }
  0xcf   : > { %v4905_v4 = vsel %vm2146_vm0, %v1540_v33, %v2202_v56  ;;  %v3848_v33 = vld [vmem:[#allocation2 + $0x410] sm:$0xf]  ;;  %v3821_v31 = vor.u32 %v4475_v24, %v3818_v25  ;;  %v3472_v24 = vld [vmem:[#allocation2 + $0x118] sm:$0xf] }
  0xd0   : > { %v4392_v25 = vld [vmem:[#allocation2 + $0x134] sm:$0xf0] }
  0xd1   : > { %v4903_v59 = vpop.f32.mrf.mxu3  ;;  %1817 = vmatpush.bf16.msrb.mxu0 %v3337_v54  ;;  %v4531_v54 = vld [vmem:[#allocation2 + $0x594] sm:$0xf]  ;;  %v3728_v32 = vld [vmem:[#allocation2 + $0x318] sm:$0xf] }
  0xd2   : > { %v1541_v57 = vpop.f32.mrf.mxu2  ;;  %v1488_v60 = vpop.f32.mrf.mxu0  ;;  %1901 = vmatpush.bf16.msrb.mxu3 %v3341_v40  ;;  %v3792_v40 = vld [vmem:[#allocation2 + $0x398] sm:$0xf] }
  0xd3   : > { %v1542_v58 = vadd.f32 %v1541_v57, %v1514_v37  ;;  %v1516_v61 = vpop.f32.mrf.mxu1  ;;  %v3849_v37 = vor.u32 %v4487_v35, %v3848_v33  ;;  %v3593_v57 = vor.u32 %v4423_v55, %v3592_v47  ;;  %v3536_v33 = vld [vmem:[#allocation2 + $0x198] sm:$0xf]  ;;  %v3793_v43 = vor.u32 %v4472_v42, %v3792_v40  ;;  %v4451_v42 = vld [vmem:[#allocation2 + $0x314] sm:$0xf] }
  0xd4   : > { %v1517_v63 = vadd.f32 %v1516_v61, %v1488_v60  ;;  %v4408_v35 = vld [vmem:[#allocation2 + $0x1b4] sm:$0xf0] }
  0xd5   : > { %vm2154_vm1 = vcmp.gt.f32.partialorder %v1542_v58, 0.0  ;;  %v2210_v62 = vmul.f32 0.2, %v1542_v58  ;;  %1711 = vmatmul.bf16.gmra.mxu0 %v4847_v45  ;;  %1739 = vmatmul.bf16.gmra.mxu1 %v4843_v39 }
  0xd6   : > { %1795 = vmatmul.bf16.gmra.mxu3 %v4847_v45  ;;  %1873 = vmatpush.bf16.msrb.mxu2 %v3849_v37 }
  0xd7   : > { %v4908_v8 = vsel %vm2154_vm1, %v1542_v58, %v2210_v62  ;;  %1767 = vmatmul.bf16.gmra.mxu2 %v4845_v44  ;;  %1845 = vmatpush.bf16.msrb.mxu1 %v3593_v57  ;;  %v4042_v57 = vld [vmem:[#allocation2 + $0x5b0] sm:$0xf0] }
  0xd8   : > { %v2314_v11 = vpack.c.bf16 %v4908_v8, %v4905_v4  ;;  %2006 = vmatpush.bf16.msra.mxu3 %v3825_v16  ;;  %1922 = vmatpush.bf16.msra.mxu0 %v3821_v31  ;;  %v4045_v5 = vor.u32 %v4531_v54, %v4042_v57  ;;  %v3473_v31 = vor.u32 %v4392_v25, %v3472_v24  ;;  %v3440_v57 = vld [vmem:[#allocation2 + $0xd8] sm:$0xf]  ;;  %v4507_v24 = vld [vmem:[#allocation2 + $0x4d4] sm:$0xf] }
  0xd9   : > { %v4915_v20 = vpop.f32.mrf.mxu3  ;;  %v3946_v25 = vld [vmem:[#allocation2 + $0x4f0] sm:$0xf0] }
  0xda   : > { %v1544_v17 = vpop.f32.mrf.mxu2  ;;  %v1490_v21 = vpop.f32.mrf.mxu0  ;;  %1978 = vmatpush.bf16.msra.mxu2 %v3569_v13 }
  0xdb   : > { %v1545_v19 = vadd.f32 %v1544_v17, %v1517_v63  ;;  %v1518_v22 = vpop.f32.mrf.mxu1  ;;  %1950 = vmatpush.bf16.msra.mxu1 %v4077_v38 }
  0xdc   : > { %v1519_v23 = vadd.f32 %v1518_v22, %v1490_v21  ;;  %2007 = vmatpush.bf16.msra.mxu3 %v3793_v43  ;;  %v3722_v43 = vld [vmem:[#allocation2 + $0x330] sm:$0xf0] }
  0xdd   : > { %v2218_v48 = vmul.f32 0.2, %v1545_v19  ;;  %vm2162_vm2 = vcmp.gt.f32.partialorder %v1545_v19, 0.0 }
  0xdf   : > { %v4922_v61 = vsel %vm2162_vm2, %v1545_v19, %v2218_v48  ;;  %1951 = vmatpush.bf16.msra.mxu1 %v4045_v5 }
  0xe1   : > { %v4917_v50 = vpop.f32.mrf.mxu3 }
  0xe2   : > { %v1546_v41 = vpop.f32.mrf.mxu2  ;;  %v1493_v53 = vpop.f32.mrf.mxu0 }
  0xe3   : > { %v1547_v49 = vadd.f32 %v1546_v41, %v1519_v23  ;;  %v1521_v56 = vpop.f32.mrf.mxu1  ;;  %v3537_v41 = vor.u32 %v4408_v35, %v3536_v33  ;;  %v4456_v33 = vld [vmem:[#allocation2 + $0x334] sm:$0xf0] }
  0xe4   : > { %v1522_v60 = vadd.f32 %v1521_v56, %v1493_v53  ;;  %v3786_v53 = vld [vmem:[#allocation2 + $0x3b0] sm:$0xf0] }
  0xe5   : > { %vm2170_vm3 = vcmp.gt.f32.partialorder %v1547_v49, 0.0  ;;  %v2226_v58 = vmul.f32 0.2, %v1547_v49  ;;  %1716 = vmatmul.bf16.gmra.mxu0 %v4863_v29  ;;  %1744 = vmatmul.bf16.gmra.mxu1 %v4859_v27 }
  0xe6   : > { %1800 = vmatmul.bf16.gmra.mxu3 %v4863_v29  ;;  %1979 = vmatpush.bf16.msra.mxu2 %v3537_v41 }
  0xe7   : > { %1772 = vmatmul.bf16.gmra.mxu2 %v4861_v28  ;;  %v4924_v62 = vsel %vm2170_vm3, %v1547_v49, %v2226_v58  ;;  %v4467_v49 = vld [vmem:[#allocation2 + $0x394] sm:$0xf]  ;;  %v3504_v58 = vld [vmem:[#allocation2 + $0x158] sm:$0xf] }
  0xe8   : > { %v2322_v63 = vpack.c.bf16 %v4924_v62, %v4922_v61  ;;  %v3789_v56 = vor.u32 %v4467_v49, %v3786_v53  ;;  %v4515_v49 = vld [vmem:[#allocation2 + $0x514] sm:$0xf] }
  0xe9   : > { %v4929_v10 = vpop.f32.mrf.mxu3  ;;  %v3978_v53 = vld [vmem:[#allocation2 + $0x530] sm:$0xf0] }
  0xea   : > { %v1549_v0 = vpop.f32.mrf.mxu2  ;;  %v1495_v12 = vpop.f32.mrf.mxu0  ;;  %1923 = vmatpush.bf16.msra.mxu0 %v3789_v56  ;;  %v3725_v56 = vor.u32 %v4451_v42, %v3722_v43  ;;  %v4440_v43 = vld [vmem:[#allocation2 + $0x2b4] sm:$0xf0] }
  0xeb   : > { %v1550_v9 = vadd.f32 %v1549_v0, %v1522_v60  ;;  %v1523_v15 = vpop.f32.mrf.mxu1  ;;  %v4400_v60 = vld [vmem:[#allocation2 + $0x174] sm:$0xf0] }
  0xec   : > { %v1524_v17 = vadd.f32 %v1523_v15, %v1495_v12  ;;  %v3505_v6 = vor.u32 %v4400_v60, %v3504_v58  ;;  %v4384_v58 = vld [vmem:[#allocation2 + $0xf4] sm:$0xf0] }
  0xed   : > { %vm2178_vm4 = vcmp.gt.f32.partialorder %v1550_v9, 0.0  ;;  %v2234_v18 = vmul.f32 0.2, %v1550_v9  ;;  %v3696_v60 = vld [vmem:[#allocation2 + $0x2d8] sm:$0xf] }
  0xee   : > { %1980 = vmatpush.bf16.msra.mxu2 %v3505_v6  ;;  %v3441_v6 = vor.u32 %v4384_v58, %v3440_v57  ;;  %v3658_v57 = vld [vmem:[#allocation2 + $0x2b0] sm:$0xf0] }
  0xef   : > { %v4937_v47 = vsel %vm2178_vm4, %v1550_v9, %v2234_v18  ;;  %v4464_v9 = vld [vmem:[#allocation2 + $0x374] sm:$0xf0]  ;;  %v3754_v18 = vld [vmem:[#allocation2 + $0x370] sm:$0xf0] }
  0xf0   : > { %v3761_v15 = vor.u32 %v4464_v9, %v3760_v7  ;;  %v4448_v7 = vld [vmem:[#allocation2 + $0x2f4] sm:$0xf0]  ;;  %v4499_v58 = vld [vmem:[#allocation2 + $0x494] sm:$0xf] }
  0xf1   : > { %v4931_v22 = vpop.f32.mrf.mxu3 }
  0xf2   : > { %v1551_v19 = vpop.f32.mrf.mxu2  ;;  %v1498_v23 = vpop.f32.mrf.mxu0  ;;  %2008 = vmatpush.bf16.msra.mxu3 %v3761_v15  ;;  %1981 = vmatpush.bf16.msra.mxu2 %v3473_v31 }
  0xf3   : > { %v1552_v21 = vadd.f32 %v1551_v19, %v1524_v17  ;;  %v1526_v30 = vpop.f32.mrf.mxu1  ;;  %v4459_v17 = vld [vmem:[#allocation2 + $0x354] sm:$0xf] }
  0xf4   : > { %v1527_v37 = vadd.f32 %v1526_v30, %v1498_v23  ;;  %v4523_v19 = vld [vmem:[#allocation2 + $0x554] sm:$0xf] }
  0xf5   : > { %vm2186_vm5 = vcmp.gt.f32.partialorder %v1552_v21, 0.0  ;;  %v2242_v36 = vmul.f32 0.2, %v1552_v21  ;;  %1721 = vmatmul.bf16.gmra.mxu0 %v4875_v3  ;;  %1749 = vmatmul.bf16.gmra.mxu1 %v4871_v1  ;;  %v4010_v23 = vld [vmem:[#allocation2 + $0x570] sm:$0xf0] }
  0xf6   : > { %1805 = vmatmul.bf16.gmra.mxu3 %v4875_v3  ;;  %v4013_v30 = vor.u32 %v4523_v19, %v4010_v23  ;;  %1982 = vmatpush.bf16.msra.mxu2 %v3441_v6  ;;  %v3690_v23 = vld [vmem:[#allocation2 + $0x2f0] sm:$0xf0]  ;;  %v3376_v6 = vld [vmem:[#allocation2 + $0x58] sm:$0xf] }
  0xf7   : > { %1777 = vmatmul.bf16.gmra.mxu2 %v4873_v2  ;;  %v4939_v48 = vsel %vm2186_vm5, %v1552_v21, %v2242_v36  ;;  %v3757_v21 = vor.u32 %v4459_v17, %v3754_v18 }
  0xf8   : > { %1952 = vmatpush.bf16.msra.mxu1 %v4013_v30 }
  0xf9   : > { %v4946_v13 = vpop.f32.mrf.mxu3  ;;  %1924 = vmatpush.bf16.msra.mxu0 %v3757_v21  ;;  %v4443_v21 = vld [vmem:[#allocation2 + $0x2d4] sm:$0xf] }
  0xfa   : > { %v1554_v0 = vpop.f32.mrf.mxu2  ;;  %v1500_v14 = vpop.f32.mrf.mxu0  ;;  %v3693_v31 = vor.u32 %v4443_v21, %v3690_v23 }
  0xfb   : > { %v4944_v12 = vadd.f32 %v1554_v0, %v1527_v37  ;;  %v1528_v16 = vpop.f32.mrf.mxu1  ;;  %v3729_v37 = vor.u32 %v4456_v33, %v3728_v32  ;;  %v3949_v32 = vor.u32 %v4507_v24, %v3946_v25  ;;  %v3408_v33 = vld [vmem:[#allocation2 + $0x98] sm:$0xf]  ;;  %v4427_v25 = vld [vmem:[#allocation2 + $0x254] sm:$0xf] }
  0xfc   : > { %v3697_v16 = vor.u32 %v4448_v7, %v3696_v60  ;;  %v3914_v60 = vld [vmem:[#allocation2 + $0x4b0] sm:$0xf0]  ;;  %v4368_v7 = vld [vmem:[#allocation2 + $0x74] sm:$0xf0] }
  0xfd   : > { %2009 = vmatpush.bf16.msra.mxu3 %v3729_v37  ;;  %1925 = vmatpush.bf16.msra.mxu0 %v3725_v56 }
 0x101   : > { %v1584_v35 = vpop.f32.mrf.mxu3  ;;  %2010 = vmatpush.bf16.msra.mxu3 %v3697_v16  ;;  %1926 = vmatpush.bf16.msra.mxu0 %v3693_v31  ;;  %v4491_v31 = vld [vmem:[#allocation2 + $0x454] sm:$0xf] }
 0x102   : > { %v1556_v26 = vpop.f32.mrf.mxu2  ;;  %v1595_v36 = vpop.f32.mrf.mxu0  ;;  %v4376_v35 = vld [vmem:[#allocation2 + $0xb4] sm:$0xf0] }
 0x103   : > { %v1596_v38 = vadd.f32 %v1595_v36, %v4901_v34  ;;  %v1623_v40 = vpop.f32.mrf.mxu1  ;;  %v3981_v34 = vor.u32 %v4515_v49, %v3978_v53  ;;  %v3664_v36 = vld [vmem:[#allocation2 + $0x298] sm:$0xf]  ;;  %v3409_v42 = vor.u32 %v4376_v35, %v3408_v33  ;;  %v3882_v33 = vld [vmem:[#allocation2 + $0x470] sm:$0xf0] }
 0x104   : > { %v3344_v35 = vld [vmem:[#allocation2 + $0x18] sm:$0xf] }
 0x105   : > { %v1624_v41 = vadd.f32 %v1623_v40, %v1596_v38  ;;  %1818 = vmatmul.bf16.vlgmr.msrb.gmra.mxu0 %v4827_v46  ;;  %1846 = vmatmul.bf16.vlgmr.msrb.gmra.mxu1 %v4829_v51 }
 0x106   : > { %1902 = vmatmul.bf16.vlgmr.msrb.gmra.mxu3 %v4827_v46  ;;  %1953 = vmatpush.bf16.msra.mxu1 %v3981_v34  ;;  %v4435_v34 = vld [vmem:[#allocation2 + $0x294] sm:$0xf] }
 0x107   : > { %1874 = vmatmul.bf16.vlgmr.msrb.gmra.mxu2 %v4831_v52  ;;  %v2203_v17 = vmul.f32 0.2, %v1624_v41  ;;  %vm2147_vm6 = vcmp.gt.f32.partialorder %v1624_v41, 0.0 }
 0x108   : > { %1983 = vmatpush.bf16.msra.mxu2 %v3409_v42  ;;  %v3885_v42 = vor.u32 %v4491_v31, %v3882_v33 }
 0x109   : > { %v1679_v0 = vpop.f32.mrf.mxu3  ;;  %v4956_v26 = vsel %vm2147_vm6, %v1624_v41, %v2203_v17  ;;  %v3377_v17 = vor.u32 %v4368_v7, %v3376_v6 }
 0x10a   : > { %v1651_v54 = vpop.f32.mrf.mxu2  ;;  %v1597_v5 = vpop.f32.mrf.mxu0  ;;  %1954 = vmatpush.bf16.msra.mxu1 %v3949_v32 }
 0x10b   : > { %v4953_v9 = vadd.f32 %v1679_v0, %v1651_v54  ;;  %v1598_v14 = vadd.f32 %v1597_v5, %v4903_v59  ;;  %v1625_v15 = vpop.f32.mrf.mxu1  ;;  %v3665_v54 = vor.u32 %v4440_v43, %v3664_v36  ;;  %v3661_v0 = vor.u32 %v4435_v34, %v3658_v57  ;;  %v4360_v36 = vld [vmem:[#allocation2 + $0x34] sm:$0xf0]  ;;  %v4419_v57 = vld [vmem:[#allocation2 + $0x214] sm:$0xf] }
 0x10c   : > { %v3917_v5 = vor.u32 %v4499_v58, %v3914_v60  ;;  %1984 = vmatpush.bf16.msra.mxu2 %v3377_v17  ;;  %v3345_v43 = vor.u32 %v4360_v36, %v3344_v35  ;;  %v3594_v58 = vld [vmem:[#allocation2 + $0x230] sm:$0xf0] }
 0x10d   : > { %v1626_v18 = vadd.f32 %v1625_v15, %v1598_v14  ;;  %2011 = vmatpush.bf16.msra.mxu3 %v3665_v54  ;;  %v3632_v14 = vld [vmem:[#allocation2 + $0x258] sm:$0xf]  ;;  %1927 = vmatpush.bf16.msra.mxu0 %v3661_v0  ;;  %v4483_v60 = vld [vmem:[#allocation2 + $0x414] sm:$0xf]  ;;  %v3597_v7 = vor.u32 %v4419_v57, %v3594_v58  ;;  %v3570_v58 = vld [vmem:[#allocation2 + $0x1f8] sm:$0xf0] }
 0x10e   : > { %1955 = vmatpush.bf16.msra.mxu1 %v3917_v5 }
 0x10f   : > { %vm2155_vm7 = vcmp.gt.f32.partialorder %v1626_v18, 0.0  ;;  %v2211_v19 = vmul.f32 0.2, %v1626_v18 }
 0x110   : > { %1985 = vmatpush.bf16.msra.mxu2 %v3345_v43 }
 0x111   : > { %v4958_v30 = vsel %vm2155_vm7, %v1626_v18, %v2211_v19  ;;  %v1681_v38 = vpop.f32.mrf.mxu3  ;;  %v4432_v18 = vld [vmem:[#allocation2 + $0x274] sm:$0xf0] }
 0x112   : > { %v1653_v59 = vpop.f32.mrf.mxu2  ;;  %v2315_v37 = vpack.c.bf16 %v4958_v30, %v4956_v26  ;;  %v1600_v40 = vpop.f32.mrf.mxu0  ;;  %v3633_v24 = vor.u32 %v4432_v18, %v3632_v14  ;;  %1956 = vmatpush.bf16.msra.mxu1 %v3885_v42  ;;  %v3850_v14 = vld [vmem:[#allocation2 + $0x430] sm:$0xf0]  ;;  %v4598_v30 = vld [vmem:[#allocation4 + $0x1a8] sm:$0xff] }
 0x113   : > { %v4962_v49 = vadd.f32 %v1681_v38, %v1653_v59  ;;  %v1601_v41 = vadd.f32 %v1600_v40, %v4915_v20  ;;  %v1628_v53 = vpop.f32.mrf.mxu1  ;;  %v3626_v59 = vld [vmem:[#allocation2 + $0x270] sm:$0xf0] }
 0x114   : > { %v3629_v32 = vor.u32 %v4427_v25, %v3626_v59  ;;  %2012 = vmatpush.bf16.msra.mxu3 %v3633_v24  ;;  %v3826_v24 = vld [vmem:[#allocation2 + $0x3f8] sm:$0xf0] }
 0x115   : > { %v1629_v56 = vadd.f32 %v1628_v53, %v1601_v41  ;;  %1823 = vmatmul.bf16.gmra.mxu0 %v4843_v39  ;;  %1851 = vmatmul.bf16.gmra.mxu1 %v4845_v44  ;;  %v3600_v41 = vld [vmem:[#allocation2 + $0x218] sm:$0xf]  ;;  %v4540_v25 = vld [vmem:[#allocation2 + $0x5dc] sm:$0xf] }
 0x116   : > { %1907 = vmatmul.bf16.gmra.mxu3 %v4843_v39  ;;  %v4424_v53 = vld [vmem:[#allocation2 + $0x234] sm:$0xf0]  ;;  %1928 = vmatpush.bf16.msra.mxu0 %v3629_v32  ;;  %v4082_v59 = vld [vmem:[#allocation2 + $0x5f8] sm:$0xf0] }
 0x117   : > { %1879 = vmatmul.bf16.gmra.mxu2 %v4847_v45  ;;  %v2219_v38 = vmul.f32 0.2, %v1629_v56  ;;  %vm2163_vm8 = vcmp.gt.f32.partialorder %v1629_v56, 0.0 }
 0x119   : > { %v1684_v15 = vpop.f32.mrf.mxu3 }
 0x11a   : > { %v1656_v20 = vpop.f32.mrf.mxu2  ;;  %v1602_v16 = vpop.f32.mrf.mxu0  ;;  %1929 = vmatpush.bf16.msra.mxu0 %v3597_v7 }
 0x11b   : > { %v4969_v19 = vadd.f32 %v1684_v15, %v1656_v20  ;;  %v1603_v21 = vadd.f32 %v1602_v16, %v4917_v50  ;;  %v1630_v23 = vpop.f32.mrf.mxu1  ;;  %v3601_v50 = vor.u32 %v4424_v53, %v3600_v41  ;;  %v4972_v20 = vsel %vm2163_vm8, %v1629_v56, %v2219_v38  ;;  %v4476_v56 = vld [vmem:[#allocation2 + $0x3dc] sm:$0xf]  ;;  %v4080_v53 = vld [vmem:[#allocation2 + $0x5d8] sm:$0xf] }
 0x11c   : > { %v3829_v32 = vor.u32 %v4476_v56, %v3826_v24  ;;  %v4050_v56 = vld [vmem:[#allocation2 + $0x5b8] sm:$0xf0] }
 0x11d   : > { %v1631_v40 = vadd.f32 %v1630_v23, %v1603_v21  ;;  %2013 = vmatpush.bf16.msra.mxu3 %v3601_v50  ;;  %v3853_v21 = vor.u32 %v4483_v60, %v3850_v14  ;;  %v4544_v50 = vld [vmem:[#allocation2 + $0x5f4] sm:$0xf0]  ;;  %v4468_v60 = vld [vmem:[#allocation2 + $0x39c] sm:$0xf] }
 0x11e   : > { %2090 = vmatpush.bf16.msrb.mxu2 %v3829_v32  ;;  %v4081_v57 = vor.u32 %v4544_v50, %v4080_v53  ;;  %v3762_v53 = vld [vmem:[#allocation2 + $0x378] sm:$0xf0] }
 0x11f   : > { %vm2171_vm9 = vcmp.gt.f32.partialorder %v1631_v40, 0.0  ;;  %v2227_v54 = vmul.f32 0.2, %v1631_v40  ;;  %1957 = vmatpush.bf16.msra.mxu1 %v3853_v21  ;;  %v4532_v21 = vld [vmem:[#allocation2 + $0x59c] sm:$0xf] }
 0x120   : > { %2034 = vmatpush.bf16.msrb.mxu0 %v4081_v57  ;;  %v4053_v32 = vor.u32 %v4532_v21, %v4050_v56  ;;  %v3506_v21 = vld [vmem:[#allocation2 + $0x178] sm:$0xf0] }
 0x121   : > { %v4974_v0 = vsel %vm2171_vm9, %v1631_v40, %v2227_v54  ;;  %v1686_v5 = vpop.f32.mrf.mxu3  ;;  %v4412_v54 = vld [vmem:[#allocation2 + $0x1dc] sm:$0xf] }
 0x122   : > { %v1658_v34 = vpop.f32.mrf.mxu2  ;;  %v1605_v6 = vpop.f32.mrf.mxu0  ;;  %v4452_v56 = vld [vmem:[#allocation2 + $0x31c] sm:$0xf] }
 0x123   : > { %v4978_v16 = vadd.f32 %v1686_v5, %v1658_v34  ;;  %v1606_v17 = vadd.f32 %v1605_v6, %v4929_v10  ;;  %v1633_v18 = vpop.f32.mrf.mxu1  ;;  %v4085_v10 = vor.u32 %v4540_v25, %v4082_v59  ;;  %v3794_v5 = vld [vmem:[#allocation2 + $0x3b8] sm:$0xf0] }
 0x125   : > { %v1634_v23 = vadd.f32 %v1633_v18, %v1606_v17  ;;  %1828 = vmatmul.bf16.gmra.mxu0 %v4859_v27  ;;  %1856 = vmatmul.bf16.gmra.mxu1 %v4861_v28  ;;  %v3573_v17 = vor.u32 %v4412_v54, %v3570_v58  ;;  %v3797_v18 = vor.u32 %v4468_v60, %v3794_v5  ;;  %v4524_v58 = vld [vmem:[#allocation2 + $0x55c] sm:$0xf] }
 0x126   : > { %1912 = vmatmul.bf16.gmra.mxu3 %v4859_v27  ;;  %v4018_v60 = vld [vmem:[#allocation2 + $0x578] sm:$0xf0] }
 0x127   : > { %1884 = vmatmul.bf16.gmra.mxu2 %v4863_v29  ;;  %2118 = vmatpush.bf16.msrb.mxu3 %v4085_v10  ;;  %v2235_v42 = vmul.f32 0.2, %v1634_v23  ;;  %vm2179_vm10 = vcmp.gt.f32.partialorder %v1634_v23, 0.0  ;;  %v4021_v5 = vor.u32 %v4524_v58, %v4018_v60  ;;  %v4444_v58 = vld [vmem:[#allocation2 + $0x2dc] sm:$0xf] }
 0x128   : > { %2062 = vmatpush.bf16.msrb.mxu1 %v3573_v17  ;;  %2091 = vmatpush.bf16.msrb.mxu2 %v3797_v18  ;;  %v4396_v17 = vld [vmem:[#allocation2 + $0x15c] sm:$0xf] }
 0x129   : > { %v1689_v33 = vpop.f32.mrf.mxu3  ;;  %v4988_v6 = vsel %vm2179_vm10, %v1634_v23, %v2235_v42  ;;  %v3698_v60 = vld [vmem:[#allocation2 + $0x2f8] sm:$0xf0] }
 0x12a   : > { %v1661_v31 = vpop.f32.mrf.mxu2  ;;  %v1607_v35 = vpop.f32.mrf.mxu0 }
 0x12b   : > { %v4985_v36 = vadd.f32 %v1689_v33, %v1661_v31  ;;  %v1608_v38 = vadd.f32 %v1607_v35, %v4931_v22  ;;  %v1635_v40 = vpop.f32.mrf.mxu1  ;;  %2119 = vmatpush.bf16.msrb.mxu3 %v4053_v32  ;;  %v4048_v33 = vld [vmem:[#allocation2 + $0x598] sm:$0xf] }
 0x12c   : > { %v4536_v35 = vld [vmem:[#allocation2 + $0x5b4] sm:$0xf0] }
 0x12d   : > { %v1636_v43 = vadd.f32 %v1635_v40, %v1608_v38  ;;  %v4049_v42 = vor.u32 %v4536_v35, %v4048_v33  ;;  %v3986_v33 = vld [vmem:[#allocation2 + $0x538] sm:$0xf0] }
 0x12f   : > { %vm2187_vm11 = vcmp.gt.f32.partialorder %v1636_v43, 0.0  ;;  %v2243_v41 = vmul.f32 0.2, %v1636_v43  ;;  %2035 = vmatpush.bf16.msrb.mxu0 %v4049_v42  ;;  %2120 = vmatpush.bf16.msrb.mxu3 %v4021_v5 }
 0x131   : > { %v4990_v7 = vsel %vm2187_vm11, %v1636_v43, %v2243_v41  ;;  %v1691_v22 = vpop.f32.mrf.mxu3  ;;  %v3538_v43 = vld [vmem:[#allocation2 + $0x1b8] sm:$0xf0] }
 0x132   : > { %v1663_v34 = vpop.f32.mrf.mxu2  ;;  %v1610_v14 = vpop.f32.mrf.mxu0  ;;  %v4460_v41 = vld [vmem:[#allocation2 + $0x35c] sm:$0xf] }
 0x133   : > { %v4994_v25 = vadd.f32 %v1691_v22, %v1663_v34  ;;  %v1611_v59 = vadd.f32 %v1610_v14, %v4946_v13  ;;  %v1638_v31 = vpop.f32.mrf.mxu1  ;;  %v4404_v13 = vld [vmem:[#allocation2 + $0x19c] sm:$0xf]  ;;  %v3765_v57 = vor.u32 %v4460_v41, %v3762_v53  ;;  %v4016_v22 = vld [vmem:[#allocation2 + $0x558] sm:$0xf] }
 0x134   : > { %v3541_v34 = vor.u32 %v4404_v13, %v3538_v43  ;;  %v4528_v14 = vld [vmem:[#allocation2 + $0x574] sm:$0xf0] }
 0x135   : > { %v4997_v23 = vadd.f32 %v1638_v31, %v1611_v59  ;;  %1833 = vmatmul.bf16.gmra.mxu0 %v4871_v1  ;;  %1861 = vmatmul.bf16.gmra.mxu1 %v4873_v2  ;;  %v4017_v18 = vor.u32 %v4528_v14, %v4016_v22  ;;  %v3730_v59 = vld [vmem:[#allocation2 + $0x338] sm:$0xf0]  ;;  %v3509_v31 = vor.u32 %v4396_v17, %v3506_v21  ;;  %v3984_v41 = vld [vmem:[#allocation2 + $0x518] sm:$0xf] }
 0x136   : > { %1917 = vmatmul.bf16.gmra.mxu3 %v4871_v1  ;;  %2063 = vmatpush.bf16.msrb.mxu1 %v3541_v34  ;;  %v3733_v32 = vor.u32 %v4452_v56, %v3730_v59  ;;  %v4520_v53 = vld [vmem:[#allocation2 + $0x534] sm:$0xf0]  ;;  %v3701_v22 = vor.u32 %v4444_v58, %v3698_v60  ;;  %v3954_v14 = vld [vmem:[#allocation2 + $0x4f8] sm:$0xf0] }
 0x137   : > { %1889 = vmatmul.bf16.gmra.mxu2 %v4875_v3  ;;  %2036 = vmatpush.bf16.msrb.mxu0 %v4017_v18  ;;  %v3985_v34 = vor.u32 %v4520_v53, %v3984_v41  ;;  %v4512_v41 = vld [vmem:[#allocation2 + $0x4f4] sm:$0xf0]  ;;  %v3442_v53 = vld [vmem:[#allocation2 + $0xf8] sm:$0xf0] }
 0x138   : > { %2092 = vmatpush.bf16.msrb.mxu2 %v3765_v57  ;;  %v3474_v57 = vld [vmem:[#allocation2 + $0x138] sm:$0xf0] }
 0x139   : > { %v1694_v38 = vpop.f32.mrf.mxu3  ;;  %v3666_v58 = vld [vmem:[#allocation2 + $0x2b8] sm:$0xf0] }
 0x13a   : > { %v1666_v10 = vpop.f32.mrf.mxu2  ;;  %v1612_v40 = vpop.f32.mrf.mxu0  ;;  %2064 = vmatpush.bf16.msrb.mxu1 %v3509_v31  ;;  %v4500_v60 = vld [vmem:[#allocation2 + $0x49c] sm:$0xf] }
 0x13b   : > { %v5003_v50 = vadd.f32 %v1694_v38, %v1666_v10  ;;  %v1640_v54 = vpop.f32.mrf.mxu1  ;;  %v4516_v10 = vld [vmem:[#allocation2 + $0x51c] sm:$0xf]  ;;  %2037 = vmatpush.bf16.msrb.mxu0 %v3985_v34 }
 0x13c   : > { %v3989_v13 = vor.u32 %v4516_v10, %v3986_v33  ;;  %2093 = vmatpush.bf16.msrb.mxu2 %v3733_v32  ;;  %v4388_v54 = vld [vmem:[#allocation2 + $0x11c] sm:$0xf] }
 0x13d   : > { %v3477_v5 = vor.u32 %v4388_v54, %v3474_v57 }
 0x13e   : > { %2121 = vmatpush.bf16.msrb.mxu3 %v3989_v13  ;;  %v3952_v13 = vld [vmem:[#allocation2 + $0x4d8] sm:$0xf] }
 0x13f   : > { %2065 = vmatpush.bf16.msrb.mxu1 %v3477_v5  ;;  %v3953_v34 = vor.u32 %v4512_v41, %v3952_v13  ;;  %v4372_v13 = vld [vmem:[#allocation2 + $0x9c] sm:$0xf] }
 0x140   : > { %2094 = vmatpush.bf16.msrb.mxu2 %v3701_v22 }
 0x141   : > { %v1696_v38 = vpop.f32.mrf.mxu3  ;;  %2038 = vmatpush.bf16.msrb.mxu0 %v3953_v34 }
 0x142   : > { %v1668_v35 = vpop.f32.mrf.mxu2  ;;  %v1707_v40 = vpop.f32.mrf.mxu0 }
 0x143   : > { %v1708_v42 = vadd.f32 %v1707_v40, %v4953_v9  ;;  %v1735_v43 = vpop.f32.mrf.mxu1  ;;  %v4508_v9 = vld [vmem:[#allocation2 + $0x4dc] sm:$0xf] }
 0x144   : > { %v3957_v18 = vor.u32 %v4508_v9, %v3954_v14  ;;  %v3922_v9 = vld [vmem:[#allocation2 + $0x4b8] sm:$0xf0] }
 0x145   : > { %1930 = vmatmul.bf16.vlgmr.msra.gmra.mxu0 %v4829_v51  ;;  %1958 = vmatmul.bf16.vlgmr.msra.gmra.mxu1 %v4831_v52  ;;  %v2204_v31 = vmul.f32 0.2, %v1708_v42  ;;  %vm2148_vm12 = vcmp.gt.f32.partialorder %v1708_v42, 0.0 }
 0x146   : > { %2014 = vmatmul.bf16.vlgmr.msra.gmra.mxu3 %v4829_v51 }
 0x147   : > { %1986 = vmatmul.bf16.vlgmr.msra.gmra.mxu2 %v4827_v46  ;;  %2122 = vmatpush.bf16.msrb.mxu3 %v3957_v18  ;;  %v5011_v38 = vsel %vm2148_vm12, %v1708_v42, %v2204_v31  ;;  %v3925_v18 = vor.u32 %v4500_v60, %v3922_v9  ;;  %v3890_v9 = vld [vmem:[#allocation2 + $0x478] sm:$0xf0] }
 0x149   : > { %v1791_v56 = vpop.f32.mrf.mxu3 }
 0x14a   : > { %v1763_v17 = vpop.f32.mrf.mxu2  ;;  %v1709_v59 = vpop.f32.mrf.mxu0 }
 0x14b   : > { %v1764_v21 = vadd.f32 %v1763_v17, %v1735_v43  ;;  %v1710_v32 = vadd.f32 %v1709_v59, %v4962_v49  ;;  %v1737_v10 = vpop.f32.mrf.mxu1  ;;  %v4380_v43 = vld [vmem:[#allocation2 + $0xdc] sm:$0xf]  ;;  %2123 = vmatpush.bf16.msrb.mxu3 %v3925_v18 }
 0x14c   : > { %v3445_v57 = vor.u32 %v4380_v43, %v3442_v53  ;;  %v4436_v49 = vld [vmem:[#allocation2 + $0x29c] sm:$0xf] }
 0x14d   : > { %v1792_v33 = vadd.f32 %v1791_v56, %v1764_v21  ;;  %vm2156_vm13 = vcmp.gt.f32.partialorder %v1710_v32, 0.0  ;;  %v2212_v35 = vmul.f32 0.2, %v1710_v32  ;;  %v3669_v22 = vor.u32 %v4436_v49, %v3666_v58  ;;  %v3634_v49 = vld [vmem:[#allocation2 + $0x278] sm:$0xf0] }
 0x14e   : > { %2066 = vmatpush.bf16.msrb.mxu1 %v3445_v57  ;;  %v4428_v57 = vld [vmem:[#allocation2 + $0x25c] sm:$0xf] }
 0x14f   : > { %v5013_v40 = vsel %vm2156_vm13, %v1710_v32, %v2212_v35  ;;  %2095 = vmatpush.bf16.msrb.mxu2 %v3669_v22  ;;  %v2205_v59 = vmul.f32 0.2, %v1792_v33  ;;  %vm2149_vm14 = vcmp.gt.f32.partialorder %v1792_v33, 0.0  ;;  %v4504_v35 = vld [vmem:[#allocation2 + $0x4b4] sm:$0xf0]  ;;  %v3637_v22 = vor.u32 %v4428_v57, %v3634_v49 }
 0x150   : > { %v2316_v54 = vpack.c.bf16 %v5013_v40, %v5011_v38  ;;  %v4492_v58 = vld [vmem:[#allocation2 + $0x45c] sm:$0xf]  ;;  %v4582_v40 = vld [vmem:[#allocation4 + $0x128] sm:$0xff] }
 0x151   : > { %v1793_v17 = vpop.f32.mrf.mxu3  ;;  %v5022_v41 = vsel %vm2149_vm14, %v1792_v33, %v2205_v59  ;;  %v3893_v33 = vor.u32 %v4492_v58, %v3890_v9  ;;  %v4364_v57 = vld [vmem:[#allocation2 + $0x5c] sm:$0xf] }
 0x152   : > { %v1765_v5 = vpop.f32.mrf.mxu2  ;;  %v1712_v42 = vpop.f32.mrf.mxu0  ;;  %v4420_v49 = vld [vmem:[#allocation2 + $0x21c] sm:$0xf] }
 0x153   : > { %v1766_v14 = vadd.f32 %v1765_v5, %v1737_v10  ;;  %v1713_v21 = vadd.f32 %v1712_v42, %v4969_v19  ;;  %v1740_v56 = vpop.f32.mrf.mxu1  ;;  %v3920_v10 = vld [vmem:[#allocation2 + $0x498] sm:$0xf]  ;;  %v3410_v19 = vld [vmem:[#allocation2 + $0xb8] sm:$0xf0]  ;;  %2096 = vmatpush.bf16.msrb.mxu2 %v3637_v22  ;;  %2124 = vmatpush.bf16.msrb.mxu3 %v3893_v33 }
 0x154   : > { %v3921_v53 = vor.u32 %v4504_v35, %v3920_v10  ;;  %v3413_v34 = vor.u32 %v4372_v13, %v3410_v19  ;;  %v3888_v35 = vld [vmem:[#allocation2 + $0x458] sm:$0xf]  ;;  %v3602_v58 = vld [vmem:[#allocation2 + $0x238] sm:$0xf0] }
 0x155   : > { %v1794_v31 = vadd.f32 %v1793_v17, %v1766_v14  ;;  %1935 = vmatmul.bf16.gmra.mxu0 %v4845_v44  ;;  %1963 = vmatmul.bf16.gmra.mxu1 %v4847_v45  ;;  %v2220_v18 = vmul.f32 0.2, %v1713_v21  ;;  %vm2164_vm0 = vcmp.gt.f32.partialorder %v1713_v21, 0.0  ;;  %v4496_v13 = vld [vmem:[#allocation2 + $0x474] sm:$0xf0] }
 0x156   : > { %2019 = vmatmul.bf16.gmra.mxu3 %v4845_v44  ;;  %2039 = vmatpush.bf16.msrb.mxu0 %v3921_v53  ;;  %v3889_v19 = vor.u32 %v4496_v13, %v3888_v35  ;;  %v3858_v9 = vld [vmem:[#allocation2 + $0x438] sm:$0xf0]  ;;  %v3856_v33 = vld [vmem:[#allocation2 + $0x418] sm:$0xf] }
 0x157   : > { %vm2157_vm15 = vcmp.gt.f32.partialorder %v1794_v31, 0.0  ;;  %v2213_v32 = vmul.f32 0.2, %v1794_v31  ;;  %1991 = vmatmul.bf16.gmra.mxu2 %v4843_v39  ;;  %2067 = vmatpush.bf16.msrb.mxu1 %v3413_v34  ;;  %v4488_v35 = vld [vmem:[#allocation2 + $0x434] sm:$0xf0] }
 0x158   : > { %v4356_v13 = vld [vmem:[#allocation2 + $0x1c] sm:$0xf] }
 0x159   : > { %v5024_v43 = vsel %vm2157_vm15, %v1794_v31, %v2213_v32  ;;  %v1796_v17 = vpop.f32.mrf.mxu3 }
 0x15a   : > { %v2317_v60 = vpack.c.bf16 %v5024_v43, %v5022_v41  ;;  %v1768_v5 = vpop.f32.mrf.mxu2  ;;  %v1714_v42 = vpop.f32.mrf.mxu0  ;;  %2040 = vmatpush.bf16.msrb.mxu0 %v3889_v19  ;;  %v4606_v43 = vld [vmem:[#allocation4 + $0x1e8] sm:$0xff] }
 0x15b   : > { %v1769_v14 = vadd.f32 %v1768_v5, %v1740_v56  ;;  %v1715_v59 = vadd.f32 %v1714_v42, %v4978_v16  ;;  %v1742_v31 = vpop.f32.mrf.mxu1  ;;  %v3378_v56 = vld [vmem:[#allocation2 + $0x78] sm:$0xf0]  ;;  %v5029_v5 = vsel %vm2164_vm0, %v1713_v21, %v2220_v18 }
 0x15c   : > { %v3381_v34 = vor.u32 %v4364_v57, %v3378_v56  ;;  %v4484_v16 = vld [vmem:[#allocation2 + $0x41c] sm:$0xf]  ;;  %v3857_v57 = vor.u32 %v4488_v35, %v3856_v33 }
 0x15d   : > { %v1797_v32 = vadd.f32 %v1796_v17, %v1769_v14  ;;  %vm2172_vm1 = vcmp.gt.f32.partialorder %v1715_v59, 0.0  ;;  %v2228_v10 = vmul.f32 0.2, %v1715_v59  ;;  %v3605_v17 = vor.u32 %v4420_v49, %v3602_v58  ;;  %v3346_v18 = vld [vmem:[#allocation2 + $0x38] sm:$0xf0] }
 0x15e   : > { %v3861_v42 = vor.u32 %v4484_v16, %v3858_v9  ;;  %2068 = vmatpush.bf16.msrb.mxu1 %v3381_v34  ;;  %v3349_v15 = vor.u32 %v4356_v13, %v3346_v18  ;;  %2041 = vmatpush.bf16.msrb.mxu0 %v3857_v57 }
 0x15f   : > { %v5031_v53 = vsel %vm2172_vm1, %v1715_v59, %v2228_v10  ;;  %2097 = vmatpush.bf16.msrb.mxu2 %v3605_v17  ;;  %v2221_v56 = vmul.f32 0.2, %v1797_v32  ;;  %vm2165_vm2 = vcmp.gt.f32.partialorder %v1797_v32, 0.0 }
 0x160   : > { %2125 = vmatpush.bf16.msrb.mxu3 %v3861_v42 }
 0x161   : > { %v1798_v55 = vpop.f32.mrf.mxu3 }
 0x162   : > { %v1770_v14 = vpop.f32.mrf.mxu2  ;;  %v1717_v21 = vpop.f32.mrf.mxu0  ;;  %2069 = vmatpush.bf16.msrb.mxu1 %v3349_v15 }
 0x163   : > { %v1771_v24 = vadd.f32 %v1770_v14, %v1742_v31  ;;  %v1718_v59 = vadd.f32 %v1717_v21, %v4985_v36  ;;  %v1745_v10 = vpop.f32.mrf.mxu1  ;;  %v5040_v36 = vsel %vm2165_vm2, %v1797_v32, %v2221_v56  ;;  %vm2194_vm2 = vcmp.gt.f32.partialorder %v4944_v12, 0.0 }
 0x165   : > { %v1799_v22 = vadd.f32 %v1798_v55, %v1771_v24  ;;  %1940 = vmatmul.bf16.gmra.mxu0 %v4861_v28  ;;  %1968 = vmatmul.bf16.gmra.mxu1 %v4863_v29  ;;  %v2236_v16 = vmul.f32 0.2, %v1718_v59  ;;  %vm2180_vm4 = vcmp.gt.f32.partialorder %v1718_v59, 0.0 }
 0x166   : > { %2024 = vmatmul.bf16.gmra.mxu3 %v4861_v28 }
 0x167   : > { %vm2173_vm3 = vcmp.gt.f32.partialorder %v1799_v22, 0.0  ;;  %v2229_v19 = vmul.f32 0.2, %v1799_v22  ;;  %1996 = vmatmul.bf16.gmra.mxu2 %v4859_v27  ;;  %v5047_v15 = vsel %vm2180_vm4, %v1718_v59, %v2236_v16 }
 0x169   : > { %v5042_v31 = vsel %vm2173_vm3, %v1799_v22, %v2229_v19  ;;  %v1801_v34 = vpop.f32.mrf.mxu3  ;;  %vm2195_vm3 = vcmp.gt.f32.partialorder %v4997_v23, 0.0 }
 0x16a   : > { %v1773_v49 = vpop.f32.mrf.mxu2  ;;  %v2325_v55 = vpack.c.bf16 %v5042_v31, %v5040_v36  ;;  %v1719_v58 = vpop.f32.mrf.mxu0  ;;  %v4578_v36 = vld [vmem:[#allocation4 + $0x108] sm:$0xff] }
 0x16b   : > { %v1774_v24 = vadd.f32 %v1773_v49, %v1745_v10  ;;  %v1720_v9 = vadd.f32 %v1719_v58, %v4994_v25  ;;  %v1747_v14 = vpop.f32.mrf.mxu1  ;;  %v4586_v31 = vld [vmem:[#allocation4 + $0x148] sm:$0xff] }
 0x16d   : > { %v1802_v17 = vadd.f32 %v1801_v34, %v1774_v24  ;;  %vm2188_vm5 = vcmp.gt.f32.partialorder %v1720_v9, 0.0  ;;  %v2244_v42 = vmul.f32 0.2, %v1720_v9 }
 0x16f   : > { %v5049_v32 = vsel %vm2188_vm5, %v1720_v9, %v2244_v42  ;;  %v2237_v10 = vmul.f32 0.2, %v1802_v17  ;;  %vm2181_vm6 = vcmp.gt.f32.partialorder %v1802_v17, 0.0  ;;  %v4552_v42 = vld [vmem:[#allocation4 + $0x38] sm:$0xff] }
 0x170   : > { %v2332_v22 = vpack.c.bf16 %v5049_v32, %v5047_v15  ;;  %2858 = vmatpush.bf16.msra.mxu0 %v4552_v42  ;;  %v2250_v15 = vmul.f32 0.2, %v4944_v12  ;;  %v2251_v32 = vmul.f32 0.2, %v4997_v23 }
 0x171   : > { %v1803_v13 = vpop.f32.mrf.mxu3  ;;  %v5060_v56 = vsel %vm2181_vm6, %v1802_v17, %v2237_v10 }
 0x172   : > { %v1775_v33 = vpop.f32.mrf.mxu2  ;;  %v1722_v21 = vpop.f32.mrf.mxu0 }
 0x173   : > { %v1776_v35 = vadd.f32 %v1775_v33, %v1747_v14  ;;  %v5054_v18 = vadd.f32 %v1722_v21, %v5003_v50  ;;  %v1750_v25 = vpop.f32.mrf.mxu1  ;;  %v4568_v14 = vld [vmem:[#allocation4 + $0xb8] sm:$0xff] }
 0x174   : > { %v4576_v33 = vld [vmem:[#allocation4 + $0xf8] sm:$0xff]  ;;  %2914 = vmatpush.bf16.msra.mxu2 %v4568_v14 }
 0x175   : > { %v1804_v57 = vadd.f32 %v1803_v13, %v1776_v35  ;;  %1945 = vmatmul.bf16.gmra.mxu0 %v4873_v2  ;;  %1973 = vmatmul.bf16.gmra.mxu1 %v4875_v3  ;;  %v4560_v35 = vld [vmem:[#allocation4 + $0x78] sm:$0xff]  ;;  %vm2196_vm4 = vcmp.gt.f32.partialorder %v5054_v18, 0.0 }
 0x176   : > { %2029 = vmatmul.bf16.gmra.mxu3 %v4873_v2  ;;  %2886 = vmatpush.bf16.msra.mxu1 %v4560_v35  ;;  %v4566_v35 = vld [vmem:[#allocation4 + $0xa8] sm:$0xff] }
 0x177   : > { %vm2189_vm7 = vcmp.gt.f32.partialorder %v1804_v57, 0.0  ;;  %v2245_v59 = vmul.f32 0.2, %v1804_v57  ;;  %2001 = vmatmul.bf16.gmra.mxu2 %v4871_v1  ;;  %2942 = vmatpush.bf16.msra.mxu3 %v4576_v33 }
 0x179   : > { %v5062_v19 = vsel %vm2189_vm7, %v1804_v57, %v2245_v59  ;;  %v1806_v34 = vpop.f32.mrf.mxu3  ;;  %v4567_v59 = vld [vmem:[#allocation4 + $0xb0] sm:$0xff] }
 0x17a   : > { %v1778_v50 = vpop.f32.mrf.mxu2  ;;  %v1724_v58 = vpop.f32.mrf.mxu0  ;;  %2915 = vmatpush.bf16.msra.mxu2 %v4567_v59 }
 0x17b   : > { %v1779_v24 = vadd.f32 %v1778_v50, %v1750_v25  ;;  %v1752_v16 = vpop.f32.mrf.mxu1  ;;  %v4551_v25 = vld [vmem:[#allocation4 + $0x30] sm:$0xff] }
 0x17c   : > { %v4575_v50 = vld [vmem:[#allocation4 + $0xf0] sm:$0xff]  ;;  %2859 = vmatpush.bf16.msra.mxu0 %v4551_v25  ;;  %v4549_v25 = vld [vmem:[#allocation4 + $0x20] sm:$0xff] }
 0x17d   : > { %v5066_v9 = vadd.f32 %v1806_v34, %v1779_v24  ;;  %v4559_v24 = vld [vmem:[#allocation4 + $0x70] sm:$0xff]  ;;  %2943 = vmatpush.bf16.msra.mxu3 %v4575_v50  ;;  %v4557_v50 = vld [vmem:[#allocation4 + $0x60] sm:$0xff] }
 0x17e   : > { %2887 = vmatpush.bf16.msra.mxu1 %v4559_v24  ;;  %2916 = vmatpush.bf16.msra.mxu2 %v4566_v35 }
 0x17f   : > { %vm2197_vm6 = vcmp.gt.f32.partialorder %v5066_v9, 0.0 }
 0x181   : > { %v1808_v13 = vpop.f32.mrf.mxu3 }
 0x182   : > { %v1780_v17 = vpop.f32.mrf.mxu2  ;;  %v1819_v21 = vpop.f32.mrf.mxu0  ;;  %v4574_v13 = vld [vmem:[#allocation4 + $0xe8] sm:$0xff] }
 0x183   : > { %v1847_v10 = vpop.f32.mrf.mxu1  ;;  %v4550_v17 = vld [vmem:[#allocation4 + $0x28] sm:$0xff]  ;;  %2944 = vmatpush.bf16.msra.mxu3 %v4574_v13  ;;  %v4556_v13 = vld [vmem:[#allocation4 + $0x58] sm:$0xff] }
 0x184   : > { %v1848_v57 = vadd.f32 %v1847_v10, %v1819_v21  ;;  %v4558_v21 = vld [vmem:[#allocation4 + $0x68] sm:$0xff]  ;;  %2860 = vmatpush.bf16.msra.mxu0 %v4550_v17  ;;  %v4548_v17 = vld [vmem:[#allocation4 + $0x18] sm:$0xff] }
 0x185   : > { %2042 = vmatmul.bf16.vlgmr.msrb.gmra.mxu0 %v4831_v52  ;;  %2070 = vmatmul.bf16.vlgmr.msrb.gmra.mxu1 %v4827_v46 }
 0x186   : > { %2126 = vmatmul.bf16.vlgmr.msrb.gmra.mxu3 %v4831_v52  ;;  %2888 = vmatpush.bf16.msra.mxu1 %v4558_v21  ;;  %v4564_v21 = vld [vmem:[#allocation4 + $0x98] sm:$0xff] }
 0x187   : > { %2098 = vmatmul.bf16.vlgmr.msrb.gmra.mxu2 %v4829_v51 }
 0x188   : > { %2861 = vmatpush.bf16.msra.mxu0 %v4549_v25  ;;  %v4563_v25 = vld [vmem:[#allocation4 + $0x90] sm:$0xff] }
 0x189   : > { %v5072_v16 = vpop.f32.mrf.mxu3 }
 0x18a   : > { %v1875_v34 = vpop.f32.mrf.mxu2  ;;  %v1821_v14 = vpop.f32.mrf.mxu0  ;;  %2889 = vmatpush.bf16.msra.mxu1 %v4557_v50 }
 0x18b   : > { %v1876_v58 = vadd.f32 %v1875_v34, %v1848_v57  ;;  %v1849_v42 = vpop.f32.mrf.mxu1  ;;  %v4565_v57 = vld [vmem:[#allocation4 + $0xa0] sm:$0xff] }
 0x18c   : > { %v1850_v33 = vadd.f32 %v1849_v42, %v1821_v14  ;;  %2917 = vmatpush.bf16.msra.mxu2 %v4565_v57  ;;  %v4573_v42 = vld [vmem:[#allocation4 + $0xe0] sm:$0xff]  ;;  %2862 = vmatpush.bf16.msra.mxu0 %v4548_v17  ;;  %v4570_v17 = vld [vmem:[#allocation4 + $0xc8] sm:$0xff] }
 0x18d   : > { %v2206_v51 = vmul.f32 0.2, %v1876_v58  ;;  %vm2150_vm8 = vcmp.gt.f32.partialorder %v1876_v58, 0.0  ;;  %2945 = vmatpush.bf16.msra.mxu3 %v4573_v42  ;;  %v4562_v42 = vld [vmem:[#allocation4 + $0x88] sm:$0xff] }
 0x18e   : > { %2890 = vmatpush.bf16.msra.mxu1 %v4556_v13 }
 0x18f   : > { %v5077_v35 = vsel %vm2150_vm8, %v1876_v58, %v2206_v51 }
 0x190   : > { %2918 = vmatpush.bf16.msra.mxu2 %v4564_v21 }
 0x191   : > { %v5074_v10 = vpop.f32.mrf.mxu3 }
 0x192   : > { %v1877_v46 = vpop.f32.mrf.mxu2  ;;  %v1824_v59 = vpop.f32.mrf.mxu0 }
 0x193   : > { %v1878_v52 = vadd.f32 %v1877_v46, %v1850_v33  ;;  %v1852_v24 = vpop.f32.mrf.mxu1  ;;  %v4546_v46 = vld [vmem:[#allocation4 + $0x8] sm:$0xff] }
 0x194   : > { %v1853_v14 = vadd.f32 %v1852_v24, %v1824_v59  ;;  %v4572_v59 = vld [vmem:[#allocation4 + $0xd8] sm:$0xff]  ;;  %2919 = vmatpush.bf16.msra.mxu2 %v4563_v25 }
 0x195   : > { %vm2158_vm9 = vcmp.gt.f32.partialorder %v1878_v52, 0.0  ;;  %v2214_v34 = vmul.f32 0.2, %v1878_v52  ;;  %2047 = vmatmul.bf16.gmra.mxu0 %v4847_v45  ;;  %2075 = vmatmul.bf16.gmra.mxu1 %v4843_v39 }
 0x196   : > { %2131 = vmatmul.bf16.gmra.mxu3 %v4847_v45  ;;  %v4554_v45 = vld [vmem:[#allocation4 + $0x48] sm:$0xff] }
 0x197   : > { %v5079_v33 = vsel %vm2158_vm9, %v1878_v52, %v2214_v34  ;;  %2103 = vmatmul.bf16.gmra.mxu2 %v4845_v44  ;;  %v4547_v52 = vld [vmem:[#allocation4 + $0x10] sm:$0xff]  ;;  %2946 = vmatpush.bf16.msra.mxu3 %v4572_v59  ;;  %v4553_v59 = vld [vmem:[#allocation4 + $0x40] sm:$0xff] }
 0x198   : > { %v4555_v44 = vld [vmem:[#allocation4 + $0x50] sm:$0xff]  ;;  %2863 = vmatpush.bf16.msra.mxu0 %v4547_v52  ;;  %2920 = vmatpush.bf16.msra.mxu2 %v4562_v42 }
 0x199   : > { %v5086_v51 = vpop.f32.mrf.mxu3  ;;  %v4571_v34 = vld [vmem:[#allocation4 + $0xd0] sm:$0xff]  ;;  %2891 = vmatpush.bf16.msra.mxu1 %v4555_v44 }
 0x19a   : > { %v1880_v57 = vpop.f32.mrf.mxu2  ;;  %v1826_v39 = vpop.f32.mrf.mxu0 }
 0x19b   : > { %v1881_v58 = vadd.f32 %v1880_v57, %v1853_v14  ;;  %v1854_v50 = vpop.f32.mrf.mxu1  ;;  %2947 = vmatpush.bf16.msra.mxu3 %v4571_v34 }
 0x19c   : > { %v1855_v24 = vadd.f32 %v1854_v50, %v1826_v39  ;;  %2864 = vmatpush.bf16.msra.mxu0 %v4546_v46  ;;  %v4545_v39 = vld [vmem:[#allocation4] sm:$0xff] }
 0x19d   : > { %2892 = vmatpush.bf16.msra.mxu1 %v4554_v45  ;;  %v2222_v13 = vmul.f32 0.2, %v1881_v58  ;;  %vm2166_vm10 = vcmp.gt.f32.partialorder %v1881_v58, 0.0  ;;  %v4561_v50 = vld [vmem:[#allocation4 + $0x80] sm:$0xff] }
 0x19e   : > { %v4569_v46 = vld [vmem:[#allocation4 + $0xc0] sm:$0xff]  ;;  %2921 = vmatpush.bf16.msra.mxu2 %v4561_v50 }
 0x19f   : > { %2948 = vmatpush.bf16.msra.mxu3 %v4570_v17 }
 0x1a0   : > { %2865 = vmatpush.bf16.msra.mxu0 %v4545_v39 }
 0x1a1   : > { %v5088_v57 = vpop.f32.mrf.mxu3  ;;  %2893 = vmatpush.bf16.msra.mxu1 %v4553_v59 }
 0x1a2   : > { %v1882_v14 = vpop.f32.mrf.mxu2  ;;  %v1829_v49 = vpop.f32.mrf.mxu0 }
 0x1a3   : > { %v1883_v21 = vadd.f32 %v1882_v14, %v1855_v24  ;;  %v1857_v52 = vpop.f32.mrf.mxu1  ;;  %v5093_v24 = vsel %vm2166_vm10, %v1881_v58, %v2222_v13  ;;  %2949 = vmatpush.bf16.msra.mxu3 %v4569_v46 }
 0x1a4   : > { %v1858_v25 = vadd.f32 %v1857_v52, %v1829_v49 }
 0x1a5   : > { %vm2174_vm11 = vcmp.gt.f32.partialorder %v1883_v21, 0.0  ;;  %v2230_v44 = vmul.f32 0.2, %v1883_v21  ;;  %2052 = vmatmul.bf16.gmra.mxu0 %v4863_v29  ;;  %2080 = vmatmul.bf16.gmra.mxu1 %v4859_v27 }
 0x1a6   : > { %2136 = vmatmul.bf16.gmra.mxu3 %v4863_v29 }
 0x1a7   : > { %2108 = vmatmul.bf16.gmra.mxu2 %v4861_v28  ;;  %v5095_v34 = vsel %vm2174_vm11, %v1883_v21, %v2230_v44 }
 0x1a8   : > { %v2326_v49 = vpack.c.bf16 %v5095_v34, %v5093_v24 }
 0x1a9   : > { %v5100_v17 = vpop.f32.mrf.mxu3 }
 0x1aa   : > { %v1885_v45 = vpop.f32.mrf.mxu2  ;;  %v1831_v14 = vpop.f32.mrf.mxu0 }
 0x1ab   : > { %v1886_v42 = vadd.f32 %v1885_v45, %v1858_v25  ;;  %v1859_v39 = vpop.f32.mrf.mxu1 }
 0x1ac   : > { %v1860_v27 = vadd.f32 %v1859_v39, %v1831_v14 }
 0x1ad   : > { %v2238_v28 = vmul.f32 0.2, %v1886_v42  ;;  %vm2182_vm12 = vcmp.gt.f32.partialorder %v1886_v42, 0.0 }
 0x1af   : > { %v5107_v44 = vsel %vm2182_vm12, %v1886_v42, %v2238_v28  ;;  %v4592_v42 = vld [vmem:[#allocation4 + $0x178] sm:$0xff] }
 0x1b0   : > { %2998 = vmatpush.bf16.msrb.mxu1 %v4592_v42 }
 0x1b1   : > { %v5102_v13 = vpop.f32.mrf.mxu3 }
 0x1b2   : > { %v1887_v59 = vpop.f32.mrf.mxu2  ;;  %v1834_v21 = vpop.f32.mrf.mxu0 }
 0x1b3   : > { %v1888_v58 = vadd.f32 %v1887_v59, %v1860_v27  ;;  %v1862_v29 = vpop.f32.mrf.mxu1 }
 0x1b4   : > { %v1863_v50 = vadd.f32 %v1862_v29, %v1834_v21  ;;  %v4600_v21 = vld [vmem:[#allocation4 + $0x1b8] sm:$0xff] }
 0x1b5   : > { %vm2190_vm13 = vcmp.gt.f32.partialorder %v1888_v58, 0.0  ;;  %v2246_v52 = vmul.f32 0.2, %v1888_v58  ;;  %2057 = vmatmul.bf16.gmra.mxu0 %v4875_v3  ;;  %2085 = vmatmul.bf16.gmra.mxu1 %v4871_v1  ;;  %v4584_v1 = vld [vmem:[#allocation4 + $0x138] sm:$0xff] }
 0x1b6   : > { %2141 = vmatmul.bf16.gmra.mxu3 %v4875_v3  ;;  %3026 = vmatpush.bf16.msrb.mxu2 %v4600_v21 }
 0x1b7   : > { %2113 = vmatmul.bf16.gmra.mxu2 %v4873_v2  ;;  %v5109_v25 = vsel %vm2190_vm13, %v1888_v58, %v2246_v52  ;;  %v4608_v2 = vld [vmem:[#allocation4 + $0x1f8] sm:$0xff]  ;;  %2970 = vmatpush.bf16.msrb.mxu0 %v4584_v1  ;;  %v4599_v52 = vld [vmem:[#allocation4 + $0x1b0] sm:$0xff] }
 0x1b8   : > { %v2334_v46 = vpack.c.bf16 %v5109_v25, %v5107_v44  ;;  %3054 = vmatpush.bf16.msrb.mxu3 %v4608_v2 }
 0x1b9   : > { %v5116_v39 = vpop.f32.mrf.mxu3 }
 0x1ba   : > { %v1890_v45 = vpop.f32.mrf.mxu2  ;;  %v1836_v27 = vpop.f32.mrf.mxu0  ;;  %3027 = vmatpush.bf16.msrb.mxu2 %v4599_v52  ;;  %v4597_v52 = vld [vmem:[#allocation4 + $0x1a0] sm:$0xff] }
 0x1bb   : > { %v5114_v14 = vadd.f32 %v1890_v45, %v1863_v50  ;;  %v1864_v59 = vpop.f32.mrf.mxu1  ;;  %v4583_v45 = vld [vmem:[#allocation4 + $0x130] sm:$0xff] }
 0x1bc   : > { %v4607_v27 = vld [vmem:[#allocation4 + $0x1f0] sm:$0xff]  ;;  %2971 = vmatpush.bf16.msrb.mxu0 %v4583_v45  ;;  %v5308_v45 = vpack.c.bf16 %v4974_v0, %v4972_v20 }
 0x1bd   : > { %3055 = vmatpush.bf16.msrb.mxu3 %v4607_v27  ;;  %v5309_v27 = vpack.c.bf16 %v5031_v53, %v5029_v5  ;;  %v4579_v0 = vld [vmem:[#allocation4 + $0x110] sm:$0xff] }
 0x1be   : > { %3028 = vmatpush.bf16.msrb.mxu2 %v4598_v30 }
 0x1c0   : > { %2972 = vmatpush.bf16.msrb.mxu0 %v4582_v40 }
 0x1c1   : > { %v1920_v58 = vpop.f32.mrf.mxu3  ;;  %3056 = vmatpush.bf16.msrb.mxu3 %v4606_v43  ;;  %v4595_v43 = vld [vmem:[#allocation4 + $0x190] sm:$0xff] }
 0x1c2   : > { %v1892_v28 = vpop.f32.mrf.mxu2  ;;  %v1931_v3 = vpop.f32.mrf.mxu0  ;;  %v4581_v58 = vld [vmem:[#allocation4 + $0x120] sm:$0xff]  ;;  %3029 = vmatpush.bf16.msrb.mxu2 %v4597_v52 }
 0x1c3   : > { %v1959_v29 = vpop.f32.mrf.mxu1  ;;  %v1932_v50 = vadd.f32 %v1931_v3, %v5072_v16  ;;  %v4591_v16 = vld [vmem:[#allocation4 + $0x170] sm:$0xff]  ;;  %v4589_v3 = vld [vmem:[#allocation4 + $0x160] sm:$0xff] }
 0x1c4   : > { %2999 = vmatpush.bf16.msrb.mxu1 %v4591_v16  ;;  %2973 = vmatpush.bf16.msrb.mxu0 %v4581_v58  ;;  %v4580_v16 = vld [vmem:[#allocation4 + $0x118] sm:$0xff]  ;;  %v4585_v58 = vld [vmem:[#allocation4 + $0x140] sm:$0xff] }
 0x1c5   : > { %2866 = vmatmul.bf16.vlgmr.msra.gmra.mxu0 %v2314_v11  ;;  %2894 = vmatmul.bf16.vlgmr.msra.gmra.mxu1 %v2315_v37  ;;  %v1960_v59 = vadd.f32 %v1959_v29, %v1932_v50 }
 0x1c6   : > { %2950 = vmatmul.bf16.vlgmr.msra.gmra.mxu3 %v2317_v60 }
 0x1c7   : > { %2922 = vmatmul.bf16.vlgmr.msra.gmra.mxu2 %v2316_v54  ;;  %v2207_v37 = vmul.f32 0.2, %v1960_v59  ;;  %vm2151_vm14 = vcmp.gt.f32.partialorder %v1960_v59, 0.0  ;;  %v4590_v54 = vld [vmem:[#allocation4 + $0x168] sm:$0xff] }
 0x1c8   : > { %3000 = vmatpush.bf16.msrb.mxu1 %v4590_v54  ;;  %2974 = vmatpush.bf16.msrb.mxu0 %v4580_v16  ;;  %v4603_v16 = vld [vmem:[#allocation4 + $0x1d0] sm:$0xff] }
 0x1c9   : > { %v5133_v4 = vpop.f32.mrf.mxu3  ;;  %v5136_v60 = vsel %vm2151_vm14, %v1960_v59, %v2207_v37  ;;  %v4588_v59 = vld [vmem:[#allocation4 + $0x158] sm:$0xff] }
 0x1ca   : > { %v5131_v21 = vpop.f32.mrf.mxu2  ;;  %v1933_v8 = vpop.f32.mrf.mxu0 }
 0x1cb   : > { %v1934_v11 = vadd.f32 %v1933_v8, %v5074_v10  ;;  %v1961_v26 = vpop.f32.mrf.mxu1  ;;  %v4587_v8 = vld [vmem:[#allocation4 + $0x150] sm:$0xff] }
 0x1cc   : > { %3001 = vmatpush.bf16.msrb.mxu1 %v4589_v3  ;;  %2975 = vmatpush.bf16.msrb.mxu0 %v4579_v0  ;;  %v2306_v0 = vsel %vm2194_vm2, %v4944_v12, %v2250_v15 }
 0x1cd   : > { %v1962_v38 = vadd.f32 %v1961_v26, %v1934_v11  ;;  %v4596_v11 = vld [vmem:[#allocation4 + $0x198] sm:$0xff] }
 0x1ce   : > { %v4604_v26 = vld [vmem:[#allocation4 + $0x1d8] sm:$0xff]  ;;  %3030 = vmatpush.bf16.msrb.mxu2 %v4596_v11 }
 0x1cf   : > { %vm2159_vm15 = vcmp.gt.f32.partialorder %v1962_v38, 0.0  ;;  %v2215_v41 = vmul.f32 0.2, %v1962_v38 }
 0x1d0   : > { %3002 = vmatpush.bf16.msrb.mxu1 %v4588_v59  ;;  %2976 = vmatpush.bf16.msrb.mxu0 %v4578_v36 }
 0x1d1   : > { %v5138_v1 = vsel %vm2159_vm15, %v1962_v38, %v2215_v41  ;;  %v5144_v42 = vpop.f32.mrf.mxu3 }
 0x1d2   : > { %v5140_v2 = vpop.f32.mrf.mxu2  ;;  %v2319_v10 = vpack.c.bf16 %v5138_v1, %v5136_v60  ;;  %v1936_v28 = vpop.f32.mrf.mxu0  ;;  %3031 = vmatpush.bf16.msrb.mxu2 %v4595_v43 }
 0x1d3   : > { %v1964_v29 = vpop.f32.mrf.mxu1  ;;  %v1937_v50 = vadd.f32 %v1936_v28, %v5086_v51  ;;  %v4605_v51 = vld [vmem:[#allocation4 + $0x1e0] sm:$0xff] }
 0x1d4   : > { %3057 = vmatpush.bf16.msrb.mxu3 %v4605_v51  ;;  %3003 = vmatpush.bf16.msrb.mxu1 %v4587_v8  ;;  %v4577_v28 = vld [vmem:[#allocation4 + $0x100] sm:$0xff]  ;;  %v4602_v8 = vld [vmem:[#allocation4 + $0x1c8] sm:$0xff] }
 0x1d5   : > { %2871 = vmatmul.bf16.gmra.mxu0 %v2322_v63  ;;  %2899 = vmatmul.bf16.gmra.mxu1 %v5308_v45  ;;  %v1965_v61 = vadd.f32 %v1964_v29, %v1937_v50  ;;  %v5310_v50 = vpack.c.bf16 %v4939_v48, %v4937_v47  ;;  %v5311_v45 = vpack.c.bf16 %v4990_v7, %v4988_v6  ;;  %v4594_v7 = vld [vmem:[#allocation4 + $0x188] sm:$0xff] }
 0x1d6   : > { %2955 = vmatmul.bf16.gmra.mxu3 %v2325_v55  ;;  %2977 = vmatpush.bf16.msrb.mxu0 %v4577_v28  ;;  %v4601_v28 = vld [vmem:[#allocation4 + $0x1c0] sm:$0xff] }
 0x1d7   : > { %2927 = vmatmul.bf16.gmra.mxu2 %v5309_v27  ;;  %v2223_v55 = vmul.f32 0.2, %v1965_v61  ;;  %vm2167_vm0 = vcmp.gt.f32.partialorder %v1965_v61, 0.0  ;;  %v5312_v27 = vpack.c.bf16 %v5062_v19, %v5060_v56 }
 0x1d8   : > { %3058 = vmatpush.bf16.msrb.mxu3 %v4604_v26  ;;  %3004 = vmatpush.bf16.msrb.mxu1 %v4586_v31 }
 0x1d9   : > { %v5161_v63 = vpop.f32.mrf.mxu3  ;;  %v5166_v40 = vsel %vm2167_vm0, %v1965_v61, %v2223_v55  ;;  %3032 = vmatpush.bf16.msrb.mxu2 %v4594_v7  ;;  %v2253_v61 = vmul.f32 0.2, %v5066_v9 }
 0x1da   : > { %v5159_v62 = vpop.f32.mrf.mxu2  ;;  %v1938_v20 = vpop.f32.mrf.mxu0 }
 0x1db   : > { %v1939_v5 = vadd.f32 %v1938_v20, %v5088_v57  ;;  %v1966_v53 = vpop.f32.mrf.mxu1  ;;  %v4593_v20 = vld [vmem:[#allocation4 + $0x180] sm:$0xff] }
 0x1dc   : > { %3005 = vmatpush.bf16.msrb.mxu1 %v4585_v58  ;;  %3059 = vmatpush.bf16.msrb.mxu3 %v4603_v16 }
 0x1dd   : > { %v1967_v30 = vadd.f32 %v1966_v53, %v1939_v5  ;;  %v2307_v53 = vsel %vm2195_vm3, %v4997_v23, %v2251_v32  ;;  %3033 = vmatpush.bf16.msrb.mxu2 %v4593_v20  ;;  %v2338_v23 = vpack.c.bf16 %v2306_v0, %v2306_v0 }
 0x1df   : > { %vm2175_vm1 = vcmp.gt.f32.partialorder %v1967_v30, 0.0  ;;  %v2231_v37 = vmul.f32 0.2, %v1967_v30 }
 0x1e0   : > { %3060 = vmatpush.bf16.msrb.mxu3 %v4602_v8  ;;  %v2021_v8 = vadd.f32 %v5161_v63, %v5159_v62 }
 0x1e1   : > { %v5168_v57 = vsel %vm2175_vm1, %v1967_v30, %v2231_v37  ;;  %v5170_v54 = vpop.f32.mrf.mxu3  ;;  %v2309_v30 = vsel %vm2197_vm6, %v5066_v9, %v2253_v61  ;;  %vm2198_vm1 = vcmp.gt.f32.partialorder %v5114_v14, 0.0 }
 0x1e2   : > { %v5164_v38 = vpop.f32.mrf.mxu2  ;;  %v1941_v41 = vpop.f32.mrf.mxu0  ;;  %v2327_v3 = vpack.c.bf16 %v5168_v57, %v5166_v40  ;;  %v2341_v43 = vpack.c.bf16 %v2309_v30, %v2309_v30 }
 0x1e3   : > { %v1969_v29 = vpop.f32.mrf.mxu1  ;;  %v1942_v52 = vadd.f32 %v1941_v41, %v5100_v17  ;;  %v2339_v41 = vpack.c.bf16 %v2307_v53, %v2307_v53 }
 0x1e4   : > { %3061 = vmatpush.bf16.msrb.mxu3 %v4601_v28 }
 0x1e5   : > { %2876 = vmatmul.bf16.gmra.mxu0 %v5310_v50  ;;  %2904 = vmatmul.bf16.gmra.mxu1 %v5311_v45  ;;  %v1970_v59 = vadd.f32 %v1969_v29, %v1942_v52 }
 0x1e6   : > { %2960 = vmatmul.bf16.gmra.mxu3 %v5312_v27 }
 0x1e7   : > { %2932 = vmatmul.bf16.gmra.mxu2 %v2332_v22  ;;  %v2252_v22 = vmul.f32 0.2, %v5054_v18  ;;  %v2239_v56 = vmul.f32 0.2, %v1970_v59  ;;  %vm2183_vm5 = vcmp.gt.f32.partialorder %v1970_v59, 0.0 }
 0x1e9   : > { %v5189_v47 = vpop.f32.mrf.mxu3  ;;  %v2308_v11 = vsel %vm2196_vm4, %v5054_v18, %v2252_v22  ;;  %v5205_v26 = vsel %vm2183_vm5, %v1970_v59, %v2239_v56  ;;  %v2016_v59 = vadd.f32 %v5133_v4, %v5131_v21 }
 0x1ea   : > { %v5187_v17 = vpop.f32.mrf.mxu2  ;;  %v1943_v48 = vpop.f32.mrf.mxu0  ;;  %v2340_v18 = vpack.c.bf16 %v2308_v11, %v2308_v11 }
 0x1eb   : > { %v1944_v51 = vadd.f32 %v1943_v48, %v5102_v13  ;;  %v1971_v6 = vpop.f32.mrf.mxu1  ;;  %v5313_v48 = vpack.c.bf16 %v5079_v33, %v5077_v35 }
 0x1ed   : > { %v1972_v19 = vadd.f32 %v1971_v6, %v1944_v51  ;;  %v2018_v6 = vadd.f32 %v5144_v42, %v5140_v2 }
 0x1ef   : > { %vm2191_vm7 = vcmp.gt.f32.partialorder %v1972_v19, 0.0  ;;  %v2247_v13 = vmul.f32 0.2, %v1972_v19 }
 0x1f1   : > { %v5207_v36 = vsel %vm2191_vm7, %v1972_v19, %v2247_v13  ;;  %v5209_v31 = vpop.f32.mrf.mxu3 }
 0x1f2   : > { %v5201_v5 = vpop.f32.mrf.mxu2  ;;  %v5211_v55 = vpop.f32.mrf.mxu0  ;;  %v2335_v12 = vpack.c.bf16 %v5207_v36, %v5205_v26 }
 0x1f3   : > { %v5216_v37 = vpop.f32.mrf.mxu1 }
 0x1f5   : > { %2881 = vmatmul.bf16.gmra.mxu0 %v2338_v23  ;;  %2909 = vmatmul.bf16.gmra.mxu1 %v2339_v41  ;;  %v2023_v41 = vadd.f32 %v5170_v54, %v5164_v38 }
 0x1f6   : > { %2965 = vmatmul.bf16.gmra.mxu3 %v2341_v43 }
 0x1f7   : > { %2937 = vmatmul.bf16.gmra.mxu2 %v2340_v18 }
 0x1f9   : > { %v5220_v29 = vpop.f32.mrf.mxu3 }
 0x1fa   : > { %v5218_v58 = vpop.f32.mrf.mxu2  ;;  %v1948_v9 = vpop.f32.mrf.mxu0 }
 0x1fb   : > { %v1976_v52 = vpop.f32.mrf.mxu1 }
 0x201   : > { %v2032_v45 = vpop.f32.mrf.mxu3 }
 0x202   : > { %v2004_v50 = vpop.f32.mrf.mxu2  ;;  %v2043_v27 = vpop.f32.mrf.mxu0 }
 0x203   : > { %v2071_v16 = vpop.f32.mrf.mxu1  ;;  %v2044_v51 = vadd.f32 %v2043_v27, %v2016_v59 }
 0x205   : > { %2978 = vmatmul.bf16.vlgmr.msrb.gmra.mxu0 %v5313_v48  ;;  %3006 = vmatmul.bf16.vlgmr.msrb.gmra.mxu1 %v2319_v10  ;;  %v2208_v22 = vmul.f32 0.2, %v2044_v51  ;;  %vm2152_vm8 = vcmp.gt.f32.partialorder %v2044_v51, 0.0  ;;  %v2026_v48 = vadd.f32 %v5189_v47, %v5187_v17  ;;  %v2028_v17 = vadd.f32 %v5209_v31, %v5201_v5 }
 0x207   : > { %v2264_v35 = vsel %vm2152_vm8, %v2044_v51, %v2208_v22  ;;  %v1947_v51 = vadd.f32 %v5211_v55, %v5116_v39 }
 0x209   : > { %v2127_v15 = vpop.f32.mrf.mxu3  ;;  %v1975_v47 = vadd.f32 %v5216_v37, %v1947_v51 }
 0x20a   : > { %v2099_v7 = vpop.f32.mrf.mxu2  ;;  %v2045_v32 = vpop.f32.mrf.mxu0 }
 0x20b   : > { %v2046_v56 = vadd.f32 %v2045_v32, %v2018_v6  ;;  %v2073_v19 = vpop.f32.mrf.mxu1  ;;  %v2100_v21 = vadd.f32 %v2099_v7, %v2071_v16  ;;  %v2255_v36 = vmul.f32 0.2, %v1975_v47  ;;  %vm2199_vm3 = vcmp.gt.f32.partialorder %v1975_v47, 0.0 }
 0x20d   : > { %vm2160_vm9 = vcmp.gt.f32.partialorder %v2046_v56, 0.0  ;;  %v2216_v4 = vmul.f32 0.2, %v2046_v56  ;;  %v2128_v61 = vadd.f32 %v2127_v15, %v2100_v21 }
 0x20f   : > { %v2272_v33 = vsel %vm2160_vm9, %v2046_v56, %v2216_v4  ;;  %v2209_v42 = vmul.f32 0.2, %v2128_v61  ;;  %vm2153_vm10 = vcmp.gt.f32.partialorder %v2128_v61, 0.0 }
 0x210   : > { %v2320_v13 = vpack.c.bf16 %v2272_v33, %v2264_v35  ;;  %v2311_v33 = vsel %vm2199_vm3, %v1975_v47, %v2255_v36 }
 0x211   : > { %v2129_v10 = vpop.f32.mrf.mxu3  ;;  %v2265_v30 = vsel %vm2153_vm10, %v2128_v61, %v2209_v42 }
 0x212   : > { %v2101_v60 = vpop.f32.mrf.mxu2  ;;  %v2048_v20 = vpop.f32.mrf.mxu0  ;;  %3034 = vmatmul.bf16.vlgmr.msrb.gmra.mxu2 %v2320_v13 }
 0x213   : > { %v2102_v1 = vadd.f32 %v2101_v60, %v2073_v19  ;;  %v2076_v2 = vpop.f32.mrf.mxu1  ;;  %v2049_v11 = vadd.f32 %v2048_v20, %v2021_v8  ;;  %v2254_v19 = vmul.f32 0.2, %v5114_v14 }
 0x215   : > { %v2130_v0 = vadd.f32 %v2129_v10, %v2102_v1  ;;  %2983 = vmatmul.bf16.gmra.mxu0 %v2326_v49  ;;  %3011 = vmatmul.bf16.gmra.mxu1 %v2327_v3  ;;  %v2224_v28 = vmul.f32 0.2, %v2049_v11  ;;  %vm2168_vm12 = vcmp.gt.f32.partialorder %v2049_v11, 0.0  ;;  %v2310_v4 = vsel %vm2198_vm1, %v5114_v14, %v2254_v19 }
 0x216   : > { %v2031_v1 = vadd.f32 %v5220_v29, %v5218_v58  ;;  %v2342_v20 = vpack.c.bf16 %v2310_v4, %v2310_v4 }
 0x217   : > { %vm2161_vm11 = vcmp.gt.f32.partialorder %v2130_v0, 0.0  ;;  %v2217_v53 = vmul.f32 0.2, %v2130_v0  ;;  %v2280_v40 = vsel %vm2168_vm12, %v2049_v11, %v2224_v28 }
 0x219   : > { %v2273_v23 = vsel %vm2161_vm11, %v2130_v0, %v2217_v53  ;;  %v2132_v62 = vpop.f32.mrf.mxu3  ;;  %v2343_v0 = vpack.c.bf16 %v2311_v33, %v2311_v33 }
 0x21a   : > { %v2321_v18 = vpack.c.bf16 %v2273_v23, %v2265_v30  ;;  %v2104_v43 = vpop.f32.mrf.mxu2  ;;  %v2050_v63 = vpop.f32.mrf.mxu0 }
 0x21b   : > { %v2051_v9 = vadd.f32 %v2050_v63, %v2023_v41  ;;  %v2078_v24 = vpop.f32.mrf.mxu1  ;;  %v2105_v34 = vadd.f32 %v2104_v43, %v2076_v2 }
 0x21c   : > { %3062 = vmatmul.bf16.vlgmr.msrb.gmra.mxu3 %v2321_v18 }
 0x21d   : > { %vm2176_vm13 = vcmp.gt.f32.partialorder %v2051_v9, 0.0  ;;  %v2232_v49 = vmul.f32 0.2, %v2051_v9  ;;  %v2133_v3 = vadd.f32 %v2132_v62, %v2105_v34 }
 0x21f   : > { %v2288_v57 = vsel %vm2176_vm13, %v2051_v9, %v2232_v49  ;;  %v2225_v16 = vmul.f32 0.2, %v2133_v3  ;;  %vm2169_vm14 = vcmp.gt.f32.partialorder %v2133_v3, 0.0 }
 0x220   : > { %v2328_v52 = vpack.c.bf16 %v2288_v57, %v2280_v40 }
 0x221   : > { %v2134_v27 = vpop.f32.mrf.mxu3  ;;  %v2281_v15 = vsel %vm2169_vm14, %v2133_v3, %v2225_v16 }
 0x222   : > { %v2106_v50 = vpop.f32.mrf.mxu2  ;;  %v2053_v38 = vpop.f32.mrf.mxu0  ;;  %3039 = vmatmul.bf16.gmra.mxu2 %v2328_v52 }
 0x223   : > { %v2107_v45 = vadd.f32 %v2106_v50, %v2078_v24  ;;  %v2081_v54 = vpop.f32.mrf.mxu1  ;;  %v2054_v7 = vadd.f32 %v2053_v38, %v2026_v48 }
 0x225   : > { %v2135_v59 = vadd.f32 %v2134_v27, %v2107_v45  ;;  %2988 = vmatmul.bf16.gmra.mxu0 %v2334_v46  ;;  %3016 = vmatmul.bf16.gmra.mxu1 %v2335_v12  ;;  %v2240_v44 = vmul.f32 0.2, %v2054_v7  ;;  %vm2184_vm0 = vcmp.gt.f32.partialorder %v2054_v7, 0.0 }
 0x227   : > { %vm2177_vm15 = vcmp.gt.f32.partialorder %v2135_v59, 0.0  ;;  %v2233_v6 = vmul.f32 0.2, %v2135_v59  ;;  %v2296_v5 = vsel %vm2184_vm0, %v2054_v7, %v2240_v44 }
 0x229   : > { %v2289_v32 = vsel %vm2177_vm15, %v2135_v59, %v2233_v6  ;;  %v2137_v22 = vpop.f32.mrf.mxu3 }
 0x22a   : > { %v2109_v39 = vpop.f32.mrf.mxu2  ;;  %v2329_v55 = vpack.c.bf16 %v2289_v32, %v2281_v15  ;;  %v2055_v56 = vpop.f32.mrf.mxu0 }
 0x22b   : > { %v2056_v25 = vadd.f32 %v2055_v56, %v2028_v17  ;;  %v2083_v46 = vpop.f32.mrf.mxu1  ;;  %v2110_v26 = vadd.f32 %v2109_v39, %v2081_v54 }
 0x22c   : > { %3067 = vmatmul.bf16.gmra.mxu3 %v2329_v55 }
 0x22d   : > { %vm2192_vm2 = vcmp.gt.f32.partialorder %v2056_v25, 0.0  ;;  %v2248_v12 = vmul.f32 0.2, %v2056_v25  ;;  %v2138_v37 = vadd.f32 %v2137_v22, %v2110_v26 }
 0x22f   : > { %v2304_v31 = vsel %vm2192_vm2, %v2056_v25, %v2248_v12  ;;  %v2241_v2 = vmul.f32 0.2, %v2138_v37  ;;  %vm2185_vm4 = vcmp.gt.f32.partialorder %v2138_v37, 0.0 }
 0x230   : > { %v2336_v21 = vpack.c.bf16 %v2304_v31, %v2296_v5 }
 0x231   : > { %v2139_v13 = vpop.f32.mrf.mxu3  ;;  %v2297_v14 = vsel %vm2185_vm4, %v2138_v37, %v2241_v2 }
 0x232   : > { %v2111_v35 = vpop.f32.mrf.mxu2  ;;  %v2058_v60 = vpop.f32.mrf.mxu0  ;;  %3044 = vmatmul.bf16.gmra.mxu2 %v2336_v21 }
 0x233   : > { %v2112_v61 = vadd.f32 %v2111_v35, %v2083_v46  ;;  %v2086_v10 = vpop.f32.mrf.mxu1  ;;  %v2059_v8 = vadd.f32 %v2058_v60, %v2031_v1 }
 0x235   : > { %v2140_v42 = vadd.f32 %v2139_v13, %v2112_v61  ;;  %2993 = vmatmul.bf16.gmra.mxu0 %v2342_v20  ;;  %3021 = vmatmul.bf16.gmra.mxu1 %v2343_v0  ;;  %v2256_v30 = vmul.f32 0.2, %v2059_v8  ;;  %vm2200_vm6 = vcmp.gt.f32.partialorder %v2059_v8, 0.0 }
 0x237   : > { %vm2193_vm5 = vcmp.gt.f32.partialorder %v2140_v42, 0.0  ;;  %v2249_v53 = vmul.f32 0.2, %v2140_v42  ;;  %v2312_v62 = vsel %vm2200_vm6, %v2059_v8, %v2256_v30 }
 0x238   : > { %v2344_v28 = vpack.c.bf16 %v2312_v62, %v2312_v62 }
 0x239   : > { %v2305_v11 = vsel %vm2193_vm5, %v2140_v42, %v2249_v53  ;;  %v2142_v43 = vpop.f32.mrf.mxu3 }
 0x23a   : > { %v2114_v23 = vpop.f32.mrf.mxu2  ;;  %v2337_v41 = vpack.c.bf16 %v2305_v11, %v2297_v14  ;;  %v2060_v58 = vpop.f32.mrf.mxu0 }
 0x23b   : > { %v2115_v18 = vadd.f32 %v2114_v23, %v2086_v10  ;;  %v2088_v29 = vpop.f32.mrf.mxu1 }
 0x23c   : > { %3072 = vmatmul.bf16.gmra.mxu3 %v2337_v41 }
 0x23d   : > { %v2143_v63 = vadd.f32 %v2142_v43, %v2115_v18 }
 0x23f   : > { %v2257_v24 = vmul.f32 0.2, %v2143_v63  ;;  %vm2201_vm7 = vcmp.gt.f32.partialorder %v2143_v63, 0.0 }
 0x241   : > { %v2144_v34 = vpop.f32.mrf.mxu3  ;;  %v2313_v3 = vsel %vm2201_vm7, %v2143_v63, %v2257_v24  ;;  %v3096_v24 = vlaneseq }
 0x242   : > { %v2116_v9 = vpop.f32.mrf.mxu2  ;;  %v2867_v49 = vpop.f32.mrf.mxu0  ;;  %3049 = vmatmul.bf16.gmra.mxu2 %v2344_v28  ;;  %v2345_v50 = vpack.c.bf16 %v2313_v3, %v2313_v3 }
 0x243   : > { %v2895_v40 = vpop.f32.mrf.mxu1 }
 0x244   : > { %v2896_v57 = vadd.f32 %v2895_v40, %v2867_v49 }
 0x249   : > { %v2951_v27 = vpop.f32.mrf.mxu3 }
 0x24a   : > { %v2923_v52 = vpop.f32.mrf.mxu2  ;;  %v2869_v38 = vpop.f32.mrf.mxu0 }
 0x24b   : > { %v2924_v45 = vadd.f32 %v2923_v52, %v2896_v57  ;;  %v2897_v54 = vpop.f32.mrf.mxu1  ;;  %v5268_v57 = vshrl.u32 %v3096_v24, 7 }
 0x24c   : > { %3077 = vmatmul.bf16.gmra.mxu3 %v2345_v50  ;;  %v2898_v59 = vadd.f32 %v2897_v54, %v2869_v38 }
 0x24d   : > { %v2952_v16 = vadd.f32 %v2951_v27, %v2924_v45  ;;  %v3098_v50 = vadd.s32 8, %v5268_v57  ;;  %v3104_v38 = vand.u32 7, %v5268_v57  ;;  %vm3157_vm15 = vcmp.eq.s32.totalorder %v5268_v57, 1 }
 0x24e   : > { %vm3156_vm0 = vcmp.eq.s32.totalorder %v5268_v57, 0 }
 0x24f   : > { %vm3111_vm8 = vcmp.lt.s32.totalorder %v3104_v38, 7 }
 0x251   : > { %v2953_v6 = vpop.f32.mrf.mxu3 }
 0x252   : > { %v2925_v48 = vpop.f32.mrf.mxu2  ;;  %v2872_v7 = vpop.f32.mrf.mxu0 }
 0x253   : > { %v2926_v51 = vadd.f32 %v2925_v48, %v2898_v59  ;;  %v2900_v15 = vpop.f32.mrf.mxu1  ;;  %v3105_v48 = vand.u32 7, %v3098_v50 }
 0x254   : > { %v2901_v17 = vadd.f32 %v2900_v15, %v2872_v7 }
 0x255   : > { %v2954_v32 = vadd.f32 %v2953_v6, %v2926_v51  ;;  %vm3112_vm9 = vcmp.lt.s32.totalorder %v3105_v48, 7 }
 0x259   : > { %v2956_v55 = vpop.f32.mrf.mxu3 }
 0x25a   : > { %v2928_v47 = vpop.f32.mrf.mxu2  ;;  %v2874_v22 = vpop.f32.mrf.mxu0 }
 0x25b   : > { %v2929_v39 = vadd.f32 %v2928_v47, %v2901_v17  ;;  %v2902_v56 = vpop.f32.mrf.mxu1  ;;  %v3099_v47 = vadd.s32 16, %v5268_v57 }
 0x25c   : > { %v2903_v25 = vadd.f32 %v2902_v56, %v2874_v22 }
 0x25d   : > { %v2957_v44 = vadd.f32 %v2956_v55, %v2929_v39 }
 0x261   : > { %v2958_v26 = vpop.f32.mrf.mxu3 }
 0x262   : > { %v2930_v46 = vpop.f32.mrf.mxu2  ;;  %v2877_v36 = vpop.f32.mrf.mxu0 }
 0x263   : > { %v2931_v19 = vadd.f32 %v2930_v46, %v2903_v25  ;;  %v2905_v12 = vpop.f32.mrf.mxu1 }
 0x264   : > { %v2906_v31 = vadd.f32 %v2905_v12, %v2877_v36  ;;  %v3106_v36 = vand.u32 7, %v3099_v47 }
 0x265   : > { %v5260_v5 = vadd.f32 %v2958_v26, %v2931_v19 }
 0x266   : > { %vm3113_vm10 = vcmp.lt.s32.totalorder %v3106_v36, 7 }
 0x269   : > { %v2961_v4 = vpop.f32.mrf.mxu3 }
 0x26a   : > { %v2933_v37 = vpop.f32.mrf.mxu2  ;;  %v2879_v35 = vpop.f32.mrf.mxu0 }
 0x26b   : > { %v2934_v21 = vadd.f32 %v2933_v37, %v2906_v31  ;;  %v2907_v33 = vpop.f32.mrf.mxu1 }
 0x26c   : > { %v2908_v13 = vadd.f32 %v2907_v33, %v2879_v35  ;;  %v3100_v35 = vadd.s32 24, %v5268_v57 }
 0x26d   : > { %v5262_v61 = vadd.f32 %v2961_v4, %v2934_v21 }
 0x271   : > { %v2963_v10 = vpop.f32.mrf.mxu3 }
 0x272   : > { %v2935_v60 = vpop.f32.mrf.mxu2  ;;  %v2882_v20 = vpop.f32.mrf.mxu0 }
 0x273   : > { %v2936_v1 = vadd.f32 %v2935_v60, %v2908_v13  ;;  %v2910_v2 = vpop.f32.mrf.mxu1 }
 0x274   : > { %v2911_v0 = vadd.f32 %v2910_v2, %v2882_v20  ;;  %v3107_v2 = vand.u32 7, %v3100_v35 }
 0x275   : > { %v5264_v42 = vadd.f32 %v2963_v10, %v2936_v1 }
 0x276   : > { %vm3114_vm11 = vcmp.lt.s32.totalorder %v3107_v2, 7 }
 0x279   : > { %v2966_v14 = vpop.f32.mrf.mxu3 }
 0x27a   : > { %v2938_v8 = vpop.f32.mrf.mxu2  ;;  %v2884_v11 = vpop.f32.mrf.mxu0 }
 0x27b   : > { %v2939_v53 = vadd.f32 %v2938_v8, %v2911_v0  ;;  %v2912_v30 = vpop.f32.mrf.mxu1 }
 0x27d   : > { %v5266_v23 = vadd.f32 %v2966_v14, %v2939_v53 }
 0x281   : > { %v2968_v18 = vpop.f32.mrf.mxu3 }
 0x282   : > { %v2940_v41 = vpop.f32.mrf.mxu2  ;;  %v2979_v43 = vpop.f32.mrf.mxu0 }
 0x283   : > { %v3007_v58 = vpop.f32.mrf.mxu1  ;;  %v2980_v49 = vadd.f32 %v2979_v43, %v2952_v16  ;;  %v3101_v41 = vadd.s32 32, %v5268_v57 }
 0x285   : > { %v3008_v45 = vadd.f32 %v3007_v58, %v2980_v49 }
 0x28a   : > { %v2981_v29 = vpop.f32.mrf.mxu0 }
 0x28b   : > { %v3009_v62 = vpop.f32.mrf.mxu1  ;;  %v2982_v27 = vadd.f32 %v2981_v29, %v2954_v32 }
 0x28d   : > { %v3010_v51 = vadd.f32 %v3009_v62, %v2982_v27 }
 0x292   : > { %v2984_v63 = vpop.f32.mrf.mxu0 }
 0x293   : > { %v3012_v28 = vpop.f32.mrf.mxu1  ;;  %v2985_v39 = vadd.f32 %v2984_v63, %v2957_v44 }
 0x295   : > { %v3035_v9 = vpop.f32.mrf.mxu2  ;;  %v3013_v12 = vadd.f32 %v3012_v28, %v2985_v39  ;;  %v3108_v28 = vand.u32 7, %v3101_v41 }
 0x296   : > { %v3036_v54 = vadd.f32 %v3035_v9, %v3008_v45 }
 0x297   : > { %vm3115_vm12 = vcmp.lt.s32.totalorder %v3108_v28, 7 }
 0x29a   : > { %v2986_v34 = vpop.f32.mrf.mxu0 }
 0x29b   : > { %v3014_v40 = vpop.f32.mrf.mxu1  ;;  %v2987_v33 = vadd.f32 %v2986_v34, %v5260_v5 }
 0x29d   : > { %v3037_v3 = vpop.f32.mrf.mxu2  ;;  %v3015_v0 = vadd.f32 %v3014_v40, %v2987_v33 }
 0x29e   : > { %v3038_v16 = vadd.f32 %v3037_v3, %v3010_v51 }
 0x29f   : > { %v3063_v52 = vpop.f32.mrf.mxu3 }
 0x2a0   : > { %v3064_v6 = vadd.f32 %v3063_v52, %v3036_v54  ;;  %v3102_v52 = vadd.s32 40, %v5268_v57 }
 0x2a2   : > { %v2989_v59 = vpop.f32.mrf.mxu0  ;;  %v3118_v55 = vsel %vm3111_vm8, %v3064_v6, 0.0  ;;  %v3109_v54 = vand.u32 7, %v3102_v52 }
 0x2a3   : > { %v3017_v7 = vpop.f32.mrf.mxu1  ;;  %v3137_v25 = vmul.f32 %v3118_v55, %v3118_v55  ;;  %v2990_v18 = vadd.f32 %v2989_v59, %v5262_v61 }
 0x2a4   : > { %vm3116_vm13 = vcmp.lt.s32.totalorder %v3109_v54, 7 }
 0x2a5   : > { %v3040_v15 = vpop.f32.mrf.mxu2  ;;  %v3018_v9 = vadd.f32 %v3017_v7, %v2990_v18 }
 0x2a6   : > { %v3041_v44 = vadd.f32 %v3040_v15, %v3013_v12 }
 0x2a7   : > { %v3065_v17 = vpop.f32.mrf.mxu3 }
 0x2a8   : > { %v3066_v22 = vadd.f32 %v3065_v17, %v3038_v16  ;;  %v3103_v16 = vadd.s32 48, %v5268_v57 }
 0x2aa   : > { %v4612_v32 = vpack.c.bf16 %v3066_v22, %v3064_v6  ;;  %v3119_v56 = vsel %vm3112_vm9, %v3066_v22, 0.0  ;;  %v2991_v26 = vpop.f32.mrf.mxu0  ;;  %v3110_v22 = vand.u32 7, %v3103_v16 }
 0x2ab   : > { %v3125_v46 = vadd.f32 %v3119_v56, %v3118_v55  ;;  %v3138_v19 = vmul.f32 %v3119_v56, %v3119_v56  ;;  %v3019_v31 = vpop.f32.mrf.mxu1  ;;  %v2992_v50 = vadd.f32 %v2991_v26, %v5264_v42 }
 0x2ac   : > { %4613 = vst [vmem:[%s5277_s16] sm:$0xff] %v4612_v32   ;;  %vm3117_vm14 = vcmp.lt.s32.totalorder %v3110_v22, 7 }
 0x2ad   : > { %v3144_v37 = vadd.f32 %v3138_v19, %v3137_v25  ;;  %v3042_v21 = vpop.f32.mrf.mxu2  ;;  %v3020_v59 = vadd.f32 %v3019_v31, %v2992_v50 }
 0x2ae   : > { %v3043_v14 = vadd.f32 %v3042_v21, %v3015_v0 }
 0x2af   : > { %v3068_v4 = vpop.f32.mrf.mxu3 }
 0x2b0   : > { %v3069_v13 = vadd.f32 %v3068_v4, %v3041_v44 }
 0x2b2   : > { %v3120_v60 = vsel %vm3113_vm10, %v3069_v13, 0.0  ;;  %v2994_v20 = vpop.f32.mrf.mxu0 }
 0x2b3   : > { %v3126_v1 = vadd.f32 %v3125_v46, %v3120_v60  ;;  %v3139_v10 = vmul.f32 %v3120_v60, %v3120_v60  ;;  %v3022_v8 = vpop.f32.mrf.mxu1  ;;  %v2995_v15 = vadd.f32 %v2994_v20, %v5266_v23 }
 0x2b5   : > { %v3145_v53 = vadd.f32 %v3144_v37, %v3139_v10  ;;  %v3045_v11 = vpop.f32.mrf.mxu2  ;;  %v3023_v32 = vadd.f32 %v3022_v8, %v2995_v15 }
 0x2b6   : > { %v3046_v49 = vadd.f32 %v3045_v11, %v3018_v9 }
 0x2b7   : > { %v3070_v30 = vpop.f32.mrf.mxu3 }
 0x2b8   : > { %v3071_v43 = vadd.f32 %v3070_v30, %v3043_v14 }
 0x2ba   : > { %v4617_v5 = vpack.c.bf16 %v3071_v43, %v3069_v13  ;;  %v3121_v58 = vsel %vm3114_vm11, %v3071_v43, 0.0  ;;  %v2996_v63 = vpop.f32.mrf.mxu0 }
 0x2bb   : > { %v3127_v29 = vadd.f32 %v3126_v1, %v3121_v58  ;;  %v3140_v62 = vmul.f32 %v3121_v58, %v3121_v58  ;;  %v3024_v24 = vpop.f32.mrf.mxu1 }
 0x2bc   : > { %4624 = vst [vmem:[%s5277_s16 + $0x8] sm:$0xff] %v4617_v5  }
 0x2bd   : > { %v3146_v34 = vadd.f32 %v3145_v53, %v3140_v62  ;;  %v3047_v40 = vpop.f32.mrf.mxu2 }
 0x2be   : > { %v3048_v51 = vadd.f32 %v3047_v40, %v3020_v59 }
 0x2bf   : > { %v3073_v3 = vpop.f32.mrf.mxu3 }
 0x2c0   : > { %v3074_v61 = vadd.f32 %v3073_v3, %v3046_v49 }
 0x2c2   : > { %v3122_v45 = vsel %vm3115_vm12, %v3074_v61, 0.0 }
 0x2c3   : > { %v3128_v27 = vadd.f32 %v3127_v29, %v3122_v45  ;;  %v3141_v38 = vmul.f32 %v3122_v45, %v3122_v45 }
 0x2c5   : > { %v3147_v48 = vadd.f32 %v3146_v34, %v3141_v38  ;;  %v3050_v6 = vpop.f32.mrf.mxu2 }
 0x2c6   : > { %v3051_v25 = vadd.f32 %v3050_v6, %v3023_v32 }
 0x2c7   : > { %v3075_v7 = vpop.f32.mrf.mxu3 }
 0x2c8   : > { %v3076_v17 = vadd.f32 %v3075_v7, %v3048_v51 }
 0x2ca   : > { %v4622_v47 = vpack.c.bf16 %v3076_v17, %v3074_v61  ;;  %v3123_v39 = vsel %vm3116_vm13, %v3076_v17, 0.0 }
 0x2cb   : > { %v3129_v42 = vadd.f32 %v3128_v27, %v3123_v39  ;;  %v3142_v55 = vmul.f32 %v3123_v39, %v3123_v39 }
 0x2cc   : > { %4625 = vst [vmem:[%s5277_s16 + $0x10] sm:$0xff] %v4622_v47  }
 0x2cd   : > { %v3148_v56 = vadd.f32 %v3147_v48, %v3142_v55  ;;  %v3052_v46 = vpop.f32.mrf.mxu2 }
 0x2cf   : > { %v3078_v19 = vpop.f32.mrf.mxu3 }
 0x2d0   : > { %v3079_v26 = vadd.f32 %v3078_v19, %v3051_v25 }
 0x2d2   : > { %v3088_v36 = vpack.c.bf16 %v3079_v26, %v3079_v26  ;;  %v3124_v12 = vsel %vm3117_vm14, %v3079_v26, 0.0 }
 0x2d3   : > { %v3130_v23 = vadd.f32 %v3129_v42, %v3124_v12  ;;  %v3143_v31 = vmul.f32 %v3124_v12, %v3124_v12 }
 0x2d4   : > { %3095 = vst [vmem:[%s5277_s16 + $0x18] sm:$0xf] %v3088_v36 }
 0x2d5   : > { %v3131_v37 = vrot.slane %v3130_v23, 4  ;;  %v3149_v44 = vadd.f32 %v3148_v56, %v3143_v31 }
 0x2d7   : > { %v3132_v21 = vadd.f32 %v3131_v37, %v3130_v23  ;;  %v3150_v4 = vrot.slane %v3149_v44, 4  ;;  %v3080_v35 = vpop.f32.mrf.mxu3 }
 0x2d9   : > { %v3133_v33 = vrot.slane %v3132_v21, 2  ;;  %v3151_v13 = vadd.f32 %v3150_v4, %v3149_v44 }
 0x2db   : > { %v3134_v60 = vadd.f32 %v3133_v33, %v3132_v21  ;;  %v3152_v1 = vrot.slane %v3151_v13, 2 }
 0x2dd   : > { %v3153_v10 = vadd.f32 %v3152_v1, %v3151_v13  ;;  %v3135_v20 = vrot.slane %v3134_v60, 1 }
 0x2df   : > { %v3154_v2 = vrot.slane %v3153_v10, 1  ;;  %v3136_v8 = vadd.f32 %v3135_v20, %v3134_v60 }
 0x2e1   : > { %v3155_v0 = vadd.f32 %v3154_v2, %v3153_v10 }
 0x2e3   : > { %v3158_v53 = vsel %vm3157_vm15, %v3155_v0, 0.0 }
 0x2e4   : > { %v3159_v14 = vsel %vm3156_vm0, %v3136_v8, %v3158_v53 }
 0x2e5   : > { %3160 = vst [vmem:[%s248_s21] sm:$0xff] %v3159_v14 }
 0x2e6 PF: > { %s17_s15 = sadd.s32 1, %s4734_s15  }
 0x2e7   : > { %p14_p8 = scmp.ge.s32.totalorder %s17_s15, 4  }
 0x2e9   :  { %16 = sbr.rel (!%p14_p8) target bundleno = 2 (0x2), region = 83 }
 0x2ee   :  { %3197 = vsyncpa [#allocation3], 1 }
 0x2ef   :  { %3199 = vsyncpa [#allocation3 + $0x1], 1 }
 0x2f0   :  { %3200 = vsyncpa [#allocation5], 1 }

// kernel: discriminator_forward.3
= control target key start
LH: loop header
LB: loop body
LE: loop exit
PB: predicated region body
PF: predicated region fallthrough
CT: control target
= control target key end

     0   :  { %s15783_s0 = inlined_call_operand.vmem [shape: bf16[2,7168], index: 0, kind: input, shape index: {}]   ;;  %s15784_s1 = inlined_call_operand.vmem [shape: f32[1,7168], index: 1, kind: input, shape index: {}]   ;;  %s15785_s2 = inlined_call_operand.vmem [shape: f32[1,7168], index: 2, kind: input, shape index: {}]   ;;  %s15786_s3 = inlined_call_operand.hbm [shape: bf16[7168,1024], index: 3, kind: input, shape index: {}]   ;;  %s15787_s4 = inlined_call_operand.hbm [shape: f32[1,1024], index: 4, kind: input, shape index: {}]   ;;  %s15788_s5 = inlined_call_operand.hbm [shape: f32[1,1024], index: 5, kind: input, shape index: {}]   ;;  %s15789_s6 = inlined_call_operand.hbm [shape: f32[1024,128], index: 6, kind: input, shape index: {}]   ;;  %s15790_s7 = inlined_call_operand.vmem [shape: f32[2,128], index: 7, kind: output, shape index: {}]  }
   0x1   :  { %15791 = sst [smem:[#allocation13_spill]] %s15787_s4 }
   0x2   :  { %15792 = sst [smem:[#allocation14_spill]] %s15788_s5 }
   0x3   :  { %15793 = sst [smem:[#allocation15_spill]] %s15789_s6 }
   0x4   :  { %12 = vsyncpa [#allocation4], 0 }
   0x5   :  { %14 = vsyncpa [#allocation4 + $0x1], 0 }
   0x6   :  { %15 = vsyncpa [#allocation6], 0 }
   0x7   :  { %16 = vsyncpa [#allocation9], 0  ;;  %s13141_s24 = smov 0   ;;  %s13143_s25 = smov 0  }
   0x8   :  { %s13145_s26 = smov 0   ;;  %s13147_s27 = smov 0  }
   0x9   :  { %s13149_s28 = smov 0   ;;  %s13151_s29 = smov 0  }
   0xa LB: > { %s8300_s30 = sadd.s32 4294967295, %s13090_s29   ;;  %p134_p0 = scmp.ne.s32.totalorder %s13074_s25, %s13070_s24  ;;  %s13090_s29 = sphi %s13151_s29, %s22_s29   ;;  %s13086_s28 = sphi %s13149_s28, %s15819_s28   ;;  %s13082_s27 = sphi %s13147_s27, %s15818_s27   ;;  %s13078_s26 = sphi %s13145_s26, %s15817_s26   ;;  %s13074_s25 = sphi %s13143_s25, %s15816_s25   ;;  %s13070_s24 = sphi %s13141_s24, %s15815_s24  }
   0xb   : > { %p13171_p1 = scmp.eq.s32.totalorder %s8300_s30, 0  ;;  %p8301_p2 = scmp.ge.s32.totalorder %s13090_s29, 1 }
   0xc   : > { %p249_p3 = scmp.lt.s32.totalorder %s13090_s29, 5  ;;  %s15796_s4 = sld [smem:[#allocation13_spill]] }
   0xd   : > { %p13179_p4 = por %p13171_p1, %p134_p0  ;;  %s13092_s14 = smov [#allocation5]  }
   0xe   : > { %p13186_p5 = pnand %p8301_p2, %p249_p3  ;;  %s265_s15 = sshll.u32 %s13092_s14, 4  ;;  %s266_s15 = int_to_ptr.vmem [resolvable:$true] %s265_s15 }
   0xf   : > { %s15798_s5 = sld [smem:[#allocation14_spill]]  ;;  %s13093_s23 = smov [#allocation7]  }
  0x10   : > { %p12816_p6 = pneg %p13186_p5  ;;  %s15800_s6 = sld [smem:[#allocation15_spill]] }
  0x11   : > { %s279_s24 = sshll.u32 %s13093_s23, 4  ;;  %s13094_s30 = smov [#allocation8]   ;;  %s280_s24 = int_to_ptr.vmem [resolvable:$true] %s279_s24 }
  0x12   : > { %s263_s12 = sshll.u32 %s15796_s4, 4  ;;  %p13197_p7 = pnand %p12816_p6, %p13171_p1  ;;  %s264_s12 = int_to_ptr.hbm [resolvable:$true] %s263_s12 }
  0x13   : > { %s293_s10 = sshll.u32 %s13094_s30, 4  ;;  %s13095_s11 = smov 128   ;;  %s294_s10 = int_to_ptr.vmem [resolvable:$true] %s293_s10 }
  0x14   : > { %12819 = dma.hbm_to_vmem [thread:$0]  (!%p13197_p7), %s264_s12, 128, %s266_s15, [#allocation6]  }
  0x15   : > { %s277_s18 = sshll.u32 %s15798_s5, 4  ;;  %s13096_s14 = smov 8   ;;  %s278_s18 = int_to_ptr.hbm [resolvable:$true] %s277_s18 }
  0x16   : > { %s291_s22 = sshll.u32 %s15800_s6, 4  ;;  %s121_s16 = sadd.s32 1, %s13078_s26  ;;  %s292_s22 = int_to_ptr.hbm [resolvable:$true] %s291_s22 }
  0x17   : > { %12822 = dma.hbm_to_vmem [thread:$0]  (!%p13197_p7), %s278_s18, 128, %s280_s24, [#allocation6]  }
  0x18   : > { %12825 = dma.hbm_to_vmem [thread:$0]  (!%p13197_p7), %s292_s22, 16384, %s294_s10, [#allocation9], %s13095_s11, %s13095_s11, %s13096_s14  }
  0x19   : > { %s31_s17 = sadd.s32 1, %s13086_s28  ;;  %p128_p8 = scmp.ne.s32.totalorder %s13078_s26, %s13074_s25 }
  0x1a   : > { %p32_p9 = scmp.ge.s32.totalorder %s31_s17, 4  ;;  %p129_p10 = scmp.eq.s32.totalorder %s13090_s29, 0 }
  0x1b   : > { %p12833_p11 = scmp.lt.s32.totalorder %s13090_s29, 4  ;;  %s331_s12 = sand.u32 1, %s13078_s26  }
  0x1c   : > { %s15821_s17 = smov (%p32_p9, %s31_s17), 0  ;;  %p130_p12 = por %p129_p10, %p128_p8 }
  0x1d   : > { %s116_s15 = ssub.s32 %s13086_s28, %s15821_s17  ;;  %s12800_s18 = smul.u32 7168, %s331_s12 }
  0x1e   : > { %p119_p13 = scmp.eq.s32.totalorder %s116_s15, 0  ;;  %s12799_s20 = smul.u32 7168, %s13086_s28 }
  0x1f   : > { %p12827_p0 = pnand %p12833_p11, %p130_p12  ;;  %s335_s24 = scalar_lea.vmem [#allocation3], %s12800_s18 }
  0x20   : > { %s13223_s21 = scalar_select %p119_p13, %s13078_s26, %s121_s16  }
  0x21   : > { %s343_s23 = scalar_lea.hbm %s15786_s3, %s12799_s20  ;;  %s346_s30 = sshll.u32 %s335_s24, 4  ;;  %s347_s30 = int_to_ptr.vmem [resolvable:$true] %s346_s30 }
  0x22   : > { %s344_s10 = sshll.u32 %s343_s23, 4  ;;  %s332_s11 = scalar_lea.sflag [#allocation4], %s331_s12  ;;  %s345_s10 = int_to_ptr.hbm [resolvable:$true] %s344_s10 }
  0x23   : > { %s13097_s14 = smov 512   ;;  %s13098_s4 = smov 32  }
  0x24   : > { %12829 = dma.hbm_to_vmem [thread:$0]  (!%p12827_p0), %s345_s10, 114688, %s347_s30, %s332_s11, %s13097_s14, %s13097_s14, %s13098_s4  }
  0x25   : > { %358 = sbr.rel (%p13186_p5) target bundleno = 2002 (0x7d2), region = 48  ;;  %s360_s16 = sand.u32 (!%p13186_p5), 1, %s13074_s25  }
  0x26   : > { %s12801_s15 = smul.u32 (!%p13186_p5), 7168, %s360_s16  ;;  %s361_s5 = scalar_lea.sflag (!%p13186_p5), [#allocation4], %s360_s16 }
  0x28   : > { %s13231_s6 = scalar_lea.vmem (!%p13186_p5), [#allocation3], %s12801_s15 }
  0x2a   : > { %13057 = dma.done.wait (%p13179_p4), %s361_s5, 114688  }
  0x2b   : > { %13059 = vsyncadd (%p13179_p4), %s361_s5, 4294852608 }
  0x2c   : > { %13061 = dma.done.wait (%p13171_p1), [#allocation6], 256  }
  0x2d   : > { %13063 = vsyncadd (%p13171_p1), [#allocation6], 4294967040 }
  0x2e   : > { %13065 = dma.done.wait (%p13171_p1), [#allocation9], 16384  }
  0x2f   : > { %13067 = vsyncadd (%p13171_p1), [#allocation9], 4294950912  ;;  %s422_s4 = smul.u32 14, %s13082_s27  ;;  %p8312_p1 = scmp.ne.s32.totalorder %s13082_s27, 0 }
  0x31   : > { %p423_p2 = scmp.lt.s32.totalorder %s422_s4, 55  ;;  %449 = sbr.rel (%p8312_p1) target bundleno = 57 (0x39), region = 68 }
  0x33   : > { %s15823_s4 = smov (!%p423_p2, %s422_s4), 55 }
  0x34   : > { %s13249_s5 = scalar_lea.vmem %s15783_s0, %s15823_s4  ;;  %s13254_s20 = scalar_lea.vmem %s15784_s1, %s15823_s4 }
  0x35   : > { %s13259_s23 = scalar_lea.vmem %s15785_s2, %s15823_s4 }
  0x36   : > { %v13099_v0 = vmov 0.0  }
  0x37   : > { %450 = vst [vmem:[#allocation2] sm:$0xff] %v13099_v0 }
  0x38   : > { %451 = vst [vmem:[#allocation2 + $0x8] sm:$0xff] %v13099_v0 }
  0x39 PF: > { %v8539_v1 = vld [vmem:[%s13231_s6 + $0x1c0] sm:$0xf]  ;;  %vm486_vm0 = vcmask 1041408   ;;  %vm488_vm1 = vcmask 1045508   ;;  %vm490_vm2 = vcmask 1043456   ;;  %p11897_p3 = scmp.ne.s32.totalorder %s13082_s27, 3 }
  0x3a   : > { %v11963_v2 = vld [vmem:[%s13231_s6 + $0x1dc] sm:$0xf0] }
  0x3b   : > { %v8795_v3 = vld [vmem:[%s13231_s6 + $0x3c0] sm:$0xf]  ;;  %v8540_v4 = vor.u32 %v11963_v2, %v8539_v1 }
  0x3c   : > { %v12027_v5 = vld [vmem:[%s13231_s6 + $0x3dc] sm:$0xf0] }
  0x3d   : > { %v9051_v6 = vld [vmem:[%s13231_s6 + $0x5c0] sm:$0xf]  ;;  %v8796_v8 = vor.u32 %v12027_v5, %v8795_v3  ;;  %5994 = vmatpush.bf16.msra.mxu0 %v8540_v4 }
  0x3e   : > { %v12091_v7 = vld [vmem:[%s13231_s6 + $0x5dc] sm:$0xf0] }
  0x3f   : > { %v9052_v9 = vor.u32 %v12091_v7, %v9051_v6  ;;  %v9307_v10 = vld [vmem:[%s13231_s6 + $0x7c0] sm:$0xf]  ;;  %6007 = vmatpush.bf16.msra.mxu1 %v8796_v8 }
  0x40   : > { %v12155_v11 = vld [vmem:[%s13231_s6 + $0x7dc] sm:$0xf0] }
  0x41   : > { %v8507_v12 = vld [vmem:[%s13231_s6 + $0x180] sm:$0xf]  ;;  %v9308_v13 = vor.u32 %v12155_v11, %v9307_v10  ;;  %6020 = vmatpush.bf16.msra.mxu2 %v9052_v9 }
  0x42   : > { %v11955_v14 = vld [vmem:[%s13231_s6 + $0x19c] sm:$0xf0] }
  0x43   : > { %v8763_v15 = vld [vmem:[%s13231_s6 + $0x380] sm:$0xf]  ;;  %v8508_v17 = vor.u32 %v11955_v14, %v8507_v12  ;;  %6033 = vmatpush.bf16.msra.mxu3 %v9308_v13 }
  0x44   : > { %v12019_v16 = vld [vmem:[%s13231_s6 + $0x39c] sm:$0xf0] }
  0x45   : > { %v8764_v18 = vor.u32 %v12019_v16, %v8763_v15  ;;  %v9019_v19 = vld [vmem:[%s13231_s6 + $0x580] sm:$0xf]  ;;  %5995 = vmatpush.bf16.msra.mxu0 %v8508_v17 }
  0x46   : > { %v12083_v20 = vld [vmem:[%s13231_s6 + $0x59c] sm:$0xf0] }
  0x47   : > { %v9275_v21 = vld [vmem:[%s13231_s6 + $0x780] sm:$0xf]  ;;  %v9020_v22 = vor.u32 %v12083_v20, %v9019_v19  ;;  %6008 = vmatpush.bf16.msra.mxu1 %v8764_v18 }
  0x48   : > { %v12147_v23 = vld [vmem:[%s13231_s6 + $0x79c] sm:$0xf0] }
  0x49   : > { %v8475_v24 = vld [vmem:[%s13231_s6 + $0x140] sm:$0xf]  ;;  %v9276_v26 = vor.u32 %v12147_v23, %v9275_v21  ;;  %6021 = vmatpush.bf16.msra.mxu2 %v9020_v22 }
  0x4a   : > { %v11947_v25 = vld [vmem:[%s13231_s6 + $0x15c] sm:$0xf0] }
  0x4b   : > { %v8731_v27 = vld [vmem:[%s13231_s6 + $0x340] sm:$0xf]  ;;  %v8476_v30 = vor.u32 %v11947_v25, %v8475_v24  ;;  %6034 = vmatpush.bf16.msra.mxu3 %v9276_v26 }
  0x4c   : > { %v12011_v28 = vld [vmem:[%s13231_s6 + $0x35c] sm:$0xf0] }
  0x4d   : > { %v8987_v29 = vld [vmem:[%s13231_s6 + $0x540] sm:$0xf]  ;;  %v8732_v34 = vor.u32 %v12011_v28, %v8731_v27  ;;  %5996 = vmatpush.bf16.msra.mxu0 %v8476_v30 }
  0x4e   : > { %v12075_v31 = vld [vmem:[%s13231_s6 + $0x55c] sm:$0xf0] }
  0x4f   : > { %v9243_v32 = vld [vmem:[%s13231_s6 + $0x740] sm:$0xf]  ;;  %v8988_v35 = vor.u32 %v12075_v31, %v8987_v29  ;;  %6009 = vmatpush.bf16.msra.mxu1 %v8732_v34 }
  0x50   : > { %v12139_v33 = vld [vmem:[%s13231_s6 + $0x75c] sm:$0xf0] }
  0x51   : > { %v8443_v36 = vld [vmem:[%s13231_s6 + $0x100] sm:$0xf]  ;;  %v9244_v39 = vor.u32 %v12139_v33, %v9243_v32  ;;  %6022 = vmatpush.bf16.msra.mxu2 %v8988_v35 }
  0x52   : > { %v11939_v37 = vld [vmem:[%s13231_s6 + $0x11c] sm:$0xf0] }
  0x53   : > { %v8699_v38 = vld [vmem:[%s13231_s6 + $0x300] sm:$0xf]  ;;  %v8444_v45 = vor.u32 %v11939_v37, %v8443_v36  ;;  %6035 = vmatpush.bf16.msra.mxu3 %v9244_v39 }
  0x54   : > { %v12003_v40 = vld [vmem:[%s13231_s6 + $0x31c] sm:$0xf0] }
  0x55   : > { %v8955_v41 = vld [vmem:[%s13231_s6 + $0x500] sm:$0xf]  ;;  %v8700_v46 = vor.u32 %v12003_v40, %v8699_v38  ;;  %5997 = vmatpush.bf16.msra.mxu0 %v8444_v45 }
  0x56   : > { %v12067_v42 = vld [vmem:[%s13231_s6 + $0x51c] sm:$0xf0] }
  0x57   : > { %v9211_v43 = vld [vmem:[%s13231_s6 + $0x700] sm:$0xf]  ;;  %v8956_v47 = vor.u32 %v12067_v42, %v8955_v41  ;;  %6010 = vmatpush.bf16.msra.mxu1 %v8700_v46 }
  0x58   : > { %v12131_v44 = vld [vmem:[%s13231_s6 + $0x71c] sm:$0xf0] }
  0x59   : > { %v8411_v48 = vld [vmem:[%s13231_s6 + $0xc0] sm:$0xf]  ;;  %v9212_v51 = vor.u32 %v12131_v44, %v9211_v43  ;;  %6023 = vmatpush.bf16.msra.mxu2 %v8956_v47 }
  0x5a   : > { %v11931_v49 = vld [vmem:[%s13231_s6 + $0xdc] sm:$0xf0] }
  0x5b   : > { %v8667_v50 = vld [vmem:[%s13231_s6 + $0x2c0] sm:$0xf]  ;;  %v8412_v57 = vor.u32 %v11931_v49, %v8411_v48  ;;  %6036 = vmatpush.bf16.msra.mxu3 %v9212_v51 }
  0x5c   : > { %v11995_v52 = vld [vmem:[%s13231_s6 + $0x2dc] sm:$0xf0] }
  0x5d   : > { %v8923_v53 = vld [vmem:[%s13231_s6 + $0x4c0] sm:$0xf]  ;;  %v8668_v58 = vor.u32 %v11995_v52, %v8667_v50  ;;  %5998 = vmatpush.bf16.msra.mxu0 %v8412_v57 }
  0x5e   : > { %v12059_v54 = vld [vmem:[%s13231_s6 + $0x4dc] sm:$0xf0] }
  0x5f   : > { %v9179_v55 = vld [vmem:[%s13231_s6 + $0x6c0] sm:$0xf]  ;;  %v8924_v59 = vor.u32 %v12059_v54, %v8923_v53  ;;  %6011 = vmatpush.bf16.msra.mxu1 %v8668_v58 }
  0x60   : > { %v12123_v56 = vld [vmem:[%s13231_s6 + $0x6dc] sm:$0xf0] }
  0x61   : > { %v8379_v60 = vld [vmem:[%s13231_s6 + $0x80] sm:$0xf]  ;;  %v9180_v63 = vor.u32 %v12123_v56, %v9179_v55  ;;  %6024 = vmatpush.bf16.msra.mxu2 %v8924_v59 }
  0x62   : > { %v11923_v61 = vld [vmem:[%s13231_s6 + $0x9c] sm:$0xf0] }
  0x63   : > { %v8635_v62 = vld [vmem:[%s13231_s6 + $0x280] sm:$0xf]  ;;  %v8380_v5 = vor.u32 %v11923_v61, %v8379_v60  ;;  %6037 = vmatpush.bf16.msra.mxu3 %v9180_v63 }
  0x64   : > { %v11987_v0 = vld [vmem:[%s13231_s6 + $0x29c] sm:$0xf0] }
  0x65   : > { %v8891_v1 = vld [vmem:[%s13231_s6 + $0x480] sm:$0xf]  ;;  %v8636_v7 = vor.u32 %v11987_v0, %v8635_v62  ;;  %5999 = vmatpush.bf16.msra.mxu0 %v8380_v5 }
  0x66   : > { %v12051_v2 = vld [vmem:[%s13231_s6 + $0x49c] sm:$0xf0] }
  0x67   : > { %v9147_v3 = vld [vmem:[%s13231_s6 + $0x680] sm:$0xf]  ;;  %v8892_v8 = vor.u32 %v12051_v2, %v8891_v1  ;;  %6012 = vmatpush.bf16.msra.mxu1 %v8636_v7 }
  0x68   : > { %v12115_v4 = vld [vmem:[%s13231_s6 + $0x69c] sm:$0xf0] }
  0x69   : > { %v8347_v6 = vld [vmem:[%s13231_s6 + $0x40] sm:$0xf]  ;;  %v9148_v12 = vor.u32 %v12115_v4, %v9147_v3  ;;  %6025 = vmatpush.bf16.msra.mxu2 %v8892_v8 }
  0x6a   : > { %v11915_v9 = vld [vmem:[%s13231_s6 + $0x5c] sm:$0xf0] }
  0x6b   : > { %v8603_v10 = vld [vmem:[%s13231_s6 + $0x240] sm:$0xf]  ;;  %v8348_v19 = vor.u32 %v11915_v9, %v8347_v6  ;;  %6038 = vmatpush.bf16.msra.mxu3 %v9148_v12  ;;  %v13419_v12 = vld [vmem:[%s13249_s5] sm:$0xff] }
  0x6c   : > { %v11979_v11 = vld [vmem:[%s13231_s6 + $0x25c] sm:$0xf0] }
  0x6d   : > { %v8859_v13 = vld [vmem:[%s13231_s6 + $0x440] sm:$0xf]  ;;  %v8604_v24 = vor.u32 %v11979_v11, %v8603_v10  ;;  %6000 = vmatpush.bf16.msra.mxu0 %v8348_v19  ;;  %v13437_v19 = vld [vmem:[%s13254_s20] sm:$0xff] }
  0x6e   : > { %v12043_v14 = vld [vmem:[%s13231_s6 + $0x45c] sm:$0xf0] }
  0x6f   : > { %v9115_v15 = vld [vmem:[%s13231_s6 + $0x640] sm:$0xf]  ;;  %v8860_v25 = vor.u32 %v12043_v14, %v8859_v13  ;;  %6013 = vmatpush.bf16.msra.mxu1 %v8604_v24  ;;  %v464_v24 = vperm.slane %v13437_v19, 2 }
  0x70   : > { %v12107_v16 = vld [vmem:[%s13231_s6 + $0x65c] sm:$0xf0] }
  0x71   : > { %v8315_v17 = vld [vmem:[%s13231_s6] sm:$0xf]  ;;  %v9116_v30 = vor.u32 %v12107_v16, %v9115_v15  ;;  %6026 = vmatpush.bf16.msra.mxu2 %v8860_v25  ;;  %v465_v25 = vperm.slane %v13437_v19, 3 }
  0x72   : > { %v11907_v18 = vld [vmem:[%s13231_s6 + $0x1c] sm:$0xf0] }
  0x73   : > { %v8571_v20 = vld [vmem:[%s13231_s6 + $0x200] sm:$0xf]  ;;  %v8316_v37 = vor.u32 %v11907_v18, %v8315_v17  ;;  %6039 = vmatpush.bf16.msra.mxu3 %v9116_v30  ;;  %v454_v18 = vunpack.c.l.bf16 %v13419_v12 }
  0x74   : > { %v11971_v21 = vld [vmem:[%s13231_s6 + $0x21c] sm:$0xf0] }
  0x75   : > { %v8827_v22 = vld [vmem:[%s13231_s6 + $0x400] sm:$0xf]  ;;  %v8572_v44 = vor.u32 %v11971_v21, %v8571_v20  ;;  %6001 = vmatpush.bf16.msra.mxu0 %v8316_v37  ;;  %v13440_v20 = vld [vmem:[%s13259_s23] sm:$0xff] }
  0x76   : > { %v12035_v23 = vld [vmem:[%s13231_s6 + $0x41c] sm:$0xf0]  ;;  %v514_v30 = vperm.slane %v13440_v20, 3 }
  0x77   : > { %v9083_v26 = vld [vmem:[%s13231_s6 + $0x600] sm:$0xf]  ;;  %v8828_v45 = vor.u32 %v12035_v23, %v8827_v22  ;;  %6014 = vmatpush.bf16.msra.mxu1 %v8572_v44  ;;  %v462_v22 = vperm.slane %v13437_v19, 0  ;;  %v463_v23 = vperm.slane %v13437_v19, 1 }
  0x78   : > { %v12099_v27 = vld [vmem:[%s13231_s6 + $0x61c] sm:$0xf0] }
  0x79   : > { %v9563_v28 = vld [vmem:[%s13231_s6 + $0x9c0] sm:$0xf]  ;;  %v9084_v49 = vor.u32 %v12099_v27, %v9083_v26  ;;  %6027 = vmatpush.bf16.msra.mxu2 %v8828_v45  ;;  %v511_v27 = vperm.slane %v13440_v20, 0 }
  0x7a   : > { %v12219_v29 = vld [vmem:[%s13231_s6 + $0x9dc] sm:$0xf0] }
  0x7b   : > { %v9819_v31 = vld [vmem:[%s13231_s6 + $0xbc0] sm:$0xf]  ;;  %v9564_v50 = vor.u32 %v12219_v29, %v9563_v28  ;;  %6040 = vmatpush.bf16.msra.mxu3 %v9084_v49  ;;  %v512_v28 = vperm.slane %v13440_v20, 1  ;;  %v513_v29 = vperm.slane %v13440_v20, 2  ;;  %v13479_v49 = vld [vmem:[%s13254_s20 + $0x8] sm:$0x3f] }
  0x7c   : > { %v12283_v32 = vld [vmem:[%s13231_s6 + $0xbdc] sm:$0xf0] }
  0x7d   : > { %v10075_v33 = vld [vmem:[%s13231_s6 + $0xdc0] sm:$0xf]  ;;  %v9820_v54 = vor.u32 %v12283_v32, %v9819_v31  ;;  %6046 = vmatpush.bf16.msrb.mxu0 %v9564_v50  ;;  %v476_v32 = vrot.slane %v463_v23, 6  ;;  %v525_v37 = vrot.slane %v512_v28, 6  ;;  %v13482_v50 = vld [vmem:[%s13259_s23 + $0x8] sm:$0x3f] }
  0x7e   : > { %v12347_v34 = vld [vmem:[%s13231_s6 + $0xddc] sm:$0xf0] }
  0x7f   : > { %v10331_v35 = vld [vmem:[%s13231_s6 + $0xfc0] sm:$0xf]  ;;  %v10076_v55 = vor.u32 %v12347_v34, %v10075_v33  ;;  %6059 = vmatpush.bf16.msrb.mxu1 %v9820_v54  ;;  %v477_v33 = vrot.slane %v464_v24, 4  ;;  %v478_v34 = vrot.slane %v465_v25, 2 }
  0x80   : > { %v12411_v36 = vld [vmem:[%s13231_s6 + $0xfdc] sm:$0xf0] }
  0x81   : > { %v13335_v38 = vld [vmem:[%s13231_s6 + $0x980] sm:$0xf]  ;;  %v10332_v59 = vor.u32 %v12411_v36, %v10331_v35  ;;  %6072 = vmatpush.bf16.msrb.mxu2 %v10076_v55 }
  0x82   : > { %v13338_v39 = vld [vmem:[%s13231_s6 + $0x99c] sm:$0xf0] }
  0x83   : > { %v13341_v40 = vld [vmem:[%s13231_s6 + $0xb80] sm:$0xf]  ;;  %v9532_v63 = vor.u32 %v13338_v39, %v13335_v38  ;;  %6085 = vmatpush.bf16.msrb.mxu3 %v10332_v59  ;;  %v526_v38 = vrot.slane %v513_v29, 4  ;;  %v527_v39 = vrot.slane %v514_v30, 2  ;;  %v472_v59 = vperm.slane %v13479_v49, 2 }
  0x84   : > { %v13344_v41 = vld [vmem:[%s13231_s6 + $0xb9c] sm:$0xf0] }
  0x85   : > { %v13347_v42 = vld [vmem:[%s13231_s6 + $0xd80] sm:$0xf]  ;;  %v9788_v0 = vor.u32 %v13344_v41, %v13341_v40  ;;  %6047 = vmatpush.bf16.msrb.mxu0 %v9532_v63 }
  0x86   : > { %v13350_v43 = vld [vmem:[%s13231_s6 + $0xd9c] sm:$0xf0] }
  0x87   : > { %v13353_v46 = vld [vmem:[%s13231_s6 + $0xf80] sm:$0xf]  ;;  %v10044_v1 = vor.u32 %v13350_v43, %v13347_v42  ;;  %6060 = vmatpush.bf16.msrb.mxu1 %v9788_v0  ;;  %v487_v42 = vsel %vm486_vm0, %v462_v22, %v476_v32  ;;  %v489_v43 = vsel %vm488_vm1, %v477_v33, %v478_v34 }
  0x88   : > { %v13356_v47 = vld [vmem:[%s13231_s6 + $0xf9c] sm:$0xf0]  ;;  %v491_v45 = vsel %vm490_vm2, %v487_v42, %v489_v43 }
  0x89   : > { %v13359_v48 = vld [vmem:[%s13231_s6 + $0x940] sm:$0xf]  ;;  %v10300_v4 = vor.u32 %v13356_v47, %v13353_v46  ;;  %6073 = vmatpush.bf16.msrb.mxu2 %v10044_v1  ;;  %v535_v46 = vsel %vm486_vm0, %v511_v27, %v525_v37  ;;  %v536_v47 = vsel %vm488_vm1, %v526_v38, %v527_v39 }
  0x8a   : > { %v13362_v51 = vld [vmem:[%s13231_s6 + $0x95c] sm:$0xf0]  ;;  %v537_v54 = vsel %vm490_vm2, %v535_v46, %v536_v47 }
  0x8b   : > { %v13365_v52 = vld [vmem:[%s13231_s6 + $0xb40] sm:$0xf]  ;;  %v9500_v5 = vor.u32 %v13362_v51, %v13359_v48  ;;  %6086 = vmatpush.bf16.msrb.mxu3 %v10300_v4  ;;  %v13476_v48 = vld [vmem:[%s13249_s5 + $0x8] sm:$0x3f]  ;;  %v519_v4 = vperm.slane %v13482_v50, 0 }
  0x8c   : > { %v13368_v53 = vld [vmem:[%s13231_s6 + $0xb5c] sm:$0xf0]  ;;  %v456_v55 = vunpack.c.l.bf16 %v13476_v48 }
  0x8d   : > { %v13371_v56 = vld [vmem:[%s13231_s6 + $0xd40] sm:$0xf]  ;;  %v9756_v6 = vor.u32 %v13368_v53, %v13365_v52  ;;  %6048 = vmatpush.bf16.msrb.mxu0 %v9500_v5  ;;  %v503_v53 = vmul.f32 %v491_v45, %v454_v18  ;;  %v520_v5 = vperm.slane %v13482_v50, 1 }
  0x8e   : > { %v13374_v57 = vld [vmem:[%s13231_s6 + $0xd5c] sm:$0xf0] }
  0x8f   : > { %v13377_v58 = vld [vmem:[%s13231_s6 + $0xf40] sm:$0xf]  ;;  %v10012_v7 = vor.u32 %v13374_v57, %v13371_v56  ;;  %6061 = vmatpush.bf16.msrb.mxu1 %v9756_v6  ;;  %v470_v57 = vperm.slane %v13479_v49, 0  ;;  %v549_v63 = vadd.f32 %v537_v54, %v503_v53  ;;  %v521_v6 = vperm.slane %v13482_v50, 2 }
  0x90   : > { %v13380_v60 = vld [vmem:[%s13231_s6 + $0xf5c] sm:$0xf0] }
  0x91   : > { %v13383_v61 = vld [vmem:[%s13231_s6 + $0x900] sm:$0xf]  ;;  %v10268_v8 = vor.u32 %v13380_v60, %v13377_v58  ;;  %6074 = vmatpush.bf16.msrb.mxu2 %v10012_v7  ;;  %v471_v58 = vperm.slane %v13479_v49, 1  ;;  %v473_v60 = vperm.slane %v13479_v49, 3  ;;  %vm553_vm3 = vcmp.gt.f32.partialorder %v549_v63, 0.0 }
  0x92   : > { %v13386_v62 = vld [vmem:[%s13231_s6 + $0x91c] sm:$0xf0] }
  0x93   : > { %v13395_v2 = vld [vmem:[%s13231_s6 + $0xb00] sm:$0xf]  ;;  %v9468_v9 = vor.u32 %v13386_v62, %v13383_v61  ;;  %6087 = vmatpush.bf16.msrb.mxu3 %v10268_v8  ;;  %v557_v61 = vmul.f32 0.2, %v549_v63  ;;  %v531_v62 = vrot.slane %v520_v5, 6 }
  0x94   : > { %v13398_v3 = vld [vmem:[%s13231_s6 + $0xb1c] sm:$0xf0] }
  0x95   : > { %v13413_v10 = vld [vmem:[%s13231_s6 + $0xd00] sm:$0xf]  ;;  %v9724_v13 = vor.u32 %v13398_v3, %v13395_v2  ;;  %6049 = vmatpush.bf16.msrb.mxu0 %v9468_v9  ;;  %v532_v9 = vrot.slane %v521_v6, 4  ;;  %v561_v2 = vsel %vm553_vm3, %v549_v63, %v557_v61  ;;  %v541_v25 = vsel %vm486_vm0, %v519_v4, %v531_v62 }
  0x96   : > { %v13416_v11 = vld [vmem:[%s13231_s6 + $0xd1c] sm:$0xf0]  ;;  %571 = vst [vmem:[#allocation1] ss:$4 sm:$0xff] %v561_v2 }
  0x97   : > { %v13424_v14 = vld [vmem:[%s13231_s6 + $0xf00] sm:$0xf]  ;;  %v9980_v35 = vor.u32 %v13416_v11, %v13413_v10  ;;  %v482_v10 = vrot.slane %v471_v58, 6  ;;  %v483_v11 = vrot.slane %v472_v59, 4  ;;  %6062 = vmatpush.bf16.msrb.mxu1 %v9724_v13 }
  0x98   : > { %v13427_v15 = vld [vmem:[%s13231_s6 + $0xf1c] sm:$0xf0] }
  0x99   : > { %v13430_v16 = vld [vmem:[%s13231_s6 + $0x8c0] sm:$0xf]  ;;  %v10236_v40 = vor.u32 %v13427_v15, %v13424_v14  ;;  %v484_v14 = vrot.slane %v473_v60, 2  ;;  %v522_v15 = vperm.slane %v13482_v50, 3  ;;  %6075 = vmatpush.bf16.msrb.mxu2 %v9980_v35 }
  0x9a   : > { %v13433_v17 = vld [vmem:[%s13231_s6 + $0x8dc] sm:$0xf0] }
  0x9b   : > { %v13443_v21 = vld [vmem:[%s13231_s6 + $0xac0] sm:$0xf]  ;;  %v9436_v41 = vor.u32 %v13433_v17, %v13430_v16  ;;  %6088 = vmatpush.bf16.msrb.mxu3 %v10236_v40  ;;  %v496_v22 = vsel %vm488_vm1, %v483_v11, %v484_v14  ;;  %v533_v23 = vrot.slane %v522_v15, 2 }
  0x9c   : > { %v13450_v26 = vld [vmem:[%s13231_s6 + $0xadc] sm:$0xf0] }
  0x9d   : > { %v13457_v31 = vld [vmem:[%s13231_s6 + $0xcc0] sm:$0xf]  ;;  %v9692_v44 = vor.u32 %v13450_v26, %v13443_v21  ;;  %v495_v21 = vsel %vm486_vm0, %v470_v57, %v482_v10  ;;  %6050 = vmatpush.bf16.msrb.mxu0 %v9436_v41  ;;  %v542_v29 = vsel %vm488_vm1, %v532_v9, %v533_v23  ;;  %v576_v4 = vld.sshfl [vmem:[#allocation1 + $0x10] sm:$0xff pattern:$0x73625140] }
  0x9e   : > { %v13462_v36 = vld [vmem:[%s13231_s6 + $0xcdc] sm:$0xf0]  ;;  %v497_v24 = vsel %vm490_vm2, %v495_v21, %v496_v22  ;;  %v543_v34 = vsel %vm490_vm2, %v541_v25, %v542_v29  ;;  %v574_v5 = vld.sshfl [vmem:[#allocation1] sm:$0xff pattern:$0x73625140]  ;;  %v13570_v11 = vpack.c.bf16 %v576_v4, %v576_v4  ;;  %v467_v29 = vperm.slane %v13437_v19, 5 }
  0x9f   : > { %v9948_v51 = vor.u32 %v13462_v36, %v13457_v31  ;;  %v10203_v52 = vld [vmem:[%s13231_s6 + $0xec0] sm:$0xf]  ;;  %v505_v28 = vmul.f32 %v497_v24, %v456_v55  ;;  %6063 = vmatpush.bf16.msrb.mxu1 %v9692_v44  ;;  %v13572_v14 = vpack.c.bf16 %v574_v5, %v574_v5  ;;  %v575_v61 = vld.sshfl [vmem:[#allocation1 + $0x8] sm:$0xff pattern:$0x73625140]  ;;  %v457_v24 = vunpack.c.h.bf16 %v13476_v48 }
  0xa0   : > { %v12379_v56 = vld [vmem:[%s13231_s6 + $0xedc] sm:$0xf0]  ;;  %v13588_v23 = vpack.c.bf16 %v575_v61, %v575_v61  ;;  %6028 = vmatmul.bf16.vlgmr.msra.gmra.mxu2 %v13570_v11 }
  0xa1   : > { %v9403_v0 = vld [vmem:[%s13231_s6 + $0x880] sm:$0xf]  ;;  %v10204_v16 = vor.u32 %v12379_v56, %v10203_v52  ;;  %6076 = vmatpush.bf16.msrb.mxu2 %v9948_v51  ;;  %v551_v39 = vadd.f32 %v543_v34, %v505_v28  ;;  %6002 = vmatmul.bf16.vlgmr.msra.gmra.mxu0 %v13572_v14  ;;  %v466_v28 = vperm.slane %v13437_v19, 4  ;;  %v516_v34 = vperm.slane %v13440_v20, 5 }
  0xa2   : > { %v12179_v1 = vld [vmem:[%s13231_s6 + $0x89c] sm:$0xf0]  ;;  %6015 = vmatmul.bf16.vlgmr.msra.gmra.mxu1 %v13588_v23 }
  0xa3   : > { %v9659_v7 = vld [vmem:[%s13231_s6 + $0xa80] sm:$0xf]  ;;  %v9404_v27 = vor.u32 %v12179_v1, %v9403_v0  ;;  %6089 = vmatpush.bf16.msrb.mxu3 %v10204_v16  ;;  %vm555_vm4 = vcmp.gt.f32.partialorder %v551_v39, 0.0  ;;  %v559_v52 = vmul.f32 0.2, %v551_v39 }
  0xa4   : > { %v12243_v8 = vld [vmem:[%s13231_s6 + $0xa9c] sm:$0xf0] }
  0xa5   : > { %v9915_v17 = vld [vmem:[%s13231_s6 + $0xc80] sm:$0xf]  ;;  %v9660_v32 = vor.u32 %v12243_v8, %v9659_v7  ;;  %6051 = vmatpush.bf16.msrb.mxu0 %v9404_v27  ;;  %v563_v60 = vsel %vm555_vm4, %v551_v39, %v559_v52  ;;  %v518_v39 = vperm.slane %v13440_v20, 7 }
  0xa6   : > { %v12307_v18 = vld [vmem:[%s13231_s6 + $0xc9c] sm:$0xf0] }
  0xa7   : > { %v10171_v3 = vld [vmem:[%s13231_s6 + $0xe80] sm:$0xf]  ;;  %v9916_v33 = vor.u32 %v12307_v18, %v9915_v17  ;;  %6064 = vmatpush.bf16.msrb.mxu1 %v9660_v32  ;;  %v469_v32 = vperm.slane %v13437_v19, 7 }
  0xa8   : > { %v12371_v13 = vld [vmem:[%s13231_s6 + $0xe9c] sm:$0xf0] }
  0xa9   : > { %v9371_v26 = vld [vmem:[%s13231_s6 + $0x840] sm:$0xf]  ;;  %v10172_v38 = vor.u32 %v12371_v13, %v10171_v3  ;;  %6077 = vmatpush.bf16.msrb.mxu2 %v9916_v33  ;;  %v455_v13 = vunpack.c.h.bf16 %v13419_v12  ;;  %v515_v33 = vperm.slane %v13440_v20, 4 }
  0xaa   : > { %v12171_v30 = vld [vmem:[%s13231_s6 + $0x85c] sm:$0xf0] }
  0xab   : > { %v9627_v31 = vld [vmem:[%s13231_s6 + $0xa40] sm:$0xf]  ;;  %v9372_v53 = vor.u32 %v12171_v30, %v9371_v26  ;;  %6090 = vmatpush.bf16.msrb.mxu3 %v10172_v38  ;;  %v468_v30 = vperm.slane %v13437_v19, 6  ;;  %v517_v38 = vperm.slane %v13440_v20, 6 }
  0xac   : > { %v12235_v35 = vld [vmem:[%s13231_s6 + $0xa5c] sm:$0xf0] }
  0xad   : > { %v9883_v36 = vld [vmem:[%s13231_s6 + $0xc40] sm:$0xf]  ;;  %v9628_v55 = vor.u32 %v12235_v35, %v9627_v31  ;;  %6052 = vmatpush.bf16.msrb.mxu0 %v9372_v53  ;;  %v529_v20 = vrot.slane %v517_v38, 4 }
  0xae   : > { %v12299_v37 = vld [vmem:[%s13231_s6 + $0xc5c] sm:$0xf0] }
  0xaf   : > { %v13525_v40 = vld [vmem:[%s13231_s6 + $0xe40] sm:$0xf]  ;;  %v9884_v56 = vor.u32 %v12299_v37, %v9883_v36  ;;  %6065 = vmatpush.bf16.msrb.mxu1 %v9628_v55  ;;  %v479_v36 = vrot.slane %v467_v29, 6  ;;  %v480_v37 = vrot.slane %v468_v30, 4 }
  0xb0   : > { %v13528_v41 = vld [vmem:[%s13231_s6 + $0xe5c] sm:$0xf0] }
  0xb1   : > { %v13531_v42 = vld [vmem:[%s13231_s6 + $0x800] sm:$0xf]  ;;  %v10140_v6 = vor.u32 %v13528_v41, %v13525_v40  ;;  %6078 = vmatpush.bf16.msrb.mxu2 %v9884_v56  ;;  %v481_v41 = vrot.slane %v469_v32, 2 }
  0xb2   : > { %v13534_v43 = vld [vmem:[%s13231_s6 + $0x81c] sm:$0xf0] }
  0xb3   : > { %v13537_v44 = vld [vmem:[%s13231_s6 + $0xa00] sm:$0xf]  ;;  %v9340_v7 = vor.u32 %v13534_v43, %v13531_v42  ;;  %6091 = vmatpush.bf16.msrb.mxu3 %v10140_v6  ;;  %v528_v42 = vrot.slane %v516_v34, 6  ;;  %v493_v52 = vsel %vm488_vm1, %v480_v37, %v481_v41 }
  0xb4   : > { %v13540_v45 = vld [vmem:[%s13231_s6 + $0xa1c] sm:$0xf0] }
  0xb5   : > { %v13543_v46 = vld [vmem:[%s13231_s6 + $0xc00] sm:$0xf]  ;;  %v9596_v8 = vor.u32 %v13540_v45, %v13537_v44  ;;  %6053 = vmatpush.bf16.msrb.mxu0 %v9340_v7  ;;  %v492_v44 = vsel %vm486_vm0, %v466_v28, %v479_v36  ;;  %v530_v45 = vrot.slane %v518_v39, 2  ;;  %v538_v53 = vsel %vm486_vm0, %v515_v33, %v528_v42 }
  0xb6   : > { %v13546_v47 = vld [vmem:[%s13231_s6 + $0xc1c] sm:$0xf0]  ;;  %v523_v7 = vperm.slane %v13482_v50, 4 }
  0xb7   : > { %v13549_v51 = vld [vmem:[%s13231_s6 + $0xe00] sm:$0xf]  ;;  %v9852_v10 = vor.u32 %v13546_v47, %v13543_v46  ;;  %6066 = vmatpush.bf16.msrb.mxu1 %v9596_v8  ;;  %v524_v8 = vperm.slane %v13482_v50, 5 }
  0xb8   : > { %v13552_v54 = vld [vmem:[%s13231_s6 + $0xe1c] sm:$0xf0] }
  0xb9   : > { %v10587_v57 = vld [vmem:[%s13231_s6 + $0x11c0] sm:$0xf]  ;;  %v10108_v62 = vor.u32 %v13552_v54, %v13549_v51  ;;  %6079 = vmatpush.bf16.msrb.mxu2 %v9852_v10 }
  0xba   : > { %v12475_v58 = vld [vmem:[%s13231_s6 + $0x11dc] sm:$0xf0] }
  0xbb   : > { %v10843_v59 = vld [vmem:[%s13231_s6 + $0x13c0] sm:$0xf]  ;;  %v10588_v9 = vor.u32 %v12475_v58, %v10587_v57  ;;  %6092 = vmatpush.bf16.msrb.mxu3 %v10108_v62  ;;  %v494_v57 = vsel %vm490_vm2, %v492_v44, %v493_v52  ;;  %v539_v58 = vsel %vm488_vm1, %v529_v20, %v530_v45 }
  0xbc   : > { %v12539_v63 = vld [vmem:[%s13231_s6 + $0x13dc] sm:$0xf0]  ;;  %v540_v4 = vsel %vm490_vm2, %v538_v53, %v539_v58 }
  0xbd   : > { %v13559_v0 = vld [vmem:[%s13231_s6 + $0x15c0] sm:$0xf]  ;;  %v10844_v25 = vor.u32 %v12539_v63, %v10843_v59  ;;  %6098 = vmatpush.bf16.msra.mxu0 %v10588_v9  ;;  %v474_v63 = vperm.slane %v13479_v49, 4 }
  0xbe   : > { %v12603_v1 = vld [vmem:[%s13231_s6 + $0x15dc] sm:$0xf0] }
  0xbf   : > { %v577_v15 = vld.sshfl [vmem:[#allocation1 + $0x18] sm:$0xff pattern:$0x73625140]  ;;  %v11100_v12 = vor.u32 %v12603_v1, %v13559_v0  ;;  %6111 = vmatpush.bf16.msra.mxu1 %v10844_v25  ;;  %v475_v0 = vperm.slane %v13479_v49, 5  ;;  %v504_v1 = vmul.f32 %v494_v57, %v455_v13 }
  0xc0   : > { %v13577_v16 = vld [vmem:[%s13231_s6 + $0x17c0] sm:$0xf]  ;;  %v13586_v22 = vpack.c.bf16 %v577_v15, %v577_v15  ;;  %582 = vst [vmem:[#allocation1] ss:$4 sm:$0xff] %v563_v60 }
  0xc1   : > { %v12667_v17 = vld [vmem:[%s13231_s6 + $0x17dc] sm:$0xf0]  ;;  %6124 = vmatpush.bf16.msra.mxu2 %v11100_v12  ;;  %v485_v61 = vrot.slane %v475_v0, 6  ;;  %v550_v9 = vadd.f32 %v540_v4, %v504_v1 }
  0xc2   : > { %v13581_v18 = vld [vmem:[%s13231_s6 + $0x1180] sm:$0xf]  ;;  %6041 = vmatmul.bf16.vlgmr.msra.gmra.mxu3 %v13586_v22  ;;  %v11356_v40 = vor.u32 %v12667_v17, %v13577_v16  ;;  %v534_v17 = vrot.slane %v524_v8, 6 }
  0xc3   : > { %v13584_v21 = vld [vmem:[%s13231_s6 + $0x119c] sm:$0xf0]  ;;  %v498_v50 = vsel %vm486_vm0, %v474_v63, %v485_v61  ;;  %vm554_vm5 = vcmp.gt.f32.partialorder %v550_v9, 0.0  ;;  %v558_v25 = vmul.f32 0.2, %v550_v9 }
  0xc4   : > { %v10811_v2 = vld [vmem:[%s13231_s6 + $0x1380] sm:$0xf]  ;;  %v10556_v19 = vor.u32 %v13584_v21, %v13581_v18  ;;  %6137 = vmatpush.bf16.msra.mxu3 %v11356_v40 }
  0xc5   : > { %v12531_v3 = vld [vmem:[%s13231_s6 + $0x139c] sm:$0xf0]  ;;  %v562_v32 = vsel %vm554_vm5, %v550_v9, %v558_v25 }
  0xc6   : > { %v11067_v26 = vld [vmem:[%s13231_s6 + $0x1580] sm:$0xf]  ;;  %v10812_v43 = vor.u32 %v12531_v3, %v10811_v2  ;;  %6099 = vmatpush.bf16.msra.mxu0 %v10556_v19  ;;  %573 = vst [vmem:[#allocation1 + $0x20] ss:$4 sm:$0xff] %v562_v32 }
  0xc7   : > { %v12595_v27 = vld [vmem:[%s13231_s6 + $0x159c] sm:$0xf0] }
  0xc8   : > { %v13605_v31 = vld [vmem:[%s13231_s6 + $0x1780] sm:$0xf]  ;;  %v11068_v47 = vor.u32 %v12595_v27, %v11067_v26  ;;  %6112 = vmatpush.bf16.msra.mxu1 %v10812_v43  ;;  %v506_v26 = vmul.f32 %v498_v50, %v457_v24  ;;  %v544_v27 = vsel %vm486_vm0, %v523_v7, %v534_v17 }
  0xc9   : > { %v12659_v35 = vld [vmem:[%s13231_s6 + $0x179c] sm:$0xf0] }
  0xca   : > { %v10523_v46 = vld [vmem:[%s13231_s6 + $0x1140] sm:$0xf]  ;;  %v11324_v51 = vor.u32 %v12659_v35, %v13605_v31  ;;  %6125 = vmatpush.bf16.msra.mxu2 %v11068_v47  ;;  %v552_v33 = vadd.f32 %v544_v27, %v506_v26 }
  0xcb   : > { %v12459_v54 = vld [vmem:[%s13231_s6 + $0x115c] sm:$0xf0] }
  0xcc   : > { %v10779_v55 = vld [vmem:[%s13231_s6 + $0x1340] sm:$0xf]  ;;  %v10524_v10 = vor.u32 %v12459_v54, %v10523_v46  ;;  %6138 = vmatpush.bf16.msra.mxu3 %v11324_v51  ;;  %v560_v39 = vmul.f32 0.2, %v552_v33  ;;  %vm556_vm6 = vcmp.gt.f32.partialorder %v552_v33, 0.0 }
  0xcd   : > { %v12523_v56 = vld [vmem:[%s13231_s6 + $0x135c] sm:$0xf0]  ;;  %v578_v57 = vld.sshfl [vmem:[#allocation1 + $0x20] sm:$0xff pattern:$0x73625140] }
  0xce   : > { %v11035_v59 = vld [vmem:[%s13231_s6 + $0x1540] sm:$0xf]  ;;  %v10780_v15 = vor.u32 %v12523_v56, %v10779_v55  ;;  %6100 = vmatpush.bf16.msra.mxu0 %v10524_v10  ;;  %v564_v53 = vsel %vm556_vm6, %v552_v33, %v560_v39  ;;  %v580_v56 = vld.sshfl [vmem:[#allocation1 + $0x30] sm:$0xff pattern:$0x73625140]  ;;  %v13668_v1 = vpack.c.bf16 %v578_v57, %v578_v57 }
  0xcf   : > { %v12587_v60 = vld [vmem:[%s13231_s6 + $0x155c] sm:$0xf0]  ;;  %v13666_v0 = vpack.c.bf16 %v580_v56, %v580_v56  ;;  %v11959_v33 = vld [vmem:[%s13231_s6 + $0x1c4] sm:$0xf] }
  0xd0   : > { %v11291_v5 = vld [vmem:[%s13231_s6 + $0x1740] sm:$0xf]  ;;  %v11036_v16 = vor.u32 %v12587_v60, %v11035_v59  ;;  %6113 = vmatpush.bf16.msra.mxu1 %v10780_v15  ;;  %6054 = vmatmul.bf16.vlgmr.msrb.gmra.mxu0 %v13668_v1  ;;  %v12015_v56 = vld [vmem:[%s13231_s6 + $0x384] sm:$0xf] }
  0xd1   : > { %v12651_v6 = vld [vmem:[%s13231_s6 + $0x175c] sm:$0xf0]  ;;  %6080 = vmatmul.bf16.vlgmr.msrb.gmra.mxu2 %v13666_v0  ;;  %v8765_v57 = vld [vmem:[%s13231_s6 + $0x3a0] sm:$0xf0] }
  0xd2   : > { %v10491_v49 = vld [vmem:[%s13231_s6 + $0x1100] sm:$0xf]  ;;  %v11292_v2 = vor.u32 %v12651_v6, %v11291_v5  ;;  %6126 = vmatpush.bf16.msra.mxu2 %v11036_v16  ;;  %v579_v5 = vld.sshfl [vmem:[#allocation1 + $0x28] sm:$0xff pattern:$0x73625140] }
  0xd3   : > { %v12451_v62 = vld [vmem:[%s13231_s6 + $0x111c] sm:$0xf0]  ;;  %v13672_v10 = vpack.c.bf16 %v579_v5, %v579_v5 }
  0xd4   : > { %v10747_v18 = vld [vmem:[%s13231_s6 + $0x1300] sm:$0xf]  ;;  %v10492_v28 = vor.u32 %v12451_v62, %v10491_v49  ;;  %6139 = vmatpush.bf16.msra.mxu3 %v11292_v2 }
  0xd5   : > { %v12515_v21 = vld [vmem:[%s13231_s6 + $0x131c] sm:$0xf0]  ;;  %6067 = vmatmul.bf16.vlgmr.msrb.gmra.mxu1 %v13672_v10 }
  0xd6   : > { %v11003_v3 = vld [vmem:[%s13231_s6 + $0x1500] sm:$0xf]  ;;  %v10748_v29 = vor.u32 %v12515_v21, %v10747_v18  ;;  %6101 = vmatpush.bf16.msra.mxu0 %v10492_v28 }
  0xd7   : > { %v12579_v13 = vld [vmem:[%s13231_s6 + $0x151c] sm:$0xf0] }
  0xd8   : > { %v11259_v30 = vld [vmem:[%s13231_s6 + $0x1700] sm:$0xf]  ;;  %v11004_v34 = vor.u32 %v12579_v13, %v11003_v3  ;;  %6114 = vmatpush.bf16.msra.mxu1 %v10748_v29 }
  0xd9   : > { %v12643_v12 = vld [vmem:[%s13231_s6 + $0x171c] sm:$0xf0] }
  0xda   : > { %v10459_v31 = vld [vmem:[%s13231_s6 + $0x10c0] sm:$0xf]  ;;  %v11260_v38 = vor.u32 %v12643_v12, %v11259_v30  ;;  %6127 = vmatpush.bf16.msra.mxu2 %v11004_v34 }
  0xdb   : > { %v12443_v48 = vld [vmem:[%s13231_s6 + $0x10dc] sm:$0xf0] }
  0xdc   : > { %v10715_v35 = vld [vmem:[%s13231_s6 + $0x12c0] sm:$0xf]  ;;  %v10460_v40 = vor.u32 %v12443_v48, %v10459_v31  ;;  %6140 = vmatpush.bf16.msra.mxu3 %v11260_v38 }
  0xdd   : > { %v12507_v24 = vld [vmem:[%s13231_s6 + $0x12dc] sm:$0xf0] }
  0xde   : > { %v10971_v36 = vld [vmem:[%s13231_s6 + $0x14c0] sm:$0xf]  ;;  %v10716_v19 = vor.u32 %v12507_v24, %v10715_v35  ;;  %6102 = vmatpush.bf16.msra.mxu0 %v10460_v40  ;;  %v8541_v35 = vld [vmem:[%s13231_s6 + $0x1e0] sm:$0xf0] }
  0xdf   : > { %v12571_v37 = vld [vmem:[%s13231_s6 + $0x14dc] sm:$0xf0]  ;;  %v12023_v24 = vld [vmem:[%s13231_s6 + $0x3c4] sm:$0xf] }
  0xe0   : > { %v11227_v41 = vld [vmem:[%s13231_s6 + $0x16c0] sm:$0xf]  ;;  %v10972_v43 = vor.u32 %v12571_v37, %v10971_v36  ;;  %6115 = vmatpush.bf16.msra.mxu1 %v10716_v19  ;;  %v8797_v36 = vld [vmem:[%s13231_s6 + $0x3e0] sm:$0xf0] }
  0xe1   : > { %v12635_v42 = vld [vmem:[%s13231_s6 + $0x16dc] sm:$0xf0]  ;;  %v584_v19 = vld.sshfl [vmem:[#allocation1] sm:$0xff pattern:$0x73625140] }
  0xe2   : > { %v10427_v44 = vld [vmem:[%s13231_s6 + $0x1080] sm:$0xf]  ;;  %v11228_v46 = vor.u32 %v12635_v42, %v11227_v41  ;;  %6128 = vmatpush.bf16.msra.mxu2 %v10972_v43  ;;  %v586_v41 = vld.sshfl [vmem:[#allocation1 + $0x10] sm:$0xff pattern:$0x73625140]  ;;  %v8544_v42 = vor.u32 %v11959_v33, %v8541_v35  ;;  %v8800_v43 = vor.u32 %v12023_v24, %v8797_v36 }
  0xe3   : > { %v12435_v20 = vld [vmem:[%s13231_s6 + $0x109c] sm:$0xf0]  ;;  %v11927_v24 = vld [vmem:[%s13231_s6 + $0xc4] sm:$0xf] }
  0xe4   : > { %v10683_v45 = vld [vmem:[%s13231_s6 + $0x1280] sm:$0xf]  ;;  %v10428_v58 = vor.u32 %v12435_v20, %v10427_v44  ;;  %6141 = vmatpush.bf16.msra.mxu3 %v11228_v46  ;;  %v585_v44 = vld.sshfl [vmem:[#allocation1 + $0x8] sm:$0xff pattern:$0x73625140] }
  0xe5   : > { %v12499_v47 = vld [vmem:[%s13231_s6 + $0x129c] sm:$0xf0]  ;;  %v8413_v36 = vld [vmem:[%s13231_s6 + $0xe0] sm:$0xf0] }
  0xe6   : > { %v10939_v51 = vld [vmem:[%s13231_s6 + $0x1480] sm:$0xf]  ;;  %v10684_v6 = vor.u32 %v12499_v47, %v10683_v45  ;;  %6103 = vmatpush.bf16.msra.mxu0 %v10428_v58  ;;  %v13711_v58 = vpack.c.bf16 %v585_v44, %v585_v44 }
  0xe7   : > { %v12563_v52 = vld [vmem:[%s13231_s6 + $0x149c] sm:$0xf0] }
  0xe8   : > { %v11195_v54 = vld [vmem:[%s13231_s6 + $0x1680] sm:$0xf]  ;;  %v10940_v7 = vor.u32 %v12563_v52, %v10939_v51  ;;  %6116 = vmatpush.bf16.msra.mxu1 %v10684_v6  ;;  %v11951_v52 = vld [vmem:[%s13231_s6 + $0x184] sm:$0xf] }
  0xe9   : > { %v12627_v55 = vld [vmem:[%s13231_s6 + $0x169c] sm:$0xf0] }
  0xea   : > { %v10395_v59 = vld [vmem:[%s13231_s6 + $0x1040] sm:$0xf]  ;;  %v11196_v15 = vor.u32 %v12627_v55, %v11195_v54  ;;  %6129 = vmatpush.bf16.msra.mxu2 %v10940_v7  ;;  %v13706_v54 = vpack.c.bf16 %v586_v41, %v586_v41  ;;  %v8509_v55 = vld [vmem:[%s13231_s6 + $0x1a0] sm:$0xf0]  ;;  %v8768_v7 = vor.u32 %v12015_v56, %v8765_v57 }
  0xeb   : > { %v12427_v60 = vld [vmem:[%s13231_s6 + $0x105c] sm:$0xf0]  ;;  %v8512_v6 = vor.u32 %v11951_v52, %v8509_v55 }
  0xec   : > { %v10651_v63 = vld [vmem:[%s13231_s6 + $0x1240] sm:$0xf]  ;;  %v10396_v18 = vor.u32 %v12427_v60, %v10395_v59  ;;  %6142 = vmatpush.bf16.msra.mxu3 %v11196_v15 }
  0xed   : > { %v581_v4 = vld.sshfl [vmem:[#allocation1 + $0x38] sm:$0xff pattern:$0x73625140] }
  0xee   : > { %v13670_v8 = vpack.c.bf16 %v581_v4, %v581_v4  ;;  %583 = vst [vmem:[#allocation1 + $0x20] ss:$4 sm:$0xff] %v564_v53  ;;  %v12491_v61 = vld [vmem:[%s13231_s6 + $0x125c] sm:$0xf0]  ;;  %6104 = vmatpush.bf16.msra.mxu0 %v10396_v18  ;;  %v13704_v53 = vpack.c.bf16 %v584_v19, %v584_v19 }
  0xef   : > { %v10907_v49 = vld [vmem:[%s13231_s6 + $0x1440] sm:$0xf]  ;;  %v10652_v21 = vor.u32 %v12491_v61, %v10651_v63 }
  0xf0   : > { %v12555_v62 = vld [vmem:[%s13231_s6 + $0x145c] sm:$0xf0]  ;;  %6093 = vmatmul.bf16.vlgmr.msrb.gmra.mxu3 %v13670_v8 }
  0xf1   : > { %v11163_v9 = vld [vmem:[%s13231_s6 + $0x1640] sm:$0xf]  ;;  %v10908_v13 = vor.u32 %v12555_v62, %v10907_v49  ;;  %6117 = vmatpush.bf16.msra.mxu1 %v10652_v21  ;;  %v11943_v49 = vld [vmem:[%s13231_s6 + $0x144] sm:$0xf] }
  0xf2   : > { %v12619_v16 = vld [vmem:[%s13231_s6 + $0x165c] sm:$0xf0]  ;;  %v8477_v62 = vld [vmem:[%s13231_s6 + $0x160] sm:$0xf0] }
  0xf3   : > { %v10363_v17 = vld [vmem:[%s13231_s6 + $0x1000] sm:$0xf]  ;;  %v11164_v25 = vor.u32 %v12619_v16, %v11163_v9  ;;  %6130 = vmatpush.bf16.msra.mxu2 %v10908_v13  ;;  %v12007_v9 = vld [vmem:[%s13231_s6 + $0x344] sm:$0xf] }
  0xf4   : > { %v12419_v2 = vld [vmem:[%s13231_s6 + $0x101c] sm:$0xf0]  ;;  %v8733_v16 = vld [vmem:[%s13231_s6 + $0x360] sm:$0xf0] }
  0xf5   : > { %v10619_v50 = vld [vmem:[%s13231_s6 + $0x1200] sm:$0xf]  ;;  %v10364_v34 = vor.u32 %v12419_v2, %v10363_v17  ;;  %6143 = vmatpush.bf16.msra.mxu3 %v11164_v25 }
  0xf6   : > { %v12483_v3 = vld [vmem:[%s13231_s6 + $0x121c] sm:$0xf0] }
  0xf7   : > { %v10875_v26 = vld [vmem:[%s13231_s6 + $0x1400] sm:$0xf]  ;;  %v10620_v48 = vor.u32 %v12483_v3, %v10619_v50  ;;  %6105 = vmatpush.bf16.msra.mxu0 %v10364_v34  ;;  %v8480_v50 = vor.u32 %v11943_v49, %v8477_v62  ;;  %v8736_v3 = vor.u32 %v12007_v9, %v8733_v16 }
  0xf8   : > { %v12547_v27 = vld [vmem:[%s13231_s6 + $0x141c] sm:$0xf0] }
  0xf9   : > { %v11131_v28 = vld [vmem:[%s13231_s6 + $0x1600] sm:$0xf]  ;;  %v10876_v37 = vor.u32 %v12547_v27, %v10875_v26  ;;  %6118 = vmatpush.bf16.msra.mxu1 %v10620_v48  ;;  %v11935_v26 = vld [vmem:[%s13231_s6 + $0x104] sm:$0xf] }
  0xfa   : > { %v12611_v29 = vld [vmem:[%s13231_s6 + $0x161c] sm:$0xf0]  ;;  %6106 = vmatmul.bf16.vlgmr.msra.gmra.mxu0 %v13704_v53  ;;  %v8445_v27 = vld [vmem:[%s13231_s6 + $0x120] sm:$0xf0] }
  0xfb   : > { %v11611_v30 = vld [vmem:[%s13231_s6 + $0x19c0] sm:$0xf]  ;;  %v11132_v38 = vor.u32 %v12611_v29, %v11131_v28  ;;  %6131 = vmatpush.bf16.msra.mxu2 %v10876_v37  ;;  %v11999_v28 = vld [vmem:[%s13231_s6 + $0x304] sm:$0xf]  ;;  %v8448_v33 = vor.u32 %v11935_v26, %v8445_v27 }
  0xfc   : > { %v12731_v12 = vld [vmem:[%s13231_s6 + $0x19dc] sm:$0xf0]  ;;  %6119 = vmatmul.bf16.vlgmr.msra.gmra.mxu1 %v13711_v58  ;;  %v8701_v29 = vld [vmem:[%s13231_s6 + $0x320] sm:$0xf0] }
  0xfd   : > { %v11867_v31 = vld [vmem:[%s13231_s6 + $0x1bc0] sm:$0xf]  ;;  %v11612_v39 = vor.u32 %v12731_v12, %v11611_v30  ;;  %6144 = vmatpush.bf16.msra.mxu3 %v11132_v38  ;;  %v8704_v34 = vor.u32 %v11999_v28, %v8701_v29  ;;  %v11991_v37 = vld [vmem:[%s13231_s6 + $0x2c4] sm:$0xf] }
  0xfe   : > { %v12795_v32 = vld [vmem:[%s13231_s6 + $0x1bdc] sm:$0xf0]  ;;  %6132 = vmatmul.bf16.vlgmr.msra.gmra.mxu2 %v13706_v54  ;;  %v8669_v38 = vld [vmem:[%s13231_s6 + $0x2e0] sm:$0xf0] }
  0xff   : > { %v11868_v40 = vor.u32 %v12795_v32, %v11867_v31  ;;  %v587_v20 = vld.sshfl [vmem:[#allocation1 + $0x18] sm:$0xff pattern:$0x73625140]  ;;  %6150 = vmatpush.bf16.msrb.mxu0 %v11612_v39  ;;  %6176 = vmatpush.bf16.msrb.mxu2 %v8544_v42  ;;  %v8416_v42 = vor.u32 %v11927_v24, %v8413_v36  ;;  %v588_v24 = vld.sshfl [vmem:[#allocation1 + $0x20] sm:$0xff pattern:$0x73625140] }
 0x100   : > { %v11579_v45 = vld [vmem:[%s13231_s6 + $0x1980] sm:$0xf]  ;;  %v13713_v59 = vpack.c.bf16 %v587_v20, %v587_v20  ;;  %v12087_v26 = vld [vmem:[%s13231_s6 + $0x5c4] sm:$0xf] }
 0x101   : > { %v12723_v46 = vld [vmem:[%s13231_s6 + $0x199c] sm:$0xf0]  ;;  %6163 = vmatpush.bf16.msrb.mxu1 %v11868_v40  ;;  %6189 = vmatpush.bf16.msrb.mxu3 %v8800_v43  ;;  %v8672_v43 = vor.u32 %v11991_v37, %v8669_v38  ;;  %v9053_v27 = vld [vmem:[%s13231_s6 + $0x5e0] sm:$0xf0] }
 0x102   : > { %v11835_v47 = vld [vmem:[%s13231_s6 + $0x1b80] sm:$0xf]  ;;  %v11580_v60 = vor.u32 %v12723_v46, %v11579_v45  ;;  %6145 = vmatmul.bf16.vlgmr.msra.gmra.mxu3 %v13713_v59  ;;  %v11919_v45 = vld [vmem:[%s13231_s6 + $0x84] sm:$0xf]  ;;  %v9056_v37 = vor.u32 %v12087_v26, %v9053_v27 }
 0x103   : > { %v12787_v51 = vld [vmem:[%s13231_s6 + $0x1b9c] sm:$0xf0]  ;;  %6177 = vmatpush.bf16.msrb.mxu2 %v8512_v6  ;;  %v8381_v46 = vld [vmem:[%s13231_s6 + $0xa0] sm:$0xf0] }
 0x104   : > { %v11836_v63 = vor.u32 %v12787_v51, %v11835_v47  ;;  %v11547_v4 = vld [vmem:[%s13231_s6 + $0x1940] sm:$0xf]  ;;  %6151 = vmatpush.bf16.msrb.mxu0 %v11580_v60  ;;  %v11983_v47 = vld [vmem:[%s13231_s6 + $0x284] sm:$0xf]  ;;  %v8384_v60 = vor.u32 %v11919_v45, %v8381_v46 }
 0x105   : > { %v12715_v5 = vld [vmem:[%s13231_s6 + $0x195c] sm:$0xf0]  ;;  %6190 = vmatpush.bf16.msrb.mxu3 %v8768_v7  ;;  %v8637_v51 = vld [vmem:[%s13231_s6 + $0x2a0] sm:$0xf0] }
 0x106   : > { %v11803_v15 = vld [vmem:[%s13231_s6 + $0x1b40] sm:$0xf]  ;;  %6164 = vmatpush.bf16.msrb.mxu1 %v11836_v63  ;;  %v11548_v17 = vor.u32 %v12715_v5, %v11547_v4  ;;  %v8640_v63 = vor.u32 %v11983_v47, %v8637_v51  ;;  %v11911_v6 = vld [vmem:[%s13231_s6 + $0x44] sm:$0xf] }
 0x107   : > { %v12779_v61 = vld [vmem:[%s13231_s6 + $0x1b5c] sm:$0xf0]  ;;  %6178 = vmatpush.bf16.msrb.mxu2 %v8480_v50  ;;  %v8349_v7 = vld [vmem:[%s13231_s6 + $0x60] sm:$0xf0] }
 0x108   : > { %v11804_v18 = vor.u32 %v12779_v61, %v11803_v15  ;;  %v11515_v21 = vld [vmem:[%s13231_s6 + $0x1900] sm:$0xf]  ;;  %6152 = vmatpush.bf16.msrb.mxu0 %v11548_v17  ;;  %v11975_v15 = vld [vmem:[%s13231_s6 + $0x244] sm:$0xf] }
 0x109   : > { %v12707_v2 = vld [vmem:[%s13231_s6 + $0x191c] sm:$0xf0]  ;;  %6191 = vmatpush.bf16.msrb.mxu3 %v8736_v3  ;;  %v8605_v61 = vld [vmem:[%s13231_s6 + $0x260] sm:$0xf0] }
 0x10a   : > { %v11771_v13 = vld [vmem:[%s13231_s6 + $0x1b00] sm:$0xf]  ;;  %6165 = vmatpush.bf16.msrb.mxu1 %v11804_v18  ;;  %v11516_v30 = vor.u32 %v12707_v2, %v11515_v21  ;;  %v8352_v21 = vor.u32 %v11911_v6, %v8349_v7  ;;  %v8608_v2 = vor.u32 %v11975_v15, %v8605_v61  ;;  %v11903_v50 = vld [vmem:[%s13231_s6 + $0x4] sm:$0xf] }
 0x10b   : > { %v12771_v25 = vld [vmem:[%s13231_s6 + $0x1b1c] sm:$0xf0]  ;;  %6179 = vmatpush.bf16.msrb.mxu2 %v8448_v33  ;;  %v8317_v3 = vld [vmem:[%s13231_s6 + $0x20] sm:$0xf0] }
 0x10c   : > { %v11772_v12 = vor.u32 %v12771_v25, %v11771_v13  ;;  %v11483_v31 = vld [vmem:[%s13231_s6 + $0x18c0] sm:$0xf]  ;;  %6153 = vmatpush.bf16.msrb.mxu0 %v11516_v30  ;;  %v11967_v13 = vld [vmem:[%s13231_s6 + $0x204] sm:$0xf] }
 0x10d   : > { %v12699_v32 = vld [vmem:[%s13231_s6 + $0x18dc] sm:$0xf0]  ;;  %6192 = vmatpush.bf16.msrb.mxu3 %v8704_v34  ;;  %v8573_v25 = vld [vmem:[%s13231_s6 + $0x220] sm:$0xf0] }
 0x10e   : > { %v11739_v48 = vld [vmem:[%s13231_s6 + $0x1ac0] sm:$0xf]  ;;  %6166 = vmatpush.bf16.msrb.mxu1 %v11772_v12  ;;  %v11484_v39 = vor.u32 %v12699_v32, %v11483_v31  ;;  %v12151_v28 = vld [vmem:[%s13231_s6 + $0x7c4] sm:$0xf] }
 0x10f   : > { %v12763_v35 = vld [vmem:[%s13231_s6 + $0x1adc] sm:$0xf0]  ;;  %6180 = vmatpush.bf16.msrb.mxu2 %v8416_v42  ;;  %v9309_v29 = vld [vmem:[%s13231_s6 + $0x7e0] sm:$0xf0] }
 0x110   : > { %v11740_v40 = vor.u32 %v12763_v35, %v11739_v48  ;;  %v11451_v19 = vld [vmem:[%s13231_s6 + $0x1880] sm:$0xf]  ;;  %6154 = vmatpush.bf16.msrb.mxu0 %v11484_v39  ;;  %v12215_v30 = vld [vmem:[%s13231_s6 + $0x9c4] sm:$0xf]  ;;  %v8320_v48 = vor.u32 %v11903_v50, %v8317_v3  ;;  %v8576_v35 = vor.u32 %v11967_v13, %v8573_v25  ;;  %v9312_v38 = vor.u32 %v12151_v28, %v9309_v29 }
 0x111   : > { %v12691_v41 = vld [vmem:[%s13231_s6 + $0x189c] sm:$0xf0]  ;;  %6193 = vmatpush.bf16.msrb.mxu3 %v8672_v43  ;;  %v9565_v32 = vld [vmem:[%s13231_s6 + $0x9e0] sm:$0xf0] }
 0x112   : > { %v11707_v44 = vld [vmem:[%s13231_s6 + $0x1a80] sm:$0xf]  ;;  %6167 = vmatpush.bf16.msrb.mxu1 %v11740_v40  ;;  %v11452_v52 = vor.u32 %v12691_v41, %v11451_v19  ;;  %v12279_v33 = vld [vmem:[%s13231_s6 + $0xbc4] sm:$0xf]  ;;  %v9568_v19 = vor.u32 %v12215_v30, %v9565_v32 }
 0x113   : > { %v12755_v20 = vld [vmem:[%s13231_s6 + $0x1a9c] sm:$0xf0]  ;;  %6181 = vmatpush.bf16.msrb.mxu2 %v8384_v60  ;;  %v9821_v34 = vld [vmem:[%s13231_s6 + $0xbe0] sm:$0xf0] }
 0x114   : > { %v11708_v55 = vor.u32 %v12755_v20, %v11707_v44  ;;  %v11419_v56 = vld [vmem:[%s13231_s6 + $0x1840] sm:$0xf]  ;;  %6155 = vmatpush.bf16.msrb.mxu0 %v11452_v52  ;;  %v589_v36 = vld.sshfl [vmem:[#allocation1 + $0x28] sm:$0xff pattern:$0x73625140]  ;;  %v9824_v41 = vor.u32 %v12279_v33, %v9821_v34  ;;  %v13780_v20 = vpack.c.bf16 %v588_v24, %v588_v24 }
 0x115   : > { %v12683_v57 = vld [vmem:[%s13231_s6 + $0x185c] sm:$0xf0]  ;;  %6194 = vmatpush.bf16.msrb.mxu3 %v8640_v63  ;;  %v12079_v39 = vld [vmem:[%s13231_s6 + $0x584] sm:$0xf]  ;;  %v13782_v45 = vpack.c.bf16 %v589_v36, %v589_v36 }
 0x116   : > { %v11675_v4 = vld [vmem:[%s13231_s6 + $0x1a40] sm:$0xf]  ;;  %6168 = vmatpush.bf16.msrb.mxu1 %v11708_v55  ;;  %v11420_v62 = vor.u32 %v12683_v57, %v11419_v56  ;;  %v9021_v40 = vld [vmem:[%s13231_s6 + $0x5a0] sm:$0xf0] }
 0x117   : > { %v12747_v5 = vld [vmem:[%s13231_s6 + $0x1a5c] sm:$0xf0]  ;;  %6182 = vmatpush.bf16.msrb.mxu2 %v8352_v21  ;;  %v12143_v42 = vld [vmem:[%s13231_s6 + $0x784] sm:$0xf]  ;;  %v9024_v52 = vor.u32 %v12079_v39, %v9021_v40 }
 0x118   : > { %v11387_v49 = vld [vmem:[%s13231_s6 + $0x1800] sm:$0xf]  ;;  %v11676_v9 = vor.u32 %v12747_v5, %v11675_v4  ;;  %6156 = vmatpush.bf16.msrb.mxu0 %v11420_v62  ;;  %v9277_v43 = vld [vmem:[%s13231_s6 + $0x7a0] sm:$0xf0] }
 0x119   : > { %v12675_v16 = vld [vmem:[%s13231_s6 + $0x181c] sm:$0xf0]  ;;  %6195 = vmatpush.bf16.msrb.mxu3 %v8608_v2  ;;  %v12207_v44 = vld [vmem:[%s13231_s6 + $0x984] sm:$0xf]  ;;  %v9280_v55 = vor.u32 %v12143_v42, %v9277_v43 }
 0x11a   : > { %v11643_v17 = vld [vmem:[%s13231_s6 + $0x1a00] sm:$0xf]  ;;  %6169 = vmatpush.bf16.msrb.mxu1 %v11676_v9  ;;  %v11388_v12 = vor.u32 %v12675_v16, %v11387_v49  ;;  %v9533_v46 = vld [vmem:[%s13231_s6 + $0x9a0] sm:$0xf0] }
 0x11b   : > { %v12739_v18 = vld [vmem:[%s13231_s6 + $0x1a1c] sm:$0xf0]  ;;  %v12271_v47 = vld [vmem:[%s13231_s6 + $0xb84] sm:$0xf]  ;;  %6183 = vmatpush.bf16.msrb.mxu2 %v8320_v48  ;;  %v9536_v60 = vor.u32 %v12207_v44, %v9533_v46 }
 0x11c   : > { %v11644_v31 = vor.u32 %v12739_v18, %v11643_v17  ;;  %6157 = vmatpush.bf16.msrb.mxu0 %v11388_v12  ;;  %v9789_v51 = vld [vmem:[%s13231_s6 + $0xba0] sm:$0xf0] }
 0x11d   : > { %6196 = vmatpush.bf16.msrb.mxu3 %v8576_v35  ;;  %v12071_v56 = vld [vmem:[%s13231_s6 + $0x544] sm:$0xf]  ;;  %v9792_v63 = vor.u32 %v12271_v47, %v9789_v51 }
 0x11e   : > { %6170 = vmatpush.bf16.msrb.mxu1 %v11644_v31  ;;  %v8989_v57 = vld [vmem:[%s13231_s6 + $0x560] sm:$0xf0]  ;;  %6184 = vmatmul.bf16.vlgmr.msrb.gmra.mxu2 %v13572_v14 }
 0x11f   : > { %6228 = vmatpush.bf16.msra.mxu2 %v9568_v19  ;;  %v12135_v4 = vld [vmem:[%s13231_s6 + $0x744] sm:$0xf]  ;;  %6158 = vmatmul.bf16.vlgmr.msrb.gmra.mxu0 %v13780_v20  ;;  %v8992_v49 = vor.u32 %v12071_v56, %v8989_v57 }
 0x120   : > { %6202 = vmatpush.bf16.msra.mxu0 %v9056_v37  ;;  %v9245_v5 = vld [vmem:[%s13231_s6 + $0x760] sm:$0xf0]  ;;  %6197 = vmatmul.bf16.vlgmr.msrb.gmra.mxu3 %v13588_v23 }
 0x121   : > { %6241 = vmatpush.bf16.msra.mxu3 %v9824_v41  ;;  %v12199_v6 = vld [vmem:[%s13231_s6 + $0x944] sm:$0xf]  ;;  %6171 = vmatmul.bf16.vlgmr.msrb.gmra.mxu1 %v13782_v45  ;;  %v9248_v62 = vor.u32 %v12135_v4, %v9245_v5 }
 0x122   : > { %6215 = vmatpush.bf16.msra.mxu1 %v9312_v38  ;;  %v9501_v7 = vld [vmem:[%s13231_s6 + $0x960] sm:$0xf0] }
 0x123   : > { %v12263_v15 = vld [vmem:[%s13231_s6 + $0xb44] sm:$0xf]  ;;  %6229 = vmatpush.bf16.msra.mxu2 %v9536_v60  ;;  %v9504_v17 = vor.u32 %v12199_v6, %v9501_v7 }
 0x124   : > { %v9757_v61 = vld [vmem:[%s13231_s6 + $0xb60] sm:$0xf0]  ;;  %6203 = vmatpush.bf16.msra.mxu0 %v9024_v52 }
 0x125   : > { %v12063_v9 = vld [vmem:[%s13231_s6 + $0x504] sm:$0xf]  ;;  %6242 = vmatpush.bf16.msra.mxu3 %v9792_v63  ;;  %v9760_v18 = vor.u32 %v12263_v15, %v9757_v61 }
 0x126   : > { %6216 = vmatpush.bf16.msra.mxu1 %v9280_v55  ;;  %v8957_v16 = vld [vmem:[%s13231_s6 + $0x520] sm:$0xf0] }
 0x127   : > { %v12127_v21 = vld [vmem:[%s13231_s6 + $0x704] sm:$0xf]  ;;  %v8960_v26 = vor.u32 %v12063_v9, %v8957_v16  ;;  %6230 = vmatpush.bf16.msra.mxu2 %v9504_v17 }
 0x128   : > { %v9213_v2 = vld [vmem:[%s13231_s6 + $0x720] sm:$0xf0]  ;;  %6204 = vmatpush.bf16.msra.mxu0 %v8992_v49 }
 0x129   : > { %v12191_v50 = vld [vmem:[%s13231_s6 + $0x904] sm:$0xf]  ;;  %v9216_v27 = vor.u32 %v12127_v21, %v9213_v2  ;;  %6243 = vmatpush.bf16.msra.mxu3 %v9760_v18 }
 0x12a   : > { %v9469_v3 = vld [vmem:[%s13231_s6 + $0x920] sm:$0xf0]  ;;  %6217 = vmatpush.bf16.msra.mxu1 %v9248_v62 }
 0x12b   : > { %v12255_v13 = vld [vmem:[%s13231_s6 + $0xb04] sm:$0xf]  ;;  %v9472_v30 = vor.u32 %v12191_v50, %v9469_v3 }
 0x12c   : > { %v9725_v25 = vld [vmem:[%s13231_s6 + $0xb20] sm:$0xf0]  ;;  %6205 = vmatpush.bf16.msra.mxu0 %v8960_v26 }
 0x12d   : > { %v12055_v28 = vld [vmem:[%s13231_s6 + $0x4c4] sm:$0xf]  ;;  %v9728_v12 = vor.u32 %v12255_v13, %v9725_v25  ;;  %6231 = vmatpush.bf16.msra.mxu2 %v9472_v30 }
 0x12e   : > { %v8925_v29 = vld [vmem:[%s13231_s6 + $0x4e0] sm:$0xf0]  ;;  %6218 = vmatpush.bf16.msra.mxu1 %v9216_v27 }
 0x12f   : > { %v12119_v31 = vld [vmem:[%s13231_s6 + $0x6c4] sm:$0xf]  ;;  %v8928_v24 = vor.u32 %v12055_v28, %v8925_v29  ;;  %6244 = vmatpush.bf16.msra.mxu3 %v9728_v12 }
 0x130   : > { %v9181_v32 = vld [vmem:[%s13231_s6 + $0x6e0] sm:$0xf0] }
 0x131   : > { %v12183_v33 = vld [vmem:[%s13231_s6 + $0x8c4] sm:$0xf]  ;;  %v9184_v36 = vor.u32 %v12119_v31, %v9181_v32  ;;  %6206 = vmatpush.bf16.msra.mxu0 %v8928_v24 }
 0x132   : > { %v9437_v34 = vld [vmem:[%s13231_s6 + $0x8e0] sm:$0xf0] }
 0x133   : > { %v12247_v48 = vld [vmem:[%s13231_s6 + $0xac4] sm:$0xf]  ;;  %v9440_v39 = vor.u32 %v12183_v33, %v9437_v34  ;;  %6219 = vmatpush.bf16.msra.mxu1 %v9184_v36 }
 0x134   : > { %v9693_v35 = vld [vmem:[%s13231_s6 + $0xae0] sm:$0xf0] }
 0x135   : > { %v12047_v37 = vld [vmem:[%s13231_s6 + $0x484] sm:$0xf]  ;;  %v9696_v40 = vor.u32 %v12247_v48, %v9693_v35  ;;  %6232 = vmatpush.bf16.msra.mxu2 %v9440_v39 }
 0x136   : > { %v8893_v38 = vld [vmem:[%s13231_s6 + $0x4a0] sm:$0xf0] }
 0x137   : > { %v12111_v19 = vld [vmem:[%s13231_s6 + $0x684] sm:$0xf]  ;;  %v8896_v47 = vor.u32 %v12047_v37, %v8893_v38  ;;  %6245 = vmatpush.bf16.msra.mxu3 %v9696_v40 }
 0x138   : > { %v9149_v41 = vld [vmem:[%s13231_s6 + $0x6a0] sm:$0xf0] }
 0x139   : > { %v12175_v42 = vld [vmem:[%s13231_s6 + $0x884] sm:$0xf]  ;;  %v9152_v51 = vor.u32 %v12111_v19, %v9149_v41  ;;  %6207 = vmatpush.bf16.msra.mxu0 %v8896_v47 }
 0x13a   : > { %v9405_v43 = vld [vmem:[%s13231_s6 + $0x8a0] sm:$0xf0] }
 0x13b   : > { %v12239_v44 = vld [vmem:[%s13231_s6 + $0xa84] sm:$0xf]  ;;  %v9408_v56 = vor.u32 %v12175_v42, %v9405_v43  ;;  %6220 = vmatpush.bf16.msra.mxu1 %v9152_v51 }
 0x13c   : > { %v9661_v46 = vld [vmem:[%s13231_s6 + $0xaa0] sm:$0xf0] }
 0x13d   : > { %v12039_v52 = vld [vmem:[%s13231_s6 + $0x444] sm:$0xf]  ;;  %v9664_v57 = vor.u32 %v12239_v44, %v9661_v46  ;;  %6233 = vmatpush.bf16.msra.mxu2 %v9408_v56 }
 0x13e   : > { %v8861_v55 = vld [vmem:[%s13231_s6 + $0x460] sm:$0xf0] }
 0x13f   : > { %v12103_v60 = vld [vmem:[%s13231_s6 + $0x644] sm:$0xf]  ;;  %v8864_v61 = vor.u32 %v12039_v52, %v8861_v55  ;;  %6246 = vmatpush.bf16.msra.mxu3 %v9664_v57 }
 0x140   : > { %v9117_v63 = vld [vmem:[%s13231_s6 + $0x660] sm:$0xf0] }
 0x141   : > { %v12167_v4 = vld [vmem:[%s13231_s6 + $0x844] sm:$0xf]  ;;  %v9120_v49 = vor.u32 %v12103_v60, %v9117_v63  ;;  %6208 = vmatpush.bf16.msra.mxu0 %v8864_v61 }
 0x142   : > { %v9373_v5 = vld [vmem:[%s13231_s6 + $0x860] sm:$0xf0] }
 0x143   : > { %v12231_v6 = vld [vmem:[%s13231_s6 + $0xa44] sm:$0xf]  ;;  %v9376_v17 = vor.u32 %v12167_v4, %v9373_v5  ;;  %6221 = vmatpush.bf16.msra.mxu1 %v9120_v49 }
 0x144   : > { %v9629_v7 = vld [vmem:[%s13231_s6 + $0xa60] sm:$0xf0] }
 0x145   : > { %v12031_v15 = vld [vmem:[%s13231_s6 + $0x404] sm:$0xf]  ;;  %v9632_v18 = vor.u32 %v12231_v6, %v9629_v7  ;;  %6234 = vmatpush.bf16.msra.mxu2 %v9376_v17 }
 0x146   : > { %v8829_v62 = vld [vmem:[%s13231_s6 + $0x420] sm:$0xf0] }
 0x147   : > { %v12095_v9 = vld [vmem:[%s13231_s6 + $0x604] sm:$0xf]  ;;  %v8832_v29 = vor.u32 %v12031_v15, %v8829_v62  ;;  %6247 = vmatpush.bf16.msra.mxu3 %v9632_v18 }
 0x148   : > { %v9085_v16 = vld [vmem:[%s13231_s6 + $0x620] sm:$0xf0] }
 0x149   : > { %v12159_v21 = vld [vmem:[%s13231_s6 + $0x804] sm:$0xf]  ;;  %v9088_v30 = vor.u32 %v12095_v9, %v9085_v16  ;;  %6209 = vmatpush.bf16.msra.mxu0 %v8832_v29 }
 0x14a   : > { %v9341_v2 = vld [vmem:[%s13231_s6 + $0x820] sm:$0xf0] }
 0x14b   : > { %v12223_v50 = vld [vmem:[%s13231_s6 + $0xa04] sm:$0xf]  ;;  %v9344_v33 = vor.u32 %v12159_v21, %v9341_v2  ;;  %6222 = vmatpush.bf16.msra.mxu1 %v9088_v30 }
 0x14c   : > { %v9597_v3 = vld [vmem:[%s13231_s6 + $0xa20] sm:$0xf0]  ;;  %6210 = vmatmul.bf16.vlgmr.msra.gmra.mxu0 %v13570_v11 }
 0x14d   : > { %v12343_v13 = vld [vmem:[%s13231_s6 + $0xdc4] sm:$0xf]  ;;  %v9600_v34 = vor.u32 %v12223_v50, %v9597_v3  ;;  %6235 = vmatpush.bf16.msra.mxu2 %v9344_v33 }
 0x14e   : > { %v10077_v25 = vld [vmem:[%s13231_s6 + $0xde0] sm:$0xf0]  ;;  %6223 = vmatmul.bf16.vlgmr.msra.gmra.mxu1 %v13586_v22 }
 0x14f   : > { %v12407_v26 = vld [vmem:[%s13231_s6 + $0xfc4] sm:$0xf]  ;;  %v10080_v48 = vor.u32 %v12343_v13, %v10077_v25  ;;  %6248 = vmatpush.bf16.msra.mxu3 %v9600_v34 }
 0x150   : > { %v10333_v27 = vld [vmem:[%s13231_s6 + $0xfe0] sm:$0xf0]  ;;  %6236 = vmatmul.bf16.vlgmr.msra.gmra.mxu2 %v13668_v1 }
 0x151   : > { %v12471_v28 = vld [vmem:[%s13231_s6 + $0x11c4] sm:$0xf]  ;;  %v10336_v35 = vor.u32 %v12407_v26, %v10333_v27  ;;  %6254 = vmatpush.bf16.msrb.mxu0 %v10080_v48 }
 0x152   : > { %v10589_v12 = vld [vmem:[%s13231_s6 + $0x11e0] sm:$0xf0]  ;;  %6249 = vmatmul.bf16.vlgmr.msra.gmra.mxu3 %v13672_v10 }
 0x153   : > { %v12535_v31 = vld [vmem:[%s13231_s6 + $0x13c4] sm:$0xf]  ;;  %v10592_v37 = vor.u32 %v12471_v28, %v10589_v12  ;;  %6267 = vmatpush.bf16.msrb.mxu1 %v10336_v35 }
 0x154   : > { %v10845_v32 = vld [vmem:[%s13231_s6 + $0x13e0] sm:$0xf0] }
 0x155   : > { %v12335_v24 = vld [vmem:[%s13231_s6 + $0xd84] sm:$0xf]  ;;  %v10848_v38 = vor.u32 %v12535_v31, %v10845_v32  ;;  %6280 = vmatpush.bf16.msrb.mxu2 %v10592_v37 }
 0x156   : > { %v10045_v36 = vld [vmem:[%s13231_s6 + $0xda0] sm:$0xf0] }
 0x157   : > { %v12399_v39 = vld [vmem:[%s13231_s6 + $0xf84] sm:$0xf]  ;;  %v10048_v44 = vor.u32 %v12335_v24, %v10045_v36  ;;  %6293 = vmatpush.bf16.msrb.mxu3 %v10848_v38 }
 0x158   : > { %v10301_v40 = vld [vmem:[%s13231_s6 + $0xfa0] sm:$0xf0] }
 0x159   : > { %v12463_v19 = vld [vmem:[%s13231_s6 + $0x1184] sm:$0xf]  ;;  %v10304_v46 = vor.u32 %v12399_v39, %v10301_v40  ;;  %6255 = vmatpush.bf16.msrb.mxu0 %v10048_v44 }
 0x15a   : > { %v10557_v41 = vld [vmem:[%s13231_s6 + $0x11a0] sm:$0xf0] }
 0x15b   : > { %v12527_v42 = vld [vmem:[%s13231_s6 + $0x1384] sm:$0xf]  ;;  %v10560_v52 = vor.u32 %v12463_v19, %v10557_v41  ;;  %6268 = vmatpush.bf16.msrb.mxu1 %v10304_v46 }
 0x15c   : > { %v10813_v43 = vld [vmem:[%s13231_s6 + $0x13a0] sm:$0xf0] }
 0x15d   : > { %v12327_v47 = vld [vmem:[%s13231_s6 + $0xd44] sm:$0xf]  ;;  %v10816_v55 = vor.u32 %v12527_v42, %v10813_v43  ;;  %6281 = vmatpush.bf16.msrb.mxu2 %v10560_v52 }
 0x15e   : > { %v10013_v51 = vld [vmem:[%s13231_s6 + $0xd60] sm:$0xf0] }
 0x15f   : > { %v12391_v56 = vld [vmem:[%s13231_s6 + $0xf44] sm:$0xf]  ;;  %v10016_v6 = vor.u32 %v12327_v47, %v10013_v51  ;;  %6294 = vmatpush.bf16.msrb.mxu3 %v10816_v55 }
 0x160   : > { %v10269_v57 = vld [vmem:[%s13231_s6 + $0xf60] sm:$0xf0] }
 0x161   : > { %v12455_v60 = vld [vmem:[%s13231_s6 + $0x1144] sm:$0xf]  ;;  %v10272_v7 = vor.u32 %v12391_v56, %v10269_v57  ;;  %6256 = vmatpush.bf16.msrb.mxu0 %v10016_v6 }
 0x162   : > { %v10525_v63 = vld [vmem:[%s13231_s6 + $0x1160] sm:$0xf0] }
 0x163   : > { %v12519_v4 = vld [vmem:[%s13231_s6 + $0x1344] sm:$0xf]  ;;  %v10528_v49 = vor.u32 %v12455_v60, %v10525_v63  ;;  %6269 = vmatpush.bf16.msrb.mxu1 %v10272_v7 }
 0x164   : > { %v10781_v5 = vld [vmem:[%s13231_s6 + $0x1360] sm:$0xf0] }
 0x165   : > { %v12319_v15 = vld [vmem:[%s13231_s6 + $0xd04] sm:$0xf]  ;;  %v10784_v62 = vor.u32 %v12519_v4, %v10781_v5  ;;  %6282 = vmatpush.bf16.msrb.mxu2 %v10528_v49 }
 0x166   : > { %v9981_v61 = vld [vmem:[%s13231_s6 + $0xd20] sm:$0xf0] }
 0x167   : > { %v12383_v9 = vld [vmem:[%s13231_s6 + $0xf04] sm:$0xf]  ;;  %v9984_v50 = vor.u32 %v12319_v15, %v9981_v61  ;;  %6295 = vmatpush.bf16.msrb.mxu3 %v10784_v62 }
 0x168   : > { %v10237_v16 = vld [vmem:[%s13231_s6 + $0xf20] sm:$0xf0] }
 0x169   : > { %v12447_v17 = vld [vmem:[%s13231_s6 + $0x1104] sm:$0xf]  ;;  %v10240_v3 = vor.u32 %v12383_v9, %v10237_v16  ;;  %6257 = vmatpush.bf16.msrb.mxu0 %v9984_v50 }
 0x16a   : > { %v10493_v18 = vld [vmem:[%s13231_s6 + $0x1120] sm:$0xf0] }
 0x16b   : > { %v12511_v21 = vld [vmem:[%s13231_s6 + $0x1304] sm:$0xf]  ;;  %v10496_v26 = vor.u32 %v12447_v17, %v10493_v18  ;;  %6270 = vmatpush.bf16.msrb.mxu1 %v10240_v3 }
 0x16c   : > { %v10749_v2 = vld [vmem:[%s13231_s6 + $0x1320] sm:$0xf0] }
 0x16d   : > { %v12311_v13 = vld [vmem:[%s13231_s6 + $0xcc4] sm:$0xf]  ;;  %v10752_v27 = vor.u32 %v12511_v21, %v10749_v2  ;;  %6283 = vmatpush.bf16.msrb.mxu2 %v10496_v26 }
 0x16e   : > { %v9949_v25 = vld [vmem:[%s13231_s6 + $0xce0] sm:$0xf0] }
 0x16f   : > { %v12375_v28 = vld [vmem:[%s13231_s6 + $0xec4] sm:$0xf]  ;;  %v9952_v33 = vor.u32 %v12311_v13, %v9949_v25  ;;  %6296 = vmatpush.bf16.msrb.mxu3 %v10752_v27 }
 0x170   : > { %v10205_v29 = vld [vmem:[%s13231_s6 + $0xee0] sm:$0xf0] }
 0x171   : > { %v12439_v30 = vld [vmem:[%s13231_s6 + $0x10c4] sm:$0xf]  ;;  %v10208_v34 = vor.u32 %v12375_v28, %v10205_v29  ;;  %6258 = vmatpush.bf16.msrb.mxu0 %v9952_v33 }
 0x172   : > { %v10461_v12 = vld [vmem:[%s13231_s6 + $0x10e0] sm:$0xf0] }
 0x173   : > { %v12503_v31 = vld [vmem:[%s13231_s6 + $0x12c4] sm:$0xf]  ;;  %v10464_v24 = vor.u32 %v12439_v30, %v10461_v12  ;;  %6271 = vmatpush.bf16.msrb.mxu1 %v10208_v34 }
 0x174   : > { %v10717_v32 = vld [vmem:[%s13231_s6 + $0x12e0] sm:$0xf0] }
 0x175   : > { %v12303_v48 = vld [vmem:[%s13231_s6 + $0xc84] sm:$0xf]  ;;  %v10720_v36 = vor.u32 %v12503_v31, %v10717_v32  ;;  %6284 = vmatpush.bf16.msrb.mxu2 %v10464_v24  ;;  %v6003_v24 = vpop.f32.mrf.mxu0 }
 0x176   : > { %v9917_v35 = vld [vmem:[%s13231_s6 + $0xca0] sm:$0xf0] }
 0x177   : > { %v12367_v37 = vld [vmem:[%s13231_s6 + $0xe84] sm:$0xf]  ;;  %v9920_v42 = vor.u32 %v12303_v48, %v9917_v35  ;;  %6297 = vmatpush.bf16.msrb.mxu3 %v10720_v36 }
 0x178   : > { %v10173_v38 = vld [vmem:[%s13231_s6 + $0xea0] sm:$0xf0] }
 0x179   : > { %v12431_v39 = vld [vmem:[%s13231_s6 + $0x1084] sm:$0xf]  ;;  %v10176_v43 = vor.u32 %v12367_v37, %v10173_v38  ;;  %6259 = vmatpush.bf16.msrb.mxu0 %v9920_v42 }
 0x17a   : > { %v10429_v40 = vld [vmem:[%s13231_s6 + $0x10a0] sm:$0xf0] }
 0x17b   : > { %v12495_v19 = vld [vmem:[%s13231_s6 + $0x1284] sm:$0xf]  ;;  %v10432_v47 = vor.u32 %v12431_v39, %v10429_v40  ;;  %6272 = vmatpush.bf16.msrb.mxu1 %v10176_v43  ;;  %v6016_v39 = vpop.f32.mrf.mxu1 }
 0x17c   : > { %v10685_v41 = vld [vmem:[%s13231_s6 + $0x12a0] sm:$0xf0]  ;;  %v6017_v42 = vadd.f32 %v6016_v39, %v6003_v24 }
 0x17d   : > { %v12295_v44 = vld [vmem:[%s13231_s6 + $0xc44] sm:$0xf]  ;;  %v10688_v51 = vor.u32 %v12495_v19, %v10685_v41  ;;  %6285 = vmatpush.bf16.msrb.mxu2 %v10432_v47 }
 0x17e   : > { %v9885_v46 = vld [vmem:[%s13231_s6 + $0xc60] sm:$0xf0] }
 0x17f   : > { %v12359_v52 = vld [vmem:[%s13231_s6 + $0xe44] sm:$0xf]  ;;  %v9888_v5 = vor.u32 %v12295_v44, %v9885_v46  ;;  %6298 = vmatpush.bf16.msrb.mxu3 %v10688_v51 }
 0x180   : > { %v10141_v55 = vld [vmem:[%s13231_s6 + $0xe60] sm:$0xf0] }
 0x181   : > { %v12423_v56 = vld [vmem:[%s13231_s6 + $0x1044] sm:$0xf]  ;;  %v10144_v6 = vor.u32 %v12359_v52, %v10141_v55  ;;  %6260 = vmatpush.bf16.msrb.mxu0 %v9888_v5  ;;  %v6029_v5 = vpop.f32.mrf.mxu2 }
 0x182   : > { %v10397_v57 = vld [vmem:[%s13231_s6 + $0x1060] sm:$0xf0] }
 0x183   : > { %v12487_v60 = vld [vmem:[%s13231_s6 + $0x1244] sm:$0xf]  ;;  %v10400_v49 = vor.u32 %v12423_v56, %v10397_v57  ;;  %6273 = vmatpush.bf16.msrb.mxu1 %v10144_v6  ;;  %v6030_v6 = vadd.f32 %v6029_v5, %v6017_v42 }
 0x184   : > { %v10653_v63 = vld [vmem:[%s13231_s6 + $0x1260] sm:$0xf0] }
 0x185   : > { %v12287_v4 = vld [vmem:[%s13231_s6 + $0xc04] sm:$0xf]  ;;  %v10656_v62 = vor.u32 %v12487_v60, %v10653_v63  ;;  %6286 = vmatpush.bf16.msrb.mxu2 %v10400_v49 }
 0x186   : > { %v9853_v7 = vld [vmem:[%s13231_s6 + $0xc20] sm:$0xf0] }
 0x187   : > { %v12351_v15 = vld [vmem:[%s13231_s6 + $0xe04] sm:$0xf]  ;;  %v9856_v25 = vor.u32 %v12287_v4, %v9853_v7  ;;  %6299 = vmatpush.bf16.msrb.mxu3 %v10656_v62  ;;  %v6042_v7 = vpop.f32.mrf.mxu3 }
 0x188   : > { %v10109_v61 = vld [vmem:[%s13231_s6 + $0xe20] sm:$0xf0] }
 0x189   : > { %v12415_v9 = vld [vmem:[%s13231_s6 + $0x1004] sm:$0xf]  ;;  %v10112_v26 = vor.u32 %v12351_v15, %v10109_v61  ;;  %6261 = vmatpush.bf16.msrb.mxu0 %v9856_v25 }
 0x18a   : > { %v10365_v16 = vld [vmem:[%s13231_s6 + $0x1020] sm:$0xf0] }
 0x18b   : > { %v12479_v17 = vld [vmem:[%s13231_s6 + $0x1204] sm:$0xf]  ;;  %v10368_v30 = vor.u32 %v12415_v9, %v10365_v16  ;;  %6274 = vmatpush.bf16.msrb.mxu1 %v10112_v26 }
 0x18c   : > { %v10621_v18 = vld [vmem:[%s13231_s6 + $0x1220] sm:$0xf0]  ;;  %6262 = vmatmul.bf16.vlgmr.msrb.gmra.mxu0 %v13666_v0 }
 0x18d   : > { %v12599_v21 = vld [vmem:[%s13231_s6 + $0x15c4] sm:$0xf]  ;;  %v10624_v12 = vor.u32 %v12479_v17, %v10621_v18  ;;  %6287 = vmatpush.bf16.msrb.mxu2 %v10368_v30  ;;  %v6005_v17 = vpop.f32.mrf.mxu0 }
 0x18e   : > { %v11101_v2 = vld [vmem:[%s13231_s6 + $0x15e0] sm:$0xf0]  ;;  %6275 = vmatmul.bf16.vlgmr.msrb.gmra.mxu1 %v13670_v8 }
 0x18f   : > { %v12663_v50 = vld [vmem:[%s13231_s6 + $0x17c4] sm:$0xf]  ;;  %v11104_v31 = vor.u32 %v12599_v21, %v11101_v2  ;;  %6300 = vmatpush.bf16.msrb.mxu3 %v10624_v12 }
 0x190   : > { %v11357_v3 = vld [vmem:[%s13231_s6 + $0x17e0] sm:$0xf0]  ;;  %6288 = vmatmul.bf16.vlgmr.msrb.gmra.mxu2 %v13704_v53 }
 0x191   : > { %v12727_v13 = vld [vmem:[%s13231_s6 + $0x19c4] sm:$0xf]  ;;  %v11360_v32 = vor.u32 %v12663_v50, %v11357_v3  ;;  %6306 = vmatpush.bf16.msra.mxu0 %v11104_v31  ;;  %v13940_v50 = vadd.f32 %v6042_v7, %v6030_v6  ;;  %v6018_v3 = vpop.f32.mrf.mxu1 }
 0x192   : > { %v11613_v27 = vld [vmem:[%s13231_s6 + $0x19e0] sm:$0xf0]  ;;  %6301 = vmatmul.bf16.vlgmr.msrb.gmra.mxu3 %v13711_v58 }
 0x193   : > { %v12791_v28 = vld [vmem:[%s13231_s6 + $0x1bc4] sm:$0xf]  ;;  %v11616_v48 = vor.u32 %v12727_v13, %v11613_v27  ;;  %6319 = vmatpush.bf16.msra.mxu1 %v11360_v32 }
 0x194   : > { %v11869_v29 = vld [vmem:[%s13231_s6 + $0x1be0] sm:$0xf0] }
 0x195   : > { %v12591_v33 = vld [vmem:[%s13231_s6 + $0x1584] sm:$0xf]  ;;  %v11872_v35 = vor.u32 %v12791_v28, %v11869_v29  ;;  %6332 = vmatpush.bf16.msra.mxu2 %v11616_v48 }
 0x196   : > { %v11069_v34 = vld [vmem:[%s13231_s6 + $0x15a0] sm:$0xf0] }
 0x197   : > { %v12655_v36 = vld [vmem:[%s13231_s6 + $0x1784] sm:$0xf]  ;;  %v11072_v43 = vor.u32 %v12591_v33, %v11069_v34  ;;  %6345 = vmatpush.bf16.msra.mxu3 %v11872_v35 }
 0x198   : > { %v11325_v37 = vld [vmem:[%s13231_s6 + $0x17a0] sm:$0xf0] }
 0x199   : > { %v12719_v38 = vld [vmem:[%s13231_s6 + $0x1984] sm:$0xf]  ;;  %v11328_v44 = vor.u32 %v12655_v36, %v11325_v37  ;;  %6307 = vmatpush.bf16.msra.mxu0 %v11072_v43  ;;  %v6031_v36 = vpop.f32.mrf.mxu2  ;;  %v6044_v37 = vpop.f32.mrf.mxu3 }
 0x19a   : > { %v11581_v40 = vld [vmem:[%s13231_s6 + $0x19a0] sm:$0xf0]  ;;  %v12092_v36 = vld [vmem:[%s13231_s6 + $0x5e4] sm:$0xf0] }
 0x19b   : > { %v12783_v19 = vld [vmem:[%s13231_s6 + $0x1b84] sm:$0xf]  ;;  %v11584_v51 = vor.u32 %v12719_v38, %v11581_v40  ;;  %6320 = vmatpush.bf16.msra.mxu1 %v11328_v44  ;;  %v9315_v37 = vld [vmem:[%s13231_s6 + $0x7c8] sm:$0xf] }
 0x19c   : > { %v11837_v41 = vld [vmem:[%s13231_s6 + $0x1ba0] sm:$0xf0] }
 0x19d   : > { %v12583_v46 = vld [vmem:[%s13231_s6 + $0x1544] sm:$0xf]  ;;  %v11840_v52 = vor.u32 %v12783_v19, %v11837_v41  ;;  %6333 = vmatpush.bf16.msra.mxu2 %v11584_v51 }
 0x19e   : > { %v11037_v47 = vld [vmem:[%s13231_s6 + $0x1560] sm:$0xf0] }
 0x19f   : > { %v12647_v55 = vld [vmem:[%s13231_s6 + $0x1744] sm:$0xf]  ;;  %v11040_v15 = vor.u32 %v12583_v46, %v11037_v47  ;;  %6346 = vmatpush.bf16.msra.mxu3 %v11840_v52 }
 0x1a0   : > { %v11293_v56 = vld [vmem:[%s13231_s6 + $0x1760] sm:$0xf0] }
 0x1a1   : > { %v12711_v57 = vld [vmem:[%s13231_s6 + $0x1944] sm:$0xf]  ;;  %v11296_v61 = vor.u32 %v12647_v55, %v11293_v56  ;;  %6308 = vmatpush.bf16.msra.mxu0 %v11040_v15 }
 0x1a2   : > { %v11549_v60 = vld [vmem:[%s13231_s6 + $0x1960] sm:$0xf0] }
 0x1a3   : > { %v12775_v63 = vld [vmem:[%s13231_s6 + $0x1b44] sm:$0xf]  ;;  %v11552_v9 = vor.u32 %v12711_v57, %v11549_v60  ;;  %6321 = vmatpush.bf16.msra.mxu1 %v11296_v61 }
 0x1a4   : > { %v11805_v4 = vld [vmem:[%s13231_s6 + $0x1b60] sm:$0xf0] }
 0x1a5   : > { %v12575_v49 = vld [vmem:[%s13231_s6 + $0x1504] sm:$0xf]  ;;  %v11808_v16 = vor.u32 %v12775_v63, %v11805_v4  ;;  %6334 = vmatpush.bf16.msra.mxu2 %v11552_v9 }
 0x1a6   : > { %v11005_v62 = vld [vmem:[%s13231_s6 + $0x1520] sm:$0xf0] }
 0x1a7   : > { %v12639_v18 = vld [vmem:[%s13231_s6 + $0x1704] sm:$0xf]  ;;  %v11008_v27 = vor.u32 %v12575_v49, %v11005_v62  ;;  %6347 = vmatpush.bf16.msra.mxu3 %v11808_v16 }
 0x1a8   : > { %v11261_v21 = vld [vmem:[%s13231_s6 + $0x1720] sm:$0xf0] }
 0x1a9   : > { %v12703_v2 = vld [vmem:[%s13231_s6 + $0x1904] sm:$0xf]  ;;  %v11264_v28 = vor.u32 %v12639_v18, %v11261_v21  ;;  %6309 = vmatpush.bf16.msra.mxu0 %v11008_v27 }
 0x1aa   : > { %v11517_v13 = vld [vmem:[%s13231_s6 + $0x1920] sm:$0xf0] }
 0x1ab   : > { %v12767_v25 = vld [vmem:[%s13231_s6 + $0x1b04] sm:$0xf]  ;;  %v11520_v12 = vor.u32 %v12703_v2, %v11517_v13  ;;  %6322 = vmatpush.bf16.msra.mxu1 %v11264_v28  ;;  %v6055_v2 = vpop.f32.mrf.mxu0 }
 0x1ac   : > { %v11773_v26 = vld [vmem:[%s13231_s6 + $0x1b20] sm:$0xf0]  ;;  %v6056_v28 = vadd.f32 %v6055_v2, %v13940_v50  ;;  %v12156_v50 = vld [vmem:[%s13231_s6 + $0x7e4] sm:$0xf0] }
 0x1ad   : > { %v12567_v29 = vld [vmem:[%s13231_s6 + $0x14c4] sm:$0xf]  ;;  %v11776_v31 = vor.u32 %v12767_v25, %v11773_v26  ;;  %6335 = vmatpush.bf16.msra.mxu2 %v11520_v12  ;;  %v8547_v12 = vld [vmem:[%s13231_s6 + $0x1c8] sm:$0xf] }
 0x1ae   : > { %v10973_v30 = vld [vmem:[%s13231_s6 + $0x14e0] sm:$0xf0]  ;;  %v9251_v2 = vld [vmem:[%s13231_s6 + $0x748] sm:$0xf] }
 0x1af   : > { %v12631_v32 = vld [vmem:[%s13231_s6 + $0x16c4] sm:$0xf]  ;;  %v10976_v38 = vor.u32 %v12567_v29, %v10973_v30  ;;  %6348 = vmatpush.bf16.msra.mxu3 %v11776_v31  ;;  %v6068_v29 = vpop.f32.mrf.mxu1  ;;  %v11964_v31 = vld [vmem:[%s13231_s6 + $0x1e4] sm:$0xf0] }
 0x1b0   : > { %v11229_v33 = vld [vmem:[%s13231_s6 + $0x16e0] sm:$0xf0] }
 0x1b1   : > { %v12695_v34 = vld [vmem:[%s13231_s6 + $0x18c4] sm:$0xf]  ;;  %v11232_v39 = vor.u32 %v12631_v32, %v11229_v33  ;;  %6310 = vmatpush.bf16.msra.mxu0 %v10976_v38  ;;  %v8803_v32 = vld [vmem:[%s13231_s6 + $0x3c8] sm:$0xf] }
 0x1b2   : > { %v11485_v48 = vld [vmem:[%s13231_s6 + $0x18e0] sm:$0xf0]  ;;  %v12028_v33 = vld [vmem:[%s13231_s6 + $0x3e4] sm:$0xf0] }
 0x1b3   : > { %v12759_v35 = vld [vmem:[%s13231_s6 + $0x1ac4] sm:$0xf]  ;;  %v11488_v41 = vor.u32 %v12695_v34, %v11485_v48  ;;  %6323 = vmatpush.bf16.msra.mxu1 %v11232_v39  ;;  %v9059_v34 = vld [vmem:[%s13231_s6 + $0x5c8] sm:$0xf]  ;;  %v6069_v48 = vadd.f32 %v6068_v29, %v6056_v28 }
 0x1b4   : > { %v11741_v24 = vld [vmem:[%s13231_s6 + $0x1ae0] sm:$0xf0] }
 0x1b5   : > { %v12559_v40 = vld [vmem:[%s13231_s6 + $0x1484] sm:$0xf]  ;;  %v11744_v42 = vor.u32 %v12759_v35, %v11741_v24  ;;  %6336 = vmatpush.bf16.msra.mxu2 %v11488_v41  ;;  %v8515_v41 = vld [vmem:[%s13231_s6 + $0x188] sm:$0xf] }
 0x1b6   : > { %v10941_v19 = vld [vmem:[%s13231_s6 + $0x14a0] sm:$0xf0] }
 0x1b7   : > { %v12623_v43 = vld [vmem:[%s13231_s6 + $0x1684] sm:$0xf]  ;;  %v10944_v55 = vor.u32 %v12559_v40, %v10941_v19  ;;  %6349 = vmatpush.bf16.msra.mxu3 %v11744_v42  ;;  %v8548_v40 = vor.u32 %v11964_v31, %v8547_v12  ;;  %v8804_v19 = vor.u32 %v12028_v33, %v8803_v32  ;;  %v11956_v42 = vld [vmem:[%s13231_s6 + $0x1a4] sm:$0xf0] }
 0x1b8   : > { %v11197_v44 = vld [vmem:[%s13231_s6 + $0x16a0] sm:$0xf0]  ;;  %v8707_v12 = vld [vmem:[%s13231_s6 + $0x308] sm:$0xf] }
 0x1b9   : > { %v12687_v46 = vld [vmem:[%s13231_s6 + $0x1884] sm:$0xf]  ;;  %v11200_v56 = vor.u32 %v12623_v43, %v11197_v44  ;;  %6311 = vmatpush.bf16.msra.mxu0 %v10944_v55  ;;  %v6081_v43 = vpop.f32.mrf.mxu2  ;;  %v9060_v44 = vor.u32 %v12092_v36, %v9059_v34  ;;  %v12004_v31 = vld [vmem:[%s13231_s6 + $0x324] sm:$0xf0] }
 0x1ba   : > { %v11453_v47 = vld [vmem:[%s13231_s6 + $0x18a0] sm:$0xf0]  ;;  %v6082_v55 = vadd.f32 %v6081_v43, %v6069_v48  ;;  %v8963_v32 = vld [vmem:[%s13231_s6 + $0x508] sm:$0xf] }
 0x1bb   : > { %v12751_v51 = vld [vmem:[%s13231_s6 + $0x1a84] sm:$0xf]  ;;  %v11456_v63 = vor.u32 %v12687_v46, %v11453_v47  ;;  %6324 = vmatpush.bf16.msra.mxu1 %v11200_v56  ;;  %v9316_v46 = vor.u32 %v12156_v50, %v9315_v37  ;;  %v8771_v47 = vld [vmem:[%s13231_s6 + $0x388] sm:$0xf]  ;;  %v6094_v56 = vpop.f32.mrf.mxu3  ;;  %v8708_v50 = vor.u32 %v12004_v31, %v8707_v12 }
 0x1bc   : > { %v11709_v52 = vld [vmem:[%s13231_s6 + $0x1aa0] sm:$0xf0]  ;;  %v12068_v34 = vld [vmem:[%s13231_s6 + $0x524] sm:$0xf0] }
 0x1bd   : > { %v12551_v57 = vld [vmem:[%s13231_s6 + $0x1444] sm:$0xf]  ;;  %v11712_v4 = vor.u32 %v12751_v51, %v11709_v52  ;;  %6337 = vmatpush.bf16.msra.mxu2 %v11456_v63  ;;  %v12020_v51 = vld [vmem:[%s13231_s6 + $0x3a4] sm:$0xf0] }
 0x1be   : > { %v10909_v60 = vld [vmem:[%s13231_s6 + $0x1460] sm:$0xf0]  ;;  %v9027_v52 = vld [vmem:[%s13231_s6 + $0x588] sm:$0xf] }
 0x1bf   : > { %v12615_v5 = vld [vmem:[%s13231_s6 + $0x1644] sm:$0xf]  ;;  %v10912_v9 = vor.u32 %v12551_v57, %v10909_v60  ;;  %6350 = vmatpush.bf16.msra.mxu3 %v11712_v4  ;;  %v12084_v57 = vld [vmem:[%s13231_s6 + $0x5a4] sm:$0xf0]  ;;  %v6057_v4 = vpop.f32.mrf.mxu0 }
 0x1c0   : > { %v11165_v6 = vld [vmem:[%s13231_s6 + $0x1660] sm:$0xf0]  ;;  %v9283_v60 = vld [vmem:[%s13231_s6 + $0x788] sm:$0xf] }
 0x1c1   : > { %v12679_v7 = vld [vmem:[%s13231_s6 + $0x1844] sm:$0xf]  ;;  %v11168_v16 = vor.u32 %v12615_v5, %v11165_v6  ;;  %6312 = vmatpush.bf16.msra.mxu0 %v10912_v9  ;;  %v12148_v63 = vld [vmem:[%s13231_s6 + $0x7a4] sm:$0xf0]  ;;  %v6095_v5 = vadd.f32 %v6094_v56, %v6082_v55  ;;  %v8516_v6 = vor.u32 %v11956_v42, %v8515_v41 }
 0x1c2   : > { %v11421_v15 = vld [vmem:[%s13231_s6 + $0x1860] sm:$0xf0]  ;;  %v9284_v9 = vor.u32 %v12148_v63, %v9283_v60  ;;  %v9219_v48 = vld [vmem:[%s13231_s6 + $0x708] sm:$0xf] }
 0x1c3   : > { %v12743_v61 = vld [vmem:[%s13231_s6 + $0x1a44] sm:$0xf]  ;;  %v11424_v3 = vor.u32 %v12679_v7, %v11421_v15  ;;  %6325 = vmatpush.bf16.msra.mxu1 %v11168_v16  ;;  %v8772_v7 = vor.u32 %v12020_v51, %v8771_v47  ;;  %v6070_v15 = vpop.f32.mrf.mxu1  ;;  %v8739_v16 = vld [vmem:[%s13231_s6 + $0x348] sm:$0xf]  ;;  %v6096_v33 = vpop.f32.mrf.mxu3 }
 0x1c4   : > { %v11677_v49 = vld [vmem:[%s13231_s6 + $0x1a60] sm:$0xf0]  ;;  %v8675_v42 = vld [vmem:[%s13231_s6 + $0x2c8] sm:$0xf] }
 0x1c5   : > { %v12543_v62 = vld [vmem:[%s13231_s6 + $0x1404] sm:$0xf]  ;;  %v11680_v13 = vor.u32 %v12743_v61, %v11677_v49  ;;  %6338 = vmatpush.bf16.msra.mxu2 %v11424_v3  ;;  %v8483_v61 = vld [vmem:[%s13231_s6 + $0x148] sm:$0xf] }
 0x1c6   : > { %v10877_v17 = vld [vmem:[%s13231_s6 + $0x1420] sm:$0xf0]  ;;  %v11948_v49 = vld [vmem:[%s13231_s6 + $0x164] sm:$0xf0] }
 0x1c7   : > { %v12607_v18 = vld [vmem:[%s13231_s6 + $0x1604] sm:$0xf]  ;;  %v10880_v35 = vor.u32 %v12543_v62, %v10877_v17  ;;  %6351 = vmatpush.bf16.msra.mxu3 %v11680_v13  ;;  %v9028_v62 = vor.u32 %v12084_v57, %v9027_v52  ;;  %v12012_v17 = vld [vmem:[%s13231_s6 + $0x364] sm:$0xf0]  ;;  %v8484_v13 = vor.u32 %v11948_v49, %v8483_v61 }
 0x1c8   : > { %v11133_v21 = vld [vmem:[%s13231_s6 + $0x1620] sm:$0xf0]  ;;  %v12140_v3 = vld [vmem:[%s13231_s6 + $0x764] sm:$0xf0] }
 0x1c9   : > { %v12671_v25 = vld [vmem:[%s13231_s6 + $0x1804] sm:$0xf]  ;;  %v11136_v24 = vor.u32 %v12607_v18, %v11133_v21  ;;  %6313 = vmatpush.bf16.msra.mxu0 %v10880_v35  ;;  %v8995_v18 = vld [vmem:[%s13231_s6 + $0x548] sm:$0xf]  ;;  %v9252_v29 = vor.u32 %v12140_v3, %v9251_v2 }
 0x1ca   : > { %v11389_v26 = vld [vmem:[%s13231_s6 + $0x1820] sm:$0xf0]  ;;  %v12076_v21 = vld [vmem:[%s13231_s6 + $0x564] sm:$0xf0] }
 0x1cb   : > { %v12735_v27 = vld [vmem:[%s13231_s6 + $0x1a04] sm:$0xf]  ;;  %v11392_v38 = vor.u32 %v12671_v25, %v11389_v26  ;;  %6326 = vmatpush.bf16.msra.mxu1 %v11136_v24  ;;  %v8740_v25 = vor.u32 %v12012_v17, %v8739_v16  ;;  %v8451_v26 = vld [vmem:[%s13231_s6 + $0x108] sm:$0xf]  ;;  %v8996_v28 = vor.u32 %v12076_v21, %v8995_v18  ;;  %v6107_v24 = vpop.f32.mrf.mxu0  ;;  %v6146_v49 = vpop.f32.mrf.mxu3 }
 0x1cc   : > { %v11645_v30 = vld [vmem:[%s13231_s6 + $0x1a20] sm:$0xf0]  ;;  %6314 = vmatmul.bf16.vlgmr.msra.gmra.mxu0 %v13706_v54  ;;  %v12132_v35 = vld [vmem:[%s13231_s6 + $0x724] sm:$0xf0]  ;;  %v6108_v36 = vadd.f32 %v6107_v24, %v6095_v5 }
 0x1cd   : > { %v11648_v39 = vor.u32 %v12735_v27, %v11645_v30  ;;  %6339 = vmatpush.bf16.msra.mxu2 %v11392_v38  ;;  %6358 = vmatpush.bf16.msrb.mxu0 %v8548_v40  ;;  %v11940_v27 = vld [vmem:[%s13231_s6 + $0x124] sm:$0xf0]  ;;  %v6083_v30 = vpop.f32.mrf.mxu2  ;;  %v6120_v38 = vpop.f32.mrf.mxu1  ;;  %v9220_v41 = vor.u32 %v12132_v35, %v9219_v48 }
 0x1ce   : > { %6327 = vmatmul.bf16.vlgmr.msra.gmra.mxu1 %v13713_v59  ;;  %v8452_v37 = vor.u32 %v11940_v27, %v8451_v26  ;;  %v11932_v40 = vld [vmem:[%s13231_s6 + $0xe4] sm:$0xf0] }
 0x1cf   : > { %6352 = vmatpush.bf16.msra.mxu3 %v11648_v39  ;;  %6371 = vmatpush.bf16.msrb.mxu1 %v8804_v19  ;;  %v8419_v39 = vld [vmem:[%s13231_s6 + $0xc8] sm:$0xf]  ;;  %v8964_v19 = vor.u32 %v12068_v34, %v8963_v32 }
 0x1d0   : > { %6340 = vmatmul.bf16.vlgmr.msra.gmra.mxu2 %v13780_v20  ;;  %v11996_v43 = vld [vmem:[%s13231_s6 + $0x2e4] sm:$0xf0]  ;;  %v8420_v55 = vor.u32 %v11932_v40, %v8419_v39 }
 0x1d1   : > { %6384 = vmatpush.bf16.msrb.mxu2 %v9060_v44  ;;  %6359 = vmatpush.bf16.msrb.mxu0 %v8516_v6  ;;  %v8931_v44 = vld [vmem:[%s13231_s6 + $0x4c8] sm:$0xf]  ;;  %v8676_v56 = vor.u32 %v11996_v43, %v8675_v42 }
 0x1d2   : > { %6353 = vmatmul.bf16.vlgmr.msra.gmra.mxu3 %v13782_v45  ;;  %v12060_v47 = vld [vmem:[%s13231_s6 + $0x4e4] sm:$0xf0] }
 0x1d3   : > { %6397 = vmatpush.bf16.msrb.mxu3 %v9316_v46  ;;  %6372 = vmatpush.bf16.msrb.mxu1 %v8772_v7  ;;  %v6121_v46 = vadd.f32 %v6120_v38, %v6108_v36  ;;  %v9187_v51 = vld [vmem:[%s13231_s6 + $0x6c8] sm:$0xf]  ;;  %v8932_v63 = vor.u32 %v12060_v47, %v8931_v44  ;;  %v6109_v17 = vpop.f32.mrf.mxu0  ;;  %v6148_v44 = vpop.f32.mrf.mxu3 }
 0x1d4   : > { %v12124_v52 = vld [vmem:[%s13231_s6 + $0x6e4] sm:$0xf0] }
 0x1d5   : > { %6385 = vmatpush.bf16.msrb.mxu2 %v9028_v62  ;;  %6360 = vmatpush.bf16.msrb.mxu0 %v8484_v13  ;;  %v8387_v57 = vld [vmem:[%s13231_s6 + $0x88] sm:$0xf]  ;;  %v9188_v4 = vor.u32 %v12124_v52, %v9187_v51  ;;  %v6133_v5 = vpop.f32.mrf.mxu2 }
 0x1d6   : > { %v11924_v60 = vld [vmem:[%s13231_s6 + $0xa4] sm:$0xf0]  ;;  %v6134_v61 = vadd.f32 %v6133_v5, %v6121_v46 }
 0x1d7   : > { %6398 = vmatpush.bf16.msrb.mxu3 %v9284_v9  ;;  %6373 = vmatpush.bf16.msrb.mxu1 %v8740_v25  ;;  %v8643_v6 = vld [vmem:[%s13231_s6 + $0x288] sm:$0xf]  ;;  %v8388_v21 = vor.u32 %v11924_v60, %v8387_v57  ;;  %v6122_v25 = vpop.f32.mrf.mxu1 }
 0x1d8   : > { %v11988_v7 = vld [vmem:[%s13231_s6 + $0x2a4] sm:$0xf0]  ;;  %v14030_v18 = vadd.f32 %v6146_v49, %v6134_v61 }
 0x1d9   : > { %6386 = vmatpush.bf16.msrb.mxu2 %v8996_v28  ;;  %6361 = vmatpush.bf16.msrb.mxu0 %v8452_v37  ;;  %v8899_v15 = vld [vmem:[%s13231_s6 + $0x488] sm:$0xf]  ;;  %v8644_v2 = vor.u32 %v11988_v7, %v8643_v6 }
 0x1da   : > { %v12052_v62 = vld [vmem:[%s13231_s6 + $0x4a4] sm:$0xf0] }
 0x1db   : > { %6399 = vmatpush.bf16.msrb.mxu3 %v9252_v29  ;;  %6374 = vmatpush.bf16.msrb.mxu1 %v8708_v50  ;;  %v9155_v9 = vld [vmem:[%s13231_s6 + $0x688] sm:$0xf]  ;;  %v8900_v26 = vor.u32 %v12052_v62, %v8899_v15 }
 0x1dc   : > { %v12116_v16 = vld [vmem:[%s13231_s6 + $0x6a4] sm:$0xf0] }
 0x1dd   : > { %6387 = vmatpush.bf16.msrb.mxu2 %v8964_v19  ;;  %6362 = vmatpush.bf16.msrb.mxu0 %v8420_v55  ;;  %v8355_v3 = vld [vmem:[%s13231_s6 + $0x48] sm:$0xf]  ;;  %v9156_v27 = vor.u32 %v12116_v16, %v9155_v9  ;;  %v6135_v19 = vpop.f32.mrf.mxu2 }
 0x1de   : > { %v11916_v13 = vld [vmem:[%s13231_s6 + $0x64] sm:$0xf0] }
 0x1df   : > { %6400 = vmatpush.bf16.msrb.mxu3 %v9220_v41  ;;  %6375 = vmatpush.bf16.msrb.mxu1 %v8676_v56  ;;  %v8611_v28 = vld [vmem:[%s13231_s6 + $0x248] sm:$0xf]  ;;  %v8356_v34 = vor.u32 %v11916_v13, %v8355_v3 }
 0x1e0   : > { %v11980_v29 = vld [vmem:[%s13231_s6 + $0x264] sm:$0xf0] }
 0x1e1   : > { %6388 = vmatpush.bf16.msrb.mxu2 %v8932_v63  ;;  %v8867_v30 = vld [vmem:[%s13231_s6 + $0x448] sm:$0xf]  ;;  %6363 = vmatpush.bf16.msrb.mxu0 %v8388_v21  ;;  %v8612_v48 = vor.u32 %v11980_v29, %v8611_v28 }
 0x1e2   : > { %v12044_v12 = vld [vmem:[%s13231_s6 + $0x464] sm:$0xf0] }
 0x1e3   : > { %6401 = vmatpush.bf16.msrb.mxu3 %v9188_v4  ;;  %v9123_v31 = vld [vmem:[%s13231_s6 + $0x648] sm:$0xf]  ;;  %6376 = vmatpush.bf16.msrb.mxu1 %v8644_v2  ;;  %v8868_v37 = vor.u32 %v12044_v12, %v8867_v30 }
 0x1e4   : > { %v12108_v32 = vld [vmem:[%s13231_s6 + $0x664] sm:$0xf0] }
 0x1e5   : > { %v8323_v33 = vld [vmem:[%s13231_s6 + $0x8] sm:$0xf]  ;;  %6389 = vmatpush.bf16.msrb.mxu2 %v8900_v26  ;;  %v9124_v50 = vor.u32 %v12108_v32, %v9123_v31  ;;  %6364 = vmatpush.bf16.msrb.mxu0 %v8356_v34 }
 0x1e6   : > { %v11908_v35 = vld [vmem:[%s13231_s6 + $0x24] sm:$0xf0] }
 0x1e7   : > { %v8579_v24 = vld [vmem:[%s13231_s6 + $0x208] sm:$0xf]  ;;  %6402 = vmatpush.bf16.msrb.mxu3 %v9156_v27  ;;  %6377 = vmatpush.bf16.msrb.mxu1 %v8612_v48  ;;  %v8324_v52 = vor.u32 %v11908_v35, %v8323_v33 }
 0x1e8   : > { %v11972_v36 = vld [vmem:[%s13231_s6 + $0x224] sm:$0xf0] }
 0x1e9   : > { %v8835_v38 = vld [vmem:[%s13231_s6 + $0x408] sm:$0xf]  ;;  %v8580_v55 = vor.u32 %v11972_v36, %v8579_v24  ;;  %6390 = vmatpush.bf16.msrb.mxu2 %v8868_v37  ;;  %6365 = vmatpush.bf16.msrb.mxu0 %v8324_v52 }
 0x1ea   : > { %v12036_v39 = vld [vmem:[%s13231_s6 + $0x424] sm:$0xf0] }
 0x1eb   : > { %v9091_v40 = vld [vmem:[%s13231_s6 + $0x608] sm:$0xf]  ;;  %6403 = vmatpush.bf16.msrb.mxu3 %v9124_v50  ;;  %v8836_v63 = vor.u32 %v12036_v39, %v8835_v38  ;;  %6378 = vmatpush.bf16.msrb.mxu1 %v8580_v55 }
 0x1ec   : > { %v12100_v41 = vld [vmem:[%s13231_s6 + $0x624] sm:$0xf0]  ;;  %6366 = vmatmul.bf16.vlgmr.msrb.gmra.mxu0 %v13572_v14 }
 0x1ed   : > { %v9571_v42 = vld [vmem:[%s13231_s6 + $0x9c8] sm:$0xf]  ;;  %v9092_v4 = vor.u32 %v12100_v41, %v9091_v40  ;;  %6391 = vmatpush.bf16.msrb.mxu2 %v8836_v63 }
 0x1ee   : > { %v12220_v43 = vld [vmem:[%s13231_s6 + $0x9e4] sm:$0xf0]  ;;  %6379 = vmatmul.bf16.vlgmr.msrb.gmra.mxu1 %v13588_v23 }
 0x1ef   : > { %v9827_v46 = vld [vmem:[%s13231_s6 + $0xbc8] sm:$0xf]  ;;  %v9572_v5 = vor.u32 %v12220_v43, %v9571_v42  ;;  %6404 = vmatpush.bf16.msrb.mxu3 %v9092_v4  ;;  %v6159_v42 = vpop.f32.mrf.mxu0  ;;  %v6172_v43 = vpop.f32.mrf.mxu1 }
 0x1f0   : > { %v12284_v47 = vld [vmem:[%s13231_s6 + $0xbe4] sm:$0xf0]  ;;  %6392 = vmatmul.bf16.vlgmr.msrb.gmra.mxu2 %v13570_v11  ;;  %v6160_v44 = vadd.f32 %v6159_v42, %v14030_v18 }
 0x1f1   : > { %v10083_v51 = vld [vmem:[%s13231_s6 + $0xdc8] sm:$0xf]  ;;  %v9828_v6 = vor.u32 %v12284_v47, %v9827_v46  ;;  %6410 = vmatpush.bf16.msra.mxu0 %v9572_v5 }
 0x1f2   : > { %v12348_v56 = vld [vmem:[%s13231_s6 + $0xde4] sm:$0xf0]  ;;  %6405 = vmatmul.bf16.vlgmr.msrb.gmra.mxu3 %v13586_v22  ;;  %v14090_v4 = vadd.f32 %v6172_v43, %v6160_v44 }
 0x1f3   : > { %v10339_v57 = vld [vmem:[%s13231_s6 + $0xfc8] sm:$0xf]  ;;  %v10084_v61 = vor.u32 %v12348_v56, %v10083_v51  ;;  %6423 = vmatpush.bf16.msra.mxu1 %v9828_v6 }
 0x1f4   : > { %v12412_v60 = vld [vmem:[%s13231_s6 + $0xfe4] sm:$0xf0] }
 0x1f5   : > { %v9539_v7 = vld [vmem:[%s13231_s6 + $0x988] sm:$0xf]  ;;  %v10340_v49 = vor.u32 %v12412_v60, %v10339_v57  ;;  %6436 = vmatpush.bf16.msra.mxu2 %v10084_v61 }
 0x1f6   : > { %v12212_v15 = vld [vmem:[%s13231_s6 + $0x9a4] sm:$0xf0] }
 0x1f7   : > { %v9795_v62 = vld [vmem:[%s13231_s6 + $0xb88] sm:$0xf]  ;;  %v9540_v3 = vor.u32 %v12212_v15, %v9539_v7  ;;  %6449 = vmatpush.bf16.msra.mxu3 %v10340_v49 }
 0x1f8   : > { %v12276_v9 = vld [vmem:[%s13231_s6 + $0xba4] sm:$0xf0] }
 0x1f9   : > { %v10051_v16 = vld [vmem:[%s13231_s6 + $0xd88] sm:$0xf]  ;;  %v9796_v13 = vor.u32 %v12276_v9, %v9795_v62  ;;  %6411 = vmatpush.bf16.msra.mxu0 %v9540_v3 }
 0x1fa   : > { %v12340_v17 = vld [vmem:[%s13231_s6 + $0xda4] sm:$0xf0] }
 0x1fb   : > { %v10307_v21 = vld [vmem:[%s13231_s6 + $0xf88] sm:$0xf]  ;;  %v10052_v27 = vor.u32 %v12340_v17, %v10051_v16  ;;  %6424 = vmatpush.bf16.msra.mxu1 %v9796_v13 }
 0x1fc   : > { %v12404_v2 = vld [vmem:[%s13231_s6 + $0xfa4] sm:$0xf0] }
 0x1fd   : > { %v9507_v25 = vld [vmem:[%s13231_s6 + $0x948] sm:$0xf]  ;;  %v10308_v28 = vor.u32 %v12404_v2, %v10307_v21  ;;  %6437 = vmatpush.bf16.msra.mxu2 %v10052_v27 }
 0x1fe   : > { %v12204_v26 = vld [vmem:[%s13231_s6 + $0x964] sm:$0xf0] }
 0x1ff   : > { %v9763_v29 = vld [vmem:[%s13231_s6 + $0xb48] sm:$0xf]  ;;  %v9508_v34 = vor.u32 %v12204_v26, %v9507_v25  ;;  %6450 = vmatpush.bf16.msra.mxu3 %v10308_v28  ;;  %v6185_v25 = vpop.f32.mrf.mxu2  ;;  %v6198_v26 = vpop.f32.mrf.mxu3 }
 0x200   : > { %v12268_v30 = vld [vmem:[%s13231_s6 + $0xb64] sm:$0xf0]  ;;  %v14103_v27 = vadd.f32 %v6198_v26, %v6185_v25  ;;  %v6161_v28 = vpop.f32.mrf.mxu0 }
 0x201   : > { %v10019_v12 = vld [vmem:[%s13231_s6 + $0xd48] sm:$0xf]  ;;  %v9764_v48 = vor.u32 %v12268_v30, %v9763_v29  ;;  %6412 = vmatpush.bf16.msra.mxu0 %v9508_v34  ;;  %v6174_v29 = vpop.f32.mrf.mxu1 }
 0x202   : > { %v12332_v31 = vld [vmem:[%s13231_s6 + $0xd64] sm:$0xf0] }
 0x203   : > { %v10275_v32 = vld [vmem:[%s13231_s6 + $0xf48] sm:$0xf]  ;;  %v10020_v36 = vor.u32 %v12332_v31, %v10019_v12  ;;  %6425 = vmatpush.bf16.msra.mxu1 %v9764_v48 }
 0x204   : > { %v12396_v33 = vld [vmem:[%s13231_s6 + $0xf64] sm:$0xf0] }
 0x205   : > { %v9475_v35 = vld [vmem:[%s13231_s6 + $0x908] sm:$0xf]  ;;  %v10276_v37 = vor.u32 %v12396_v33, %v10275_v32  ;;  %6438 = vmatpush.bf16.msra.mxu2 %v10020_v36 }
 0x206   : > { %v12196_v24 = vld [vmem:[%s13231_s6 + $0x924] sm:$0xf0] }
 0x207   : > { %v9731_v50 = vld [vmem:[%s13231_s6 + $0xb08] sm:$0xf]  ;;  %v9476_v46 = vor.u32 %v12196_v24, %v9475_v35  ;;  %6451 = vmatpush.bf16.msra.mxu3 %v10276_v37 }
 0x208   : > { %v12260_v38 = vld [vmem:[%s13231_s6 + $0xb24] sm:$0xf0] }
 0x209   : > { %v9987_v39 = vld [vmem:[%s13231_s6 + $0xd08] sm:$0xf]  ;;  %v9732_v47 = vor.u32 %v12260_v38, %v9731_v50  ;;  %6413 = vmatpush.bf16.msra.mxu0 %v9476_v46 }
 0x20a   : > { %v12324_v40 = vld [vmem:[%s13231_s6 + $0xd24] sm:$0xf0] }
 0x20b   : > { %v10243_v19 = vld [vmem:[%s13231_s6 + $0xf08] sm:$0xf]  ;;  %v9988_v55 = vor.u32 %v12324_v40, %v9987_v39  ;;  %6426 = vmatpush.bf16.msra.mxu1 %v9732_v47 }
 0x20c   : > { %v12388_v41 = vld [vmem:[%s13231_s6 + $0xf24] sm:$0xf0] }
 0x20d   : > { %v9443_v51 = vld [vmem:[%s13231_s6 + $0x8c8] sm:$0xf]  ;;  %v10244_v56 = vor.u32 %v12388_v41, %v10243_v19  ;;  %6439 = vmatpush.bf16.msra.mxu2 %v9988_v55 }
 0x20e   : > { %v12188_v52 = vld [vmem:[%s13231_s6 + $0x8e4] sm:$0xf0] }
 0x20f   : > { %v9699_v57 = vld [vmem:[%s13231_s6 + $0xac8] sm:$0xf]  ;;  %v9444_v7 = vor.u32 %v12188_v52, %v9443_v51  ;;  %6452 = vmatpush.bf16.msra.mxu3 %v10244_v56 }
 0x210   : > { %v12252_v60 = vld [vmem:[%s13231_s6 + $0xae4] sm:$0xf0] }
 0x211   : > { %v9955_v63 = vld [vmem:[%s13231_s6 + $0xcc8] sm:$0xf]  ;;  %v9700_v15 = vor.u32 %v12252_v60, %v9699_v57  ;;  %6414 = vmatpush.bf16.msra.mxu0 %v9444_v7  ;;  %v6187_v57 = vpop.f32.mrf.mxu2  ;;  %v6200_v60 = vpop.f32.mrf.mxu3 }
 0x212   : > { %v12316_v5 = vld [vmem:[%s13231_s6 + $0xce4] sm:$0xf0]  ;;  %v6211_v57 = vpop.f32.mrf.mxu0 }
 0x213   : > { %v10211_v18 = vld [vmem:[%s13231_s6 + $0xec8] sm:$0xf]  ;;  %v9956_v62 = vor.u32 %v12316_v5, %v9955_v63  ;;  %6427 = vmatpush.bf16.msra.mxu1 %v9700_v15 }
 0x214   : > { %v12380_v6 = vld [vmem:[%s13231_s6 + $0xee4] sm:$0xf0] }
 0x215   : > { %v9411_v61 = vld [vmem:[%s13231_s6 + $0x888] sm:$0xf]  ;;  %v10212_v9 = vor.u32 %v12380_v6, %v10211_v18  ;;  %6440 = vmatpush.bf16.msra.mxu2 %v9956_v62 }
 0x216   : > { %v12180_v49 = vld [vmem:[%s13231_s6 + $0x8a4] sm:$0xf0] }
 0x217   : > { %v9667_v16 = vld [vmem:[%s13231_s6 + $0xa88] sm:$0xf]  ;;  %v9412_v30 = vor.u32 %v12180_v49, %v9411_v61  ;;  %6453 = vmatpush.bf16.msra.mxu3 %v10212_v9 }
 0x218   : > { %v12244_v17 = vld [vmem:[%s13231_s6 + $0xaa4] sm:$0xf0] }
 0x219   : > { %v9923_v21 = vld [vmem:[%s13231_s6 + $0xc88] sm:$0xf]  ;;  %v9668_v12 = vor.u32 %v12244_v17, %v9667_v16  ;;  %6415 = vmatpush.bf16.msra.mxu0 %v9412_v30 }
 0x21a   : > { %v12308_v2 = vld [vmem:[%s13231_s6 + $0xca4] sm:$0xf0] }
 0x21b   : > { %v10179_v3 = vld [vmem:[%s13231_s6 + $0xe88] sm:$0xf]  ;;  %v9924_v33 = vor.u32 %v12308_v2, %v9923_v21  ;;  %6428 = vmatpush.bf16.msra.mxu1 %v9668_v12 }
 0x21c   : > { %v12372_v13 = vld [vmem:[%s13231_s6 + $0xea4] sm:$0xf0] }
 0x21d   : > { %v9379_v31 = vld [vmem:[%s13231_s6 + $0x848] sm:$0xf]  ;;  %v10180_v34 = vor.u32 %v12372_v13, %v10179_v3  ;;  %6441 = vmatpush.bf16.msra.mxu2 %v9924_v33 }
 0x21e   : > { %v12172_v32 = vld [vmem:[%s13231_s6 + $0x864] sm:$0xf0] }
 0x21f   : > { %v9635_v48 = vld [vmem:[%s13231_s6 + $0xa48] sm:$0xf]  ;;  %v9380_v39 = vor.u32 %v12172_v32, %v9379_v31  ;;  %6454 = vmatpush.bf16.msra.mxu3 %v10180_v34 }
 0x220   : > { %v12236_v35 = vld [vmem:[%s13231_s6 + $0xa64] sm:$0xf0] }
 0x221   : > { %v9891_v24 = vld [vmem:[%s13231_s6 + $0xc48] sm:$0xf]  ;;  %v9636_v40 = vor.u32 %v12236_v35, %v9635_v48  ;;  %6416 = vmatpush.bf16.msra.mxu0 %v9380_v39 }
 0x222   : > { %v12300_v36 = vld [vmem:[%s13231_s6 + $0xc64] sm:$0xf0] }
 0x223   : > { %v10147_v37 = vld [vmem:[%s13231_s6 + $0xe48] sm:$0xf]  ;;  %v9892_v43 = vor.u32 %v12300_v36, %v9891_v24  ;;  %6429 = vmatpush.bf16.msra.mxu1 %v9636_v40 }
 0x224   : > { %v12364_v50 = vld [vmem:[%s13231_s6 + $0xe64] sm:$0xf0] }
 0x225   : > { %v9347_v38 = vld [vmem:[%s13231_s6 + $0x808] sm:$0xf]  ;;  %v10148_v44 = vor.u32 %v12364_v50, %v10147_v37  ;;  %6442 = vmatpush.bf16.msra.mxu2 %v9892_v43 }
 0x226   : > { %v12164_v19 = vld [vmem:[%s13231_s6 + $0x824] sm:$0xf0] }
 0x227   : > { %v9603_v41 = vld [vmem:[%s13231_s6 + $0xa08] sm:$0xf]  ;;  %v9348_v6 = vor.u32 %v12164_v19, %v9347_v38  ;;  %6455 = vmatpush.bf16.msra.mxu3 %v10148_v44 }
 0x228   : > { %v12228_v42 = vld [vmem:[%s13231_s6 + $0xa24] sm:$0xf0] }
 0x229   : > { %v9859_v46 = vld [vmem:[%s13231_s6 + $0xc08] sm:$0xf]  ;;  %v9604_v7 = vor.u32 %v12228_v42, %v9603_v41  ;;  %6417 = vmatpush.bf16.msra.mxu0 %v9348_v6  ;;  %v6212_v6 = vadd.f32 %v6211_v57, %v14103_v27 }
 0x22a   : > { %v12292_v47 = vld [vmem:[%s13231_s6 + $0xc24] sm:$0xf0] }
 0x22b   : > { %v10115_v51 = vld [vmem:[%s13231_s6 + $0xe08] sm:$0xf]  ;;  %v9860_v62 = vor.u32 %v12292_v47, %v9859_v46  ;;  %6430 = vmatpush.bf16.msra.mxu1 %v9604_v7  ;;  %v6224_v7 = vpop.f32.mrf.mxu1 }
 0x22c   : > { %v12356_v52 = vld [vmem:[%s13231_s6 + $0xe24] sm:$0xf0]  ;;  %6418 = vmatmul.bf16.vlgmr.msra.gmra.mxu0 %v13668_v1 }
 0x22d   : > { %v10595_v55 = vld [vmem:[%s13231_s6 + $0x11c8] sm:$0xf]  ;;  %v10116_v9 = vor.u32 %v12356_v52, %v10115_v51  ;;  %6443 = vmatpush.bf16.msra.mxu2 %v9860_v62 }
 0x22e   : > { %v12476_v56 = vld [vmem:[%s13231_s6 + $0x11e4] sm:$0xf0]  ;;  %6431 = vmatmul.bf16.vlgmr.msra.gmra.mxu1 %v13672_v10 }
 0x22f   : > { %v10851_v63 = vld [vmem:[%s13231_s6 + $0x13c8] sm:$0xf]  ;;  %v10596_v16 = vor.u32 %v12476_v56, %v10595_v55  ;;  %6456 = vmatpush.bf16.msra.mxu3 %v10116_v9 }
 0x230   : > { %v12540_v5 = vld [vmem:[%s13231_s6 + $0x13e4] sm:$0xf0]  ;;  %6444 = vmatmul.bf16.vlgmr.msra.gmra.mxu2 %v13666_v0 }
 0x231   : > { %v11107_v18 = vld [vmem:[%s13231_s6 + $0x15c8] sm:$0xf]  ;;  %v10852_v17 = vor.u32 %v12540_v5, %v10851_v63  ;;  %6462 = vmatpush.bf16.msrb.mxu0 %v10596_v16 }
 0x232   : > { %v12604_v15 = vld [vmem:[%s13231_s6 + $0x15e4] sm:$0xf0]  ;;  %6457 = vmatmul.bf16.vlgmr.msra.gmra.mxu3 %v13670_v8 }
 0x233   : > { %v11363_v61 = vld [vmem:[%s13231_s6 + $0x17c8] sm:$0xf]  ;;  %v11108_v3 = vor.u32 %v12604_v15, %v11107_v18  ;;  %6475 = vmatpush.bf16.msrb.mxu1 %v10852_v17 }
 0x234   : > { %v12668_v49 = vld [vmem:[%s13231_s6 + $0x17e4] sm:$0xf0] }
 0x235   : > { %v10563_v21 = vld [vmem:[%s13231_s6 + $0x1188] sm:$0xf]  ;;  %v11364_v13 = vor.u32 %v12668_v49, %v11363_v61  ;;  %6488 = vmatpush.bf16.msrb.mxu2 %v11108_v3 }
 0x236   : > { %v12468_v2 = vld [vmem:[%s13231_s6 + $0x11a4] sm:$0xf0] }
 0x237   : > { %v10819_v25 = vld [vmem:[%s13231_s6 + $0x1388] sm:$0xf]  ;;  %v10564_v31 = vor.u32 %v12468_v2, %v10563_v21  ;;  %6501 = vmatpush.bf16.msrb.mxu3 %v11364_v13  ;;  %v6225_v2 = vadd.f32 %v6224_v7, %v6212_v6 }
 0x238   : > { %v12532_v26 = vld [vmem:[%s13231_s6 + $0x13a4] sm:$0xf0] }
 0x239   : > { %v11075_v28 = vld [vmem:[%s13231_s6 + $0x1588] sm:$0xf]  ;;  %v10820_v32 = vor.u32 %v12532_v26, %v10819_v25  ;;  %6463 = vmatpush.bf16.msrb.mxu0 %v10564_v31  ;;  %v6237_v31 = vpop.f32.mrf.mxu2 }
 0x23a   : > { %v12596_v29 = vld [vmem:[%s13231_s6 + $0x15a4] sm:$0xf0] }
 0x23b   : > { %v11331_v30 = vld [vmem:[%s13231_s6 + $0x1788] sm:$0xf]  ;;  %v11076_v48 = vor.u32 %v12596_v29, %v11075_v28  ;;  %6476 = vmatpush.bf16.msrb.mxu1 %v10820_v32 }
 0x23c   : > { %v12660_v12 = vld [vmem:[%s13231_s6 + $0x17a4] sm:$0xf0] }
 0x23d   : > { %v10531_v33 = vld [vmem:[%s13231_s6 + $0x1148] sm:$0xf]  ;;  %v11332_v35 = vor.u32 %v12660_v12, %v11331_v30  ;;  %6489 = vmatpush.bf16.msrb.mxu2 %v11076_v48  ;;  %v6238_v48 = vadd.f32 %v6237_v31, %v6225_v2  ;;  %v11960_v2 = vld [vmem:[%s13231_s6 + $0x1cc] sm:$0xf] }
 0x23e   : > { %v12460_v34 = vld [vmem:[%s13231_s6 + $0x1164] sm:$0xf0] }
 0x23f   : > { %v10787_v24 = vld [vmem:[%s13231_s6 + $0x1348] sm:$0xf]  ;;  %v10532_v40 = vor.u32 %v12460_v34, %v10531_v33  ;;  %6502 = vmatpush.bf16.msrb.mxu3 %v11332_v35  ;;  %v6250_v35 = vpop.f32.mrf.mxu3 }
 0x240   : > { %v12524_v36 = vld [vmem:[%s13231_s6 + $0x1364] sm:$0xf0] }
 0x241   : > { %v11043_v37 = vld [vmem:[%s13231_s6 + $0x1548] sm:$0xf]  ;;  %v10788_v19 = vor.u32 %v12524_v36, %v10787_v24  ;;  %6464 = vmatpush.bf16.msrb.mxu0 %v10532_v40  ;;  %v6213_v24 = vpop.f32.mrf.mxu0  ;;  %v6226_v40 = vpop.f32.mrf.mxu1 }
 0x242   : > { %v12588_v50 = vld [vmem:[%s13231_s6 + $0x1564] sm:$0xf0]  ;;  %v11952_v24 = vld [vmem:[%s13231_s6 + $0x18c] sm:$0xf] }
 0x243   : > { %v11299_v38 = vld [vmem:[%s13231_s6 + $0x1748] sm:$0xf]  ;;  %v11044_v43 = vor.u32 %v12588_v50, %v11043_v37  ;;  %6477 = vmatpush.bf16.msrb.mxu1 %v10788_v19  ;;  %v14174_v50 = vadd.f32 %v6250_v35, %v6238_v48 }
 0x244   : > { %v12652_v39 = vld [vmem:[%s13231_s6 + $0x1764] sm:$0xf0] }
 0x245   : > { %v10499_v41 = vld [vmem:[%s13231_s6 + $0x1108] sm:$0xf]  ;;  %v11300_v44 = vor.u32 %v12652_v39, %v11299_v38  ;;  %6490 = vmatpush.bf16.msrb.mxu2 %v11044_v43 }
 0x246   : > { %v12452_v42 = vld [vmem:[%s13231_s6 + $0x1124] sm:$0xf0] }
 0x247   : > { %v10755_v46 = vld [vmem:[%s13231_s6 + $0x1308] sm:$0xf]  ;;  %v10500_v60 = vor.u32 %v12452_v42, %v10499_v41  ;;  %6503 = vmatpush.bf16.msrb.mxu3 %v11300_v44 }
 0x248   : > { %v12516_v47 = vld [vmem:[%s13231_s6 + $0x1324] sm:$0xf0] }
 0x249   : > { %v11011_v51 = vld [vmem:[%s13231_s6 + $0x1508] sm:$0xf]  ;;  %v10756_v63 = vor.u32 %v12516_v47, %v10755_v46  ;;  %6465 = vmatpush.bf16.msrb.mxu0 %v10500_v60 }
 0x24a   : > { %v12580_v52 = vld [vmem:[%s13231_s6 + $0x1524] sm:$0xf0] }
 0x24b   : > { %v11267_v55 = vld [vmem:[%s13231_s6 + $0x1708] sm:$0xf]  ;;  %v11012_v15 = vor.u32 %v12580_v52, %v11011_v51  ;;  %6478 = vmatpush.bf16.msrb.mxu1 %v10756_v63 }
 0x24c   : > { %v12644_v56 = vld [vmem:[%s13231_s6 + $0x1724] sm:$0xf0] }
 0x24d   : > { %v10467_v5 = vld [vmem:[%s13231_s6 + $0x10c8] sm:$0xf]  ;;  %v11268_v61 = vor.u32 %v12644_v56, %v11267_v55  ;;  %6491 = vmatpush.bf16.msrb.mxu2 %v11012_v15 }
 0x24e   : > { %v12444_v18 = vld [vmem:[%s13231_s6 + $0x10e4] sm:$0xf0] }
 0x24f   : > { %v10723_v49 = vld [vmem:[%s13231_s6 + $0x12c8] sm:$0xf]  ;;  %v10468_v27 = vor.u32 %v12444_v18, %v10467_v5  ;;  %6504 = vmatpush.bf16.msrb.mxu3 %v11268_v61  ;;  %v6239_v61 = vpop.f32.mrf.mxu2 }
 0x250   : > { %v12508_v62 = vld [vmem:[%s13231_s6 + $0x12e4] sm:$0xf0]  ;;  %v8453_v61 = vld [vmem:[%s13231_s6 + $0x128] sm:$0xf0] }
 0x251   : > { %v10979_v9 = vld [vmem:[%s13231_s6 + $0x14c8] sm:$0xf]  ;;  %v10724_v3 = vor.u32 %v12508_v62, %v10723_v49  ;;  %6466 = vmatpush.bf16.msrb.mxu0 %v10468_v27 }
 0x252   : > { %v12572_v16 = vld [vmem:[%s13231_s6 + $0x14e4] sm:$0xf0] }
 0x253   : > { %v11235_v17 = vld [vmem:[%s13231_s6 + $0x16c8] sm:$0xf]  ;;  %v10980_v26 = vor.u32 %v12572_v16, %v10979_v9  ;;  %6479 = vmatpush.bf16.msrb.mxu1 %v10724_v3  ;;  %v6252_v16 = vpop.f32.mrf.mxu3 }
 0x254   : > { %v12636_v21 = vld [vmem:[%s13231_s6 + $0x16e4] sm:$0xf0] }
 0x255   : > { %v10435_v13 = vld [vmem:[%s13231_s6 + $0x1088] sm:$0xf]  ;;  %v11236_v28 = vor.u32 %v12636_v21, %v11235_v17  ;;  %6492 = vmatpush.bf16.msrb.mxu2 %v10980_v26  ;;  %v8805_v26 = vld [vmem:[%s13231_s6 + $0x3e8] sm:$0xf0] }
 0x256   : > { %v12436_v25 = vld [vmem:[%s13231_s6 + $0x10a4] sm:$0xf0] }
 0x257   : > { %v10691_v29 = vld [vmem:[%s13231_s6 + $0x1288] sm:$0xf]  ;;  %v10436_v36 = vor.u32 %v12436_v25, %v10435_v13  ;;  %6505 = vmatpush.bf16.msrb.mxu3 %v11236_v28  ;;  %v8549_v13 = vld [vmem:[%s13231_s6 + $0x1e8] sm:$0xf0] }
 0x258   : > { %v12500_v30 = vld [vmem:[%s13231_s6 + $0x12a4] sm:$0xf0]  ;;  %v12024_v25 = vld [vmem:[%s13231_s6 + $0x3cc] sm:$0xf] }
 0x259   : > { %v10947_v12 = vld [vmem:[%s13231_s6 + $0x1488] sm:$0xf]  ;;  %v10692_v37 = vor.u32 %v12500_v30, %v10691_v29  ;;  %6467 = vmatpush.bf16.msrb.mxu0 %v10436_v36  ;;  %v8517_v36 = vld [vmem:[%s13231_s6 + $0x1a8] sm:$0xf0] }
 0x25a   : > { %v12564_v32 = vld [vmem:[%s13231_s6 + $0x14a4] sm:$0xf0] }
 0x25b   : > { %v11203_v33 = vld [vmem:[%s13231_s6 + $0x1688] sm:$0xf]  ;;  %v10948_v19 = vor.u32 %v12564_v32, %v10947_v12  ;;  %6480 = vmatpush.bf16.msrb.mxu1 %v10692_v37  ;;  %v12016_v37 = vld [vmem:[%s13231_s6 + $0x38c] sm:$0xf] }
 0x25c   : > { %v12628_v34 = vld [vmem:[%s13231_s6 + $0x16a4] sm:$0xf0] }
 0x25d   : > { %v10403_v38 = vld [vmem:[%s13231_s6 + $0x1048] sm:$0xf]  ;;  %v11204_v41 = vor.u32 %v12628_v34, %v11203_v33  ;;  %6493 = vmatpush.bf16.msrb.mxu2 %v10948_v19  ;;  %v8552_v33 = vor.u32 %v11960_v2, %v8549_v13  ;;  %v8808_v34 = vor.u32 %v12024_v25, %v8805_v26  ;;  %v6276_v2 = vpop.f32.mrf.mxu1 }
 0x25e   : > { %v12428_v39 = vld [vmem:[%s13231_s6 + $0x1064] sm:$0xf0] }
 0x25f   : > { %v10659_v42 = vld [vmem:[%s13231_s6 + $0x1248] sm:$0xf]  ;;  %v10404_v55 = vor.u32 %v12428_v39, %v10403_v38  ;;  %6506 = vmatpush.bf16.msrb.mxu3 %v11204_v41  ;;  %v8773_v38 = vld [vmem:[%s13231_s6 + $0x3a8] sm:$0xf0] }
 0x260   : > { %v12492_v43 = vld [vmem:[%s13231_s6 + $0x1264] sm:$0xf0] }
 0x261   : > { %v10915_v44 = vld [vmem:[%s13231_s6 + $0x1448] sm:$0xf]  ;;  %v10660_v56 = vor.u32 %v12492_v43, %v10659_v42  ;;  %6468 = vmatpush.bf16.msrb.mxu0 %v10404_v55  ;;  %v8520_v42 = vor.u32 %v11952_v24, %v8517_v36  ;;  %v8776_v43 = vor.u32 %v12016_v37, %v8773_v38  ;;  %v8741_v55 = vld [vmem:[%s13231_s6 + $0x368] sm:$0xf0]  ;;  %v6289_v36 = vpop.f32.mrf.mxu2 }
 0x262   : > { %v12556_v46 = vld [vmem:[%s13231_s6 + $0x1464] sm:$0xf0] }
 0x263   : > { %v11171_v47 = vld [vmem:[%s13231_s6 + $0x1648] sm:$0xf]  ;;  %v10916_v5 = vor.u32 %v12556_v46, %v10915_v44  ;;  %6481 = vmatpush.bf16.msrb.mxu1 %v10660_v56 }
 0x264   : > { %v12620_v51 = vld [vmem:[%s13231_s6 + $0x1664] sm:$0xf0] }
 0x265   : > { %v10371_v52 = vld [vmem:[%s13231_s6 + $0x1008] sm:$0xf]  ;;  %v11172_v18 = vor.u32 %v12620_v51, %v11171_v47  ;;  %6494 = vmatpush.bf16.msrb.mxu2 %v10916_v5  ;;  %v11944_v47 = vld [vmem:[%s13231_s6 + $0x14c] sm:$0xf] }
 0x266   : > { %v12420_v57 = vld [vmem:[%s13231_s6 + $0x1024] sm:$0xf0]  ;;  %v8485_v51 = vld [vmem:[%s13231_s6 + $0x168] sm:$0xf0] }
 0x267   : > { %v10627_v60 = vld [vmem:[%s13231_s6 + $0x1208] sm:$0xf]  ;;  %v10372_v27 = vor.u32 %v12420_v57, %v10371_v52  ;;  %6507 = vmatpush.bf16.msrb.mxu3 %v11172_v18  ;;  %v12008_v52 = vld [vmem:[%s13231_s6 + $0x34c] sm:$0xf]  ;;  %v8488_v5 = vor.u32 %v11944_v47, %v8485_v51 }
 0x268   : > { %v12484_v63 = vld [vmem:[%s13231_s6 + $0x1224] sm:$0xf0]  ;;  %v8744_v18 = vor.u32 %v12008_v52, %v8741_v55 }
 0x269   : > { %v10883_v6 = vld [vmem:[%s13231_s6 + $0x1408] sm:$0xf]  ;;  %v10628_v3 = vor.u32 %v12484_v63, %v10627_v60  ;;  %6469 = vmatpush.bf16.msrb.mxu0 %v10372_v27 }
 0x26a   : > { %v12548_v7 = vld [vmem:[%s13231_s6 + $0x1424] sm:$0xf0] }
 0x26b   : > { %v11139_v15 = vld [vmem:[%s13231_s6 + $0x1608] sm:$0xf]  ;;  %v10884_v28 = vor.u32 %v12548_v7, %v10883_v6  ;;  %6482 = vmatpush.bf16.msrb.mxu1 %v10628_v3 }
 0x26c   : > { %v12612_v49 = vld [vmem:[%s13231_s6 + $0x1624] sm:$0xf0]  ;;  %6470 = vmatmul.bf16.vlgmr.msrb.gmra.mxu0 %v13704_v53 }
 0x26d   : > { %v11619_v62 = vld [vmem:[%s13231_s6 + $0x19c8] sm:$0xf]  ;;  %v11140_v29 = vor.u32 %v12612_v49, %v11139_v15  ;;  %6495 = vmatpush.bf16.msrb.mxu2 %v10884_v28  ;;  %v11936_v15 = vld [vmem:[%s13231_s6 + $0x10c] sm:$0xf] }
 0x26e   : > { %v12732_v9 = vld [vmem:[%s13231_s6 + $0x19e4] sm:$0xf0]  ;;  %6483 = vmatmul.bf16.vlgmr.msrb.gmra.mxu1 %v13711_v58  ;;  %v12000_v49 = vld [vmem:[%s13231_s6 + $0x30c] sm:$0xf]  ;;  %v8456_v13 = vor.u32 %v11936_v15, %v8453_v61 }
 0x26f   : > { %v11875_v17 = vld [vmem:[%s13231_s6 + $0x1bc8] sm:$0xf]  ;;  %v11620_v30 = vor.u32 %v12732_v9, %v11619_v62  ;;  %6508 = vmatpush.bf16.msrb.mxu3 %v11140_v29  ;;  %v8709_v62 = vld [vmem:[%s13231_s6 + $0x328] sm:$0xf0]  ;;  %v6263_v9 = vpop.f32.mrf.mxu0 }
 0x270   : > { %v12796_v21 = vld [vmem:[%s13231_s6 + $0x1be4] sm:$0xf0]  ;;  %6496 = vmatmul.bf16.vlgmr.msrb.gmra.mxu2 %v13706_v54  ;;  %v6264_v16 = vadd.f32 %v6263_v9, %v14174_v50  ;;  %v8712_v25 = vor.u32 %v12000_v49, %v8709_v62  ;;  %v11928_v29 = vld [vmem:[%s13231_s6 + $0xcc] sm:$0xf] }
 0x271   : > { %v11876_v12 = vor.u32 %v12796_v21, %v11875_v17  ;;  %v11587_v31 = vld [vmem:[%s13231_s6 + $0x1988] sm:$0xf]  ;;  %6514 = vmatpush.bf16.msra.mxu0 %v11620_v30  ;;  %6540 = vmatpush.bf16.msra.mxu2 %v8552_v33  ;;  %v11992_v50 = vld [vmem:[%s13231_s6 + $0x2cc] sm:$0xf] }
 0x272   : > { %v12724_v32 = vld [vmem:[%s13231_s6 + $0x19a4] sm:$0xf0]  ;;  %6509 = vmatmul.bf16.vlgmr.msrb.gmra.mxu3 %v13713_v59  ;;  %v6277_v30 = vadd.f32 %v6276_v2, %v6264_v16  ;;  %v8613_v15 = vld [vmem:[%s13231_s6 + $0x268] sm:$0xf0] }
 0x273   : > { %v11843_v48 = vld [vmem:[%s13231_s6 + $0x1b88] sm:$0xf]  ;;  %6527 = vmatpush.bf16.msra.mxu1 %v11876_v12  ;;  %v11588_v39 = vor.u32 %v12724_v32, %v11587_v31  ;;  %6553 = vmatpush.bf16.msra.mxu3 %v8808_v34  ;;  %v8421_v12 = vld [vmem:[%s13231_s6 + $0xe8] sm:$0xf0] }
 0x274   : > { %v12788_v35 = vld [vmem:[%s13231_s6 + $0x1ba4] sm:$0xf0]  ;;  %v8677_v31 = vld [vmem:[%s13231_s6 + $0x2e8] sm:$0xf0] }
 0x275   : > { %v11844_v40 = vor.u32 %v12788_v35, %v11843_v48  ;;  %v11555_v19 = vld [vmem:[%s13231_s6 + $0x1948] sm:$0xf]  ;;  %6515 = vmatpush.bf16.msra.mxu0 %v11588_v39  ;;  %6541 = vmatpush.bf16.msra.mxu2 %v8520_v42  ;;  %v8424_v35 = vor.u32 %v11928_v29, %v8421_v12  ;;  %v8680_v24 = vor.u32 %v11992_v50, %v8677_v31  ;;  %v11920_v39 = vld [vmem:[%s13231_s6 + $0x8c] sm:$0xf] }
 0x276   : > { %v12716_v41 = vld [vmem:[%s13231_s6 + $0x1964] sm:$0xf0]  ;;  %v11984_v42 = vld [vmem:[%s13231_s6 + $0x28c] sm:$0xf] }
 0x277   : > { %v11811_v44 = vld [vmem:[%s13231_s6 + $0x1b48] sm:$0xf]  ;;  %6528 = vmatpush.bf16.msra.mxu1 %v11844_v40  ;;  %v11556_v56 = vor.u32 %v12716_v41, %v11555_v19  ;;  %6554 = vmatpush.bf16.msra.mxu3 %v8776_v43  ;;  %v6290_v40 = vadd.f32 %v6289_v36, %v6277_v30  ;;  %v6302_v19 = vpop.f32.mrf.mxu3  ;;  %v8389_v41 = vld [vmem:[%s13231_s6 + $0xa8] sm:$0xf0] }
 0x278   : > { %v12780_v46 = vld [vmem:[%s13231_s6 + $0x1b64] sm:$0xf0]  ;;  %v8645_v43 = vld [vmem:[%s13231_s6 + $0x2a8] sm:$0xf0] }
 0x279   : > { %v11812_v57 = vor.u32 %v12780_v46, %v11811_v44  ;;  %v11523_v60 = vld [vmem:[%s13231_s6 + $0x1908] sm:$0xf]  ;;  %6516 = vmatpush.bf16.msra.mxu0 %v11556_v56  ;;  %6542 = vmatpush.bf16.msra.mxu2 %v8488_v5  ;;  %v6265_v44 = vpop.f32.mrf.mxu0  ;;  %v14245_v46 = vadd.f32 %v6302_v19, %v6290_v40  ;;  %v6278_v56 = vpop.f32.mrf.mxu1  ;;  %v9061_v29 = vld [vmem:[%s13231_s6 + $0x5e8] sm:$0xf0] }
 0x27a   : > { %v12708_v63 = vld [vmem:[%s13231_s6 + $0x1924] sm:$0xf0]  ;;  %v12152_v12 = vld [vmem:[%s13231_s6 + $0x7cc] sm:$0xf] }
 0x27b   : > { %v11779_v6 = vld [vmem:[%s13231_s6 + $0x1b08] sm:$0xf]  ;;  %6529 = vmatpush.bf16.msra.mxu1 %v11812_v57  ;;  %v11524_v17 = vor.u32 %v12708_v63, %v11523_v60  ;;  %6555 = vmatpush.bf16.msra.mxu3 %v8744_v18  ;;  %v8392_v57 = vor.u32 %v11920_v39, %v8389_v41  ;;  %v8648_v60 = vor.u32 %v11984_v42, %v8645_v43  ;;  %v11912_v18 = vld [vmem:[%s13231_s6 + $0x4c] sm:$0xf] }
 0x27c   : > { %v12772_v7 = vld [vmem:[%s13231_s6 + $0x1b24] sm:$0xf0]  ;;  %v9317_v50 = vld [vmem:[%s13231_s6 + $0x7e8] sm:$0xf0] }
 0x27d   : > { %v11780_v21 = vor.u32 %v12772_v7, %v11779_v6  ;;  %v11491_v27 = vld [vmem:[%s13231_s6 + $0x18c8] sm:$0xf]  ;;  %6517 = vmatpush.bf16.msra.mxu0 %v11524_v17  ;;  %6543 = vmatpush.bf16.msra.mxu2 %v8456_v13  ;;  %v8357_v6 = vld [vmem:[%s13231_s6 + $0x68] sm:$0xf0] }
 0x27e   : > { %v12700_v3 = vld [vmem:[%s13231_s6 + $0x18e4] sm:$0xf0]  ;;  %v11976_v7 = vld [vmem:[%s13231_s6 + $0x24c] sm:$0xf] }
 0x27f   : > { %v11747_v26 = vld [vmem:[%s13231_s6 + $0x1ac8] sm:$0xf]  ;;  %6530 = vmatpush.bf16.msra.mxu1 %v11780_v21  ;;  %v11492_v32 = vor.u32 %v12700_v3, %v11491_v27  ;;  %6556 = vmatpush.bf16.msra.mxu3 %v8712_v25  ;;  %v8360_v21 = vor.u32 %v11912_v18, %v8357_v6  ;;  %v8616_v2 = vor.u32 %v11976_v7, %v8613_v15  ;;  %v11904_v27 = vld [vmem:[%s13231_s6 + $0xc] sm:$0xf]  ;;  %v6291_v25 = vpop.f32.mrf.mxu2  ;;  %v6304_v30 = vpop.f32.mrf.mxu3 }
 0x280   : > { %v12764_v28 = vld [vmem:[%s13231_s6 + $0x1ae4] sm:$0xf0]  ;;  %v8325_v3 = vld [vmem:[%s13231_s6 + $0x28] sm:$0xf0] }
 0x281   : > { %v11748_v33 = vor.u32 %v12764_v28, %v11747_v26  ;;  %v11459_v34 = vld [vmem:[%s13231_s6 + $0x1888] sm:$0xf]  ;;  %6518 = vmatpush.bf16.msra.mxu0 %v11492_v32  ;;  %6544 = vmatpush.bf16.msra.mxu2 %v8424_v35  ;;  %v11968_v13 = vld [vmem:[%s13231_s6 + $0x20c] sm:$0xf] }
 0x282   : > { %v12692_v48 = vld [vmem:[%s13231_s6 + $0x18a4] sm:$0xf0]  ;;  %v8581_v26 = vld [vmem:[%s13231_s6 + $0x228] sm:$0xf0] }
 0x283   : > { %v11715_v37 = vld [vmem:[%s13231_s6 + $0x1a88] sm:$0xf]  ;;  %6531 = vmatpush.bf16.msra.mxu1 %v11748_v33  ;;  %v11460_v47 = vor.u32 %v12692_v48, %v11459_v34  ;;  %6557 = vmatpush.bf16.msra.mxu3 %v8680_v24  ;;  %v12088_v28 = vld [vmem:[%s13231_s6 + $0x5cc] sm:$0xf]  ;;  %v8328_v24 = vor.u32 %v11904_v27, %v8325_v3  ;;  %v8584_v36 = vor.u32 %v11968_v13, %v8581_v26 }
 0x284   : > { %v12756_v38 = vld [vmem:[%s13231_s6 + $0x1aa4] sm:$0xf0]  ;;  %v12216_v31 = vld [vmem:[%s13231_s6 + $0x9cc] sm:$0xf] }
 0x285   : > { %v11716_v51 = vor.u32 %v12756_v38, %v11715_v37  ;;  %v11427_v52 = vld [vmem:[%s13231_s6 + $0x1848] sm:$0xf]  ;;  %6519 = vmatpush.bf16.msra.mxu0 %v11460_v47  ;;  %6545 = vmatpush.bf16.msra.mxu2 %v8392_v57  ;;  %v9573_v34 = vld [vmem:[%s13231_s6 + $0x9e8] sm:$0xf0]  ;;  %v9064_v37 = vor.u32 %v12088_v28, %v9061_v29  ;;  %v9320_v38 = vor.u32 %v12152_v12, %v9317_v50  ;;  %v6315_v29 = vpop.f32.mrf.mxu0 }
 0x286   : > { %v12684_v55 = vld [vmem:[%s13231_s6 + $0x1864] sm:$0xf0]  ;;  %v12280_v48 = vld [vmem:[%s13231_s6 + $0xbcc] sm:$0xf]  ;;  %v9576_v19 = vor.u32 %v12216_v31, %v9573_v34  ;;  %v6316_v30 = vadd.f32 %v6315_v29, %v14245_v46  ;;  %v6328_v31 = vpop.f32.mrf.mxu1 }
 0x287   : > { %v11683_v63 = vld [vmem:[%s13231_s6 + $0x1a48] sm:$0xf]  ;;  %6532 = vmatpush.bf16.msra.mxu1 %v11716_v51  ;;  %v11428_v49 = vor.u32 %v12684_v55, %v11427_v52  ;;  %6558 = vmatpush.bf16.msra.mxu3 %v8648_v60  ;;  %v9829_v35 = vld [vmem:[%s13231_s6 + $0xbe8] sm:$0xf0] }
 0x288   : > { %v12748_v5 = vld [vmem:[%s13231_s6 + $0x1a64] sm:$0xf0]  ;;  %v12080_v39 = vld [vmem:[%s13231_s6 + $0x58c] sm:$0xf]  ;;  %v9832_v41 = vor.u32 %v12280_v48, %v9829_v35 }
 0x289   : > { %v11395_v61 = vld [vmem:[%s13231_s6 + $0x1808] sm:$0xf]  ;;  %v11684_v62 = vor.u32 %v12748_v5, %v11683_v63  ;;  %6520 = vmatpush.bf16.msra.mxu0 %v11428_v49  ;;  %6546 = vmatpush.bf16.msra.mxu2 %v8360_v21  ;;  %v9029_v40 = vld [vmem:[%s13231_s6 + $0x5a8] sm:$0xf0] }
 0x28a   : > { %v12676_v9 = vld [vmem:[%s13231_s6 + $0x1824] sm:$0xf0]  ;;  %v12144_v42 = vld [vmem:[%s13231_s6 + $0x78c] sm:$0xf]  ;;  %v9032_v55 = vor.u32 %v12080_v39, %v9029_v40 }
 0x28b   : > { %v11651_v16 = vld [vmem:[%s13231_s6 + $0x1a08] sm:$0xf]  ;;  %6533 = vmatpush.bf16.msra.mxu1 %v11684_v62  ;;  %v11396_v32 = vor.u32 %v12676_v9, %v11395_v61  ;;  %6559 = vmatpush.bf16.msra.mxu3 %v8616_v2  ;;  %v9285_v43 = vld [vmem:[%s13231_s6 + $0x7a8] sm:$0xf0] }
 0x28c   : > { %v12740_v17 = vld [vmem:[%s13231_s6 + $0x1a24] sm:$0xf0]  ;;  %v12208_v44 = vld [vmem:[%s13231_s6 + $0x98c] sm:$0xf]  ;;  %v9288_v56 = vor.u32 %v12144_v42, %v9285_v43 }
 0x28d   : > { %v11652_v33 = vor.u32 %v12740_v17, %v11651_v16  ;;  %6521 = vmatpush.bf16.msra.mxu0 %v11396_v32  ;;  %v9541_v47 = vld [vmem:[%s13231_s6 + $0x9a8] sm:$0xf0]  ;;  %6547 = vmatpush.bf16.msra.mxu2 %v8328_v24 }
 0x28e   : > { %v12272_v51 = vld [vmem:[%s13231_s6 + $0xb8c] sm:$0xf]  ;;  %v9544_v63 = vor.u32 %v12208_v44, %v9541_v47  ;;  %v6341_v47 = vpop.f32.mrf.mxu2 }
 0x28f   : > { %6534 = vmatpush.bf16.msra.mxu1 %v11652_v33  ;;  %v9797_v52 = vld [vmem:[%s13231_s6 + $0xba8] sm:$0xf0]  ;;  %6560 = vmatpush.bf16.msra.mxu3 %v8584_v36 }
 0x290   : > { %v12072_v57 = vld [vmem:[%s13231_s6 + $0x54c] sm:$0xf]  ;;  %v9800_v5 = vor.u32 %v12272_v51, %v9797_v52  ;;  %6522 = vmatmul.bf16.vlgmr.msra.gmra.mxu0 %v13780_v20  ;;  %6548 = vmatmul.bf16.vlgmr.msra.gmra.mxu2 %v13572_v14 }
 0x291   : > { %6566 = vmatpush.bf16.msrb.mxu0 %v9064_v37  ;;  %v8997_v60 = vld [vmem:[%s13231_s6 + $0x568] sm:$0xf0]  ;;  %6592 = vmatpush.bf16.msrb.mxu2 %v9576_v19  ;;  %v6329_v37 = vadd.f32 %v6328_v31, %v6316_v30 }
 0x292   : > { %v12136_v18 = vld [vmem:[%s13231_s6 + $0x74c] sm:$0xf]  ;;  %6535 = vmatmul.bf16.vlgmr.msra.gmra.mxu1 %v13782_v45  ;;  %6561 = vmatmul.bf16.vlgmr.msra.gmra.mxu3 %v13588_v23  ;;  %v9000_v62 = vor.u32 %v12072_v57, %v8997_v60  ;;  %v6354_v57 = vpop.f32.mrf.mxu3 }
 0x293   : > { %6579 = vmatpush.bf16.msrb.mxu1 %v9320_v38  ;;  %6605 = vmatpush.bf16.msrb.mxu3 %v9832_v41  ;;  %v9253_v6 = vld [vmem:[%s13231_s6 + $0x768] sm:$0xf0] }
 0x294   : > { %v12200_v7 = vld [vmem:[%s13231_s6 + $0x94c] sm:$0xf]  ;;  %v9256_v9 = vor.u32 %v12136_v18, %v9253_v6  ;;  %v6317_v18 = vpop.f32.mrf.mxu0 }
 0x295   : > { %v9509_v15 = vld [vmem:[%s13231_s6 + $0x968] sm:$0xf0]  ;;  %6567 = vmatpush.bf16.msrb.mxu0 %v9032_v55  ;;  %6593 = vmatpush.bf16.msrb.mxu2 %v9544_v63 }
 0x296   : > { %v12264_v61 = vld [vmem:[%s13231_s6 + $0xb4c] sm:$0xf]  ;;  %v9512_v21 = vor.u32 %v12200_v7, %v9509_v15 }
 0x297   : > { %v9765_v49 = vld [vmem:[%s13231_s6 + $0xb68] sm:$0xf0]  ;;  %6580 = vmatpush.bf16.msrb.mxu1 %v9288_v56  ;;  %6606 = vmatpush.bf16.msrb.mxu3 %v9800_v5  ;;  %v6342_v56 = vadd.f32 %v6341_v47, %v6329_v37 }
 0x298   : > { %v12064_v16 = vld [vmem:[%s13231_s6 + $0x50c] sm:$0xf]  ;;  %v9768_v2 = vor.u32 %v12264_v61, %v9765_v49 }
 0x299   : > { %v8965_v17 = vld [vmem:[%s13231_s6 + $0x528] sm:$0xf0]  ;;  %6568 = vmatpush.bf16.msrb.mxu0 %v9000_v62  ;;  %6594 = vmatpush.bf16.msrb.mxu2 %v9512_v21  ;;  %v6355_v6 = vadd.f32 %v6354_v57, %v6342_v56 }
 0x29a   : > { %v12128_v27 = vld [vmem:[%s13231_s6 + $0x70c] sm:$0xf]  ;;  %v8968_v12 = vor.u32 %v12064_v16, %v8965_v17 }
 0x29b   : > { %v9221_v3 = vld [vmem:[%s13231_s6 + $0x728] sm:$0xf0]  ;;  %6581 = vmatpush.bf16.msrb.mxu1 %v9256_v9  ;;  %6607 = vmatpush.bf16.msrb.mxu3 %v9768_v2  ;;  %v6330_v9 = vpop.f32.mrf.mxu1 }
 0x29c   : > { %v12192_v13 = vld [vmem:[%s13231_s6 + $0x90c] sm:$0xf]  ;;  %v9224_v50 = vor.u32 %v12128_v27, %v9221_v3  ;;  %v7458_v3 = vrot.slane %v6355_v6, 6 }
 0x29d   : > { %v9477_v25 = vld [vmem:[%s13231_s6 + $0x928] sm:$0xf0]  ;;  %6569 = vmatpush.bf16.msrb.mxu0 %v8968_v12 }
 0x29e   : > { %v12256_v26 = vld [vmem:[%s13231_s6 + $0xb0c] sm:$0xf]  ;;  %v9480_v34 = vor.u32 %v12192_v13, %v9477_v25 }
 0x29f   : > { %v9733_v28 = vld [vmem:[%s13231_s6 + $0xb28] sm:$0xf0]  ;;  %6582 = vmatpush.bf16.msrb.mxu1 %v9224_v50 }
 0x2a0   : > { %v12056_v32 = vld [vmem:[%s13231_s6 + $0x4cc] sm:$0xf]  ;;  %v9736_v48 = vor.u32 %v12256_v26, %v9733_v28  ;;  %6595 = vmatpush.bf16.msrb.mxu2 %v9480_v34  ;;  %v14327_v28 = vsel %vm486_vm0, %v14090_v4, %v7458_v3 }
 0x2a1   : > { %v8933_v33 = vld [vmem:[%s13231_s6 + $0x4e8] sm:$0xf0] }
 0x2a2   : > { %v12120_v35 = vld [vmem:[%s13231_s6 + $0x6cc] sm:$0xf]  ;;  %v8936_v40 = vor.u32 %v12056_v32, %v8933_v33  ;;  %6608 = vmatpush.bf16.msrb.mxu3 %v9736_v48 }
 0x2a3   : > { %v9189_v24 = vld [vmem:[%s13231_s6 + $0x6e8] sm:$0xf0] }
 0x2a4   : > { %v12184_v36 = vld [vmem:[%s13231_s6 + $0x8cc] sm:$0xf]  ;;  %v9192_v19 = vor.u32 %v12120_v35, %v9189_v24  ;;  %6570 = vmatpush.bf16.msrb.mxu0 %v8936_v40  ;;  %v6343_v35 = vpop.f32.mrf.mxu2 }
 0x2a5   : > { %v9445_v38 = vld [vmem:[%s13231_s6 + $0x8e8] sm:$0xf0] }
 0x2a6   : > { %v12248_v46 = vld [vmem:[%s13231_s6 + $0xacc] sm:$0xf]  ;;  %v9448_v43 = vor.u32 %v12184_v36, %v9445_v38  ;;  %6583 = vmatpush.bf16.msrb.mxu1 %v9192_v19  ;;  %v6356_v38 = vpop.f32.mrf.mxu3 }
 0x2a7   : > { %v9701_v39 = vld [vmem:[%s13231_s6 + $0xae8] sm:$0xf0] }
 0x2a8   : > { %v12048_v41 = vld [vmem:[%s13231_s6 + $0x48c] sm:$0xf]  ;;  %v9704_v44 = vor.u32 %v12248_v46, %v9701_v39  ;;  %6596 = vmatpush.bf16.msrb.mxu2 %v9448_v43 }
 0x2a9   : > { %v8901_v42 = vld [vmem:[%s13231_s6 + $0x4a8] sm:$0xf0] }
 0x2aa   : > { %v12112_v51 = vld [vmem:[%s13231_s6 + $0x68c] sm:$0xf]  ;;  %v8904_v7 = vor.u32 %v12048_v41, %v8901_v42  ;;  %6609 = vmatpush.bf16.msrb.mxu3 %v9704_v44 }
 0x2ab   : > { %v9157_v52 = vld [vmem:[%s13231_s6 + $0x6a8] sm:$0xf0] }
 0x2ac   : > { %v12176_v55 = vld [vmem:[%s13231_s6 + $0x88c] sm:$0xf]  ;;  %v9160_v15 = vor.u32 %v12112_v51, %v9157_v52  ;;  %6571 = vmatpush.bf16.msrb.mxu0 %v8904_v7 }
 0x2ad   : > { %v9413_v60 = vld [vmem:[%s13231_s6 + $0x8a8] sm:$0xf0] }
 0x2ae   : > { %v12240_v63 = vld [vmem:[%s13231_s6 + $0xa8c] sm:$0xf]  ;;  %v9416_v16 = vor.u32 %v12176_v55, %v9413_v60  ;;  %6584 = vmatpush.bf16.msrb.mxu1 %v9160_v15 }
 0x2af   : > { %v9669_v5 = vld [vmem:[%s13231_s6 + $0xaa8] sm:$0xf0] }
 0x2b0   : > { %v12040_v61 = vld [vmem:[%s13231_s6 + $0x44c] sm:$0xf]  ;;  %v9672_v17 = vor.u32 %v12240_v63, %v9669_v5  ;;  %6597 = vmatpush.bf16.msrb.mxu2 %v9416_v16 }
 0x2b1   : > { %v8869_v49 = vld [vmem:[%s13231_s6 + $0x468] sm:$0xf0] }
 0x2b2   : > { %v12104_v62 = vld [vmem:[%s13231_s6 + $0x64c] sm:$0xf]  ;;  %v8872_v29 = vor.u32 %v12040_v61, %v8869_v49  ;;  %6610 = vmatpush.bf16.msrb.mxu3 %v9672_v17 }
 0x2b3   : > { %v9125_v21 = vld [vmem:[%s13231_s6 + $0x668] sm:$0xf0] }
 0x2b4   : > { %v12168_v2 = vld [vmem:[%s13231_s6 + $0x84c] sm:$0xf]  ;;  %v9128_v30 = vor.u32 %v12104_v62, %v9125_v21  ;;  %6572 = vmatpush.bf16.msrb.mxu0 %v8872_v29 }
 0x2b5   : > { %v9381_v27 = vld [vmem:[%s13231_s6 + $0x868] sm:$0xf0] }
 0x2b6   : > { %v12232_v13 = vld [vmem:[%s13231_s6 + $0xa4c] sm:$0xf]  ;;  %v9384_v32 = vor.u32 %v12168_v2, %v9381_v27  ;;  %6585 = vmatpush.bf16.msrb.mxu1 %v9128_v30 }
 0x2b7   : > { %v9637_v25 = vld [vmem:[%s13231_s6 + $0xa68] sm:$0xf0] }
 0x2b8   : > { %v12032_v26 = vld [vmem:[%s13231_s6 + $0x40c] sm:$0xf]  ;;  %v9640_v33 = vor.u32 %v12232_v13, %v9637_v25  ;;  %6598 = vmatpush.bf16.msrb.mxu2 %v9384_v32 }
 0x2b9   : > { %v8837_v12 = vld [vmem:[%s13231_s6 + $0x428] sm:$0xf0] }
 0x2ba   : > { %v12096_v50 = vld [vmem:[%s13231_s6 + $0x60c] sm:$0xf]  ;;  %v8840_v19 = vor.u32 %v12032_v26, %v8837_v12  ;;  %6611 = vmatpush.bf16.msrb.mxu3 %v9640_v33 }
 0x2bb   : > { %v9093_v31 = vld [vmem:[%s13231_s6 + $0x628] sm:$0xf0] }
 0x2bc   : > { %v12160_v4 = vld [vmem:[%s13231_s6 + $0x80c] sm:$0xf]  ;;  %v9096_v41 = vor.u32 %v12096_v50, %v9093_v31  ;;  %6573 = vmatpush.bf16.msrb.mxu0 %v8840_v19 }
 0x2bd   : > { %v9349_v34 = vld [vmem:[%s13231_s6 + $0x828] sm:$0xf0] }
 0x2be   : > { %v12224_v48 = vld [vmem:[%s13231_s6 + $0xa0c] sm:$0xf]  ;;  %v9352_v47 = vor.u32 %v12160_v4, %v9349_v34  ;;  %6586 = vmatpush.bf16.msrb.mxu1 %v9096_v41 }
 0x2bf   : > { %v9605_v24 = vld [vmem:[%s13231_s6 + $0xa28] sm:$0xf0]  ;;  %6574 = vmatmul.bf16.vlgmr.msrb.gmra.mxu0 %v13570_v11 }
 0x2c0   : > { %v12344_v36 = vld [vmem:[%s13231_s6 + $0xdcc] sm:$0xf]  ;;  %v9608_v51 = vor.u32 %v12224_v48, %v9605_v24  ;;  %6599 = vmatpush.bf16.msrb.mxu2 %v9352_v47 }
 0x2c1   : > { %v10085_v37 = vld [vmem:[%s13231_s6 + $0xde8] sm:$0xf0]  ;;  %6587 = vmatmul.bf16.vlgmr.msrb.gmra.mxu1 %v13586_v22 }
 0x2c2   : > { %v12408_v46 = vld [vmem:[%s13231_s6 + $0xfcc] sm:$0xf]  ;;  %v10088_v52 = vor.u32 %v12344_v36, %v10085_v37  ;;  %6612 = vmatpush.bf16.msrb.mxu3 %v9608_v51  ;;  %v6367_v36 = vpop.f32.mrf.mxu0 }
 0x2c3   : > { %v10341_v39 = vld [vmem:[%s13231_s6 + $0xfe8] sm:$0xf0]  ;;  %6600 = vmatmul.bf16.vlgmr.msrb.gmra.mxu2 %v13668_v1 }
 0x2c4   : > { %v12472_v40 = vld [vmem:[%s13231_s6 + $0x11cc] sm:$0xf]  ;;  %v10344_v55 = vor.u32 %v12408_v46, %v10341_v39  ;;  %6618 = vmatpush.bf16.msra.mxu0 %v10088_v52 }
 0x2c5   : > { %v10597_v42 = vld [vmem:[%s13231_s6 + $0x11e8] sm:$0xf0]  ;;  %6613 = vmatmul.bf16.vlgmr.msrb.gmra.mxu3 %v13672_v10 }
 0x2c6   : > { %v12536_v43 = vld [vmem:[%s13231_s6 + $0x13cc] sm:$0xf]  ;;  %v10600_v60 = vor.u32 %v12472_v40, %v10597_v42  ;;  %6631 = vmatpush.bf16.msra.mxu1 %v10344_v55  ;;  %v6380_v40 = vpop.f32.mrf.mxu1 }
 0x2c7   : > { %v10853_v44 = vld [vmem:[%s13231_s6 + $0x13e8] sm:$0xf0]  ;;  %v6381_v47 = vadd.f32 %v6380_v40, %v6367_v36 }
 0x2c8   : > { %v12336_v56 = vld [vmem:[%s13231_s6 + $0xd8c] sm:$0xf]  ;;  %v10856_v63 = vor.u32 %v12536_v43, %v10853_v44  ;;  %6644 = vmatpush.bf16.msra.mxu2 %v10600_v60 }
 0x2c9   : > { %v10053_v57 = vld [vmem:[%s13231_s6 + $0xda8] sm:$0xf0] }
 0x2ca   : > { %v12400_v5 = vld [vmem:[%s13231_s6 + $0xf8c] sm:$0xf]  ;;  %v10056_v49 = vor.u32 %v12336_v56, %v10053_v57  ;;  %6657 = vmatpush.bf16.msra.mxu3 %v10856_v63 }
 0x2cb   : > { %v10309_v18 = vld [vmem:[%s13231_s6 + $0xfa8] sm:$0xf0] }
 0x2cc   : > { %v12464_v6 = vld [vmem:[%s13231_s6 + $0x118c] sm:$0xf]  ;;  %v10312_v62 = vor.u32 %v12400_v5, %v10309_v18  ;;  %6619 = vmatpush.bf16.msra.mxu0 %v10056_v49 }
 0x2cd   : > { %v10565_v7 = vld [vmem:[%s13231_s6 + $0x11a8] sm:$0xf0] }
 0x2ce   : > { %v12528_v15 = vld [vmem:[%s13231_s6 + $0x138c] sm:$0xf]  ;;  %v10568_v17 = vor.u32 %v12464_v6, %v10565_v7  ;;  %6632 = vmatpush.bf16.msra.mxu1 %v10312_v62 }
 0x2cf   : > { %v10821_v61 = vld [vmem:[%s13231_s6 + $0x13a8] sm:$0xf0] }
 0x2d0   : > { %v12328_v9 = vld [vmem:[%s13231_s6 + $0xd4c] sm:$0xf]  ;;  %v10824_v21 = vor.u32 %v12528_v15, %v10821_v61  ;;  %6645 = vmatpush.bf16.msra.mxu2 %v10568_v17  ;;  %v6393_v61 = vpop.f32.mrf.mxu2  ;;  %v6406_v17 = vpop.f32.mrf.mxu3 }
 0x2d1   : > { %v10021_v16 = vld [vmem:[%s13231_s6 + $0xd68] sm:$0xf0] }
 0x2d2   : > { %v12392_v2 = vld [vmem:[%s13231_s6 + $0xf4c] sm:$0xf]  ;;  %v10024_v29 = vor.u32 %v12328_v9, %v10021_v16  ;;  %6658 = vmatpush.bf16.msra.mxu3 %v10824_v21  ;;  %v6394_v16 = vadd.f32 %v6393_v61, %v6381_v47  ;;  %v6369_v21 = vpop.f32.mrf.mxu0 }
 0x2d3   : > { %v10277_v27 = vld [vmem:[%s13231_s6 + $0xf68] sm:$0xf0] }
 0x2d4   : > { %v12456_v3 = vld [vmem:[%s13231_s6 + $0x114c] sm:$0xf]  ;;  %v10280_v30 = vor.u32 %v12392_v2, %v10277_v27  ;;  %6620 = vmatpush.bf16.msra.mxu0 %v10024_v29 }
 0x2d5   : > { %v10533_v13 = vld [vmem:[%s13231_s6 + $0x1168] sm:$0xf0] }
 0x2d6   : > { %v12520_v25 = vld [vmem:[%s13231_s6 + $0x134c] sm:$0xf]  ;;  %v10536_v31 = vor.u32 %v12456_v3, %v10533_v13  ;;  %6633 = vmatpush.bf16.msra.mxu1 %v10280_v30 }
 0x2d7   : > { %v10789_v26 = vld [vmem:[%s13231_s6 + $0x1368] sm:$0xf0] }
 0x2d8   : > { %v12320_v12 = vld [vmem:[%s13231_s6 + $0xd0c] sm:$0xf]  ;;  %v10792_v32 = vor.u32 %v12520_v25, %v10789_v26  ;;  %6646 = vmatpush.bf16.msra.mxu2 %v10536_v31  ;;  %v14390_v25 = vadd.f32 %v6406_v17, %v6394_v16  ;;  %v6382_v26 = vpop.f32.mrf.mxu1  ;;  %v6408_v47 = vpop.f32.mrf.mxu3 }
 0x2d9   : > { %v9989_v50 = vld [vmem:[%s13231_s6 + $0xd28] sm:$0xf0] }
 0x2da   : > { %v12384_v33 = vld [vmem:[%s13231_s6 + $0xf0c] sm:$0xf]  ;;  %v9992_v37 = vor.u32 %v12320_v12, %v9989_v50  ;;  %6659 = vmatpush.bf16.msra.mxu3 %v10792_v32 }
 0x2db   : > { %v10245_v4 = vld [vmem:[%s13231_s6 + $0xf28] sm:$0xf0] }
 0x2dc   : > { %v12448_v34 = vld [vmem:[%s13231_s6 + $0x110c] sm:$0xf]  ;;  %v10248_v38 = vor.u32 %v12384_v33, %v10245_v4  ;;  %6621 = vmatpush.bf16.msra.mxu0 %v9992_v37 }
 0x2dd   : > { %v10501_v48 = vld [vmem:[%s13231_s6 + $0x1128] sm:$0xf0] }
 0x2de   : > { %v12512_v35 = vld [vmem:[%s13231_s6 + $0x130c] sm:$0xf]  ;;  %v10504_v19 = vor.u32 %v12448_v34, %v10501_v48  ;;  %6634 = vmatpush.bf16.msra.mxu1 %v10248_v38 }
 0x2df   : > { %v10757_v24 = vld [vmem:[%s13231_s6 + $0x1328] sm:$0xf0] }
 0x2e0   : > { %v12312_v46 = vld [vmem:[%s13231_s6 + $0xccc] sm:$0xf]  ;;  %v10760_v41 = vor.u32 %v12512_v35, %v10757_v24  ;;  %6647 = vmatpush.bf16.msra.mxu2 %v10504_v19 }
 0x2e1   : > { %v9957_v39 = vld [vmem:[%s13231_s6 + $0xce8] sm:$0xf0] }
 0x2e2   : > { %v12376_v42 = vld [vmem:[%s13231_s6 + $0xecc] sm:$0xf]  ;;  %v9960_v56 = vor.u32 %v12312_v46, %v9957_v39  ;;  %6660 = vmatpush.bf16.msra.mxu3 %v10760_v41  ;;  %v6395_v41 = vpop.f32.mrf.mxu2 }
 0x2e3   : > { %v10213_v43 = vld [vmem:[%s13231_s6 + $0xee8] sm:$0xf0] }
 0x2e4   : > { %v12440_v44 = vld [vmem:[%s13231_s6 + $0x10cc] sm:$0xf]  ;;  %v10216_v57 = vor.u32 %v12376_v42, %v10213_v43  ;;  %6622 = vmatpush.bf16.msra.mxu0 %v9960_v56 }
 0x2e5   : > { %v10469_v51 = vld [vmem:[%s13231_s6 + $0x10e8] sm:$0xf0] }
 0x2e6   : > { %v12504_v52 = vld [vmem:[%s13231_s6 + $0x12cc] sm:$0xf]  ;;  %v10472_v5 = vor.u32 %v12440_v44, %v10469_v51  ;;  %6635 = vmatpush.bf16.msra.mxu1 %v10216_v57 }
 0x2e7   : > { %v10725_v55 = vld [vmem:[%s13231_s6 + $0x12e8] sm:$0xf0] }
 0x2e8   : > { %v12304_v60 = vld [vmem:[%s13231_s6 + $0xc8c] sm:$0xf]  ;;  %v10728_v18 = vor.u32 %v12504_v52, %v10725_v55  ;;  %6648 = vmatpush.bf16.msra.mxu2 %v10472_v5 }
 0x2e9   : > { %v9925_v63 = vld [vmem:[%s13231_s6 + $0xca8] sm:$0xf0] }
 0x2ea   : > { %v12368_v6 = vld [vmem:[%s13231_s6 + $0xe8c] sm:$0xf]  ;;  %v9928_v2 = vor.u32 %v12304_v60, %v9925_v63  ;;  %6661 = vmatpush.bf16.msra.mxu3 %v10728_v18 }
 0x2eb   : > { %v10181_v7 = vld [vmem:[%s13231_s6 + $0xea8] sm:$0xf0] }
 0x2ec   : > { %v12432_v15 = vld [vmem:[%s13231_s6 + $0x108c] sm:$0xf]  ;;  %v10184_v27 = vor.u32 %v12368_v6, %v10181_v7  ;;  %6623 = vmatpush.bf16.msra.mxu0 %v9928_v2 }
 0x2ed   : > { %v10437_v49 = vld [vmem:[%s13231_s6 + $0x10a8] sm:$0xf0] }
 0x2ee   : > { %v12496_v62 = vld [vmem:[%s13231_s6 + $0x128c] sm:$0xf]  ;;  %v10440_v29 = vor.u32 %v12432_v15, %v10437_v49  ;;  %6636 = vmatpush.bf16.msra.mxu1 %v10184_v27 }
 0x2ef   : > { %v10693_v9 = vld [vmem:[%s13231_s6 + $0x12a8] sm:$0xf0] }
 0x2f0   : > { %v12296_v3 = vld [vmem:[%s13231_s6 + $0xc4c] sm:$0xf]  ;;  %v10696_v30 = vor.u32 %v12496_v62, %v10693_v9  ;;  %6649 = vmatpush.bf16.msra.mxu2 %v10440_v29 }
 0x2f1   : > { %v9893_v13 = vld [vmem:[%s13231_s6 + $0xc68] sm:$0xf0] }
 0x2f2   : > { %v12360_v12 = vld [vmem:[%s13231_s6 + $0xe4c] sm:$0xf]  ;;  %v9896_v48 = vor.u32 %v12296_v3, %v9893_v13  ;;  %6662 = vmatpush.bf16.msra.mxu3 %v10696_v30 }
 0x2f3   : > { %v10149_v50 = vld [vmem:[%s13231_s6 + $0xe68] sm:$0xf0] }
 0x2f4   : > { %v12424_v31 = vld [vmem:[%s13231_s6 + $0x104c] sm:$0xf]  ;;  %v10152_v35 = vor.u32 %v12360_v12, %v10149_v50  ;;  %6624 = vmatpush.bf16.msra.mxu0 %v9896_v48 }
 0x2f5   : > { %v10405_v32 = vld [vmem:[%s13231_s6 + $0x1068] sm:$0xf0] }
 0x2f6   : > { %v12488_v33 = vld [vmem:[%s13231_s6 + $0x124c] sm:$0xf]  ;;  %v10408_v38 = vor.u32 %v12424_v31, %v10405_v32  ;;  %6637 = vmatpush.bf16.msra.mxu1 %v10152_v35 }
 0x2f7   : > { %v10661_v4 = vld [vmem:[%s13231_s6 + $0x1268] sm:$0xf0] }
 0x2f8   : > { %v12288_v34 = vld [vmem:[%s13231_s6 + $0xc0c] sm:$0xf]  ;;  %v10664_v46 = vor.u32 %v12488_v33, %v10661_v4  ;;  %6650 = vmatpush.bf16.msra.mxu2 %v10408_v38 }
 0x2f9   : > { %v9861_v24 = vld [vmem:[%s13231_s6 + $0xc28] sm:$0xf0] }
 0x2fa   : > { %v12352_v36 = vld [vmem:[%s13231_s6 + $0xe0c] sm:$0xf]  ;;  %v9864_v56 = vor.u32 %v12288_v34, %v9861_v24  ;;  %6663 = vmatpush.bf16.msra.mxu3 %v10664_v46 }
 0x2fb   : > { %v10117_v37 = vld [vmem:[%s13231_s6 + $0xe28] sm:$0xf0] }
 0x2fc   : > { %v12416_v39 = vld [vmem:[%s13231_s6 + $0x100c] sm:$0xf]  ;;  %v10120_v57 = vor.u32 %v12352_v36, %v10117_v37  ;;  %6625 = vmatpush.bf16.msra.mxu0 %v9864_v56 }
 0x2fd   : > { %v10373_v40 = vld [vmem:[%s13231_s6 + $0x1028] sm:$0xf0] }
 0x2fe   : > { %v12480_v19 = vld [vmem:[%s13231_s6 + $0x120c] sm:$0xf]  ;;  %v10376_v18 = vor.u32 %v12416_v39, %v10373_v40  ;;  %6638 = vmatpush.bf16.msra.mxu1 %v10120_v57  ;;  %v6432_v57 = vpop.f32.mrf.mxu1 }
 0x2ff   : > { %v10629_v42 = vld [vmem:[%s13231_s6 + $0x1228] sm:$0xf0]  ;;  %6626 = vmatmul.bf16.vlgmr.msra.gmra.mxu0 %v13666_v0 }
 0x300   : > { %v12600_v43 = vld [vmem:[%s13231_s6 + $0x15cc] sm:$0xf]  ;;  %v10632_v6 = vor.u32 %v12480_v19, %v10629_v42  ;;  %6651 = vmatpush.bf16.msra.mxu2 %v10376_v18 }
 0x301   : > { %v11109_v44 = vld [vmem:[%s13231_s6 + $0x15e8] sm:$0xf0]  ;;  %6639 = vmatmul.bf16.vlgmr.msra.gmra.mxu1 %v13670_v8 }
 0x302   : > { %v12664_v51 = vld [vmem:[%s13231_s6 + $0x17cc] sm:$0xf]  ;;  %v11112_v7 = vor.u32 %v12600_v43, %v11109_v44  ;;  %6664 = vmatpush.bf16.msra.mxu3 %v10632_v6  ;;  %v6419_v44 = vpop.f32.mrf.mxu0 }
 0x303   : > { %v11365_v52 = vld [vmem:[%s13231_s6 + $0x17e8] sm:$0xf0]  ;;  %6652 = vmatmul.bf16.vlgmr.msra.gmra.mxu2 %v13704_v53  ;;  %v6420_v56 = vadd.f32 %v6419_v44, %v14390_v25 }
 0x304   : > { %v12728_v55 = vld [vmem:[%s13231_s6 + $0x19cc] sm:$0xf]  ;;  %v11368_v15 = vor.u32 %v12664_v51, %v11365_v52  ;;  %6670 = vmatpush.bf16.msrb.mxu0 %v11112_v7 }
 0x305   : > { %v11621_v60 = vld [vmem:[%s13231_s6 + $0x19e8] sm:$0xf0]  ;;  %6665 = vmatmul.bf16.vlgmr.msra.gmra.mxu3 %v13711_v58 }
 0x306   : > { %v12792_v63 = vld [vmem:[%s13231_s6 + $0x1bcc] sm:$0xf]  ;;  %v11624_v62 = vor.u32 %v12728_v55, %v11621_v60  ;;  %6683 = vmatpush.bf16.msrb.mxu1 %v11368_v15 }
 0x307   : > { %v11877_v5 = vld [vmem:[%s13231_s6 + $0x1be8] sm:$0xf0] }
 0x308   : > { %v12592_v61 = vld [vmem:[%s13231_s6 + $0x158c] sm:$0xf]  ;;  %v11880_v9 = vor.u32 %v12792_v63, %v11877_v5  ;;  %6696 = vmatpush.bf16.msrb.mxu2 %v11624_v62 }
 0x309   : > { %v11077_v49 = vld [vmem:[%s13231_s6 + $0x15a8] sm:$0xf0] }
 0x30a   : > { %v12656_v16 = vld [vmem:[%s13231_s6 + $0x178c] sm:$0xf]  ;;  %v11080_v13 = vor.u32 %v12592_v61, %v11077_v49  ;;  %6709 = vmatpush.bf16.msrb.mxu3 %v11880_v9  ;;  %v6433_v49 = vadd.f32 %v6432_v57, %v6420_v56 }
 0x30b   : > { %v11333_v17 = vld [vmem:[%s13231_s6 + $0x17a8] sm:$0xf0] }
 0x30c   : > { %v12720_v21 = vld [vmem:[%s13231_s6 + $0x198c] sm:$0xf]  ;;  %v11336_v26 = vor.u32 %v12656_v16, %v11333_v17  ;;  %6671 = vmatpush.bf16.msrb.mxu0 %v11080_v13  ;;  %v6445_v13 = vpop.f32.mrf.mxu2 }
 0x30d   : > { %v11589_v2 = vld [vmem:[%s13231_s6 + $0x19a8] sm:$0xf0] }
 0x30e   : > { %v12784_v27 = vld [vmem:[%s13231_s6 + $0x1b8c] sm:$0xf]  ;;  %v11592_v12 = vor.u32 %v12720_v21, %v11589_v2  ;;  %6684 = vmatpush.bf16.msrb.mxu1 %v11336_v26 }
 0x30f   : > { %v11845_v3 = vld [vmem:[%s13231_s6 + $0x1ba8] sm:$0xf0] }
 0x310   : > { %v12584_v29 = vld [vmem:[%s13231_s6 + $0x154c] sm:$0xf]  ;;  %v11848_v50 = vor.u32 %v12784_v27, %v11845_v3  ;;  %6697 = vmatpush.bf16.msrb.mxu2 %v11592_v12  ;;  %v6446_v12 = vadd.f32 %v6445_v13, %v6433_v49  ;;  %v9067_v49 = vld [vmem:[%s13231_s6 + $0x5d0] sm:$0xf] }
 0x311   : > { %v11045_v30 = vld [vmem:[%s13231_s6 + $0x1568] sm:$0xf0]  ;;  %v8523_v13 = vld [vmem:[%s13231_s6 + $0x190] sm:$0xf] }
 0x312   : > { %v12648_v31 = vld [vmem:[%s13231_s6 + $0x174c] sm:$0xf]  ;;  %v11048_v35 = vor.u32 %v12584_v29, %v11045_v30  ;;  %6710 = vmatpush.bf16.msrb.mxu3 %v11848_v50  ;;  %v6458_v50 = vpop.f32.mrf.mxu3 }
 0x313   : > { %v11301_v32 = vld [vmem:[%s13231_s6 + $0x1768] sm:$0xf0] }
 0x314   : > { %v12712_v33 = vld [vmem:[%s13231_s6 + $0x194c] sm:$0xf]  ;;  %v11304_v24 = vor.u32 %v12648_v31, %v11301_v32  ;;  %6672 = vmatpush.bf16.msrb.mxu0 %v11048_v35  ;;  %v6421_v31 = vpop.f32.mrf.mxu0  ;;  %v6434_v35 = vpop.f32.mrf.mxu1 }
 0x315   : > { %v11557_v4 = vld [vmem:[%s13231_s6 + $0x1968] sm:$0xf0]  ;;  %v9035_v31 = vld [vmem:[%s13231_s6 + $0x590] sm:$0xf] }
 0x316   : > { %v12776_v34 = vld [vmem:[%s13231_s6 + $0x1b4c] sm:$0xf]  ;;  %v11560_v38 = vor.u32 %v12712_v33, %v11557_v4  ;;  %6685 = vmatpush.bf16.msrb.mxu1 %v11304_v24  ;;  %v14459_v4 = vadd.f32 %v6458_v50, %v6446_v12  ;;  %v8779_v12 = vld [vmem:[%s13231_s6 + $0x390] sm:$0xf] }
 0x317   : > { %v11813_v48 = vld [vmem:[%s13231_s6 + $0x1b68] sm:$0xf0]  ;;  %v12021_v50 = vld [vmem:[%s13231_s6 + $0x3ac] sm:$0xf0] }
 0x318   : > { %v12576_v36 = vld [vmem:[%s13231_s6 + $0x150c] sm:$0xf]  ;;  %v11816_v46 = vor.u32 %v12776_v34, %v11813_v48  ;;  %6698 = vmatpush.bf16.msrb.mxu2 %v11560_v38  ;;  %v8780_v35 = vor.u32 %v12021_v50, %v8779_v12  ;;  %v11925_v12 = vld [vmem:[%s13231_s6 + $0xac] sm:$0xf0] }
 0x319   : > { %v11013_v37 = vld [vmem:[%s13231_s6 + $0x1528] sm:$0xf0] }
 0x31a   : > { %v12640_v39 = vld [vmem:[%s13231_s6 + $0x170c] sm:$0xf]  ;;  %v11016_v47 = vor.u32 %v12576_v36, %v11013_v37  ;;  %6711 = vmatpush.bf16.msrb.mxu3 %v11816_v46 }
 0x31b   : > { %v11269_v40 = vld [vmem:[%s13231_s6 + $0x1728] sm:$0xf0] }
 0x31c   : > { %v12704_v19 = vld [vmem:[%s13231_s6 + $0x190c] sm:$0xf]  ;;  %v11272_v51 = vor.u32 %v12640_v39, %v11269_v40  ;;  %6673 = vmatpush.bf16.msrb.mxu0 %v11016_v47 }
 0x31d   : > { %v11525_v41 = vld [vmem:[%s13231_s6 + $0x1928] sm:$0xf0] }
 0x31e   : > { %v12768_v42 = vld [vmem:[%s13231_s6 + $0x1b0c] sm:$0xf]  ;;  %v11528_v60 = vor.u32 %v12704_v19, %v11525_v41  ;;  %6686 = vmatpush.bf16.msrb.mxu1 %v11272_v51 }
 0x31f   : > { %v11781_v43 = vld [vmem:[%s13231_s6 + $0x1b28] sm:$0xf0] }
 0x320   : > { %v12568_v52 = vld [vmem:[%s13231_s6 + $0x14cc] sm:$0xf]  ;;  %v11784_v63 = vor.u32 %v12768_v42, %v11781_v43  ;;  %6699 = vmatpush.bf16.msrb.mxu2 %v11528_v60 }
 0x321   : > { %v10981_v55 = vld [vmem:[%s13231_s6 + $0x14e8] sm:$0xf0] }
 0x322   : > { %v12632_v5 = vld [vmem:[%s13231_s6 + $0x16cc] sm:$0xf]  ;;  %v10984_v25 = vor.u32 %v12568_v52, %v10981_v55  ;;  %6712 = vmatpush.bf16.msrb.mxu3 %v11784_v63  ;;  %v6447_v63 = vpop.f32.mrf.mxu2 }
 0x323   : > { %v11237_v18 = vld [vmem:[%s13231_s6 + $0x16e8] sm:$0xf0]  ;;  %v12069_v63 = vld [vmem:[%s13231_s6 + $0x52c] sm:$0xf0] }
 0x324   : > { %v12696_v6 = vld [vmem:[%s13231_s6 + $0x18cc] sm:$0xf]  ;;  %v11240_v62 = vor.u32 %v12632_v5, %v11237_v18  ;;  %6674 = vmatpush.bf16.msrb.mxu0 %v10984_v25  ;;  %v8555_v18 = vld [vmem:[%s13231_s6 + $0x1d0] sm:$0xf] }
 0x325   : > { %v11493_v7 = vld [vmem:[%s13231_s6 + $0x18e8] sm:$0xf0] }
 0x326   : > { %v12760_v15 = vld [vmem:[%s13231_s6 + $0x1acc] sm:$0xf]  ;;  %v11496_v17 = vor.u32 %v12696_v6, %v11493_v7  ;;  %6687 = vmatpush.bf16.msrb.mxu1 %v11240_v62  ;;  %v11965_v6 = vld [vmem:[%s13231_s6 + $0x1ec] sm:$0xf0]  ;;  %v6460_v7 = vpop.f32.mrf.mxu3 }
 0x327   : > { %v11749_v61 = vld [vmem:[%s13231_s6 + $0x1ae8] sm:$0xf0] }
 0x328   : > { %v12560_v9 = vld [vmem:[%s13231_s6 + $0x148c] sm:$0xf]  ;;  %v11752_v21 = vor.u32 %v12760_v15, %v11749_v61  ;;  %6700 = vmatpush.bf16.msrb.mxu2 %v11496_v17  ;;  %v8811_v15 = vld [vmem:[%s13231_s6 + $0x3d0] sm:$0xf] }
 0x329   : > { %v10949_v16 = vld [vmem:[%s13231_s6 + $0x14a8] sm:$0xf0]  ;;  %v12029_v61 = vld [vmem:[%s13231_s6 + $0x3ec] sm:$0xf0] }
 0x32a   : > { %v12624_v2 = vld [vmem:[%s13231_s6 + $0x168c] sm:$0xf]  ;;  %v10952_v32 = vor.u32 %v12560_v9, %v10949_v16  ;;  %6713 = vmatpush.bf16.msrb.mxu3 %v11752_v21  ;;  %v12093_v9 = vld [vmem:[%s13231_s6 + $0x5ec] sm:$0xf0] }
 0x32b   : > { %v11205_v27 = vld [vmem:[%s13231_s6 + $0x16a8] sm:$0xf0]  ;;  %v9323_v16 = vld [vmem:[%s13231_s6 + $0x7d0] sm:$0xf] }
 0x32c   : > { %v12688_v3 = vld [vmem:[%s13231_s6 + $0x188c] sm:$0xf]  ;;  %v11208_v33 = vor.u32 %v12624_v2, %v11205_v27  ;;  %6675 = vmatpush.bf16.msrb.mxu0 %v10952_v32  ;;  %v12157_v17 = vld [vmem:[%s13231_s6 + $0x7ec] sm:$0xf0]  ;;  %v8556_v27 = vor.u32 %v11965_v6, %v8555_v18  ;;  %v6471_v6 = vpop.f32.mrf.mxu0 }
 0x32d   : > { %v11461_v26 = vld [vmem:[%s13231_s6 + $0x18a8] sm:$0xf0]  ;;  %v12085_v32 = vld [vmem:[%s13231_s6 + $0x5ac] sm:$0xf0]  ;;  %v6472_v7 = vadd.f32 %v6471_v6, %v14459_v4 }
 0x32e   : > { %v12752_v29 = vld [vmem:[%s13231_s6 + $0x1a8c] sm:$0xf]  ;;  %v11464_v24 = vor.u32 %v12688_v3, %v11461_v26  ;;  %6688 = vmatpush.bf16.msrb.mxu1 %v11208_v33  ;;  %v8812_v3 = vor.u32 %v12029_v61, %v8811_v15  ;;  %v11957_v26 = vld [vmem:[%s13231_s6 + $0x1ac] sm:$0xf0] }
 0x32f   : > { %v11717_v30 = vld [vmem:[%s13231_s6 + $0x1aa8] sm:$0xf0]  ;;  %v9291_v33 = vld [vmem:[%s13231_s6 + $0x790] sm:$0xf] }
 0x330   : > { %v12552_v34 = vld [vmem:[%s13231_s6 + $0x144c] sm:$0xf]  ;;  %v11720_v36 = vor.u32 %v12752_v29, %v11717_v30  ;;  %6701 = vmatpush.bf16.msrb.mxu2 %v11464_v24  ;;  %v9068_v29 = vor.u32 %v12093_v9, %v9067_v49  ;;  %v9324_v30 = vor.u32 %v12157_v17, %v9323_v16  ;;  %v8491_v24 = vld [vmem:[%s13231_s6 + $0x150] sm:$0xf]  ;;  %v6484_v49 = vpop.f32.mrf.mxu1 }
 0x331   : > { %v10917_v48 = vld [vmem:[%s13231_s6 + $0x1468] sm:$0xf0]  ;;  %v12133_v18 = vld [vmem:[%s13231_s6 + $0x72c] sm:$0xf0] }
 0x332   : > { %v12616_v37 = vld [vmem:[%s13231_s6 + $0x164c] sm:$0xf]  ;;  %v10920_v42 = vor.u32 %v12552_v34, %v10917_v48  ;;  %6714 = vmatpush.bf16.msrb.mxu3 %v11720_v36  ;;  %v12149_v34 = vld [vmem:[%s13231_s6 + $0x7ac] sm:$0xf0]  ;;  %v8524_v48 = vor.u32 %v11957_v26, %v8523_v13 }
 0x333   : > { %v11173_v38 = vld [vmem:[%s13231_s6 + $0x1668] sm:$0xf0]  ;;  %v11949_v36 = vld [vmem:[%s13231_s6 + $0x16c] sm:$0xf0] }
 0x334   : > { %v12680_v46 = vld [vmem:[%s13231_s6 + $0x184c] sm:$0xf]  ;;  %v11176_v43 = vor.u32 %v12616_v37, %v11173_v38  ;;  %6676 = vmatpush.bf16.msrb.mxu0 %v10920_v42  ;;  %v9036_v37 = vor.u32 %v12085_v32, %v9035_v31  ;;  %v9292_v38 = vor.u32 %v12149_v34, %v9291_v33  ;;  %v12141_v42 = vld [vmem:[%s13231_s6 + $0x76c] sm:$0xf0]  ;;  %v6497_v32 = vpop.f32.mrf.mxu2 }
 0x335   : > { %v11429_v39 = vld [vmem:[%s13231_s6 + $0x1868] sm:$0xf0]  ;;  %v8683_v17 = vld [vmem:[%s13231_s6 + $0x2d0] sm:$0xf] }
 0x336   : > { %v12744_v40 = vld [vmem:[%s13231_s6 + $0x1a4c] sm:$0xf]  ;;  %v11432_v52 = vor.u32 %v12680_v46, %v11429_v39  ;;  %6689 = vmatpush.bf16.msrb.mxu1 %v11176_v43  ;;  %v8747_v46 = vld [vmem:[%s13231_s6 + $0x350] sm:$0xf]  ;;  %v8492_v43 = vor.u32 %v11949_v36, %v8491_v24  ;;  %v6510_v24 = vpop.f32.mrf.mxu3 }
 0x337   : > { %v11685_v19 = vld [vmem:[%s13231_s6 + $0x1a68] sm:$0xf0]  ;;  %v12013_v39 = vld [vmem:[%s13231_s6 + $0x36c] sm:$0xf0] }
 0x338   : > { %v12544_v41 = vld [vmem:[%s13231_s6 + $0x140c] sm:$0xf]  ;;  %v11688_v55 = vor.u32 %v12744_v40, %v11685_v19  ;;  %6702 = vmatpush.bf16.msrb.mxu2 %v11432_v52  ;;  %v9003_v40 = vld [vmem:[%s13231_s6 + $0x550] sm:$0xf] }
 0x339   : > { %v10885_v44 = vld [vmem:[%s13231_s6 + $0x1428] sm:$0xf0]  ;;  %v12077_v19 = vld [vmem:[%s13231_s6 + $0x56c] sm:$0xf0] }
 0x33a   : > { %v12608_v47 = vld [vmem:[%s13231_s6 + $0x160c] sm:$0xf]  ;;  %v10888_v25 = vor.u32 %v12544_v41, %v10885_v44  ;;  %6715 = vmatpush.bf16.msrb.mxu3 %v11688_v55  ;;  %v9259_v41 = vld [vmem:[%s13231_s6 + $0x750] sm:$0xf]  ;;  %v8748_v44 = vor.u32 %v12013_v39, %v8747_v46  ;;  %v9004_v52 = vor.u32 %v12077_v19, %v9003_v40  ;;  %v6473_v46 = vpop.f32.mrf.mxu0 }
 0x33b   : > { %v11141_v51 = vld [vmem:[%s13231_s6 + $0x1628] sm:$0xf0]  ;;  %v9260_v55 = vor.u32 %v12141_v42, %v9259_v41  ;;  %v9195_v4 = vld [vmem:[%s13231_s6 + $0x6d0] sm:$0xf] }
 0x33c   : > { %v12672_v56 = vld [vmem:[%s13231_s6 + $0x180c] sm:$0xf]  ;;  %v11144_v62 = vor.u32 %v12608_v47, %v11141_v51  ;;  %6677 = vmatpush.bf16.msrb.mxu0 %v10888_v25  ;;  %v8459_v47 = vld [vmem:[%s13231_s6 + $0x110] sm:$0xf] }
 0x33d   : > { %v11397_v57 = vld [vmem:[%s13231_s6 + $0x1828] sm:$0xf0]  ;;  %v11941_v51 = vld [vmem:[%s13231_s6 + $0x12c] sm:$0xf0] }
 0x33e   : > { %v12736_v60 = vld [vmem:[%s13231_s6 + $0x1a0c] sm:$0xf]  ;;  %v11400_v21 = vor.u32 %v12672_v56, %v11397_v57  ;;  %6690 = vmatpush.bf16.msrb.mxu1 %v11144_v62  ;;  %v8715_v56 = vld [vmem:[%s13231_s6 + $0x310] sm:$0xf]  ;;  %v8460_v15 = vor.u32 %v11941_v51, %v8459_v47 }
 0x33f   : > { %v11653_v5 = vld [vmem:[%s13231_s6 + $0x1a28] sm:$0xf0]  ;;  %6678 = vmatmul.bf16.vlgmr.msrb.gmra.mxu0 %v13706_v54  ;;  %v12005_v57 = vld [vmem:[%s13231_s6 + $0x32c] sm:$0xf0] }
 0x340   : > { %v11656_v2 = vor.u32 %v12736_v60, %v11653_v5  ;;  %6703 = vmatpush.bf16.msrb.mxu2 %v11400_v21  ;;  %6722 = vmatpush.bf16.msra.mxu0 %v8556_v27  ;;  %v8971_v60 = vld [vmem:[%s13231_s6 + $0x510] sm:$0xf]  ;;  %v8716_v61 = vor.u32 %v12005_v57, %v8715_v56  ;;  %v6485_v27 = vadd.f32 %v6484_v49, %v6472_v7 }
 0x341   : > { %6691 = vmatmul.bf16.vlgmr.msrb.gmra.mxu1 %v13713_v59  ;;  %v9227_v5 = vld [vmem:[%s13231_s6 + $0x710] sm:$0xf]  ;;  %v8972_v9 = vor.u32 %v12069_v63, %v8971_v60 }
 0x342   : > { %6716 = vmatpush.bf16.msrb.mxu3 %v11656_v2  ;;  %6735 = vmatpush.bf16.msra.mxu1 %v8812_v3  ;;  %v8427_v25 = vld [vmem:[%s13231_s6 + $0xd0] sm:$0xf]  ;;  %v9228_v16 = vor.u32 %v12133_v18, %v9227_v5 }
 0x343   : > { %6704 = vmatmul.bf16.vlgmr.msrb.gmra.mxu2 %v13780_v20  ;;  %v11933_v62 = vld [vmem:[%s13231_s6 + $0xec] sm:$0xf0] }
 0x344   : > { %6748 = vmatpush.bf16.msra.mxu2 %v9068_v29  ;;  %6723 = vmatpush.bf16.msra.mxu0 %v8524_v48  ;;  %v11997_v21 = vld [vmem:[%s13231_s6 + $0x2ec] sm:$0xf0]  ;;  %v8428_v26 = vor.u32 %v11933_v62, %v8427_v25 }
 0x345   : > { %6717 = vmatmul.bf16.vlgmr.msrb.gmra.mxu3 %v13782_v45  ;;  %v8939_v2 = vld [vmem:[%s13231_s6 + $0x4d0] sm:$0xf]  ;;  %v8684_v29 = vor.u32 %v11997_v21, %v8683_v17 }
 0x346   : > { %6761 = vmatpush.bf16.msra.mxu3 %v9324_v30  ;;  %6736 = vmatpush.bf16.msra.mxu1 %v8780_v35  ;;  %v12061_v3 = vld [vmem:[%s13231_s6 + $0x4ec] sm:$0xf0]  ;;  %v6498_v35 = vadd.f32 %v6497_v32, %v6485_v27  ;;  %v6512_v27 = vpop.f32.mrf.mxu3 }
 0x347   : > { %v12125_v13 = vld [vmem:[%s13231_s6 + $0x6ec] sm:$0xf0]  ;;  %v8940_v50 = vor.u32 %v12061_v3, %v8939_v2 }
 0x348   : > { %6749 = vmatpush.bf16.msra.mxu2 %v9036_v37  ;;  %6724 = vmatpush.bf16.msra.mxu0 %v8492_v43  ;;  %v8395_v30 = vld [vmem:[%s13231_s6 + $0x90] sm:$0xf]  ;;  %v9196_v31 = vor.u32 %v12125_v13, %v9195_v4  ;;  %v14530_v39 = vadd.f32 %v6510_v24, %v6498_v35  ;;  %v6486_v43 = vpop.f32.mrf.mxu1 }
 0x349   : > { %v8651_v33 = vld [vmem:[%s13231_s6 + $0x290] sm:$0xf]  ;;  %v8396_v40 = vor.u32 %v11925_v12, %v8395_v30 }
 0x34a   : > { %6762 = vmatpush.bf16.msra.mxu3 %v9292_v38  ;;  %6737 = vmatpush.bf16.msra.mxu1 %v8748_v44  ;;  %v11989_v34 = vld [vmem:[%s13231_s6 + $0x2ac] sm:$0xf0] }
 0x34b   : > { %v8907_v48 = vld [vmem:[%s13231_s6 + $0x490] sm:$0xf]  ;;  %v8652_v19 = vor.u32 %v11989_v34, %v8651_v33 }
 0x34c   : > { %6750 = vmatpush.bf16.msra.mxu2 %v9004_v52  ;;  %6725 = vmatpush.bf16.msra.mxu0 %v8460_v15  ;;  %v12053_v36 = vld [vmem:[%s13231_s6 + $0x4ac] sm:$0xf0] }
 0x34d   : > { %v9163_v37 = vld [vmem:[%s13231_s6 + $0x690] sm:$0xf]  ;;  %v8908_v44 = vor.u32 %v12053_v36, %v8907_v48 }
 0x34e   : > { %6763 = vmatpush.bf16.msra.mxu3 %v9260_v55  ;;  %6738 = vmatpush.bf16.msra.mxu1 %v8716_v61  ;;  %v12117_v38 = vld [vmem:[%s13231_s6 + $0x6ac] sm:$0xf0] }
 0x34f   : > { %v8363_v41 = vld [vmem:[%s13231_s6 + $0x50] sm:$0xf]  ;;  %v9164_v47 = vor.u32 %v12117_v38, %v9163_v37 }
 0x350   : > { %6751 = vmatpush.bf16.msra.mxu2 %v8972_v9  ;;  %6726 = vmatpush.bf16.msra.mxu0 %v8428_v26  ;;  %v11917_v42 = vld [vmem:[%s13231_s6 + $0x6c] sm:$0xf0]  ;;  %v6536_v27 = vpop.f32.mrf.mxu1 }
 0x351   : > { %v8619_v51 = vld [vmem:[%s13231_s6 + $0x250] sm:$0xf]  ;;  %v8364_v5 = vor.u32 %v11917_v42, %v8363_v41 }
 0x352   : > { %6764 = vmatpush.bf16.msra.mxu3 %v9228_v16  ;;  %6739 = vmatpush.bf16.msra.mxu1 %v8684_v29  ;;  %v11981_v52 = vld [vmem:[%s13231_s6 + $0x26c] sm:$0xf0]  ;;  %v6499_v16 = vpop.f32.mrf.mxu2 }
 0x353   : > { %v8875_v55 = vld [vmem:[%s13231_s6 + $0x450] sm:$0xf]  ;;  %v8620_v18 = vor.u32 %v11981_v52, %v8619_v51 }
 0x354   : > { %6752 = vmatpush.bf16.msra.mxu2 %v8940_v50  ;;  %v12045_v56 = vld [vmem:[%s13231_s6 + $0x46c] sm:$0xf0]  ;;  %6727 = vmatpush.bf16.msra.mxu0 %v8396_v40 }
 0x355   : > { %v9131_v57 = vld [vmem:[%s13231_s6 + $0x650] sm:$0xf]  ;;  %v8876_v61 = vor.u32 %v12045_v56, %v8875_v55 }
 0x356   : > { %6765 = vmatpush.bf16.msra.mxu3 %v9196_v31  ;;  %v12109_v60 = vld [vmem:[%s13231_s6 + $0x66c] sm:$0xf0]  ;;  %6740 = vmatpush.bf16.msra.mxu1 %v8652_v19 }
 0x357   : > { %v8331_v63 = vld [vmem:[%s13231_s6 + $0x10] sm:$0xf]  ;;  %v9132_v49 = vor.u32 %v12109_v60, %v9131_v57 }
 0x358   : > { %v11909_v6 = vld [vmem:[%s13231_s6 + $0x2c] sm:$0xf0]  ;;  %6753 = vmatpush.bf16.msra.mxu2 %v8908_v44  ;;  %6728 = vmatpush.bf16.msra.mxu0 %v8364_v5 }
 0x359   : > { %v8587_v7 = vld [vmem:[%s13231_s6 + $0x210] sm:$0xf]  ;;  %v8332_v26 = vor.u32 %v11909_v6, %v8331_v63 }
 0x35a   : > { %v11973_v15 = vld [vmem:[%s13231_s6 + $0x22c] sm:$0xf0]  ;;  %6766 = vmatpush.bf16.msra.mxu3 %v9164_v47  ;;  %6741 = vmatpush.bf16.msra.mxu1 %v8620_v18 }
 0x35b   : > { %v8843_v25 = vld [vmem:[%s13231_s6 + $0x410] sm:$0xf]  ;;  %v8588_v29 = vor.u32 %v11973_v15, %v8587_v7 }
 0x35c   : > { %v12037_v62 = vld [vmem:[%s13231_s6 + $0x42c] sm:$0xf0]  ;;  %6754 = vmatpush.bf16.msra.mxu2 %v8876_v61  ;;  %6729 = vmatpush.bf16.msra.mxu0 %v8332_v26 }
 0x35d   : > { %v9099_v9 = vld [vmem:[%s13231_s6 + $0x610] sm:$0xf]  ;;  %v8844_v31 = vor.u32 %v12037_v62, %v8843_v25 }
 0x35e   : > { %v12101_v17 = vld [vmem:[%s13231_s6 + $0x62c] sm:$0xf0]  ;;  %6767 = vmatpush.bf16.msra.mxu3 %v9132_v49  ;;  %6742 = vmatpush.bf16.msra.mxu1 %v8588_v29 }
 0x35f   : > { %v9579_v21 = vld [vmem:[%s13231_s6 + $0x9d0] sm:$0xf]  ;;  %v9100_v32 = vor.u32 %v12101_v17, %v9099_v9  ;;  %6730 = vmatmul.bf16.vlgmr.msra.gmra.mxu0 %v13572_v14 }
 0x360   : > { %v12221_v2 = vld [vmem:[%s13231_s6 + $0x9ec] sm:$0xf0]  ;;  %6755 = vmatpush.bf16.msra.mxu2 %v8844_v31 }
 0x361   : > { %v9835_v3 = vld [vmem:[%s13231_s6 + $0xbd0] sm:$0xf]  ;;  %v9580_v33 = vor.u32 %v12221_v2, %v9579_v21  ;;  %6743 = vmatmul.bf16.vlgmr.msra.gmra.mxu1 %v13588_v23  ;;  %v6523_v2 = vpop.f32.mrf.mxu0 }
 0x362   : > { %v12285_v4 = vld [vmem:[%s13231_s6 + $0xbec] sm:$0xf0]  ;;  %6768 = vmatpush.bf16.msra.mxu3 %v9100_v32 }
 0x363   : > { %v10091_v13 = vld [vmem:[%s13231_s6 + $0xdd0] sm:$0xf]  ;;  %v9836_v34 = vor.u32 %v12285_v4, %v9835_v3  ;;  %6774 = vmatpush.bf16.msrb.mxu0 %v9580_v33  ;;  %6756 = vmatmul.bf16.vlgmr.msra.gmra.mxu2 %v13570_v11  ;;  %v6524_v3 = vadd.f32 %v6523_v2, %v14530_v39 }
 0x364   : > { %v12349_v30 = vld [vmem:[%s13231_s6 + $0xdec] sm:$0xf0] }
 0x365   : > { %v10347_v12 = vld [vmem:[%s13231_s6 + $0xfd0] sm:$0xf]  ;;  %v10092_v24 = vor.u32 %v12349_v30, %v10091_v13  ;;  %6787 = vmatpush.bf16.msrb.mxu1 %v9836_v34  ;;  %6769 = vmatmul.bf16.vlgmr.msra.gmra.mxu3 %v13586_v22  ;;  %v14590_v33 = vadd.f32 %v6536_v27, %v6524_v3 }
 0x366   : > { %v12413_v50 = vld [vmem:[%s13231_s6 + $0xfec] sm:$0xf0] }
 0x367   : > { %v9547_v48 = vld [vmem:[%s13231_s6 + $0x990] sm:$0xf]  ;;  %v10348_v36 = vor.u32 %v12413_v50, %v10347_v12  ;;  %6800 = vmatpush.bf16.msrb.mxu2 %v10092_v24 }
 0x368   : > { %v12213_v35 = vld [vmem:[%s13231_s6 + $0x9ac] sm:$0xf0] }
 0x369   : > { %v9803_v37 = vld [vmem:[%s13231_s6 + $0xb90] sm:$0xf]  ;;  %v9548_v42 = vor.u32 %v12213_v35, %v9547_v48  ;;  %6813 = vmatpush.bf16.msrb.mxu3 %v10348_v36 }
 0x36a   : > { %v12277_v38 = vld [vmem:[%s13231_s6 + $0xbac] sm:$0xf0] }
 0x36b   : > { %v10059_v46 = vld [vmem:[%s13231_s6 + $0xd90] sm:$0xf]  ;;  %v9804_v43 = vor.u32 %v12277_v38, %v9803_v37  ;;  %6775 = vmatpush.bf16.msrb.mxu0 %v9548_v42 }
 0x36c   : > { %v12341_v40 = vld [vmem:[%s13231_s6 + $0xdac] sm:$0xf0] }
 0x36d   : > { %v10315_v19 = vld [vmem:[%s13231_s6 + $0xf90] sm:$0xf]  ;;  %v10060_v51 = vor.u32 %v12341_v40, %v10059_v46  ;;  %6788 = vmatpush.bf16.msrb.mxu1 %v9804_v43 }
 0x36e   : > { %v12405_v41 = vld [vmem:[%s13231_s6 + $0xfac] sm:$0xf0] }
 0x36f   : > { %v9515_v44 = vld [vmem:[%s13231_s6 + $0x950] sm:$0xf]  ;;  %v10316_v52 = vor.u32 %v12405_v41, %v10315_v19  ;;  %6801 = vmatpush.bf16.msrb.mxu2 %v10060_v51  ;;  %v6562_v51 = vpop.f32.mrf.mxu3 }
 0x370   : > { %v12205_v47 = vld [vmem:[%s13231_s6 + $0x96c] sm:$0xf0] }
 0x371   : > { %v9771_v55 = vld [vmem:[%s13231_s6 + $0xb50] sm:$0xf]  ;;  %v9516_v18 = vor.u32 %v12205_v47, %v9515_v44  ;;  %6814 = vmatpush.bf16.msrb.mxu3 %v10316_v52  ;;  %v6549_v47 = vpop.f32.mrf.mxu2 }
 0x372   : > { %v12269_v56 = vld [vmem:[%s13231_s6 + $0xb6c] sm:$0xf0]  ;;  %v14603_v52 = vadd.f32 %v6562_v51, %v6549_v47 }
 0x373   : > { %v10027_v57 = vld [vmem:[%s13231_s6 + $0xd50] sm:$0xf]  ;;  %v9772_v6 = vor.u32 %v12269_v56, %v9771_v55  ;;  %6776 = vmatpush.bf16.msrb.mxu0 %v9516_v18  ;;  %v6525_v55 = vpop.f32.mrf.mxu0  ;;  %v6538_v56 = vpop.f32.mrf.mxu1 }
 0x374   : > { %v12333_v60 = vld [vmem:[%s13231_s6 + $0xd6c] sm:$0xf0] }
 0x375   : > { %v10283_v63 = vld [vmem:[%s13231_s6 + $0xf50] sm:$0xf]  ;;  %v10028_v61 = vor.u32 %v12333_v60, %v10027_v57  ;;  %6789 = vmatpush.bf16.msrb.mxu1 %v9772_v6 }
 0x376   : > { %v12397_v5 = vld [vmem:[%s13231_s6 + $0xf6c] sm:$0xf0] }
 0x377   : > { %v9483_v7 = vld [vmem:[%s13231_s6 + $0x910] sm:$0xf]  ;;  %v10284_v49 = vor.u32 %v12397_v5, %v10283_v63  ;;  %6802 = vmatpush.bf16.msrb.mxu2 %v10028_v61 }
 0x378   : > { %v12197_v15 = vld [vmem:[%s13231_s6 + $0x92c] sm:$0xf0] }
 0x379   : > { %v9739_v25 = vld [vmem:[%s13231_s6 + $0xb10] sm:$0xf]  ;;  %v9484_v4 = vor.u32 %v12197_v15, %v9483_v7  ;;  %6815 = vmatpush.bf16.msrb.mxu3 %v10284_v49 }
 0x37a   : > { %v12261_v62 = vld [vmem:[%s13231_s6 + $0xb2c] sm:$0xf0] }
 0x37b   : > { %v9995_v9 = vld [vmem:[%s13231_s6 + $0xd10] sm:$0xf]  ;;  %v9740_v13 = vor.u32 %v12261_v62, %v9739_v25  ;;  %6777 = vmatpush.bf16.msrb.mxu0 %v9484_v4 }
 0x37c   : > { %v12325_v16 = vld [vmem:[%s13231_s6 + $0xd2c] sm:$0xf0] }
 0x37d   : > { %v10251_v17 = vld [vmem:[%s13231_s6 + $0xf10] sm:$0xf]  ;;  %v9996_v30 = vor.u32 %v12325_v16, %v9995_v9  ;;  %6790 = vmatpush.bf16.msrb.mxu1 %v9740_v13 }
 0x37e   : > { %v12389_v21 = vld [vmem:[%s13231_s6 + $0xf2c] sm:$0xf0] }
 0x37f   : > { %v9451_v26 = vld [vmem:[%s13231_s6 + $0x8d0] sm:$0xf]  ;;  %v10252_v12 = vor.u32 %v12389_v21, %v10251_v17  ;;  %6803 = vmatpush.bf16.msrb.mxu2 %v9996_v30 }
 0x380   : > { %v12189_v29 = vld [vmem:[%s13231_s6 + $0x8ec] sm:$0xf0] }
 0x381   : > { %v9707_v50 = vld [vmem:[%s13231_s6 + $0xad0] sm:$0xf]  ;;  %v9452_v35 = vor.u32 %v12189_v29, %v9451_v26  ;;  %6816 = vmatpush.bf16.msrb.mxu3 %v10252_v12 }
 0x382   : > { %v12253_v31 = vld [vmem:[%s13231_s6 + $0xaec] sm:$0xf0] }
 0x383   : > { %v9963_v32 = vld [vmem:[%s13231_s6 + $0xcd0] sm:$0xf]  ;;  %v9708_v24 = vor.u32 %v12253_v31, %v9707_v50  ;;  %6778 = vmatpush.bf16.msrb.mxu0 %v9452_v35  ;;  %v6551_v31 = vpop.f32.mrf.mxu2 }
 0x384   : > { %v12317_v34 = vld [vmem:[%s13231_s6 + $0xcec] sm:$0xf0] }
 0x385   : > { %v10219_v39 = vld [vmem:[%s13231_s6 + $0xed0] sm:$0xf]  ;;  %v9964_v38 = vor.u32 %v12317_v34, %v9963_v32  ;;  %6791 = vmatpush.bf16.msrb.mxu1 %v9708_v24  ;;  %v6564_v32 = vpop.f32.mrf.mxu3 }
 0x386   : > { %v12381_v48 = vld [vmem:[%s13231_s6 + $0xeec] sm:$0xf0]  ;;  %v14657_v32 = vpop.f32.mrf.mxu0 }
 0x387   : > { %v9419_v36 = vld [vmem:[%s13231_s6 + $0x890] sm:$0xf]  ;;  %v10220_v46 = vor.u32 %v12381_v48, %v10219_v39  ;;  %6804 = vmatpush.bf16.msrb.mxu2 %v9964_v38 }
 0x388   : > { %v12181_v37 = vld [vmem:[%s13231_s6 + $0x8ac] sm:$0xf0] }
 0x389   : > { %v9675_v40 = vld [vmem:[%s13231_s6 + $0xa90] sm:$0xf]  ;;  %v9420_v57 = vor.u32 %v12181_v37, %v9419_v36  ;;  %6817 = vmatpush.bf16.msrb.mxu3 %v10220_v46 }
 0x38a   : > { %v12245_v19 = vld [vmem:[%s13231_s6 + $0xaac] sm:$0xf0] }
 0x38b   : > { %v9931_v41 = vld [vmem:[%s13231_s6 + $0xc90] sm:$0xf]  ;;  %v9676_v60 = vor.u32 %v12245_v19, %v9675_v40  ;;  %6779 = vmatpush.bf16.msrb.mxu0 %v9420_v57 }
 0x38c   : > { %v12309_v42 = vld [vmem:[%s13231_s6 + $0xcac] sm:$0xf0] }
 0x38d   : > { %v10187_v43 = vld [vmem:[%s13231_s6 + $0xe90] sm:$0xf]  ;;  %v9932_v18 = vor.u32 %v12309_v42, %v9931_v41  ;;  %6792 = vmatpush.bf16.msrb.mxu1 %v9676_v60 }
 0x38e   : > { %v12373_v44 = vld [vmem:[%s13231_s6 + $0xeac] sm:$0xf0] }
 0x38f   : > { %v9387_v63 = vld [vmem:[%s13231_s6 + $0x850] sm:$0xf]  ;;  %v10188_v6 = vor.u32 %v12373_v44, %v10187_v43  ;;  %6805 = vmatpush.bf16.msrb.mxu2 %v9932_v18 }
 0x390   : > { %v12173_v5 = vld [vmem:[%s13231_s6 + $0x86c] sm:$0xf0] }
 0x391   : > { %v9643_v7 = vld [vmem:[%s13231_s6 + $0xa50] sm:$0xf]  ;;  %v9388_v16 = vor.u32 %v12173_v5, %v9387_v63  ;;  %6818 = vmatpush.bf16.msrb.mxu3 %v10188_v6 }
 0x392   : > { %v12237_v15 = vld [vmem:[%s13231_s6 + $0xa6c] sm:$0xf0] }
 0x393   : > { %v9899_v61 = vld [vmem:[%s13231_s6 + $0xc50] sm:$0xf]  ;;  %v9644_v17 = vor.u32 %v12237_v15, %v9643_v7  ;;  %6780 = vmatpush.bf16.msrb.mxu0 %v9388_v16 }
 0x394   : > { %v12301_v49 = vld [vmem:[%s13231_s6 + $0xc6c] sm:$0xf0] }
 0x395   : > { %v10155_v25 = vld [vmem:[%s13231_s6 + $0xe50] sm:$0xf]  ;;  %v9900_v3 = vor.u32 %v12301_v49, %v9899_v61  ;;  %6793 = vmatpush.bf16.msrb.mxu1 %v9644_v17 }
 0x396   : > { %v12365_v62 = vld [vmem:[%s13231_s6 + $0xe6c] sm:$0xf0] }
 0x397   : > { %v9355_v9 = vld [vmem:[%s13231_s6 + $0x810] sm:$0xf]  ;;  %v10156_v4 = vor.u32 %v12365_v62, %v10155_v25  ;;  %6806 = vmatpush.bf16.msrb.mxu2 %v9900_v3 }
 0x398   : > { %v12165_v21 = vld [vmem:[%s13231_s6 + $0x82c] sm:$0xf0] }
 0x399   : > { %v9611_v2 = vld [vmem:[%s13231_s6 + $0xa10] sm:$0xf]  ;;  %v9356_v35 = vor.u32 %v12165_v21, %v9355_v9  ;;  %6819 = vmatpush.bf16.msrb.mxu3 %v10156_v4 }
 0x39a   : > { %v12229_v27 = vld [vmem:[%s13231_s6 + $0xa2c] sm:$0xf0] }
 0x39b   : > { %v9867_v13 = vld [vmem:[%s13231_s6 + $0xc10] sm:$0xf]  ;;  %v9612_v24 = vor.u32 %v12229_v27, %v9611_v2  ;;  %6781 = vmatpush.bf16.msrb.mxu0 %v9356_v35 }
 0x39c   : > { %v12293_v26 = vld [vmem:[%s13231_s6 + $0xc2c] sm:$0xf0] }
 0x39d   : > { %v10123_v29 = vld [vmem:[%s13231_s6 + $0xe10] sm:$0xf]  ;;  %v9868_v46 = vor.u32 %v12293_v26, %v9867_v13  ;;  %6794 = vmatpush.bf16.msrb.mxu1 %v9612_v24  ;;  %v14661_v24 = vpop.f32.mrf.mxu1 }
 0x39e   : > { %v12357_v30 = vld [vmem:[%s13231_s6 + $0xe2c] sm:$0xf0]  ;;  %6782 = vmatmul.bf16.vlgmr.msrb.gmra.mxu0 %v13668_v1 }
 0x39f   : > { %v10603_v12 = vld [vmem:[%s13231_s6 + $0x11d0] sm:$0xf]  ;;  %v10124_v40 = vor.u32 %v12357_v30, %v10123_v29  ;;  %6807 = vmatpush.bf16.msrb.mxu2 %v9868_v46 }
 0x3a0   : > { %v12477_v50 = vld [vmem:[%s13231_s6 + $0x11ec] sm:$0xf0]  ;;  %6795 = vmatmul.bf16.vlgmr.msrb.gmra.mxu1 %v13672_v10 }
 0x3a1   : > { %v10859_v34 = vld [vmem:[%s13231_s6 + $0x13d0] sm:$0xf]  ;;  %v10604_v19 = vor.u32 %v12477_v50, %v10603_v12  ;;  %6820 = vmatpush.bf16.msrb.mxu3 %v10124_v40 }
 0x3a2   : > { %v12541_v39 = vld [vmem:[%s13231_s6 + $0x13ec] sm:$0xf0]  ;;  %6808 = vmatmul.bf16.vlgmr.msrb.gmra.mxu2 %v13666_v0 }
 0x3a3   : > { %v11115_v48 = vld [vmem:[%s13231_s6 + $0x15d0] sm:$0xf]  ;;  %v10860_v41 = vor.u32 %v12541_v39, %v10859_v34  ;;  %6826 = vmatpush.bf16.msra.mxu0 %v10604_v19 }
 0x3a4   : > { %v12605_v36 = vld [vmem:[%s13231_s6 + $0x15ec] sm:$0xf0]  ;;  %6821 = vmatmul.bf16.vlgmr.msrb.gmra.mxu3 %v13670_v8 }
 0x3a5   : > { %v11371_v37 = vld [vmem:[%s13231_s6 + $0x17d0] sm:$0xf]  ;;  %v11116_v44 = vor.u32 %v12605_v36, %v11115_v48  ;;  %6839 = vmatpush.bf16.msra.mxu1 %v10860_v41 }
 0x3a6   : > { %v12669_v38 = vld [vmem:[%s13231_s6 + $0x17ec] sm:$0xf0] }
 0x3a7   : > { %v10571_v42 = vld [vmem:[%s13231_s6 + $0x1190] sm:$0xf]  ;;  %v11372_v47 = vor.u32 %v12669_v38, %v11371_v37  ;;  %6852 = vmatpush.bf16.msra.mxu2 %v11116_v44 }
 0x3a8   : > { %v12469_v43 = vld [vmem:[%s13231_s6 + $0x11ac] sm:$0xf0] }
 0x3a9   : > { %v10827_v51 = vld [vmem:[%s13231_s6 + $0x1390] sm:$0xf]  ;;  %v10572_v5 = vor.u32 %v12469_v43, %v10571_v42  ;;  %6865 = vmatpush.bf16.msra.mxu3 %v11372_v47 }
 0x3aa   : > { %v12533_v55 = vld [vmem:[%s13231_s6 + $0x13ac] sm:$0xf0] }
 0x3ab   : > { %v11083_v56 = vld [vmem:[%s13231_s6 + $0x1590] sm:$0xf]  ;;  %v10828_v18 = vor.u32 %v12533_v55, %v10827_v51  ;;  %6827 = vmatpush.bf16.msra.mxu0 %v10572_v5  ;;  %v14674_v5 = vpop.f32.mrf.mxu2 }
 0x3ac   : > { %v12597_v57 = vld [vmem:[%s13231_s6 + $0x15ac] sm:$0xf0] }
 0x3ad   : > { %v11339_v60 = vld [vmem:[%s13231_s6 + $0x1790] sm:$0xf]  ;;  %v11084_v15 = vor.u32 %v12597_v57, %v11083_v56  ;;  %6840 = vmatpush.bf16.msra.mxu1 %v10828_v18 }
 0x3ae   : > { %v12661_v63 = vld [vmem:[%s13231_s6 + $0x17ac] sm:$0xf0] }
 0x3af   : > { %v10539_v6 = vld [vmem:[%s13231_s6 + $0x1150] sm:$0xf]  ;;  %v11340_v61 = vor.u32 %v12661_v63, %v11339_v60  ;;  %6853 = vmatpush.bf16.msra.mxu2 %v11084_v15  ;;  %v14679_v15 = vpop.f32.mrf.mxu3 }
 0x3b0   : > { %v12461_v7 = vld [vmem:[%s13231_s6 + $0x116c] sm:$0xf0] }
 0x3b1   : > { %v10795_v49 = vld [vmem:[%s13231_s6 + $0x1350] sm:$0xf]  ;;  %v10540_v21 = vor.u32 %v12461_v7, %v10539_v6  ;;  %6866 = vmatpush.bf16.msra.mxu3 %v11340_v61  ;;  %v6577_v61 = vpop.f32.mrf.mxu0 }
 0x3b2   : > { %v12525_v25 = vld [vmem:[%s13231_s6 + $0x136c] sm:$0xf0] }
 0x3b3   : > { %v11051_v62 = vld [vmem:[%s13231_s6 + $0x1550] sm:$0xf]  ;;  %v10796_v2 = vor.u32 %v12525_v25, %v10795_v49  ;;  %6828 = vmatpush.bf16.msra.mxu0 %v10540_v21 }
 0x3b4   : > { %v12589_v9 = vld [vmem:[%s13231_s6 + $0x156c] sm:$0xf0] }
 0x3b5   : > { %v11307_v16 = vld [vmem:[%s13231_s6 + $0x1750] sm:$0xf]  ;;  %v11052_v4 = vor.u32 %v12589_v9, %v11051_v62  ;;  %6841 = vmatpush.bf16.msra.mxu1 %v10796_v2 }
 0x3b6   : > { %v12653_v17 = vld [vmem:[%s13231_s6 + $0x176c] sm:$0xf0] }
 0x3b7   : > { %v10507_v27 = vld [vmem:[%s13231_s6 + $0x1110] sm:$0xf]  ;;  %v11308_v13 = vor.u32 %v12653_v17, %v11307_v16  ;;  %6854 = vmatpush.bf16.msra.mxu2 %v11052_v4  ;;  %v6590_v16 = vpop.f32.mrf.mxu1 }
 0x3b8   : > { %v12453_v3 = vld [vmem:[%s13231_s6 + $0x112c] sm:$0xf0]  ;;  %v11953_v16 = vld [vmem:[%s13231_s6 + $0x194] sm:$0xf] }
 0x3b9   : > { %v10763_v26 = vld [vmem:[%s13231_s6 + $0x1310] sm:$0xf]  ;;  %v10508_v34 = vor.u32 %v12453_v3, %v10507_v27  ;;  %6867 = vmatpush.bf16.msra.mxu3 %v11308_v13 }
 0x3ba   : > { %v12517_v29 = vld [vmem:[%s13231_s6 + $0x132c] sm:$0xf0] }
 0x3bb   : > { %v11019_v30 = vld [vmem:[%s13231_s6 + $0x1510] sm:$0xf]  ;;  %v10764_v39 = vor.u32 %v12517_v29, %v10763_v26  ;;  %6829 = vmatpush.bf16.msra.mxu0 %v10508_v34 }
 0x3bc   : > { %v12581_v12 = vld [vmem:[%s13231_s6 + $0x152c] sm:$0xf0] }
 0x3bd   : > { %v11275_v50 = vld [vmem:[%s13231_s6 + $0x1710] sm:$0xf]  ;;  %v11020_v36 = vor.u32 %v12581_v12, %v11019_v30  ;;  %6842 = vmatpush.bf16.msra.mxu1 %v10764_v39 }
 0x3be   : > { %v12645_v31 = vld [vmem:[%s13231_s6 + $0x172c] sm:$0xf0] }
 0x3bf   : > { %v10475_v48 = vld [vmem:[%s13231_s6 + $0x10d0] sm:$0xf]  ;;  %v11276_v37 = vor.u32 %v12645_v31, %v11275_v50  ;;  %6855 = vmatpush.bf16.msra.mxu2 %v11020_v36 }
 0x3c0   : > { %v12445_v35 = vld [vmem:[%s13231_s6 + $0x10ec] sm:$0xf0] }
 0x3c1   : > { %v10731_v38 = vld [vmem:[%s13231_s6 + $0x12d0] sm:$0xf]  ;;  %v10476_v43 = vor.u32 %v12445_v35, %v10475_v48  ;;  %6868 = vmatpush.bf16.msra.mxu3 %v11276_v37 }
 0x3c2   : > { %v12509_v46 = vld [vmem:[%s13231_s6 + $0x12ec] sm:$0xf0] }
 0x3c3   : > { %v10987_v40 = vld [vmem:[%s13231_s6 + $0x14d0] sm:$0xf]  ;;  %v10732_v44 = vor.u32 %v12509_v46, %v10731_v38  ;;  %6830 = vmatpush.bf16.msra.mxu0 %v10476_v43  ;;  %v6603_v38 = vpop.f32.mrf.mxu2 }
 0x3c4   : > { %v12573_v19 = vld [vmem:[%s13231_s6 + $0x14ec] sm:$0xf0] }
 0x3c5   : > { %v11243_v41 = vld [vmem:[%s13231_s6 + $0x16d0] sm:$0xf]  ;;  %v10988_v55 = vor.u32 %v12573_v19, %v10987_v40  ;;  %6843 = vmatpush.bf16.msra.mxu1 %v10732_v44  ;;  %v11961_v44 = vld [vmem:[%s13231_s6 + $0x1d4] sm:$0xf] }
 0x3c6   : > { %v12637_v42 = vld [vmem:[%s13231_s6 + $0x16ec] sm:$0xf0] }
 0x3c7   : > { %v10443_v47 = vld [vmem:[%s13231_s6 + $0x1090] sm:$0xf]  ;;  %v11244_v56 = vor.u32 %v12637_v42, %v11243_v41  ;;  %6856 = vmatpush.bf16.msra.mxu2 %v10988_v55  ;;  %v6616_v41 = vpop.f32.mrf.mxu3  ;;  %v8557_v55 = vld [vmem:[%s13231_s6 + $0x1f0] sm:$0xf0] }
 0x3c8   : > { %v12437_v51 = vld [vmem:[%s13231_s6 + $0x10ac] sm:$0xf0]  ;;  %v11937_v41 = vld [vmem:[%s13231_s6 + $0x114] sm:$0xf] }
 0x3c9   : > { %v10699_v57 = vld [vmem:[%s13231_s6 + $0x1290] sm:$0xf]  ;;  %v10444_v49 = vor.u32 %v12437_v51, %v10443_v47  ;;  %6869 = vmatpush.bf16.msra.mxu3 %v11244_v56  ;;  %v12025_v56 = vld [vmem:[%s13231_s6 + $0x3d4] sm:$0xf] }
 0x3ca   : > { %v12501_v60 = vld [vmem:[%s13231_s6 + $0x12ac] sm:$0xf0] }
 0x3cb   : > { %v10955_v63 = vld [vmem:[%s13231_s6 + $0x1490] sm:$0xf]  ;;  %v10700_v25 = vor.u32 %v12501_v60, %v10699_v57  ;;  %6831 = vmatpush.bf16.msra.mxu0 %v10444_v49  ;;  %v8813_v57 = vld [vmem:[%s13231_s6 + $0x3f0] sm:$0xf0]  ;;  %v8560_v49 = vor.u32 %v11961_v44, %v8557_v55 }
 0x3cc   : > { %v12565_v18 = vld [vmem:[%s13231_s6 + $0x14ac] sm:$0xf0]  ;;  %v8717_v44 = vld [vmem:[%s13231_s6 + $0x330] sm:$0xf0] }
 0x3cd   : > { %v11211_v6 = vld [vmem:[%s13231_s6 + $0x1690] sm:$0xf]  ;;  %v10956_v17 = vor.u32 %v12565_v18, %v10955_v63  ;;  %6844 = vmatpush.bf16.msra.mxu1 %v10700_v25  ;;  %v8816_v25 = vor.u32 %v12025_v56, %v8813_v57  ;;  %v14735_v56 = vpop.f32.mrf.mxu1 }
 0x3ce   : > { %v12629_v7 = vld [vmem:[%s13231_s6 + $0x16ac] sm:$0xf0] }
 0x3cf   : > { %v10411_v62 = vld [vmem:[%s13231_s6 + $0x1050] sm:$0xf]  ;;  %v11212_v21 = vor.u32 %v12629_v7, %v11211_v6  ;;  %6857 = vmatpush.bf16.msra.mxu2 %v10956_v17  ;;  %v8525_v17 = vld [vmem:[%s13231_s6 + $0x1b0] sm:$0xf0] }
 0x3d0   : > { %v12429_v9 = vld [vmem:[%s13231_s6 + $0x106c] sm:$0xf0] }
 0x3d1   : > { %v10667_v2 = vld [vmem:[%s13231_s6 + $0x1250] sm:$0xf]  ;;  %v10412_v30 = vor.u32 %v12429_v9, %v10411_v62  ;;  %6870 = vmatpush.bf16.msra.mxu3 %v11212_v21  ;;  %v12017_v21 = vld [vmem:[%s13231_s6 + $0x394] sm:$0xf] }
 0x3d2   : > { %v12493_v27 = vld [vmem:[%s13231_s6 + $0x126c] sm:$0xf0] }
 0x3d3   : > { %v10923_v3 = vld [vmem:[%s13231_s6 + $0x1450] sm:$0xf]  ;;  %v10668_v12 = vor.u32 %v12493_v27, %v10667_v2  ;;  %6832 = vmatpush.bf16.msra.mxu0 %v10412_v30  ;;  %v8781_v2 = vld [vmem:[%s13231_s6 + $0x3b0] sm:$0xf0] }
 0x3d4   : > { %v12557_v4 = vld [vmem:[%s13231_s6 + $0x146c] sm:$0xf0] }
 0x3d5   : > { %v11179_v13 = vld [vmem:[%s13231_s6 + $0x1650] sm:$0xf]  ;;  %v10924_v39 = vor.u32 %v12557_v4, %v10923_v3  ;;  %6845 = vmatpush.bf16.msra.mxu1 %v10668_v12 }
 0x3d6   : > { %v12621_v26 = vld [vmem:[%s13231_s6 + $0x166c] sm:$0xf0] }
 0x3d7   : > { %v10379_v29 = vld [vmem:[%s13231_s6 + $0x1010] sm:$0xf]  ;;  %v11180_v48 = vor.u32 %v12621_v26, %v11179_v13  ;;  %6858 = vmatpush.bf16.msra.mxu2 %v10924_v39  ;;  %v8528_v26 = vor.u32 %v11953_v16, %v8525_v17  ;;  %v8749_v39 = vld [vmem:[%s13231_s6 + $0x370] sm:$0xf0] }
 0x3d8   : > { %v12421_v50 = vld [vmem:[%s13231_s6 + $0x102c] sm:$0xf0] }
 0x3d9   : > { %v10635_v31 = vld [vmem:[%s13231_s6 + $0x1210] sm:$0xf]  ;;  %v10380_v47 = vor.u32 %v12421_v50, %v10379_v29  ;;  %6871 = vmatpush.bf16.msra.mxu3 %v11180_v48  ;;  %v8784_v29 = vor.u32 %v12017_v21, %v8781_v2  ;;  %v11945_v50 = vld [vmem:[%s13231_s6 + $0x154] sm:$0xf] }
 0x3da   : > { %v12485_v34 = vld [vmem:[%s13231_s6 + $0x122c] sm:$0xf0] }
 0x3db   : > { %v10891_v35 = vld [vmem:[%s13231_s6 + $0x1410] sm:$0xf]  ;;  %v10636_v51 = vor.u32 %v12485_v34, %v10635_v31  ;;  %6833 = vmatpush.bf16.msra.mxu0 %v10380_v47  ;;  %v8493_v31 = vld [vmem:[%s13231_s6 + $0x170] sm:$0xf0]  ;;  %v14733_v47 = vpop.f32.mrf.mxu0 }
 0x3dc   : > { %v12549_v36 = vld [vmem:[%s13231_s6 + $0x142c] sm:$0xf0]  ;;  %v12009_v34 = vld [vmem:[%s13231_s6 + $0x354] sm:$0xf]  ;;  %v8496_v38 = vor.u32 %v11945_v50, %v8493_v31 }
 0x3dd   : > { %v11147_v37 = vld [vmem:[%s13231_s6 + $0x1610] sm:$0xf]  ;;  %v10892_v60 = vor.u32 %v12549_v36, %v10891_v35  ;;  %6846 = vmatpush.bf16.msra.mxu1 %v10636_v51 }
 0x3de   : > { %v12613_v46 = vld [vmem:[%s13231_s6 + $0x162c] sm:$0xf0]  ;;  %6834 = vmatmul.bf16.vlgmr.msra.gmra.mxu0 %v13704_v53 }
 0x3df   : > { %v11627_v40 = vld [vmem:[%s13231_s6 + $0x19d0] sm:$0xf]  ;;  %v11148_v63 = vor.u32 %v12613_v46, %v11147_v37  ;;  %6859 = vmatpush.bf16.msra.mxu2 %v10892_v60  ;;  %v8752_v46 = vor.u32 %v12009_v34, %v8749_v39 }
 0x3e0   : > { %v12733_v19 = vld [vmem:[%s13231_s6 + $0x19ec] sm:$0xf0]  ;;  %6847 = vmatmul.bf16.vlgmr.msra.gmra.mxu1 %v13711_v58 }
 0x3e1   : > { %v11883_v42 = vld [vmem:[%s13231_s6 + $0x1bd0] sm:$0xf]  ;;  %v11628_v18 = vor.u32 %v12733_v19, %v11627_v40  ;;  %6872 = vmatpush.bf16.msra.mxu3 %v11148_v63 }
 0x3e2   : > { %v12797_v43 = vld [vmem:[%s13231_s6 + $0x1bec] sm:$0xf0]  ;;  %6860 = vmatmul.bf16.vlgmr.msra.gmra.mxu2 %v13706_v54 }
 0x3e3   : > { %v11884_v6 = vor.u32 %v12797_v43, %v11883_v42  ;;  %v11595_v7 = vld [vmem:[%s13231_s6 + $0x1990] sm:$0xf]  ;;  %6878 = vmatpush.bf16.msrb.mxu0 %v11628_v18  ;;  %6904 = vmatpush.bf16.msrb.mxu2 %v8560_v49  ;;  %v8461_v42 = vld [vmem:[%s13231_s6 + $0x130] sm:$0xf0]  ;;  %v6629_v50 = vpop.f32.mrf.mxu0 }
 0x3e4   : > { %v12725_v61 = vld [vmem:[%s13231_s6 + $0x19ac] sm:$0xf0]  ;;  %6873 = vmatmul.bf16.vlgmr.msra.gmra.mxu3 %v13713_v59  ;;  %v12001_v43 = vld [vmem:[%s13231_s6 + $0x314] sm:$0xf]  ;;  %v8464_v63 = vor.u32 %v11937_v41, %v8461_v42 }
 0x3e5   : > { %v11851_v62 = vld [vmem:[%s13231_s6 + $0x1b90] sm:$0xf]  ;;  %6891 = vmatpush.bf16.msrb.mxu1 %v11884_v6  ;;  %v11596_v27 = vor.u32 %v12725_v61, %v11595_v7  ;;  %6917 = vmatpush.bf16.msrb.mxu3 %v8816_v25  ;;  %v8720_v18 = vor.u32 %v12001_v43, %v8717_v44  ;;  %v11929_v61 = vld [vmem:[%s13231_s6 + $0xd4] sm:$0xf] }
 0x3e6   : > { %v12789_v9 = vld [vmem:[%s13231_s6 + $0x1bac] sm:$0xf0]  ;;  %v8429_v49 = vld [vmem:[%s13231_s6 + $0xf0] sm:$0xf0] }
 0x3e7   : > { %v11852_v3 = vor.u32 %v12789_v9, %v11851_v62  ;;  %v11563_v4 = vld [vmem:[%s13231_s6 + $0x1950] sm:$0xf]  ;;  %6879 = vmatpush.bf16.msrb.mxu0 %v11596_v27  ;;  %6905 = vmatpush.bf16.msrb.mxu2 %v8528_v26  ;;  %v11993_v25 = vld [vmem:[%s13231_s6 + $0x2d4] sm:$0xf]  ;;  %v6576_v9 = vadd.f32 %v14657_v32, %v14603_v52  ;;  %v8432_v27 = vor.u32 %v11929_v61, %v8429_v49  ;;  %v14754_v32 = vpop.f32.mrf.mxu3 }
 0x3e8   : > { %v12717_v13 = vld [vmem:[%s13231_s6 + $0x196c] sm:$0xf0]  ;;  %v8685_v62 = vld [vmem:[%s13231_s6 + $0x2f0] sm:$0xf0] }
 0x3e9   : > { %v11819_v30 = vld [vmem:[%s13231_s6 + $0x1b50] sm:$0xf]  ;;  %6892 = vmatpush.bf16.msrb.mxu1 %v11852_v3  ;;  %v11564_v48 = vor.u32 %v12717_v13, %v11563_v4  ;;  %6918 = vmatpush.bf16.msrb.mxu3 %v8784_v29  ;;  %v8688_v3 = vor.u32 %v11993_v25, %v8685_v62  ;;  %v14749_v4 = vpop.f32.mrf.mxu2  ;;  %v11921_v52 = vld [vmem:[%s13231_s6 + $0x94] sm:$0xf]  ;;  %v6589_v31 = vadd.f32 %v14661_v24, %v6576_v9 }
 0x3ea   : > { %v12781_v12 = vld [vmem:[%s13231_s6 + $0x1b6c] sm:$0xf0]  ;;  %v8397_v29 = vld [vmem:[%s13231_s6 + $0xb0] sm:$0xf0] }
 0x3eb   : > { %v11820_v35 = vor.u32 %v12781_v12, %v11819_v30  ;;  %v11531_v36 = vld [vmem:[%s13231_s6 + $0x1910] sm:$0xf]  ;;  %6880 = vmatpush.bf16.msrb.mxu0 %v11564_v48  ;;  %6906 = vmatpush.bf16.msrb.mxu2 %v8496_v38  ;;  %v11985_v30 = vld [vmem:[%s13231_s6 + $0x294] sm:$0xf]  ;;  %v6602_v44 = vadd.f32 %v14674_v5, %v6589_v31 }
 0x3ec   : > { %v12709_v37 = vld [vmem:[%s13231_s6 + $0x192c] sm:$0xf0]  ;;  %v8653_v12 = vld [vmem:[%s13231_s6 + $0x2b0] sm:$0xf0] }
 0x3ed   : > { %v11787_v40 = vld [vmem:[%s13231_s6 + $0x1b10] sm:$0xf]  ;;  %6893 = vmatpush.bf16.msrb.mxu1 %v11820_v35  ;;  %v11532_v51 = vor.u32 %v12709_v37, %v11531_v36  ;;  %6919 = vmatpush.bf16.msrb.mxu3 %v8752_v46  ;;  %v6642_v36 = vpop.f32.mrf.mxu1  ;;  %v8400_v37 = vor.u32 %v11921_v52, %v8397_v29  ;;  %v8656_v38 = vor.u32 %v11985_v30, %v8653_v12  ;;  %v11913_v24 = vld [vmem:[%s13231_s6 + $0x54] sm:$0xf] }
 0x3ee   : > { %v12773_v19 = vld [vmem:[%s13231_s6 + $0x1b2c] sm:$0xf0]  ;;  %v11977_v41 = vld [vmem:[%s13231_s6 + $0x254] sm:$0xf] }
 0x3ef   : > { %v11788_v55 = vor.u32 %v12773_v19, %v11787_v40  ;;  %v11499_v57 = vld [vmem:[%s13231_s6 + $0x18d0] sm:$0xf]  ;;  %6881 = vmatpush.bf16.msrb.mxu0 %v11532_v51  ;;  %6907 = vmatpush.bf16.msrb.mxu2 %v8464_v63  ;;  %v8365_v19 = vld [vmem:[%s13231_s6 + $0x70] sm:$0xf0] }
 0x3f0   : > { %v12701_v60 = vld [vmem:[%s13231_s6 + $0x18ec] sm:$0xf0]  ;;  %v8621_v42 = vld [vmem:[%s13231_s6 + $0x270] sm:$0xf0] }
 0x3f1   : > { %v11755_v6 = vld [vmem:[%s13231_s6 + $0x1ad0] sm:$0xf]  ;;  %6894 = vmatpush.bf16.msrb.mxu1 %v11788_v55  ;;  %v11500_v16 = vor.u32 %v12701_v60, %v11499_v57  ;;  %6920 = vmatpush.bf16.msrb.mxu3 %v8720_v18  ;;  %v8368_v18 = vor.u32 %v11913_v24, %v8365_v19  ;;  %v8333_v5 = vld [vmem:[%s13231_s6 + $0x30] sm:$0xf0]  ;;  %v6655_v49 = vpop.f32.mrf.mxu2 }
 0x3f2   : > { %v12765_v7 = vld [vmem:[%s13231_s6 + $0x1aec] sm:$0xf0]  ;;  %v11969_v61 = vld [vmem:[%s13231_s6 + $0x214] sm:$0xf] }
 0x3f3   : > { %v11756_v17 = vor.u32 %v12765_v7, %v11755_v6  ;;  %v11467_v21 = vld [vmem:[%s13231_s6 + $0x1890] sm:$0xf]  ;;  %6882 = vmatpush.bf16.msrb.mxu0 %v11500_v16  ;;  %6908 = vmatpush.bf16.msrb.mxu2 %v8432_v27  ;;  %v8624_v6 = vor.u32 %v11977_v41, %v8621_v42  ;;  %v11905_v7 = vld [vmem:[%s13231_s6 + $0x14] sm:$0xf]  ;;  %v6668_v16 = vpop.f32.mrf.mxu3  ;;  %v6615_v27 = vadd.f32 %v14679_v15, %v6602_v44 }
 0x3f4   : > { %v12693_v2 = vld [vmem:[%s13231_s6 + $0x18ac] sm:$0xf0]  ;;  %v8589_v25 = vld [vmem:[%s13231_s6 + $0x230] sm:$0xf0]  ;;  %v8336_v30 = vor.u32 %v11905_v7, %v8333_v5 }
 0x3f5   : > { %v11723_v13 = vld [vmem:[%s13231_s6 + $0x1a90] sm:$0xf]  ;;  %6895 = vmatpush.bf16.msrb.mxu1 %v11756_v17  ;;  %v11468_v34 = vor.u32 %v12693_v2, %v11467_v21  ;;  %6921 = vmatpush.bf16.msrb.mxu3 %v8688_v3  ;;  %v12089_v62 = vld [vmem:[%s13231_s6 + $0x5d4] sm:$0xf]  ;;  %v8592_v12 = vor.u32 %v11969_v61, %v8589_v25  ;;  %v6628_v15 = vadd.f32 %v14733_v47, %v6615_v27 }
 0x3f6   : > { %v12757_v26 = vld [vmem:[%s13231_s6 + $0x1aac] sm:$0xf0]  ;;  %v9069_v9 = vld [vmem:[%s13231_s6 + $0x5f0] sm:$0xf0] }
 0x3f7   : > { %v11724_v39 = vor.u32 %v12757_v26, %v11723_v13  ;;  %v11435_v48 = vld [vmem:[%s13231_s6 + $0x1850] sm:$0xf]  ;;  %6883 = vmatpush.bf16.msrb.mxu0 %v11468_v34  ;;  %6909 = vmatpush.bf16.msrb.mxu2 %v8400_v37  ;;  %v12153_v17 = vld [vmem:[%s13231_s6 + $0x7d4] sm:$0xf]  ;;  %v9072_v50 = vor.u32 %v12089_v62, %v9069_v9  ;;  %v6641_v47 = vadd.f32 %v14735_v56, %v6628_v15 }
 0x3f8   : > { %v12685_v35 = vld [vmem:[%s13231_s6 + $0x186c] sm:$0xf0]  ;;  %v9325_v21 = vld [vmem:[%s13231_s6 + $0x7f0] sm:$0xf0] }
 0x3f9   : > { %v11691_v46 = vld [vmem:[%s13231_s6 + $0x1a50] sm:$0xf]  ;;  %6896 = vmatpush.bf16.msrb.mxu1 %v11724_v39  ;;  %v11436_v51 = vor.u32 %v12685_v35, %v11435_v48  ;;  %6922 = vmatpush.bf16.msrb.mxu3 %v8656_v38  ;;  %v12217_v2 = vld [vmem:[%s13231_s6 + $0x9d4] sm:$0xf]  ;;  %v9328_v31 = vor.u32 %v12153_v17, %v9325_v21  ;;  %v6654_v56 = vadd.f32 %v14749_v4, %v6641_v47 }
 0x3fa   : > { %v12749_v40 = vld [vmem:[%s13231_s6 + $0x1a6c] sm:$0xf0]  ;;  %v9581_v26 = vld [vmem:[%s13231_s6 + $0x9f0] sm:$0xf0] }
 0x3fb   : > { %v11403_v43 = vld [vmem:[%s13231_s6 + $0x1810] sm:$0xf]  ;;  %v11692_v55 = vor.u32 %v12749_v40, %v11691_v46  ;;  %6884 = vmatpush.bf16.msrb.mxu0 %v11436_v51  ;;  %v12281_v52 = vld [vmem:[%s13231_s6 + $0xbd4] sm:$0xf]  ;;  %6910 = vmatpush.bf16.msrb.mxu2 %v8368_v18  ;;  %v9584_v48 = vor.u32 %v12217_v2, %v9581_v26  ;;  %v6667_v17 = vadd.f32 %v14754_v32, %v6654_v56 }
 0x3fc   : > { %v12677_v57 = vld [vmem:[%s13231_s6 + $0x182c] sm:$0xf0]  ;;  %v9837_v29 = vld [vmem:[%s13231_s6 + $0xbf0] sm:$0xf0] }
 0x3fd   : > { %v11659_v60 = vld [vmem:[%s13231_s6 + $0x1a10] sm:$0xf]  ;;  %6897 = vmatpush.bf16.msrb.mxu1 %v11692_v55  ;;  %v11404_v3 = vor.u32 %v12677_v57, %v11403_v43  ;;  %6923 = vmatpush.bf16.msrb.mxu3 %v8624_v6  ;;  %v12081_v34 = vld [vmem:[%s13231_s6 + $0x594] sm:$0xf]  ;;  %v9840_v35 = vor.u32 %v12281_v52, %v9837_v29  ;;  %v6692_v29 = vpop.f32.mrf.mxu1 }
 0x3fe   : > { %v12741_v63 = vld [vmem:[%s13231_s6 + $0x1a2c] sm:$0xf0]  ;;  %v9037_v39 = vld [vmem:[%s13231_s6 + $0x5b0] sm:$0xf0] }
 0x3ff   : > { %v11660_v13 = vor.u32 %v12741_v63, %v11659_v60  ;;  %v12145_v36 = vld [vmem:[%s13231_s6 + $0x794] sm:$0xf]  ;;  %6885 = vmatpush.bf16.msrb.mxu0 %v11404_v3  ;;  %6911 = vmatpush.bf16.msrb.mxu2 %v8336_v30  ;;  %v9040_v19 = vor.u32 %v12081_v34, %v9037_v39  ;;  %v6679_v3 = vpop.f32.mrf.mxu0 }
 0x400   : > { %v9293_v37 = vld [vmem:[%s13231_s6 + $0x7b0] sm:$0xf0] }
 0x401   : > { %v12209_v38 = vld [vmem:[%s13231_s6 + $0x994] sm:$0xf]  ;;  %6898 = vmatpush.bf16.msrb.mxu1 %v11660_v13  ;;  %6924 = vmatpush.bf16.msrb.mxu3 %v8592_v12  ;;  %v9296_v41 = vor.u32 %v12145_v36, %v9293_v37  ;;  %v6680_v13 = vadd.f32 %v6679_v3, %v6667_v17  ;;  %v7459_v17 = vrot.slane %v14590_v33, 4 }
 0x402   : > { %v9549_v46 = vld [vmem:[%s13231_s6 + $0x9b0] sm:$0xf0]  ;;  %6886 = vmatmul.bf16.vlgmr.msrb.gmra.mxu0 %v13780_v20  ;;  %6912 = vmatmul.bf16.vlgmr.msrb.gmra.mxu2 %v13572_v14 }
 0x403   : > { %v12273_v40 = vld [vmem:[%s13231_s6 + $0xb94] sm:$0xf]  ;;  %6930 = vmatpush.bf16.msra.mxu0 %v9072_v50  ;;  %6956 = vmatpush.bf16.msra.mxu2 %v9584_v48  ;;  %v9552_v44 = vor.u32 %v12209_v38, %v9549_v46  ;;  %v6693_v36 = vadd.f32 %v6692_v29, %v6680_v13 }
 0x404   : > { %v9805_v24 = vld [vmem:[%s13231_s6 + $0xbb0] sm:$0xf0]  ;;  %6899 = vmatmul.bf16.vlgmr.msrb.gmra.mxu1 %v13782_v45  ;;  %6925 = vmatmul.bf16.vlgmr.msrb.gmra.mxu3 %v13588_v23 }
 0x405   : > { %6943 = vmatpush.bf16.msra.mxu1 %v9328_v31  ;;  %v12073_v42 = vld [vmem:[%s13231_s6 + $0x554] sm:$0xf]  ;;  %6969 = vmatpush.bf16.msra.mxu3 %v9840_v35  ;;  %v9808_v51 = vor.u32 %v12273_v40, %v9805_v24 }
 0x406   : > { %v9005_v43 = vld [vmem:[%s13231_s6 + $0x570] sm:$0xf0] }
 0x407   : > { %v12137_v55 = vld [vmem:[%s13231_s6 + $0x754] sm:$0xf]  ;;  %6931 = vmatpush.bf16.msra.mxu0 %v9040_v19  ;;  %v9008_v4 = vor.u32 %v12073_v42, %v9005_v43  ;;  %6957 = vmatpush.bf16.msra.mxu2 %v9552_v44  ;;  %v6705_v19 = vpop.f32.mrf.mxu2  ;;  %v6681_v56 = vpop.f32.mrf.mxu0 }
 0x408   : > { %v9261_v57 = vld [vmem:[%s13231_s6 + $0x770] sm:$0xf0]  ;;  %v6706_v44 = vadd.f32 %v6705_v19, %v6693_v36 }
 0x409   : > { %v12201_v60 = vld [vmem:[%s13231_s6 + $0x954] sm:$0xf]  ;;  %6944 = vmatpush.bf16.msra.mxu1 %v9296_v41  ;;  %v9264_v7 = vor.u32 %v12137_v55, %v9261_v57  ;;  %6970 = vmatpush.bf16.msra.mxu3 %v9808_v51  ;;  %v6718_v51 = vpop.f32.mrf.mxu3 }
 0x40a   : > { %v9517_v63 = vld [vmem:[%s13231_s6 + $0x970] sm:$0xf0] }
 0x40b   : > { %v12265_v18 = vld [vmem:[%s13231_s6 + $0xb54] sm:$0xf]  ;;  %v9520_v49 = vor.u32 %v12201_v60, %v9517_v63  ;;  %6932 = vmatpush.bf16.msra.mxu0 %v9008_v4  ;;  %v6719_v63 = vadd.f32 %v6718_v51, %v6706_v44 }
 0x40c   : > { %v9773_v6 = vld [vmem:[%s13231_s6 + $0xb70] sm:$0xf0] }
 0x40d   : > { %v12065_v5 = vld [vmem:[%s13231_s6 + $0x514] sm:$0xf]  ;;  %v9776_v25 = vor.u32 %v12265_v18, %v9773_v6  ;;  %6945 = vmatpush.bf16.msra.mxu1 %v9264_v7  ;;  %6958 = vmatpush.bf16.msra.mxu2 %v9520_v49 }
 0x40e   : > { %v8973_v61 = vld [vmem:[%s13231_s6 + $0x530] sm:$0xf0] }
 0x40f   : > { %v12129_v62 = vld [vmem:[%s13231_s6 + $0x714] sm:$0xf]  ;;  %v8976_v26 = vor.u32 %v12065_v5, %v8973_v61  ;;  %6971 = vmatpush.bf16.msra.mxu3 %v9776_v25  ;;  %v6694_v61 = vpop.f32.mrf.mxu1 }
 0x410   : > { %v9229_v9 = vld [vmem:[%s13231_s6 + $0x730] sm:$0xf0] }
 0x411   : > { %v12193_v16 = vld [vmem:[%s13231_s6 + $0x914] sm:$0xf]  ;;  %v9232_v52 = vor.u32 %v12129_v62, %v9229_v9  ;;  %6933 = vmatpush.bf16.msra.mxu0 %v8976_v26 }
 0x412   : > { %v9485_v21 = vld [vmem:[%s13231_s6 + $0x930] sm:$0xf0] }
 0x413   : > { %v12257_v2 = vld [vmem:[%s13231_s6 + $0xb14] sm:$0xf]  ;;  %v9488_v32 = vor.u32 %v12193_v16, %v9485_v21  ;;  %6946 = vmatpush.bf16.msra.mxu1 %v9232_v52  ;;  %v7460_v21 = vrot.slane %v6719_v63, 2 }
 0x414   : > { %v9741_v27 = vld [vmem:[%s13231_s6 + $0xb30] sm:$0xf0] }
 0x415   : > { %v12057_v30 = vld [vmem:[%s13231_s6 + $0x4d4] sm:$0xf]  ;;  %v9744_v15 = vor.u32 %v12257_v2, %v9741_v27  ;;  %6959 = vmatpush.bf16.msra.mxu2 %v9488_v32  ;;  %v7465_v52 = vsel %vm488_vm1, %v7459_v17, %v7460_v21 }
 0x416   : > { %v8941_v12 = vld [vmem:[%s13231_s6 + $0x4f0] sm:$0xf0] }
 0x417   : > { %v12121_v50 = vld [vmem:[%s13231_s6 + $0x6d4] sm:$0xf]  ;;  %v8944_v37 = vor.u32 %v12057_v30, %v8941_v12  ;;  %6972 = vmatpush.bf16.msra.mxu3 %v9744_v15  ;;  %v7466_v15 = vsel %vm490_vm2, %v14327_v28, %v7465_v52 }
 0x418   : > { %v9197_v31 = vld [vmem:[%s13231_s6 + $0x6f0] sm:$0xf0] }
 0x419   : > { %v12185_v34 = vld [vmem:[%s13231_s6 + $0x8d4] sm:$0xf]  ;;  %v9200_v38 = vor.u32 %v12121_v50, %v9197_v31  ;;  %6934 = vmatpush.bf16.msra.mxu0 %v8944_v37 }
 0x41a   : > { %v9453_v39 = vld [vmem:[%s13231_s6 + $0x8f0] sm:$0xf0] }
 0x41b   : > { %v12249_v48 = vld [vmem:[%s13231_s6 + $0xad4] sm:$0xf]  ;;  %v9456_v24 = vor.u32 %v12185_v34, %v9453_v39  ;;  %6947 = vmatpush.bf16.msra.mxu1 %v9200_v38 }
 0x41c   : > { %v9709_v35 = vld [vmem:[%s13231_s6 + $0xaf0] sm:$0xf0] }
 0x41d   : > { %v12049_v46 = vld [vmem:[%s13231_s6 + $0x494] sm:$0xf]  ;;  %v9712_v47 = vor.u32 %v12249_v48, %v9709_v35  ;;  %6960 = vmatpush.bf16.msra.mxu2 %v9456_v24  ;;  %v6707_v35 = vpop.f32.mrf.mxu2 }
 0x41e   : > { %v8909_v40 = vld [vmem:[%s13231_s6 + $0x4b0] sm:$0xf0] }
 0x41f   : > { %v12113_v41 = vld [vmem:[%s13231_s6 + $0x694] sm:$0xf]  ;;  %v8912_v18 = vor.u32 %v12049_v46, %v8909_v40  ;;  %6973 = vmatpush.bf16.msra.mxu3 %v9712_v47  ;;  %v6720_v40 = vpop.f32.mrf.mxu3 }
 0x420   : > { %v9165_v42 = vld [vmem:[%s13231_s6 + $0x6b0] sm:$0xf0] }
 0x421   : > { %v12177_v43 = vld [vmem:[%s13231_s6 + $0x894] sm:$0xf]  ;;  %v9168_v6 = vor.u32 %v12113_v41, %v9165_v42  ;;  %6935 = vmatpush.bf16.msra.mxu0 %v8912_v18 }
 0x422   : > { %v9421_v55 = vld [vmem:[%s13231_s6 + $0x8b0] sm:$0xf0] }
 0x423   : > { %v12241_v57 = vld [vmem:[%s13231_s6 + $0xa94] sm:$0xf]  ;;  %v9424_v49 = vor.u32 %v12177_v43, %v9421_v55  ;;  %6948 = vmatpush.bf16.msra.mxu1 %v9168_v6 }
 0x424   : > { %v9677_v60 = vld [vmem:[%s13231_s6 + $0xab0] sm:$0xf0] }
 0x425   : > { %v12041_v4 = vld [vmem:[%s13231_s6 + $0x454] sm:$0xf]  ;;  %v9680_v25 = vor.u32 %v12241_v57, %v9677_v60  ;;  %6961 = vmatpush.bf16.msra.mxu2 %v9424_v49 }
 0x426   : > { %v8877_v7 = vld [vmem:[%s13231_s6 + $0x470] sm:$0xf0] }
 0x427   : > { %v12105_v5 = vld [vmem:[%s13231_s6 + $0x654] sm:$0xf]  ;;  %v8880_v29 = vor.u32 %v12041_v4, %v8877_v7  ;;  %6974 = vmatpush.bf16.msra.mxu3 %v9680_v25 }
 0x428   : > { %v9133_v62 = vld [vmem:[%s13231_s6 + $0x670] sm:$0xf0] }
 0x429   : > { %v12169_v9 = vld [vmem:[%s13231_s6 + $0x854] sm:$0xf]  ;;  %v9136_v30 = vor.u32 %v12105_v5, %v9133_v62  ;;  %6936 = vmatpush.bf16.msra.mxu0 %v8880_v29 }
 0x42a   : > { %v9389_v16 = vld [vmem:[%s13231_s6 + $0x870] sm:$0xf0] }
 0x42b   : > { %v12233_v2 = vld [vmem:[%s13231_s6 + $0xa54] sm:$0xf]  ;;  %v9392_v50 = vor.u32 %v12169_v9, %v9389_v16  ;;  %6949 = vmatpush.bf16.msra.mxu1 %v9136_v30 }
 0x42c   : > { %v9645_v27 = vld [vmem:[%s13231_s6 + $0xa70] sm:$0xf0] }
 0x42d   : > { %v565_v3 = vld [vmem:[#allocation2] sm:$0xff]  ;;  %v9648_v31 = vor.u32 %v12233_v2, %v9645_v27  ;;  %6962 = vmatpush.bf16.msra.mxu2 %v9392_v50 }
 0x42e   : > { %v12033_v13 = vld [vmem:[%s13231_s6 + $0x414] sm:$0xf]  ;;  %v7472_v36 = vadd.f32 %v7466_v15, %v565_v3 }
 0x42f   : > { %v8845_v26 = vld [vmem:[%s13231_s6 + $0x430] sm:$0xf0]  ;;  %6975 = vmatpush.bf16.msra.mxu3 %v9648_v31 }
 0x430   : > { %v12097_v12 = vld [vmem:[%s13231_s6 + $0x614] sm:$0xf]  ;;  %7474 = vst [vmem:[#allocation2] sm:$0xff] %v7472_v36  ;;  %v8848_v19 = vor.u32 %v12033_v13, %v8845_v26  ;;  %v6731_v36 = vpop.f32.mrf.mxu0 }
 0x431   : > { %v9101_v33 = vld [vmem:[%s13231_s6 + $0x630] sm:$0xf0] }
 0x432   : > { %v12161_v32 = vld [vmem:[%s13231_s6 + $0x814] sm:$0xf]  ;;  %v9104_v41 = vor.u32 %v12097_v12, %v9101_v33  ;;  %6937 = vmatpush.bf16.msra.mxu0 %v8848_v19 }
 0x433   : > { %v9357_v34 = vld [vmem:[%s13231_s6 + $0x830] sm:$0xf0] }
 0x434   : > { %v12225_v39 = vld [vmem:[%s13231_s6 + $0xa14] sm:$0xf]  ;;  %v9360_v44 = vor.u32 %v12161_v32, %v9357_v34  ;;  %6950 = vmatpush.bf16.msra.mxu1 %v9104_v41 }
 0x435   : > { %v9613_v48 = vld [vmem:[%s13231_s6 + $0xa30] sm:$0xf0]  ;;  %6938 = vmatmul.bf16.vlgmr.msra.gmra.mxu0 %v13570_v11 }
 0x436   : > { %v12345_v37 = vld [vmem:[%s13231_s6 + $0xdd4] sm:$0xf]  ;;  %v9616_v51 = vor.u32 %v12225_v39, %v9613_v48  ;;  %6963 = vmatpush.bf16.msra.mxu2 %v9360_v44 }
 0x437   : > { %v10093_v38 = vld [vmem:[%s13231_s6 + $0xdf0] sm:$0xf0]  ;;  %6951 = vmatmul.bf16.vlgmr.msra.gmra.mxu1 %v13586_v22 }
 0x438   : > { %v12409_v46 = vld [vmem:[%s13231_s6 + $0xfd4] sm:$0xf]  ;;  %v10096_v55 = vor.u32 %v12345_v37, %v10093_v38  ;;  %6976 = vmatpush.bf16.msra.mxu3 %v9616_v51 }
 0x439   : > { %v10349_v24 = vld [vmem:[%s13231_s6 + $0xff0] sm:$0xf0]  ;;  %6964 = vmatmul.bf16.vlgmr.msra.gmra.mxu2 %v13668_v1 }
 0x43a   : > { %v12473_v47 = vld [vmem:[%s13231_s6 + $0x11d4] sm:$0xf]  ;;  %v10352_v57 = vor.u32 %v12409_v46, %v10349_v24  ;;  %6982 = vmatpush.bf16.msrb.mxu0 %v10096_v55  ;;  %v6744_v24 = vpop.f32.mrf.mxu1 }
 0x43b   : > { %v10605_v28 = vld [vmem:[%s13231_s6 + $0x11f0] sm:$0xf0]  ;;  %6977 = vmatmul.bf16.vlgmr.msra.gmra.mxu3 %v13672_v10 }
 0x43c   : > { %v12537_v42 = vld [vmem:[%s13231_s6 + $0x13d4] sm:$0xf]  ;;  %v10608_v63 = vor.u32 %v12473_v47, %v10605_v28  ;;  %6995 = vmatpush.bf16.msrb.mxu1 %v10352_v57 }
 0x43d   : > { %v10861_v43 = vld [vmem:[%s13231_s6 + $0x13f0] sm:$0xf0] }
 0x43e   : > { %v12337_v60 = vld [vmem:[%s13231_s6 + $0xd94] sm:$0xf]  ;;  %v10864_v18 = vor.u32 %v12537_v42, %v10861_v43  ;;  %7008 = vmatpush.bf16.msrb.mxu2 %v10608_v63  ;;  %v6745_v43 = vadd.f32 %v6744_v24, %v6731_v36 }
 0x43f   : > { %v10061_v56 = vld [vmem:[%s13231_s6 + $0xdb0] sm:$0xf0] }
 0x440   : > { %v12401_v6 = vld [vmem:[%s13231_s6 + $0xf94] sm:$0xf]  ;;  %v10064_v25 = vor.u32 %v12337_v60, %v10061_v56  ;;  %7021 = vmatpush.bf16.msrb.mxu3 %v10864_v18 }
 0x441   : > { %v10317_v4 = vld [vmem:[%s13231_s6 + $0xfb0] sm:$0xf0] }
 0x442   : > { %v12465_v7 = vld [vmem:[%s13231_s6 + $0x1194] sm:$0xf]  ;;  %v10320_v62 = vor.u32 %v12401_v6, %v10317_v4  ;;  %6983 = vmatpush.bf16.msrb.mxu0 %v10064_v25 }
 0x443   : > { %v10573_v5 = vld [vmem:[%s13231_s6 + $0x11b0] sm:$0xf0] }
 0x444   : > { %v12529_v61 = vld [vmem:[%s13231_s6 + $0x1394] sm:$0xf]  ;;  %v10576_v17 = vor.u32 %v12465_v7, %v10573_v5  ;;  %6996 = vmatpush.bf16.msrb.mxu1 %v10320_v62 }
 0x445   : > { %v10829_v49 = vld [vmem:[%s13231_s6 + $0x13b0] sm:$0xf0] }
 0x446   : > { %v12329_v9 = vld [vmem:[%s13231_s6 + $0xd54] sm:$0xf]  ;;  %v10832_v21 = vor.u32 %v12529_v61, %v10829_v49  ;;  %7009 = vmatpush.bf16.msrb.mxu2 %v10576_v17  ;;  %v6757_v61 = vpop.f32.mrf.mxu2  ;;  %v6733_v17 = vpop.f32.mrf.mxu0 }
 0x447   : > { %v10029_v16 = vld [vmem:[%s13231_s6 + $0xd70] sm:$0xf0] }
 0x448   : > { %v12393_v2 = vld [vmem:[%s13231_s6 + $0xf54] sm:$0xf]  ;;  %v10032_v29 = vor.u32 %v12329_v9, %v10029_v16  ;;  %7022 = vmatpush.bf16.msrb.mxu3 %v10832_v21  ;;  %v6758_v9 = vadd.f32 %v6757_v61, %v6745_v43  ;;  %v6770_v16 = vpop.f32.mrf.mxu3 }
 0x449   : > { %v10285_v27 = vld [vmem:[%s13231_s6 + $0xf70] sm:$0xf0] }
 0x44a   : > { %v12457_v3 = vld [vmem:[%s13231_s6 + $0x1154] sm:$0xf]  ;;  %v10288_v30 = vor.u32 %v12393_v2, %v10285_v27  ;;  %6984 = vmatpush.bf16.msrb.mxu0 %v10032_v29 }
 0x44b   : > { %v10541_v13 = vld [vmem:[%s13231_s6 + $0x1170] sm:$0xf0] }
 0x44c   : > { %v12521_v26 = vld [vmem:[%s13231_s6 + $0x1354] sm:$0xf]  ;;  %v10544_v32 = vor.u32 %v12457_v3, %v10541_v13  ;;  %6997 = vmatpush.bf16.msrb.mxu1 %v10288_v30  ;;  %v14908_v13 = vadd.f32 %v6770_v16, %v6758_v9 }
 0x44d   : > { %v10797_v52 = vld [vmem:[%s13231_s6 + $0x1370] sm:$0xf0] }
 0x44e   : > { %v12321_v12 = vld [vmem:[%s13231_s6 + $0xd14] sm:$0xf]  ;;  %v10800_v15 = vor.u32 %v12521_v26, %v10797_v52  ;;  %7010 = vmatpush.bf16.msrb.mxu2 %v10544_v32  ;;  %v6746_v26 = vpop.f32.mrf.mxu1 }
 0x44f   : > { %v9997_v33 = vld [vmem:[%s13231_s6 + $0xd30] sm:$0xf0] }
 0x450   : > { %v12385_v50 = vld [vmem:[%s13231_s6 + $0xf14] sm:$0xf]  ;;  %v10000_v37 = vor.u32 %v12321_v12, %v9997_v33  ;;  %7023 = vmatpush.bf16.msrb.mxu3 %v10800_v15 }
 0x451   : > { %v10253_v31 = vld [vmem:[%s13231_s6 + $0xf30] sm:$0xf0] }
 0x452   : > { %v12449_v34 = vld [vmem:[%s13231_s6 + $0x1114] sm:$0xf]  ;;  %v10256_v38 = vor.u32 %v12385_v50, %v10253_v31  ;;  %6985 = vmatpush.bf16.msrb.mxu0 %v10000_v37 }
 0x453   : > { %v10509_v39 = vld [vmem:[%s13231_s6 + $0x1130] sm:$0xf0] }
 0x454   : > { %v12513_v48 = vld [vmem:[%s13231_s6 + $0x1314] sm:$0xf]  ;;  %v10512_v47 = vor.u32 %v12449_v34, %v10509_v39  ;;  %6998 = vmatpush.bf16.msrb.mxu1 %v10256_v38 }
 0x455   : > { %v10765_v35 = vld [vmem:[%s13231_s6 + $0x1330] sm:$0xf0] }
 0x456   : > { %v12313_v46 = vld [vmem:[%s13231_s6 + $0xcd4] sm:$0xf]  ;;  %v10768_v28 = vor.u32 %v12513_v48, %v10765_v35  ;;  %7011 = vmatpush.bf16.msrb.mxu2 %v10512_v47  ;;  %v6759_v47 = vpop.f32.mrf.mxu2 }
 0x457   : > { %v9965_v40 = vld [vmem:[%s13231_s6 + $0xcf0] sm:$0xf0] }
 0x458   : > { %v12377_v19 = vld [vmem:[%s13231_s6 + $0xed4] sm:$0xf]  ;;  %v9968_v57 = vor.u32 %v12313_v46, %v9965_v40  ;;  %7024 = vmatpush.bf16.msrb.mxu3 %v10768_v28 }
 0x459   : > { %v10221_v41 = vld [vmem:[%s13231_s6 + $0xef0] sm:$0xf0] }
 0x45a   : > { %v12441_v42 = vld [vmem:[%s13231_s6 + $0x10d4] sm:$0xf]  ;;  %v10224_v60 = vor.u32 %v12377_v19, %v10221_v41  ;;  %6986 = vmatpush.bf16.msrb.mxu0 %v9968_v57 }
 0x45b   : > { %v10477_v44 = vld [vmem:[%s13231_s6 + $0x10f0] sm:$0xf0] }
 0x45c   : > { %v12505_v51 = vld [vmem:[%s13231_s6 + $0x12d4] sm:$0xf]  ;;  %v10480_v18 = vor.u32 %v12441_v42, %v10477_v44  ;;  %6999 = vmatpush.bf16.msrb.mxu1 %v10224_v60  ;;  %v6772_v42 = vpop.f32.mrf.mxu3 }
 0x45d   : > { %v10733_v55 = vld [vmem:[%s13231_s6 + $0x12f0] sm:$0xf0] }
 0x45e   : > { %v12305_v56 = vld [vmem:[%s13231_s6 + $0xc94] sm:$0xf]  ;;  %v10736_v6 = vor.u32 %v12505_v51, %v10733_v55  ;;  %7012 = vmatpush.bf16.msrb.mxu2 %v10480_v18 }
 0x45f   : > { %v9933_v63 = vld [vmem:[%s13231_s6 + $0xcb0] sm:$0xf0] }
 0x460   : > { %v12369_v4 = vld [vmem:[%s13231_s6 + $0xe94] sm:$0xf]  ;;  %v9936_v21 = vor.u32 %v12305_v56, %v9933_v63  ;;  %7025 = vmatpush.bf16.msrb.mxu3 %v10736_v6 }
 0x461   : > { %v10189_v7 = vld [vmem:[%s13231_s6 + $0xeb0] sm:$0xf0] }
 0x462   : > { %v12433_v5 = vld [vmem:[%s13231_s6 + $0x1094] sm:$0xf]  ;;  %v10192_v2 = vor.u32 %v12369_v4, %v10189_v7  ;;  %6987 = vmatpush.bf16.msrb.mxu0 %v9936_v21 }
 0x463   : > { %v10445_v49 = vld [vmem:[%s13231_s6 + $0x10b0] sm:$0xf0] }
 0x464   : > { %v12497_v25 = vld [vmem:[%s13231_s6 + $0x1294] sm:$0xf]  ;;  %v10448_v52 = vor.u32 %v12433_v5, %v10445_v49  ;;  %7000 = vmatpush.bf16.msrb.mxu1 %v10192_v2 }
 0x465   : > { %v10701_v62 = vld [vmem:[%s13231_s6 + $0x12b0] sm:$0xf0] }
 0x466   : > { %v12297_v27 = vld [vmem:[%s13231_s6 + $0xc54] sm:$0xf]  ;;  %v10704_v29 = vor.u32 %v12497_v25, %v10701_v62  ;;  %7013 = vmatpush.bf16.msrb.mxu2 %v10448_v52 }
 0x467   : > { %v9901_v3 = vld [vmem:[%s13231_s6 + $0xc70] sm:$0xf0] }
 0x468   : > { %v12361_v30 = vld [vmem:[%s13231_s6 + $0xe54] sm:$0xf]  ;;  %v9904_v34 = vor.u32 %v12297_v27, %v9901_v3  ;;  %7026 = vmatpush.bf16.msrb.mxu3 %v10704_v29 }
 0x469   : > { %v10157_v12 = vld [vmem:[%s13231_s6 + $0xe70] sm:$0xf0] }
 0x46a   : > { %v12425_v33 = vld [vmem:[%s13231_s6 + $0x1054] sm:$0xf]  ;;  %v10160_v39 = vor.u32 %v12361_v30, %v10157_v12  ;;  %6988 = vmatpush.bf16.msrb.mxu0 %v9904_v34 }
 0x46b   : > { %v10413_v32 = vld [vmem:[%s13231_s6 + $0x1070] sm:$0xf0] }
 0x46c   : > { %v12489_v15 = vld [vmem:[%s13231_s6 + $0x1254] sm:$0xf]  ;;  %v10416_v37 = vor.u32 %v12425_v33, %v10413_v32  ;;  %7001 = vmatpush.bf16.msrb.mxu1 %v10160_v39 }
 0x46d   : > { %v10669_v50 = vld [vmem:[%s13231_s6 + $0x1270] sm:$0xf0] }
 0x46e   : > { %v12289_v31 = vld [vmem:[%s13231_s6 + $0xc14] sm:$0xf]  ;;  %v10672_v38 = vor.u32 %v12489_v15, %v10669_v50  ;;  %7014 = vmatpush.bf16.msrb.mxu2 %v10416_v37 }
 0x46f   : > { %v9869_v48 = vld [vmem:[%s13231_s6 + $0xc30] sm:$0xf0] }
 0x470   : > { %v12353_v35 = vld [vmem:[%s13231_s6 + $0xe14] sm:$0xf]  ;;  %v9872_v55 = vor.u32 %v12289_v31, %v9869_v48  ;;  %7027 = vmatpush.bf16.msrb.mxu3 %v10672_v38 }
 0x471   : > { %v10125_v36 = vld [vmem:[%s13231_s6 + $0xe30] sm:$0xf0] }
 0x472   : > { %v12417_v46 = vld [vmem:[%s13231_s6 + $0x1014] sm:$0xf]  ;;  %v10128_v57 = vor.u32 %v12353_v35, %v10125_v36  ;;  %6989 = vmatpush.bf16.msrb.mxu0 %v9872_v55  ;;  %v6796_v55 = vpop.f32.mrf.mxu1 }
 0x473   : > { %v10381_v40 = vld [vmem:[%s13231_s6 + $0x1030] sm:$0xf0] }
 0x474   : > { %v12481_v24 = vld [vmem:[%s13231_s6 + $0x1214] sm:$0xf]  ;;  %v10384_v18 = vor.u32 %v12417_v46, %v10381_v40  ;;  %7002 = vmatpush.bf16.msrb.mxu1 %v10128_v57 }
 0x475   : > { %v10637_v28 = vld [vmem:[%s13231_s6 + $0x1230] sm:$0xf0]  ;;  %6990 = vmatmul.bf16.vlgmr.msrb.gmra.mxu0 %v13666_v0 }
 0x476   : > { %v12601_v19 = vld [vmem:[%s13231_s6 + $0x15d4] sm:$0xf]  ;;  %v10640_v6 = vor.u32 %v12481_v24, %v10637_v28  ;;  %7015 = vmatpush.bf16.msrb.mxu2 %v10384_v18 }
 0x477   : > { %v11117_v41 = vld [vmem:[%s13231_s6 + $0x15f0] sm:$0xf0]  ;;  %7003 = vmatmul.bf16.vlgmr.msrb.gmra.mxu1 %v13670_v8 }
 0x478   : > { %v12665_v43 = vld [vmem:[%s13231_s6 + $0x17d4] sm:$0xf]  ;;  %v11120_v4 = vor.u32 %v12601_v19, %v11117_v41  ;;  %7028 = vmatpush.bf16.msrb.mxu3 %v10640_v6  ;;  %v6783_v19 = vpop.f32.mrf.mxu0 }
 0x479   : > { %v11373_v44 = vld [vmem:[%s13231_s6 + $0x17f0] sm:$0xf0]  ;;  %7016 = vmatmul.bf16.vlgmr.msrb.gmra.mxu2 %v13704_v53 }
 0x47a   : > { %v12729_v51 = vld [vmem:[%s13231_s6 + $0x19d4] sm:$0xf]  ;;  %v11376_v7 = vor.u32 %v12665_v43, %v11373_v44  ;;  %7034 = vmatpush.bf16.msra.mxu0 %v11120_v4 }
 0x47b   : > { %v11629_v60 = vld [vmem:[%s13231_s6 + $0x19f0] sm:$0xf0]  ;;  %7029 = vmatmul.bf16.vlgmr.msrb.gmra.mxu3 %v13711_v58 }
 0x47c   : > { %v12793_v56 = vld [vmem:[%s13231_s6 + $0x1bd4] sm:$0xf]  ;;  %v11632_v49 = vor.u32 %v12729_v51, %v11629_v60  ;;  %7047 = vmatpush.bf16.msra.mxu1 %v11376_v7  ;;  %v6784_v51 = vadd.f32 %v6783_v19, %v14908_v13 }
 0x47d   : > { %v11885_v63 = vld [vmem:[%s13231_s6 + $0x1bf0] sm:$0xf0] }
 0x47e   : > { %v12593_v5 = vld [vmem:[%s13231_s6 + $0x1594] sm:$0xf]  ;;  %v11888_v25 = vor.u32 %v12793_v56, %v11885_v63  ;;  %7060 = vmatpush.bf16.msra.mxu2 %v11632_v49 }
 0x47f   : > { %v11085_v61 = vld [vmem:[%s13231_s6 + $0x15b0] sm:$0xf0] }
 0x480   : > { %v12657_v62 = vld [vmem:[%s13231_s6 + $0x1794] sm:$0xf]  ;;  %v11088_v27 = vor.u32 %v12593_v5, %v11085_v61  ;;  %7073 = vmatpush.bf16.msra.mxu3 %v11888_v25  ;;  %v6797_v5 = vadd.f32 %v6796_v55, %v6784_v51 }
 0x481   : > { %v11341_v9 = vld [vmem:[%s13231_s6 + $0x17b0] sm:$0xf0] }
 0x482   : > { %v12721_v16 = vld [vmem:[%s13231_s6 + $0x1994] sm:$0xf]  ;;  %v11344_v3 = vor.u32 %v12657_v62, %v11341_v9  ;;  %7035 = vmatpush.bf16.msra.mxu0 %v11088_v27 }
 0x483   : > { %v11597_v17 = vld [vmem:[%s13231_s6 + $0x19b0] sm:$0xf0] }
 0x484   : > { %v12785_v21 = vld [vmem:[%s13231_s6 + $0x1b94] sm:$0xf]  ;;  %v11600_v29 = vor.u32 %v12721_v16, %v11597_v17  ;;  %7048 = vmatpush.bf16.msra.mxu1 %v11344_v3 }
 0x485   : > { %v11853_v2 = vld [vmem:[%s13231_s6 + $0x1bb0] sm:$0xf0] }
 0x486   : > { %v12585_v26 = vld [vmem:[%s13231_s6 + $0x1554] sm:$0xf]  ;;  %v11856_v30 = vor.u32 %v12785_v21, %v11853_v2  ;;  %7061 = vmatpush.bf16.msra.mxu2 %v11600_v29  ;;  %v6809_v2 = vpop.f32.mrf.mxu2  ;;  %v6822_v29 = vpop.f32.mrf.mxu3 }
 0x487   : > { %v11053_v52 = vld [vmem:[%s13231_s6 + $0x1570] sm:$0xf0] }
 0x488   : > { %v12649_v12 = vld [vmem:[%s13231_s6 + $0x1754] sm:$0xf]  ;;  %v11056_v34 = vor.u32 %v12585_v26, %v11053_v52  ;;  %7074 = vmatpush.bf16.msra.mxu3 %v11856_v30  ;;  %v6810_v52 = vadd.f32 %v6809_v2, %v6797_v5  ;;  %v6785_v30 = vpop.f32.mrf.mxu0  ;;  %v11958_v2 = vld [vmem:[%s13231_s6 + $0x1b4] sm:$0xf0] }
 0x489   : > { %v11309_v33 = vld [vmem:[%s13231_s6 + $0x1770] sm:$0xf0]  ;;  %v12086_v30 = vld [vmem:[%s13231_s6 + $0x5b4] sm:$0xf0] }
 0x48a   : > { %v12713_v32 = vld [vmem:[%s13231_s6 + $0x1954] sm:$0xf]  ;;  %v11312_v39 = vor.u32 %v12649_v12, %v11309_v33  ;;  %7036 = vmatpush.bf16.msra.mxu0 %v11056_v34 }
 0x48b   : > { %v11565_v15 = vld [vmem:[%s13231_s6 + $0x1970] sm:$0xf0] }
 0x48c   : > { %v12777_v50 = vld [vmem:[%s13231_s6 + $0x1b54] sm:$0xf]  ;;  %v11568_v36 = vor.u32 %v12713_v32, %v11565_v15  ;;  %7049 = vmatpush.bf16.msra.mxu1 %v11312_v39  ;;  %v14977_v32 = vadd.f32 %v6822_v29, %v6810_v52  ;;  %v12022_v52 = vld [vmem:[%s13231_s6 + $0x3b4] sm:$0xf0] }
 0x48d   : > { %v11821_v31 = vld [vmem:[%s13231_s6 + $0x1b70] sm:$0xf0]  ;;  %v9043_v29 = vld [vmem:[%s13231_s6 + $0x598] sm:$0xf] }
 0x48e   : > { %v12577_v48 = vld [vmem:[%s13231_s6 + $0x1514] sm:$0xf]  ;;  %v11824_v37 = vor.u32 %v12777_v50, %v11821_v31  ;;  %7062 = vmatpush.bf16.msra.mxu2 %v11568_v36  ;;  %v6798_v31 = vpop.f32.mrf.mxu1 }
 0x48f   : > { %v11021_v35 = vld [vmem:[%s13231_s6 + $0x1530] sm:$0xf0]  ;;  %v8499_v31 = vld [vmem:[%s13231_s6 + $0x158] sm:$0xf] }
 0x490   : > { %v12641_v38 = vld [vmem:[%s13231_s6 + $0x1714] sm:$0xf]  ;;  %v11024_v41 = vor.u32 %v12577_v48, %v11021_v35  ;;  %7075 = vmatpush.bf16.msra.mxu3 %v11824_v37 }
 0x491   : > { %v11277_v46 = vld [vmem:[%s13231_s6 + $0x1730] sm:$0xf0] }
 0x492   : > { %v12705_v40 = vld [vmem:[%s13231_s6 + $0x1914] sm:$0xf]  ;;  %v11280_v42 = vor.u32 %v12641_v38, %v11277_v46  ;;  %7037 = vmatpush.bf16.msra.mxu0 %v11024_v41 }
 0x493   : > { %v11533_v24 = vld [vmem:[%s13231_s6 + $0x1930] sm:$0xf0] }
 0x494   : > { %v12769_v47 = vld [vmem:[%s13231_s6 + $0x1b14] sm:$0xf]  ;;  %v11536_v57 = vor.u32 %v12705_v40, %v11533_v24  ;;  %7050 = vmatpush.bf16.msra.mxu1 %v11280_v42 }
 0x495   : > { %v11789_v28 = vld [vmem:[%s13231_s6 + $0x1b30] sm:$0xf0] }
 0x496   : > { %v12569_v43 = vld [vmem:[%s13231_s6 + $0x14d4] sm:$0xf]  ;;  %v11792_v60 = vor.u32 %v12769_v47, %v11789_v28  ;;  %7063 = vmatpush.bf16.msra.mxu2 %v11536_v57  ;;  %v6811_v57 = vpop.f32.mrf.mxu2 }
 0x497   : > { %v10989_v44 = vld [vmem:[%s13231_s6 + $0x14f0] sm:$0xf0]  ;;  %v9235_v57 = vld [vmem:[%s13231_s6 + $0x718] sm:$0xf] }
 0x498   : > { %v12633_v56 = vld [vmem:[%s13231_s6 + $0x16d4] sm:$0xf]  ;;  %v10992_v13 = vor.u32 %v12569_v43, %v10989_v44  ;;  %7076 = vmatpush.bf16.msra.mxu3 %v11792_v60 }
 0x499   : > { %v11245_v63 = vld [vmem:[%s13231_s6 + $0x16f0] sm:$0xf0] }
 0x49a   : > { %v12697_v18 = vld [vmem:[%s13231_s6 + $0x18d4] sm:$0xf]  ;;  %v11248_v61 = vor.u32 %v12633_v56, %v11245_v63  ;;  %7038 = vmatpush.bf16.msra.mxu0 %v10992_v13  ;;  %v8563_v56 = vld [vmem:[%s13231_s6 + $0x1d8] sm:$0xf] }
 0x49b   : > { %v11501_v6 = vld [vmem:[%s13231_s6 + $0x18f0] sm:$0xf0]  ;;  %v11966_v63 = vld [vmem:[%s13231_s6 + $0x1f4] sm:$0xf0] }
 0x49c   : > { %v12761_v4 = vld [vmem:[%s13231_s6 + $0x1ad4] sm:$0xf]  ;;  %v11504_v62 = vor.u32 %v12697_v18, %v11501_v6  ;;  %7051 = vmatpush.bf16.msra.mxu1 %v11248_v61  ;;  %v6824_v18 = vpop.f32.mrf.mxu3  ;;  %v8819_v6 = vld [vmem:[%s13231_s6 + $0x3d8] sm:$0xf] }
 0x49d   : > { %v11757_v7 = vld [vmem:[%s13231_s6 + $0x1af0] sm:$0xf0]  ;;  %v12094_v61 = vld [vmem:[%s13231_s6 + $0x5f4] sm:$0xf0] }
 0x49e   : > { %v12561_v49 = vld [vmem:[%s13231_s6 + $0x1494] sm:$0xf]  ;;  %v11760_v9 = vor.u32 %v12761_v4, %v11757_v7  ;;  %7064 = vmatpush.bf16.msra.mxu2 %v11504_v62  ;;  %v12030_v4 = vld [vmem:[%s13231_s6 + $0x3f4] sm:$0xf0] }
 0x49f   : > { %v10957_v25 = vld [vmem:[%s13231_s6 + $0x14b0] sm:$0xf0]  ;;  %v9075_v7 = vld [vmem:[%s13231_s6 + $0x5d8] sm:$0xf] }
 0x4a0   : > { %v12625_v16 = vld [vmem:[%s13231_s6 + $0x1694] sm:$0xf]  ;;  %v10960_v12 = vor.u32 %v12561_v49, %v10957_v25  ;;  %7077 = vmatpush.bf16.msra.mxu3 %v11760_v9  ;;  %v9331_v49 = vld [vmem:[%s13231_s6 + $0x7d8] sm:$0xf] }
 0x4a1   : > { %v11213_v17 = vld [vmem:[%s13231_s6 + $0x16b0] sm:$0xf0]  ;;  %v12158_v25 = vld [vmem:[%s13231_s6 + $0x7f4] sm:$0xf0] }
 0x4a2   : > { %v12689_v21 = vld [vmem:[%s13231_s6 + $0x1894] sm:$0xf]  ;;  %v11216_v33 = vor.u32 %v12625_v16, %v11213_v17  ;;  %7039 = vmatpush.bf16.msra.mxu0 %v10960_v12  ;;  %v8564_v16 = vor.u32 %v11966_v63, %v8563_v56  ;;  %v8820_v17 = vor.u32 %v12030_v4, %v8819_v6  ;;  %v9299_v12 = vld [vmem:[%s13231_s6 + $0x798] sm:$0xf]  ;;  %v6835_v56 = vpop.f32.mrf.mxu0  ;;  %v6848_v4 = vpop.f32.mrf.mxu1 }
 0x4a3   : > { %v11469_v27 = vld [vmem:[%s13231_s6 + $0x18b0] sm:$0xf0]  ;;  %v6836_v63 = vadd.f32 %v6835_v56, %v14977_v32  ;;  %v9203_v32 = vld [vmem:[%s13231_s6 + $0x6d8] sm:$0xf] }
 0x4a4   : > { %v12753_v3 = vld [vmem:[%s13231_s6 + $0x1a94] sm:$0xf]  ;;  %v11472_v34 = vor.u32 %v12689_v21, %v11469_v27  ;;  %7052 = vmatpush.bf16.msra.mxu1 %v11216_v33  ;;  %v8531_v21 = vld [vmem:[%s13231_s6 + $0x198] sm:$0xf]  ;;  %v9076_v27 = vor.u32 %v12094_v61, %v9075_v7 }
 0x4a5   : > { %v11725_v26 = vld [vmem:[%s13231_s6 + $0x1ab0] sm:$0xf0]  ;;  %v12150_v33 = vld [vmem:[%s13231_s6 + $0x7b4] sm:$0xf0] }
 0x4a6   : > { %v12553_v15 = vld [vmem:[%s13231_s6 + $0x1454] sm:$0xf]  ;;  %v11728_v39 = vor.u32 %v12753_v3, %v11725_v26  ;;  %7065 = vmatpush.bf16.msra.mxu2 %v11472_v34  ;;  %v9332_v3 = vor.u32 %v12158_v25, %v9331_v49  ;;  %v8787_v26 = vld [vmem:[%s13231_s6 + $0x398] sm:$0xf] }
 0x4a7   : > { %v10925_v50 = vld [vmem:[%s13231_s6 + $0x1470] sm:$0xf0]  ;;  %v11950_v34 = vld [vmem:[%s13231_s6 + $0x174] sm:$0xf0] }
 0x4a8   : > { %v12617_v48 = vld [vmem:[%s13231_s6 + $0x1654] sm:$0xf]  ;;  %v10928_v24 = vor.u32 %v12553_v15, %v10925_v50  ;;  %7078 = vmatpush.bf16.msra.mxu3 %v11728_v39  ;;  %v8532_v15 = vor.u32 %v11958_v2, %v8531_v21  ;;  %v8788_v50 = vor.u32 %v12022_v52, %v8787_v26  ;;  %v9044_v39 = vor.u32 %v12086_v30, %v9043_v29  ;;  %v8435_v7 = vld [vmem:[%s13231_s6 + $0xd8] sm:$0xf]  ;;  %v6861_v29 = vpop.f32.mrf.mxu2 }
 0x4a9   : > { %v11181_v35 = vld [vmem:[%s13231_s6 + $0x1670] sm:$0xf0]  ;;  %v8691_v49 = vld [vmem:[%s13231_s6 + $0x2d8] sm:$0xf] }
 0x4aa   : > { %v12681_v36 = vld [vmem:[%s13231_s6 + $0x1854] sm:$0xf]  ;;  %v11184_v47 = vor.u32 %v12617_v48, %v11181_v35  ;;  %7040 = vmatpush.bf16.msra.mxu0 %v10928_v24  ;;  %v9300_v48 = vor.u32 %v12150_v33, %v9299_v12  ;;  %v8755_v35 = vld [vmem:[%s13231_s6 + $0x358] sm:$0xf]  ;;  %v8500_v24 = vor.u32 %v11950_v34, %v8499_v31 }
 0x4ab   : > { %v11437_v37 = vld [vmem:[%s13231_s6 + $0x1870] sm:$0xf0]  ;;  %v11998_v25 = vld [vmem:[%s13231_s6 + $0x2f4] sm:$0xf0] }
 0x4ac   : > { %v12745_v38 = vld [vmem:[%s13231_s6 + $0x1a54] sm:$0xf]  ;;  %v11440_v42 = vor.u32 %v12681_v36, %v11437_v37  ;;  %7053 = vmatpush.bf16.msra.mxu1 %v11184_v47  ;;  %v12014_v36 = vld [vmem:[%s13231_s6 + $0x374] sm:$0xf0]  ;;  %v8692_v2 = vor.u32 %v11998_v25, %v8691_v49 }
 0x4ad   : > { %v11693_v46 = vld [vmem:[%s13231_s6 + $0x1a70] sm:$0xf0]  ;;  %v9011_v37 = vld [vmem:[%s13231_s6 + $0x558] sm:$0xf]  ;;  %v8756_v47 = vor.u32 %v12014_v36, %v8755_v35 }
 0x4ae   : > { %v12545_v40 = vld [vmem:[%s13231_s6 + $0x1414] sm:$0xf]  ;;  %v11696_v43 = vor.u32 %v12745_v38, %v11693_v46  ;;  %7066 = vmatpush.bf16.msra.mxu2 %v11440_v42  ;;  %v12078_v38 = vld [vmem:[%s13231_s6 + $0x574] sm:$0xf0] }
 0x4af   : > { %v10893_v28 = vld [vmem:[%s13231_s6 + $0x1430] sm:$0xf0]  ;;  %v9267_v46 = vld [vmem:[%s13231_s6 + $0x758] sm:$0xf] }
 0x4b0   : > { %v12609_v19 = vld [vmem:[%s13231_s6 + $0x1614] sm:$0xf]  ;;  %v10896_v5 = vor.u32 %v12545_v40, %v10893_v28  ;;  %7079 = vmatpush.bf16.msra.mxu3 %v11696_v43  ;;  %v12142_v40 = vld [vmem:[%s13231_s6 + $0x774] sm:$0xf0] }
 0x4b1   : > { %v11149_v41 = vld [vmem:[%s13231_s6 + $0x1630] sm:$0xf0]  ;;  %v8467_v28 = vld [vmem:[%s13231_s6 + $0x118] sm:$0xf]  ;;  %v9268_v42 = vor.u32 %v12142_v40, %v9267_v46  ;;  %v6850_v40 = vpop.f32.mrf.mxu1 }
 0x4b2   : > { %v12673_v44 = vld [vmem:[%s13231_s6 + $0x1814] sm:$0xf]  ;;  %v11152_v13 = vor.u32 %v12609_v19, %v11149_v41  ;;  %7041 = vmatpush.bf16.msra.mxu0 %v10896_v5  ;;  %v11942_v19 = vld [vmem:[%s13231_s6 + $0x134] sm:$0xf0]  ;;  %v9012_v41 = vor.u32 %v12078_v38, %v9011_v37 }
 0x4b3   : > { %v11405_v51 = vld [vmem:[%s13231_s6 + $0x1830] sm:$0xf0]  ;;  %v8723_v43 = vld [vmem:[%s13231_s6 + $0x318] sm:$0xf]  ;;  %v8468_v18 = vor.u32 %v11942_v19, %v8467_v28 }
 0x4b4   : > { %v12737_v55 = vld [vmem:[%s13231_s6 + $0x1a14] sm:$0xf]  ;;  %v11408_v62 = vor.u32 %v12673_v44, %v11405_v51  ;;  %7054 = vmatpush.bf16.msra.mxu1 %v11152_v13  ;;  %v12006_v44 = vld [vmem:[%s13231_s6 + $0x334] sm:$0xf0] }
 0x4b5   : > { %v11661_v60 = vld [vmem:[%s13231_s6 + $0x1a30] sm:$0xf0]  ;;  %7042 = vmatmul.bf16.vlgmr.msra.gmra.mxu0 %v13706_v54  ;;  %v8979_v51 = vld [vmem:[%s13231_s6 + $0x518] sm:$0xf]  ;;  %v8724_v6 = vor.u32 %v12006_v44, %v8723_v43 }
 0x4b6   : > { %v11664_v9 = vor.u32 %v12737_v55, %v11661_v60  ;;  %7067 = vmatpush.bf16.msra.mxu2 %v11408_v62  ;;  %7086 = vmatpush.bf16.msrb.mxu0 %v8564_v16  ;;  %v12070_v55 = vld [vmem:[%s13231_s6 + $0x534] sm:$0xf0] }
 0x4b7   : > { %7055 = vmatmul.bf16.vlgmr.msra.gmra.mxu1 %v13713_v59  ;;  %v12134_v60 = vld [vmem:[%s13231_s6 + $0x734] sm:$0xf0]  ;;  %v8980_v13 = vor.u32 %v12070_v55, %v8979_v51 }
 0x4b8   : > { %7080 = vmatpush.bf16.msra.mxu3 %v11664_v9  ;;  %7099 = vmatpush.bf16.msrb.mxu1 %v8820_v17  ;;  %v11934_v5 = vld [vmem:[%s13231_s6 + $0xf4] sm:$0xf0]  ;;  %v9236_v61 = vor.u32 %v12134_v60, %v9235_v57  ;;  %v6849_v9 = vadd.f32 %v6848_v4, %v6836_v63 }
 0x4b9   : > { %7068 = vmatmul.bf16.vlgmr.msra.gmra.mxu2 %v13780_v20  ;;  %v8947_v62 = vld [vmem:[%s13231_s6 + $0x4d8] sm:$0xf]  ;;  %v8436_v21 = vor.u32 %v11934_v5, %v8435_v7 }
 0x4ba   : > { %7112 = vmatpush.bf16.msrb.mxu2 %v9076_v27  ;;  %7087 = vmatpush.bf16.msrb.mxu0 %v8532_v15  ;;  %v12062_v16 = vld [vmem:[%s13231_s6 + $0x4f4] sm:$0xf0]  ;;  %v6862_v15 = vadd.f32 %v6861_v29, %v6849_v9 }
 0x4bb   : > { %7081 = vmatmul.bf16.vlgmr.msra.gmra.mxu3 %v13782_v45  ;;  %v12126_v17 = vld [vmem:[%s13231_s6 + $0x6f4] sm:$0xf0]  ;;  %v8948_v26 = vor.u32 %v12062_v16, %v8947_v62 }
 0x4bc   : > { %7125 = vmatpush.bf16.msrb.mxu3 %v9332_v3  ;;  %7100 = vmatpush.bf16.msrb.mxu1 %v8788_v50  ;;  %v8403_v27 = vld [vmem:[%s13231_s6 + $0x98] sm:$0xf]  ;;  %v9204_v52 = vor.u32 %v12126_v17, %v9203_v32  ;;  %v6874_v50 = vpop.f32.mrf.mxu3 }
 0x4bd   : > { %v11926_v3 = vld [vmem:[%s13231_s6 + $0xb4] sm:$0xf0]  ;;  %v15048_v35 = vadd.f32 %v6874_v50, %v6862_v15 }
 0x4be   : > { %7113 = vmatpush.bf16.msrb.mxu2 %v9044_v39  ;;  %7088 = vmatpush.bf16.msrb.mxu0 %v8500_v24  ;;  %v8659_v30 = vld [vmem:[%s13231_s6 + $0x298] sm:$0xf]  ;;  %v8404_v36 = vor.u32 %v11926_v3, %v8403_v27 }
 0x4bf   : > { %v11990_v12 = vld [vmem:[%s13231_s6 + $0x2b4] sm:$0xf0] }
 0x4c0   : > { %7126 = vmatpush.bf16.msrb.mxu3 %v9300_v48  ;;  %7101 = vmatpush.bf16.msrb.mxu1 %v8756_v47  ;;  %v8915_v33 = vld [vmem:[%s13231_s6 + $0x498] sm:$0xf]  ;;  %v6837_v48 = vpop.f32.mrf.mxu0  ;;  %v8660_v37 = vor.u32 %v11990_v12, %v8659_v30 }
 0x4c1   : > { %v12054_v31 = vld [vmem:[%s13231_s6 + $0x4b4] sm:$0xf0] }
 0x4c2   : > { %7114 = vmatpush.bf16.msrb.mxu2 %v9012_v41  ;;  %7089 = vmatpush.bf16.msrb.mxu0 %v8468_v18  ;;  %v9171_v34 = vld [vmem:[%s13231_s6 + $0x698] sm:$0xf]  ;;  %v8916_v24 = vor.u32 %v12054_v31, %v8915_v33 }
 0x4c3   : > { %v12118_v39 = vld [vmem:[%s13231_s6 + $0x6b4] sm:$0xf0] }
 0x4c4   : > { %7127 = vmatpush.bf16.msrb.mxu3 %v9268_v42  ;;  %7102 = vmatpush.bf16.msrb.mxu1 %v8724_v6  ;;  %v8371_v38 = vld [vmem:[%s13231_s6 + $0x58] sm:$0xf]  ;;  %v9172_v47 = vor.u32 %v12118_v39, %v9171_v34  ;;  %v6876_v62 = vpop.f32.mrf.mxu3 }
 0x4c5   : > { %v11918_v46 = vld [vmem:[%s13231_s6 + $0x74] sm:$0xf0] }
 0x4c6   : > { %7115 = vmatpush.bf16.msrb.mxu2 %v8980_v13  ;;  %7090 = vmatpush.bf16.msrb.mxu0 %v8436_v21  ;;  %v8627_v28 = vld [vmem:[%s13231_s6 + $0x258] sm:$0xf]  ;;  %v8372_v55 = vor.u32 %v11918_v46, %v8371_v38  ;;  %v6863_v13 = vpop.f32.mrf.mxu2 }
 0x4c7   : > { %v11982_v19 = vld [vmem:[%s13231_s6 + $0x274] sm:$0xf0] }
 0x4c8   : > { %7128 = vmatpush.bf16.msrb.mxu3 %v9236_v61  ;;  %7103 = vmatpush.bf16.msrb.mxu1 %v8692_v2  ;;  %v8883_v41 = vld [vmem:[%s13231_s6 + $0x458] sm:$0xf]  ;;  %v8628_v57 = vor.u32 %v11982_v19, %v8627_v28 }
 0x4c9   : > { %v12046_v42 = vld [vmem:[%s13231_s6 + $0x474] sm:$0xf0] }
 0x4ca   : > { %7116 = vmatpush.bf16.msrb.mxu2 %v8948_v26  ;;  %v9139_v43 = vld [vmem:[%s13231_s6 + $0x658] sm:$0xf]  ;;  %7091 = vmatpush.bf16.msrb.mxu0 %v8404_v36  ;;  %v8884_v18 = vor.u32 %v12046_v42, %v8883_v41 }
 0x4cb   : > { %v12110_v44 = vld [vmem:[%s13231_s6 + $0x674] sm:$0xf0] }
 0x4cc   : > { %7129 = vmatpush.bf16.msrb.mxu3 %v9204_v52  ;;  %v8339_v51 = vld [vmem:[%s13231_s6 + $0x18] sm:$0xf]  ;;  %7104 = vmatpush.bf16.msrb.mxu1 %v8660_v37  ;;  %v9140_v6 = vor.u32 %v12110_v44, %v9139_v43 }
 0x4cd   : > { %v11910_v60 = vld [vmem:[%s13231_s6 + $0x34] sm:$0xf0] }
 0x4ce   : > { %v8595_v56 = vld [vmem:[%s13231_s6 + $0x218] sm:$0xf]  ;;  %7117 = vmatpush.bf16.msrb.mxu2 %v8916_v24  ;;  %7092 = vmatpush.bf16.msrb.mxu0 %v8372_v55  ;;  %v8340_v17 = vor.u32 %v11910_v60, %v8339_v51 }
 0x4cf   : > { %v11974_v63 = vld [vmem:[%s13231_s6 + $0x234] sm:$0xf0] }
 0x4d0   : > { %7130 = vmatpush.bf16.msrb.mxu3 %v9172_v47  ;;  %v8851_v4 = vld [vmem:[%s13231_s6 + $0x418] sm:$0xf]  ;;  %7105 = vmatpush.bf16.msrb.mxu1 %v8628_v57  ;;  %v8596_v21 = vor.u32 %v11974_v63, %v8595_v56 }
 0x4d1   : > { %v12038_v7 = vld [vmem:[%s13231_s6 + $0x434] sm:$0xf0] }
 0x4d2   : > { %v9107_v5 = vld [vmem:[%s13231_s6 + $0x618] sm:$0xf]  ;;  %7118 = vmatpush.bf16.msrb.mxu2 %v8884_v18  ;;  %v8852_v26 = vor.u32 %v12038_v7, %v8851_v4  ;;  %7093 = vmatpush.bf16.msrb.mxu0 %v8340_v17 }
 0x4d3   : > { %v12102_v61 = vld [vmem:[%s13231_s6 + $0x634] sm:$0xf0] }
 0x4d4   : > { %v9587_v49 = vld [vmem:[%s13231_s6 + $0x9d8] sm:$0xf]  ;;  %7131 = vmatpush.bf16.msrb.mxu3 %v9140_v6  ;;  %v9108_v52 = vor.u32 %v12102_v61, %v9107_v5  ;;  %7106 = vmatpush.bf16.msrb.mxu1 %v8596_v21 }
 0x4d5   : > { %v12222_v25 = vld [vmem:[%s13231_s6 + $0x9f4] sm:$0xf0]  ;;  %7094 = vmatmul.bf16.vlgmr.msrb.gmra.mxu0 %v13572_v14 }
 0x4d6   : > { %v9843_v9 = vld [vmem:[%s13231_s6 + $0xbd8] sm:$0xf]  ;;  %v9588_v29 = vor.u32 %v12222_v25, %v9587_v49  ;;  %7119 = vmatpush.bf16.msrb.mxu2 %v8852_v26  ;;  %v6887_v49 = vpop.f32.mrf.mxu0  ;;  %v6900_v25 = vpop.f32.mrf.mxu1 }
 0x4d7   : > { %v12286_v16 = vld [vmem:[%s13231_s6 + $0xbf4] sm:$0xf0]  ;;  %7107 = vmatmul.bf16.vlgmr.msrb.gmra.mxu1 %v13588_v23  ;;  %v6888_v62 = vadd.f32 %v6887_v49, %v15048_v35 }
 0x4d8   : > { %v10099_v32 = vld [vmem:[%s13231_s6 + $0xdd8] sm:$0xf]  ;;  %v9844_v30 = vor.u32 %v12286_v16, %v9843_v9  ;;  %7132 = vmatpush.bf16.msrb.mxu3 %v9108_v52  ;;  %7138 = vmatpush.bf16.msra.mxu0 %v9588_v29 }
 0x4d9   : > { %v12350_v2 = vld [vmem:[%s13231_s6 + $0xdf4] sm:$0xf0]  ;;  %7120 = vmatmul.bf16.vlgmr.msrb.gmra.mxu2 %v13570_v11  ;;  %v15108_v52 = vadd.f32 %v6900_v25, %v6888_v62 }
 0x4da   : > { %v10355_v27 = vld [vmem:[%s13231_s6 + $0xfd8] sm:$0xf]  ;;  %v10100_v15 = vor.u32 %v12350_v2, %v10099_v32  ;;  %7151 = vmatpush.bf16.msra.mxu1 %v9844_v30 }
 0x4db   : > { %v12414_v3 = vld [vmem:[%s13231_s6 + $0xff4] sm:$0xf0]  ;;  %7133 = vmatmul.bf16.vlgmr.msrb.gmra.mxu3 %v13586_v22 }
 0x4dc   : > { %v9555_v12 = vld [vmem:[%s13231_s6 + $0x998] sm:$0xf]  ;;  %v10356_v50 = vor.u32 %v12414_v3, %v10355_v27  ;;  %7164 = vmatpush.bf16.msra.mxu2 %v10100_v15 }
 0x4dd   : > { %v12214_v33 = vld [vmem:[%s13231_s6 + $0x9b4] sm:$0xf0] }
 0x4de   : > { %v9811_v31 = vld [vmem:[%s13231_s6 + $0xb98] sm:$0xf]  ;;  %v9556_v38 = vor.u32 %v12214_v33, %v9555_v12  ;;  %7177 = vmatpush.bf16.msra.mxu3 %v10356_v50 }
 0x4df   : > { %v12278_v34 = vld [vmem:[%s13231_s6 + $0xbb4] sm:$0xf0] }
 0x4e0   : > { %v10067_v39 = vld [vmem:[%s13231_s6 + $0xd98] sm:$0xf]  ;;  %v9812_v46 = vor.u32 %v12278_v34, %v9811_v31  ;;  %7139 = vmatpush.bf16.msra.mxu0 %v9556_v38 }
 0x4e1   : > { %v12342_v48 = vld [vmem:[%s13231_s6 + $0xdb4] sm:$0xf0] }
 0x4e2   : > { %v10323_v36 = vld [vmem:[%s13231_s6 + $0xf98] sm:$0xf]  ;;  %v10068_v47 = vor.u32 %v12342_v48, %v10067_v39  ;;  %7152 = vmatpush.bf16.msra.mxu1 %v9812_v46 }
 0x4e3   : > { %v12406_v37 = vld [vmem:[%s13231_s6 + $0xfb4] sm:$0xf0] }
 0x4e4   : > { %v9523_v40 = vld [vmem:[%s13231_s6 + $0x958] sm:$0xf]  ;;  %v10324_v28 = vor.u32 %v12406_v37, %v10323_v36  ;;  %7165 = vmatpush.bf16.msra.mxu2 %v10068_v47 }
 0x4e5   : > { %v12206_v24 = vld [vmem:[%s13231_s6 + $0x974] sm:$0xf0] }
 0x4e6   : > { %v9779_v19 = vld [vmem:[%s13231_s6 + $0xb58] sm:$0xf]  ;;  %v9524_v55 = vor.u32 %v12206_v24, %v9523_v40  ;;  %7178 = vmatpush.bf16.msra.mxu3 %v10324_v28  ;;  %v6913_v40 = vpop.f32.mrf.mxu2  ;;  %v6926_v24 = vpop.f32.mrf.mxu3 }
 0x4e7   : > { %v12270_v41 = vld [vmem:[%s13231_s6 + $0xb74] sm:$0xf0]  ;;  %v15121_v47 = vadd.f32 %v6926_v24, %v6913_v40  ;;  %v6889_v28 = vpop.f32.mrf.mxu0 }
 0x4e8   : > { %v10035_v42 = vld [vmem:[%s13231_s6 + $0xd58] sm:$0xf]  ;;  %v9780_v57 = vor.u32 %v12270_v41, %v9779_v19  ;;  %7140 = vmatpush.bf16.msra.mxu0 %v9524_v55  ;;  %v6902_v19 = vpop.f32.mrf.mxu1 }
 0x4e9   : > { %v12334_v43 = vld [vmem:[%s13231_s6 + $0xd74] sm:$0xf0] }
 0x4ea   : > { %v10291_v44 = vld [vmem:[%s13231_s6 + $0xf58] sm:$0xf]  ;;  %v10036_v63 = vor.u32 %v12334_v43, %v10035_v42  ;;  %7153 = vmatpush.bf16.msra.mxu1 %v9780_v57 }
 0x4eb   : > { %v12398_v51 = vld [vmem:[%s13231_s6 + $0xf74] sm:$0xf0] }
 0x4ec   : > { %v9491_v60 = vld [vmem:[%s13231_s6 + $0x918] sm:$0xf]  ;;  %v10292_v18 = vor.u32 %v12398_v51, %v10291_v44  ;;  %7166 = vmatpush.bf16.msra.mxu2 %v10036_v63 }
 0x4ed   : > { %v12198_v56 = vld [vmem:[%s13231_s6 + $0x934] sm:$0xf0] }
 0x4ee   : > { %v9747_v6 = vld [vmem:[%s13231_s6 + $0xb18] sm:$0xf]  ;;  %v9492_v9 = vor.u32 %v12198_v56, %v9491_v60  ;;  %7179 = vmatpush.bf16.msra.mxu3 %v10292_v18 }
 0x4ef   : > { %v12262_v4 = vld [vmem:[%s13231_s6 + $0xb34] sm:$0xf0] }
 0x4f0   : > { %v10003_v7 = vld [vmem:[%s13231_s6 + $0xd18] sm:$0xf]  ;;  %v9748_v16 = vor.u32 %v12262_v4, %v9747_v6  ;;  %7141 = vmatpush.bf16.msra.mxu0 %v9492_v9 }
 0x4f1   : > { %v12326_v5 = vld [vmem:[%s13231_s6 + $0xd34] sm:$0xf0] }
 0x4f2   : > { %v10259_v13 = vld [vmem:[%s13231_s6 + $0xf18] sm:$0xf]  ;;  %v10004_v21 = vor.u32 %v12326_v5, %v10003_v7  ;;  %7154 = vmatpush.bf16.msra.mxu1 %v9748_v16 }
 0x4f3   : > { %v12390_v61 = vld [vmem:[%s13231_s6 + $0xf34] sm:$0xf0] }
 0x4f4   : > { %v9459_v32 = vld [vmem:[%s13231_s6 + $0x8d8] sm:$0xf]  ;;  %v10260_v2 = vor.u32 %v12390_v61, %v10259_v13  ;;  %7167 = vmatpush.bf16.msra.mxu2 %v10004_v21 }
 0x4f5   : > { %v12190_v17 = vld [vmem:[%s13231_s6 + $0x8f4] sm:$0xf0] }
 0x4f6   : > { %v9715_v27 = vld [vmem:[%s13231_s6 + $0xad8] sm:$0xf]  ;;  %v9460_v12 = vor.u32 %v12190_v17, %v9459_v32  ;;  %7180 = vmatpush.bf16.msra.mxu3 %v10260_v2 }
 0x4f7   : > { %v12254_v3 = vld [vmem:[%s13231_s6 + $0xaf4] sm:$0xf0] }
 0x4f8   : > { %v9971_v26 = vld [vmem:[%s13231_s6 + $0xcd8] sm:$0xf]  ;;  %v9716_v33 = vor.u32 %v12254_v3, %v9715_v27  ;;  %7142 = vmatpush.bf16.msra.mxu0 %v9460_v12  ;;  %v6915_v27 = vpop.f32.mrf.mxu2  ;;  %v6928_v3 = vpop.f32.mrf.mxu3 }
 0x4f9   : > { %v12318_v29 = vld [vmem:[%s13231_s6 + $0xcf4] sm:$0xf0]  ;;  %v6939_v27 = vpop.f32.mrf.mxu0 }
 0x4fa   : > { %v10227_v35 = vld [vmem:[%s13231_s6 + $0xed8] sm:$0xf]  ;;  %v9972_v31 = vor.u32 %v12318_v29, %v9971_v26  ;;  %7155 = vmatpush.bf16.msra.mxu1 %v9716_v33 }
 0x4fb   : > { %v12382_v30 = vld [vmem:[%s13231_s6 + $0xef4] sm:$0xf0] }
 0x4fc   : > { %v9427_v15 = vld [vmem:[%s13231_s6 + $0x898] sm:$0xf]  ;;  %v10228_v34 = vor.u32 %v12382_v30, %v10227_v35  ;;  %7168 = vmatpush.bf16.msra.mxu2 %v9972_v31 }
 0x4fd   : > { %v12182_v50 = vld [vmem:[%s13231_s6 + $0x8b4] sm:$0xf0] }
 0x4fe   : > { %v9683_v39 = vld [vmem:[%s13231_s6 + $0xa98] sm:$0xf]  ;;  %v9428_v41 = vor.u32 %v12182_v50, %v9427_v15  ;;  %7181 = vmatpush.bf16.msra.mxu3 %v10228_v34 }
 0x4ff   : > { %v12246_v48 = vld [vmem:[%s13231_s6 + $0xab4] sm:$0xf0] }
 0x500   : > { %v9939_v36 = vld [vmem:[%s13231_s6 + $0xc98] sm:$0xf]  ;;  %v9684_v42 = vor.u32 %v12246_v48, %v9683_v39  ;;  %7143 = vmatpush.bf16.msra.mxu0 %v9428_v41 }
 0x501   : > { %v12310_v37 = vld [vmem:[%s13231_s6 + $0xcb4] sm:$0xf0] }
 0x502   : > { %v10195_v38 = vld [vmem:[%s13231_s6 + $0xe98] sm:$0xf]  ;;  %v9940_v51 = vor.u32 %v12310_v37, %v9939_v36  ;;  %7156 = vmatpush.bf16.msra.mxu1 %v9684_v42 }
 0x503   : > { %v12374_v46 = vld [vmem:[%s13231_s6 + $0xeb4] sm:$0xf0] }
 0x504   : > { %v9395_v43 = vld [vmem:[%s13231_s6 + $0x858] sm:$0xf]  ;;  %v10196_v55 = vor.u32 %v12374_v46, %v10195_v38  ;;  %7169 = vmatpush.bf16.msra.mxu2 %v9940_v51 }
 0x505   : > { %v12174_v44 = vld [vmem:[%s13231_s6 + $0x874] sm:$0xf0] }
 0x506   : > { %v9651_v57 = vld [vmem:[%s13231_s6 + $0xa58] sm:$0xf]  ;;  %v9396_v7 = vor.u32 %v12174_v44, %v9395_v43  ;;  %7182 = vmatpush.bf16.msra.mxu3 %v10196_v55 }
 0x507   : > { %v12238_v60 = vld [vmem:[%s13231_s6 + $0xa74] sm:$0xf0] }
 0x508   : > { %v9907_v56 = vld [vmem:[%s13231_s6 + $0xc58] sm:$0xf]  ;;  %v9652_v5 = vor.u32 %v12238_v60, %v9651_v57  ;;  %7144 = vmatpush.bf16.msra.mxu0 %v9396_v7 }
 0x509   : > { %v12302_v63 = vld [vmem:[%s13231_s6 + $0xc74] sm:$0xf0] }
 0x50a   : > { %v10163_v18 = vld [vmem:[%s13231_s6 + $0xe58] sm:$0xf]  ;;  %v9908_v25 = vor.u32 %v12302_v63, %v9907_v56  ;;  %7157 = vmatpush.bf16.msra.mxu1 %v9652_v5 }
 0x50b   : > { %v12366_v6 = vld [vmem:[%s13231_s6 + $0xe74] sm:$0xf0] }
 0x50c   : > { %v9363_v4 = vld [vmem:[%s13231_s6 + $0x818] sm:$0xf]  ;;  %v10164_v62 = vor.u32 %v12366_v6, %v10163_v18  ;;  %7170 = vmatpush.bf16.msra.mxu2 %v9908_v25 }
 0x50d   : > { %v12166_v13 = vld [vmem:[%s13231_s6 + $0x834] sm:$0xf0] }
 0x50e   : > { %v9619_v61 = vld [vmem:[%s13231_s6 + $0xa18] sm:$0xf]  ;;  %v9364_v30 = vor.u32 %v12166_v13, %v9363_v4  ;;  %7183 = vmatpush.bf16.msra.mxu3 %v10164_v62 }
 0x50f   : > { %v12230_v49 = vld [vmem:[%s13231_s6 + $0xa34] sm:$0xf0] }
 0x510   : > { %v9875_v9 = vld [vmem:[%s13231_s6 + $0xc18] sm:$0xf]  ;;  %v9620_v12 = vor.u32 %v12230_v49, %v9619_v61  ;;  %7145 = vmatpush.bf16.msra.mxu0 %v9364_v30  ;;  %v6940_v30 = vadd.f32 %v6939_v27, %v15121_v47 }
 0x511   : > { %v12294_v16 = vld [vmem:[%s13231_s6 + $0xc34] sm:$0xf0] }
 0x512   : > { %v10131_v32 = vld [vmem:[%s13231_s6 + $0xe18] sm:$0xf]  ;;  %v9876_v31 = vor.u32 %v12294_v16, %v9875_v9  ;;  %7158 = vmatpush.bf16.msra.mxu1 %v9620_v12  ;;  %v6952_v12 = vpop.f32.mrf.mxu1 }
 0x513   : > { %v12358_v17 = vld [vmem:[%s13231_s6 + $0xe34] sm:$0xf0]  ;;  %7146 = vmatmul.bf16.vlgmr.msra.gmra.mxu0 %v13668_v1 }
 0x514   : > { %v10611_v21 = vld [vmem:[%s13231_s6 + $0x11d8] sm:$0xf]  ;;  %v10132_v34 = vor.u32 %v12358_v17, %v10131_v32  ;;  %7171 = vmatpush.bf16.msra.mxu2 %v9876_v31 }
 0x515   : > { %v12478_v2 = vld [vmem:[%s13231_s6 + $0x11f4] sm:$0xf0]  ;;  %7159 = vmatmul.bf16.vlgmr.msra.gmra.mxu1 %v13672_v10 }
 0x516   : > { %v10867_v26 = vld [vmem:[%s13231_s6 + $0x13d8] sm:$0xf]  ;;  %v10612_v39 = vor.u32 %v12478_v2, %v10611_v21  ;;  %7184 = vmatpush.bf16.msra.mxu3 %v10132_v34 }
 0x517   : > { %v12542_v29 = vld [vmem:[%s13231_s6 + $0x13f4] sm:$0xf0]  ;;  %7172 = vmatmul.bf16.vlgmr.msra.gmra.mxu2 %v13666_v0 }
 0x518   : > { %v11123_v35 = vld [vmem:[%s13231_s6 + $0x15d8] sm:$0xf]  ;;  %v10868_v48 = vor.u32 %v12542_v29, %v10867_v26  ;;  %7190 = vmatpush.bf16.msrb.mxu0 %v10612_v39 }
 0x519   : > { %v12606_v33 = vld [vmem:[%s13231_s6 + $0x15f4] sm:$0xf0]  ;;  %7185 = vmatmul.bf16.vlgmr.msra.gmra.mxu3 %v13670_v8 }
 0x51a   : > { %v11379_v15 = vld [vmem:[%s13231_s6 + $0x17d8] sm:$0xf]  ;;  %v11124_v38 = vor.u32 %v12606_v33, %v11123_v35  ;;  %7203 = vmatpush.bf16.msrb.mxu1 %v10868_v48 }
 0x51b   : > { %v12670_v50 = vld [vmem:[%s13231_s6 + $0x17f4] sm:$0xf0] }
 0x51c   : > { %v10579_v36 = vld [vmem:[%s13231_s6 + $0x1198] sm:$0xf]  ;;  %v11380_v46 = vor.u32 %v12670_v50, %v11379_v15  ;;  %7216 = vmatpush.bf16.msrb.mxu2 %v11124_v38 }
 0x51d   : > { %v12470_v37 = vld [vmem:[%s13231_s6 + $0x11b4] sm:$0xf0] }
 0x51e   : > { %v10835_v40 = vld [vmem:[%s13231_s6 + $0x1398] sm:$0xf]  ;;  %v10580_v43 = vor.u32 %v12470_v37, %v10579_v36  ;;  %7229 = vmatpush.bf16.msrb.mxu3 %v11380_v46  ;;  %v6953_v37 = vadd.f32 %v6952_v12, %v6940_v30 }
 0x51f   : > { %v12534_v24 = vld [vmem:[%s13231_s6 + $0x13b4] sm:$0xf0] }
 0x520   : > { %v11091_v28 = vld [vmem:[%s13231_s6 + $0x1598] sm:$0xf]  ;;  %v10836_v44 = vor.u32 %v12534_v24, %v10835_v40  ;;  %7191 = vmatpush.bf16.msrb.mxu0 %v10580_v43  ;;  %v6965_v43 = vpop.f32.mrf.mxu2 }
 0x521   : > { %v12598_v19 = vld [vmem:[%s13231_s6 + $0x15b4] sm:$0xf0] }
 0x522   : > { %v11347_v41 = vld [vmem:[%s13231_s6 + $0x1798] sm:$0xf]  ;;  %v11092_v57 = vor.u32 %v12598_v19, %v11091_v28  ;;  %7204 = vmatpush.bf16.msrb.mxu1 %v10836_v44 }
 0x523   : > { %v12662_v42 = vld [vmem:[%s13231_s6 + $0x17b4] sm:$0xf0] }
 0x524   : > { %v10547_v51 = vld [vmem:[%s13231_s6 + $0x1158] sm:$0xf]  ;;  %v11348_v60 = vor.u32 %v12662_v42, %v11347_v41  ;;  %7217 = vmatpush.bf16.msrb.mxu2 %v11092_v57  ;;  %v6966_v57 = vadd.f32 %v6965_v43, %v6953_v37  ;;  %v11962_v37 = vld [vmem:[%s13231_s6 + $0x1dc] sm:$0xf] }
 0x525   : > { %v12462_v55 = vld [vmem:[%s13231_s6 + $0x1174] sm:$0xf0] }
 0x526   : > { %v10803_v56 = vld [vmem:[%s13231_s6 + $0x1358] sm:$0xf]  ;;  %v10548_v5 = vor.u32 %v12462_v55, %v10547_v51  ;;  %7230 = vmatpush.bf16.msrb.mxu3 %v11348_v60  ;;  %v6978_v60 = vpop.f32.mrf.mxu3 }
 0x527   : > { %v12526_v63 = vld [vmem:[%s13231_s6 + $0x1374] sm:$0xf0] }
 0x528   : > { %v11059_v18 = vld [vmem:[%s13231_s6 + $0x1558] sm:$0xf]  ;;  %v10804_v13 = vor.u32 %v12526_v63, %v10803_v56  ;;  %7192 = vmatpush.bf16.msrb.mxu0 %v10548_v5  ;;  %v6941_v56 = vpop.f32.mrf.mxu0  ;;  %v6954_v5 = vpop.f32.mrf.mxu1 }
 0x529   : > { %v12590_v6 = vld [vmem:[%s13231_s6 + $0x1574] sm:$0xf0]  ;;  %v11954_v56 = vld [vmem:[%s13231_s6 + $0x19c] sm:$0xf] }
 0x52a   : > { %v11315_v4 = vld [vmem:[%s13231_s6 + $0x1758] sm:$0xf]  ;;  %v11060_v25 = vor.u32 %v12590_v6, %v11059_v18  ;;  %7205 = vmatpush.bf16.msrb.mxu1 %v10804_v13  ;;  %v15192_v6 = vadd.f32 %v6978_v60, %v6966_v57 }
 0x52b   : > { %v12654_v7 = vld [vmem:[%s13231_s6 + $0x1774] sm:$0xf0] }
 0x52c   : > { %v10515_v61 = vld [vmem:[%s13231_s6 + $0x1118] sm:$0xf]  ;;  %v11316_v62 = vor.u32 %v12654_v7, %v11315_v4  ;;  %7218 = vmatpush.bf16.msrb.mxu2 %v11060_v25 }
 0x52d   : > { %v12454_v49 = vld [vmem:[%s13231_s6 + $0x1134] sm:$0xf0] }
 0x52e   : > { %v10771_v9 = vld [vmem:[%s13231_s6 + $0x1318] sm:$0xf]  ;;  %v10516_v3 = vor.u32 %v12454_v49, %v10515_v61  ;;  %7231 = vmatpush.bf16.msrb.mxu3 %v11316_v62 }
 0x52f   : > { %v12518_v16 = vld [vmem:[%s13231_s6 + $0x1334] sm:$0xf0] }
 0x530   : > { %v11027_v32 = vld [vmem:[%s13231_s6 + $0x1518] sm:$0xf]  ;;  %v10772_v26 = vor.u32 %v12518_v16, %v10771_v9  ;;  %7193 = vmatpush.bf16.msrb.mxu0 %v10516_v3 }
 0x531   : > { %v12582_v17 = vld [vmem:[%s13231_s6 + $0x1534] sm:$0xf0] }
 0x532   : > { %v11283_v21 = vld [vmem:[%s13231_s6 + $0x1718] sm:$0xf]  ;;  %v11028_v33 = vor.u32 %v12582_v17, %v11027_v32  ;;  %7206 = vmatpush.bf16.msrb.mxu1 %v10772_v26 }
 0x533   : > { %v12646_v2 = vld [vmem:[%s13231_s6 + $0x1734] sm:$0xf0] }
 0x534   : > { %v10483_v29 = vld [vmem:[%s13231_s6 + $0x10d8] sm:$0xf]  ;;  %v11284_v15 = vor.u32 %v12646_v2, %v11283_v21  ;;  %7219 = vmatpush.bf16.msrb.mxu2 %v11028_v33 }
 0x535   : > { %v12446_v35 = vld [vmem:[%s13231_s6 + $0x10f4] sm:$0xf0] }
 0x536   : > { %v10739_v50 = vld [vmem:[%s13231_s6 + $0x12d8] sm:$0xf]  ;;  %v10484_v47 = vor.u32 %v12446_v35, %v10483_v29  ;;  %7232 = vmatpush.bf16.msrb.mxu3 %v11284_v15  ;;  %v6967_v15 = vpop.f32.mrf.mxu2 }
 0x537   : > { %v12510_v31 = vld [vmem:[%s13231_s6 + $0x12f4] sm:$0xf0]  ;;  %v8469_v15 = vld [vmem:[%s13231_s6 + $0x138] sm:$0xf0] }
 0x538   : > { %v10995_v34 = vld [vmem:[%s13231_s6 + $0x14d8] sm:$0xf]  ;;  %v10740_v38 = vor.u32 %v12510_v31, %v10739_v50  ;;  %7194 = vmatpush.bf16.msrb.mxu0 %v10484_v47 }
 0x539   : > { %v12574_v39 = vld [vmem:[%s13231_s6 + $0x14f4] sm:$0xf0] }
 0x53a   : > { %v11251_v48 = vld [vmem:[%s13231_s6 + $0x16d8] sm:$0xf]  ;;  %v10996_v24 = vor.u32 %v12574_v39, %v10995_v34  ;;  %7207 = vmatpush.bf16.msrb.mxu1 %v10740_v38  ;;  %v6980_v39 = vpop.f32.mrf.mxu3 }
 0x53b   : > { %v12638_v36 = vld [vmem:[%s13231_s6 + $0x16f4] sm:$0xf0] }
 0x53c   : > { %v10451_v46 = vld [vmem:[%s13231_s6 + $0x1098] sm:$0xf]  ;;  %v11252_v28 = vor.u32 %v12638_v36, %v11251_v48  ;;  %7220 = vmatpush.bf16.msrb.mxu2 %v10996_v24  ;;  %v8821_v24 = vld [vmem:[%s13231_s6 + $0x3f8] sm:$0xf0] }
 0x53d   : > { %v12438_v40 = vld [vmem:[%s13231_s6 + $0x10b4] sm:$0xf0] }
 0x53e   : > { %v10707_v19 = vld [vmem:[%s13231_s6 + $0x1298] sm:$0xf]  ;;  %v10452_v63 = vor.u32 %v12438_v40, %v10451_v46  ;;  %7233 = vmatpush.bf16.msrb.mxu3 %v11252_v28  ;;  %v8565_v46 = vld [vmem:[%s13231_s6 + $0x1f8] sm:$0xf0] }
 0x53f   : > { %v12502_v41 = vld [vmem:[%s13231_s6 + $0x12b4] sm:$0xf0]  ;;  %v12026_v40 = vld [vmem:[%s13231_s6 + $0x3dc] sm:$0xf] }
 0x540   : > { %v10963_v42 = vld [vmem:[%s13231_s6 + $0x1498] sm:$0xf]  ;;  %v10708_v18 = vor.u32 %v12502_v41, %v10707_v19  ;;  %7195 = vmatpush.bf16.msrb.mxu0 %v10452_v63  ;;  %v8533_v63 = vld [vmem:[%s13231_s6 + $0x1b8] sm:$0xf0] }
 0x541   : > { %v12566_v44 = vld [vmem:[%s13231_s6 + $0x14b4] sm:$0xf0] }
 0x542   : > { %v11219_v51 = vld [vmem:[%s13231_s6 + $0x1698] sm:$0xf]  ;;  %v10964_v13 = vor.u32 %v12566_v44, %v10963_v42  ;;  %7208 = vmatpush.bf16.msrb.mxu1 %v10708_v18  ;;  %v12018_v18 = vld [vmem:[%s13231_s6 + $0x39c] sm:$0xf] }
 0x543   : > { %v12630_v55 = vld [vmem:[%s13231_s6 + $0x16b4] sm:$0xf0] }
 0x544   : > { %v10419_v4 = vld [vmem:[%s13231_s6 + $0x1058] sm:$0xf]  ;;  %v11220_v61 = vor.u32 %v12630_v55, %v11219_v51  ;;  %7221 = vmatpush.bf16.msrb.mxu2 %v10964_v13  ;;  %v8568_v51 = vor.u32 %v11962_v37, %v8565_v46  ;;  %v8824_v55 = vor.u32 %v12026_v40, %v8821_v24  ;;  %v7004_v37 = vpop.f32.mrf.mxu1 }
 0x545   : > { %v12430_v7 = vld [vmem:[%s13231_s6 + $0x1074] sm:$0xf0] }
 0x546   : > { %v10675_v49 = vld [vmem:[%s13231_s6 + $0x1258] sm:$0xf]  ;;  %v10420_v21 = vor.u32 %v12430_v7, %v10419_v4  ;;  %7234 = vmatpush.bf16.msrb.mxu3 %v11220_v61  ;;  %v8789_v4 = vld [vmem:[%s13231_s6 + $0x3b8] sm:$0xf0] }
 0x547   : > { %v12494_v25 = vld [vmem:[%s13231_s6 + $0x1274] sm:$0xf0] }
 0x548   : > { %v10931_v62 = vld [vmem:[%s13231_s6 + $0x1458] sm:$0xf]  ;;  %v10676_v2 = vor.u32 %v12494_v25, %v10675_v49  ;;  %7196 = vmatpush.bf16.msrb.mxu0 %v10420_v21  ;;  %v8536_v49 = vor.u32 %v11954_v56, %v8533_v63  ;;  %v8792_v25 = vor.u32 %v12018_v18, %v8789_v4  ;;  %v8757_v21 = vld [vmem:[%s13231_s6 + $0x378] sm:$0xf0]  ;;  %v7017_v63 = vpop.f32.mrf.mxu2 }
 0x549   : > { %v12558_v9 = vld [vmem:[%s13231_s6 + $0x1474] sm:$0xf0] }
 0x54a   : > { %v11187_v16 = vld [vmem:[%s13231_s6 + $0x1658] sm:$0xf]  ;;  %v10932_v29 = vor.u32 %v12558_v9, %v10931_v62  ;;  %7209 = vmatpush.bf16.msrb.mxu1 %v10676_v2 }
 0x54b   : > { %v12622_v32 = vld [vmem:[%s13231_s6 + $0x1674] sm:$0xf0] }
 0x54c   : > { %v10387_v17 = vld [vmem:[%s13231_s6 + $0x1018] sm:$0xf]  ;;  %v11188_v35 = vor.u32 %v12622_v32, %v11187_v16  ;;  %7222 = vmatpush.bf16.msrb.mxu2 %v10932_v29  ;;  %v11946_v16 = vld [vmem:[%s13231_s6 + $0x15c] sm:$0xf] }
 0x54d   : > { %v12422_v27 = vld [vmem:[%s13231_s6 + $0x1034] sm:$0xf0]  ;;  %v8501_v32 = vld [vmem:[%s13231_s6 + $0x178] sm:$0xf0] }
 0x54e   : > { %v10643_v3 = vld [vmem:[%s13231_s6 + $0x1218] sm:$0xf]  ;;  %v10388_v47 = vor.u32 %v12422_v27, %v10387_v17  ;;  %7235 = vmatpush.bf16.msrb.mxu3 %v11188_v35  ;;  %v12010_v17 = vld [vmem:[%s13231_s6 + $0x35c] sm:$0xf]  ;;  %v8504_v29 = vor.u32 %v11946_v16, %v8501_v32 }
 0x54f   : > { %v12486_v26 = vld [vmem:[%s13231_s6 + $0x1234] sm:$0xf0]  ;;  %v8760_v35 = vor.u32 %v12010_v17, %v8757_v21 }
 0x550   : > { %v10899_v30 = vld [vmem:[%s13231_s6 + $0x1418] sm:$0xf]  ;;  %v10644_v38 = vor.u32 %v12486_v26, %v10643_v3  ;;  %7197 = vmatpush.bf16.msrb.mxu0 %v10388_v47 }
 0x551   : > { %v12550_v12 = vld [vmem:[%s13231_s6 + $0x1434] sm:$0xf0] }
 0x552   : > { %v11155_v33 = vld [vmem:[%s13231_s6 + $0x1618] sm:$0xf]  ;;  %v10900_v28 = vor.u32 %v12550_v12, %v10899_v30  ;;  %7210 = vmatpush.bf16.msrb.mxu1 %v10644_v38 }
 0x553   : > { %v12614_v50 = vld [vmem:[%s13231_s6 + $0x1634] sm:$0xf0]  ;;  %7198 = vmatmul.bf16.vlgmr.msrb.gmra.mxu0 %v13704_v53 }
 0x554   : > { %v11635_v31 = vld [vmem:[%s13231_s6 + $0x19d8] sm:$0xf]  ;;  %v11156_v19 = vor.u32 %v12614_v50, %v11155_v33  ;;  %7223 = vmatpush.bf16.msrb.mxu2 %v10900_v28  ;;  %v11938_v33 = vld [vmem:[%s13231_s6 + $0x11c] sm:$0xf] }
 0x555   : > { %v12734_v34 = vld [vmem:[%s13231_s6 + $0x19f4] sm:$0xf0]  ;;  %7211 = vmatmul.bf16.vlgmr.msrb.gmra.mxu1 %v13711_v58  ;;  %v12002_v50 = vld [vmem:[%s13231_s6 + $0x31c] sm:$0xf]  ;;  %v8472_v46 = vor.u32 %v11938_v33, %v8469_v15 }
 0x556   : > { %v11891_v48 = vld [vmem:[%s13231_s6 + $0x1bd8] sm:$0xf]  ;;  %v11636_v41 = vor.u32 %v12734_v34, %v11635_v31  ;;  %7236 = vmatpush.bf16.msrb.mxu3 %v11156_v19  ;;  %v8725_v31 = vld [vmem:[%s13231_s6 + $0x338] sm:$0xf0]  ;;  %v6991_v34 = vpop.f32.mrf.mxu0 }
 0x557   : > { %v12798_v36 = vld [vmem:[%s13231_s6 + $0x1bf4] sm:$0xf0]  ;;  %7224 = vmatmul.bf16.vlgmr.msrb.gmra.mxu2 %v13706_v54  ;;  %v6992_v39 = vadd.f32 %v6991_v34, %v15192_v6  ;;  %v8728_v40 = vor.u32 %v12002_v50, %v8725_v31  ;;  %v11930_v19 = vld [vmem:[%s13231_s6 + $0xdc] sm:$0xf] }
 0x558   : > { %v11892_v42 = vor.u32 %v12798_v36, %v11891_v48  ;;  %v11603_v43 = vld [vmem:[%s13231_s6 + $0x1998] sm:$0xf]  ;;  %7242 = vmatpush.bf16.msra.mxu0 %v11636_v41  ;;  %7268 = vmatpush.bf16.msra.mxu2 %v8568_v51  ;;  %v11994_v6 = vld [vmem:[%s13231_s6 + $0x2dc] sm:$0xf] }
 0x559   : > { %v12726_v44 = vld [vmem:[%s13231_s6 + $0x19b4] sm:$0xf0]  ;;  %7237 = vmatmul.bf16.vlgmr.msrb.gmra.mxu3 %v13713_v59  ;;  %v7005_v41 = vadd.f32 %v7004_v37, %v6992_v39  ;;  %v8629_v33 = vld [vmem:[%s13231_s6 + $0x278] sm:$0xf0] }
 0x55a   : > { %v11859_v57 = vld [vmem:[%s13231_s6 + $0x1b98] sm:$0xf]  ;;  %7255 = vmatpush.bf16.msra.mxu1 %v11892_v42  ;;  %v11604_v7 = vor.u32 %v12726_v44, %v11603_v43  ;;  %7281 = vmatpush.bf16.msra.mxu3 %v8824_v55  ;;  %v8437_v42 = vld [vmem:[%s13231_s6 + $0xf8] sm:$0xf0] }
 0x55b   : > { %v12790_v60 = vld [vmem:[%s13231_s6 + $0x1bb4] sm:$0xf0]  ;;  %v8693_v43 = vld [vmem:[%s13231_s6 + $0x2f8] sm:$0xf0] }
 0x55c   : > { %v11860_v5 = vor.u32 %v12790_v60, %v11859_v57  ;;  %v11571_v13 = vld [vmem:[%s13231_s6 + $0x1958] sm:$0xf]  ;;  %7243 = vmatpush.bf16.msra.mxu0 %v11604_v7  ;;  %7269 = vmatpush.bf16.msra.mxu2 %v8536_v49  ;;  %v8440_v60 = vor.u32 %v11930_v19, %v8437_v42  ;;  %v8696_v56 = vor.u32 %v11994_v6, %v8693_v43  ;;  %v11922_v7 = vld [vmem:[%s13231_s6 + $0x9c] sm:$0xf] }
 0x55d   : > { %v12718_v61 = vld [vmem:[%s13231_s6 + $0x1974] sm:$0xf0]  ;;  %v11986_v49 = vld [vmem:[%s13231_s6 + $0x29c] sm:$0xf] }
 0x55e   : > { %v11827_v62 = vld [vmem:[%s13231_s6 + $0x1b58] sm:$0xf]  ;;  %7256 = vmatpush.bf16.msra.mxu1 %v11860_v5  ;;  %v11572_v2 = vor.u32 %v12718_v61, %v11571_v13  ;;  %7282 = vmatpush.bf16.msra.mxu3 %v8792_v25  ;;  %v7018_v5 = vadd.f32 %v7017_v63, %v7005_v41  ;;  %v7030_v13 = vpop.f32.mrf.mxu3  ;;  %v8405_v61 = vld [vmem:[%s13231_s6 + $0xb8] sm:$0xf0] }
 0x55f   : > { %v12782_v9 = vld [vmem:[%s13231_s6 + $0x1b74] sm:$0xf0]  ;;  %v8661_v25 = vld [vmem:[%s13231_s6 + $0x2b8] sm:$0xf0] }
 0x560   : > { %v11828_v27 = vor.u32 %v12782_v9, %v11827_v62  ;;  %v11539_v3 = vld [vmem:[%s13231_s6 + $0x1918] sm:$0xf]  ;;  %7244 = vmatpush.bf16.msra.mxu0 %v11572_v2  ;;  %7270 = vmatpush.bf16.msra.mxu2 %v8504_v29  ;;  %v6993_v62 = vpop.f32.mrf.mxu0  ;;  %v15263_v9 = vadd.f32 %v7030_v13, %v7018_v5  ;;  %v7006_v2 = vpop.f32.mrf.mxu1  ;;  %v9077_v19 = vld [vmem:[%s13231_s6 + $0x5f8] sm:$0xf0] }
 0x561   : > { %v12710_v26 = vld [vmem:[%s13231_s6 + $0x1934] sm:$0xf0]  ;;  %v12154_v42 = vld [vmem:[%s13231_s6 + $0x7dc] sm:$0xf] }
 0x562   : > { %v11795_v30 = vld [vmem:[%s13231_s6 + $0x1b18] sm:$0xf]  ;;  %7257 = vmatpush.bf16.msra.mxu1 %v11828_v27  ;;  %v11540_v48 = vor.u32 %v12710_v26, %v11539_v3  ;;  %7283 = vmatpush.bf16.msra.mxu3 %v8760_v35  ;;  %v8408_v27 = vor.u32 %v11922_v7, %v8405_v61  ;;  %v8664_v3 = vor.u32 %v11986_v49, %v8661_v25  ;;  %v11914_v35 = vld [vmem:[%s13231_s6 + $0x5c] sm:$0xf] }
 0x563   : > { %v12774_v12 = vld [vmem:[%s13231_s6 + $0x1b34] sm:$0xf0]  ;;  %v9333_v6 = vld [vmem:[%s13231_s6 + $0x7f8] sm:$0xf0] }
 0x564   : > { %v11796_v36 = vor.u32 %v12774_v12, %v11795_v30  ;;  %v11507_v47 = vld [vmem:[%s13231_s6 + $0x18d8] sm:$0xf]  ;;  %7245 = vmatpush.bf16.msra.mxu0 %v11540_v48  ;;  %7271 = vmatpush.bf16.msra.mxu2 %v8472_v46  ;;  %v8373_v30 = vld [vmem:[%s13231_s6 + $0x78] sm:$0xf0] }
 0x565   : > { %v12702_v38 = vld [vmem:[%s13231_s6 + $0x18f4] sm:$0xf0]  ;;  %v11978_v12 = vld [vmem:[%s13231_s6 + $0x25c] sm:$0xf] }
 0x566   : > { %v11763_v24 = vld [vmem:[%s13231_s6 + $0x1ad8] sm:$0xf]  ;;  %7258 = vmatpush.bf16.msra.mxu1 %v11796_v36  ;;  %v11508_v44 = vor.u32 %v12702_v38, %v11507_v47  ;;  %7284 = vmatpush.bf16.msra.mxu3 %v8728_v40  ;;  %v8376_v36 = vor.u32 %v11914_v35, %v8373_v30  ;;  %v8632_v37 = vor.u32 %v11978_v12, %v8629_v33  ;;  %v11906_v47 = vld [vmem:[%s13231_s6 + $0x1c] sm:$0xf]  ;;  %v7019_v40 = vpop.f32.mrf.mxu2  ;;  %v7032_v41 = vpop.f32.mrf.mxu3 }
 0x567   : > { %v12766_v28 = vld [vmem:[%s13231_s6 + $0x1af4] sm:$0xf0]  ;;  %v8341_v38 = vld [vmem:[%s13231_s6 + $0x38] sm:$0xf0] }
 0x568   : > { %v11764_v51 = vor.u32 %v12766_v28, %v11763_v24  ;;  %v11475_v55 = vld [vmem:[%s13231_s6 + $0x1898] sm:$0xf]  ;;  %7246 = vmatpush.bf16.msra.mxu0 %v11508_v44  ;;  %7272 = vmatpush.bf16.msra.mxu2 %v8440_v60  ;;  %v11970_v46 = vld [vmem:[%s13231_s6 + $0x21c] sm:$0xf] }
 0x569   : > { %v12694_v57 = vld [vmem:[%s13231_s6 + $0x18b4] sm:$0xf0]  ;;  %v8597_v24 = vld [vmem:[%s13231_s6 + $0x238] sm:$0xf0] }
 0x56a   : > { %v11731_v18 = vld [vmem:[%s13231_s6 + $0x1a98] sm:$0xf]  ;;  %7259 = vmatpush.bf16.msra.mxu1 %v11764_v51  ;;  %v11476_v16 = vor.u32 %v12694_v57, %v11475_v55  ;;  %7285 = vmatpush.bf16.msra.mxu3 %v8696_v56  ;;  %v12090_v28 = vld [vmem:[%s13231_s6 + $0x5dc] sm:$0xf]  ;;  %v8344_v56 = vor.u32 %v11906_v47, %v8341_v38  ;;  %v8600_v63 = vor.u32 %v11970_v46, %v8597_v24  ;;  %v7043_v24 = vpop.f32.mrf.mxu0 }
 0x56b   : > { %v12758_v4 = vld [vmem:[%s13231_s6 + $0x1ab4] sm:$0xf0]  ;;  %v12218_v43 = vld [vmem:[%s13231_s6 + $0x9dc] sm:$0xf] }
 0x56c   : > { %v11732_v32 = vor.u32 %v12758_v4, %v11731_v18  ;;  %v11443_v17 = vld [vmem:[%s13231_s6 + $0x1858] sm:$0xf]  ;;  %7247 = vmatpush.bf16.msra.mxu0 %v11476_v16  ;;  %7273 = vmatpush.bf16.msra.mxu2 %v8408_v27  ;;  %v9589_v55 = vld [vmem:[%s13231_s6 + $0x9f8] sm:$0xf0]  ;;  %v9080_v18 = vor.u32 %v12090_v28, %v9077_v19  ;;  %v9336_v4 = vor.u32 %v12154_v42, %v9333_v6  ;;  %v7056_v42 = vpop.f32.mrf.mxu1 }
 0x56d   : > { %v12686_v21 = vld [vmem:[%s13231_s6 + $0x1874] sm:$0xf0]  ;;  %v12282_v57 = vld [vmem:[%s13231_s6 + $0xbdc] sm:$0xf]  ;;  %v9592_v13 = vor.u32 %v12218_v43, %v9589_v55  ;;  %v7044_v28 = vadd.f32 %v7043_v24, %v15263_v9 }
 0x56e   : > { %v11699_v26 = vld [vmem:[%s13231_s6 + $0x1a58] sm:$0xf]  ;;  %7260 = vmatpush.bf16.msra.mxu1 %v11732_v32  ;;  %v11444_v50 = vor.u32 %v12686_v21, %v11443_v17  ;;  %7286 = vmatpush.bf16.msra.mxu3 %v8664_v3  ;;  %v9845_v60 = vld [vmem:[%s13231_s6 + $0xbf8] sm:$0xf0] }
 0x56f   : > { %v12750_v29 = vld [vmem:[%s13231_s6 + $0x1a74] sm:$0xf0]  ;;  %v12082_v7 = vld [vmem:[%s13231_s6 + $0x59c] sm:$0xf]  ;;  %v9848_v61 = vor.u32 %v12282_v57, %v9845_v60 }
 0x570   : > { %v11411_v15 = vld [vmem:[%s13231_s6 + $0x1818] sm:$0xf]  ;;  %v11700_v31 = vor.u32 %v12750_v29, %v11699_v26  ;;  %7248 = vmatpush.bf16.msra.mxu0 %v11444_v50  ;;  %7274 = vmatpush.bf16.msra.mxu2 %v8376_v36  ;;  %v9045_v5 = vld [vmem:[%s13231_s6 + $0x5b8] sm:$0xf0] }
 0x571   : > { %v12678_v34 = vld [vmem:[%s13231_s6 + $0x1834] sm:$0xf0]  ;;  %v12146_v49 = vld [vmem:[%s13231_s6 + $0x79c] sm:$0xf]  ;;  %v9048_v21 = vor.u32 %v12082_v7, %v9045_v5 }
 0x572   : > { %v11667_v39 = vld [vmem:[%s13231_s6 + $0x1a18] sm:$0xf]  ;;  %7261 = vmatpush.bf16.msra.mxu1 %v11700_v31  ;;  %v11412_v44 = vor.u32 %v12678_v34, %v11411_v15  ;;  %7287 = vmatpush.bf16.msra.mxu3 %v8632_v37  ;;  %v9301_v25 = vld [vmem:[%s13231_s6 + $0x7b8] sm:$0xf0] }
 0x573   : > { %v12742_v48 = vld [vmem:[%s13231_s6 + $0x1a34] sm:$0xf0]  ;;  %v12210_v62 = vld [vmem:[%s13231_s6 + $0x99c] sm:$0xf]  ;;  %v9304_v2 = vor.u32 %v12146_v49, %v9301_v25  ;;  %v7069_v25 = vpop.f32.mrf.mxu2 }
 0x574   : > { %v11668_v51 = vor.u32 %v12742_v48, %v11667_v39  ;;  %7249 = vmatpush.bf16.msra.mxu0 %v11412_v44  ;;  %v9557_v16 = vld [vmem:[%s13231_s6 + $0x9b8] sm:$0xf0]  ;;  %7275 = vmatpush.bf16.msra.mxu2 %v8344_v56  ;;  %v7057_v56 = vadd.f32 %v7056_v42, %v7044_v28 }
 0x575   : > { %v12274_v32 = vld [vmem:[%s13231_s6 + $0xb9c] sm:$0xf]  ;;  %v9560_v26 = vor.u32 %v12210_v62, %v9557_v16 }
 0x576   : > { %7262 = vmatpush.bf16.msra.mxu1 %v11668_v51  ;;  %v9813_v17 = vld [vmem:[%s13231_s6 + $0xbb8] sm:$0xf0]  ;;  %7288 = vmatpush.bf16.msra.mxu3 %v8600_v63 }
 0x577   : > { %v12074_v27 = vld [vmem:[%s13231_s6 + $0x55c] sm:$0xf]  ;;  %v9816_v29 = vor.u32 %v12274_v32, %v9813_v17  ;;  %7250 = vmatmul.bf16.vlgmr.msra.gmra.mxu0 %v13780_v20  ;;  %7276 = vmatmul.bf16.vlgmr.msra.gmra.mxu2 %v13572_v14  ;;  %v7070_v17 = vadd.f32 %v7069_v25, %v7057_v56 }
 0x578   : > { %7294 = vmatpush.bf16.msrb.mxu0 %v9080_v18  ;;  %v9013_v3 = vld [vmem:[%s13231_s6 + $0x578] sm:$0xf0]  ;;  %7320 = vmatpush.bf16.msrb.mxu2 %v9592_v13 }
 0x579   : > { %v12138_v35 = vld [vmem:[%s13231_s6 + $0x75c] sm:$0xf]  ;;  %7263 = vmatmul.bf16.vlgmr.msra.gmra.mxu1 %v13782_v45  ;;  %7289 = vmatmul.bf16.vlgmr.msra.gmra.mxu3 %v13588_v23  ;;  %v9016_v31 = vor.u32 %v12074_v27, %v9013_v3 }
 0x57a   : > { %7307 = vmatpush.bf16.msrb.mxu1 %v9336_v4  ;;  %7333 = vmatpush.bf16.msrb.mxu3 %v9848_v61  ;;  %v9269_v30 = vld [vmem:[%s13231_s6 + $0x778] sm:$0xf0] }
 0x57b   : > { %v12202_v12 = vld [vmem:[%s13231_s6 + $0x95c] sm:$0xf]  ;;  %v9272_v34 = vor.u32 %v12138_v35, %v9269_v30 }
 0x57c   : > { %v9525_v33 = vld [vmem:[%s13231_s6 + $0x978] sm:$0xf0]  ;;  %7295 = vmatpush.bf16.msrb.mxu0 %v9048_v21  ;;  %7321 = vmatpush.bf16.msrb.mxu2 %v9560_v26  ;;  %v7082_v21 = vpop.f32.mrf.mxu3  ;;  %v7045_v26 = vpop.f32.mrf.mxu0 }
 0x57d   : > { %v12266_v15 = vld [vmem:[%s13231_s6 + $0xb5c] sm:$0xf]  ;;  %v9528_v36 = vor.u32 %v12202_v12, %v9525_v33 }
 0x57e   : > { %v9781_v50 = vld [vmem:[%s13231_s6 + $0xb78] sm:$0xf0]  ;;  %7308 = vmatpush.bf16.msrb.mxu1 %v9304_v2  ;;  %7334 = vmatpush.bf16.msrb.mxu3 %v9816_v29  ;;  %v7083_v29 = vadd.f32 %v7082_v21, %v7070_v17 }
 0x57f   : > { %v12066_v39 = vld [vmem:[%s13231_s6 + $0x51c] sm:$0xf]  ;;  %v9784_v37 = vor.u32 %v12266_v15, %v9781_v50  ;;  %v7058_v50 = vpop.f32.mrf.mxu1 }
 0x580   : > { %v8981_v48 = vld [vmem:[%s13231_s6 + $0x538] sm:$0xf0]  ;;  %7296 = vmatpush.bf16.msrb.mxu0 %v9016_v31  ;;  %7322 = vmatpush.bf16.msrb.mxu2 %v9528_v36 }
 0x581   : > { %v12130_v47 = vld [vmem:[%s13231_s6 + $0x71c] sm:$0xf]  ;;  %v8984_v19 = vor.u32 %v12066_v39, %v8981_v48 }
 0x582   : > { %v9237_v38 = vld [vmem:[%s13231_s6 + $0x738] sm:$0xf0]  ;;  %7309 = vmatpush.bf16.msrb.mxu1 %v9272_v34  ;;  %7335 = vmatpush.bf16.msrb.mxu3 %v9784_v37  ;;  %v7461_v37 = vrot.slane %v7083_v29, 6 }
 0x583   : > { %v12194_v46 = vld [vmem:[%s13231_s6 + $0x91c] sm:$0xf]  ;;  %v9240_v41 = vor.u32 %v12130_v47, %v9237_v38 }
 0x584   : > { %v9493_v14 = vld [vmem:[%s13231_s6 + $0x938] sm:$0xf0]  ;;  %7297 = vmatpush.bf16.msrb.mxu0 %v8984_v19 }
 0x585   : > { %v12258_v40 = vld [vmem:[%s13231_s6 + $0xb1c] sm:$0xf]  ;;  %v9496_v44 = vor.u32 %v12194_v46, %v9493_v14  ;;  %v15345_v14 = vsel %vm486_vm0, %v15108_v52, %v7461_v37 }
 0x586   : > { %v9749_v23 = vld [vmem:[%s13231_s6 + $0xb38] sm:$0xf0]  ;;  %7310 = vmatpush.bf16.msrb.mxu1 %v9240_v41 }
 0x587   : > { %v12058_v6 = vld [vmem:[%s13231_s6 + $0x4dc] sm:$0xf]  ;;  %v9752_v51 = vor.u32 %v12258_v40, %v9749_v23  ;;  %7323 = vmatpush.bf16.msrb.mxu2 %v9496_v44  ;;  %v7071_v44 = vpop.f32.mrf.mxu2 }
 0x588   : > { %v8949_v43 = vld [vmem:[%s13231_s6 + $0x4f8] sm:$0xf0] }
 0x589   : > { %v12122_v55 = vld [vmem:[%s13231_s6 + $0x6dc] sm:$0xf]  ;;  %v8952_v4 = vor.u32 %v12058_v6, %v8949_v43  ;;  %7336 = vmatpush.bf16.msrb.mxu3 %v9752_v51 }
 0x58a   : > { %v9205_v57 = vld [vmem:[%s13231_s6 + $0x6f8] sm:$0xf0] }
 0x58b   : > { %v12186_v60 = vld [vmem:[%s13231_s6 + $0x8dc] sm:$0xf]  ;;  %v9208_v7 = vor.u32 %v12122_v55, %v9205_v57  ;;  %7298 = vmatpush.bf16.msrb.mxu0 %v8952_v4 }
 0x58c   : > { %v9461_v63 = vld [vmem:[%s13231_s6 + $0x8f8] sm:$0xf0] }
 0x58d   : > { %v12250_v9 = vld [vmem:[%s13231_s6 + $0xadc] sm:$0xf]  ;;  %v9464_v61 = vor.u32 %v12186_v60, %v9461_v63  ;;  %7311 = vmatpush.bf16.msrb.mxu1 %v9208_v7  ;;  %v7084_v60 = vpop.f32.mrf.mxu3 }
 0x58e   : > { %v9717_v18 = vld [vmem:[%s13231_s6 + $0xaf8] sm:$0xf0] }
 0x58f   : > { %v12050_v5 = vld [vmem:[%s13231_s6 + $0x49c] sm:$0xf]  ;;  %v9720_v49 = vor.u32 %v12250_v9, %v9717_v18  ;;  %7324 = vmatpush.bf16.msrb.mxu2 %v9464_v61 }
 0x590   : > { %v8917_v13 = vld [vmem:[%s13231_s6 + $0x4b8] sm:$0xf0] }
 0x591   : > { %v12114_v62 = vld [vmem:[%s13231_s6 + $0x69c] sm:$0xf]  ;;  %v8920_v35 = vor.u32 %v12050_v5, %v8917_v13  ;;  %7337 = vmatpush.bf16.msrb.mxu3 %v9720_v49 }
 0x592   : > { %v9173_v16 = vld [vmem:[%s13231_s6 + $0x6b8] sm:$0xf0] }
 0x593   : > { %v12178_v32 = vld [vmem:[%s13231_s6 + $0x89c] sm:$0xf]  ;;  %v9176_v30 = vor.u32 %v12114_v62, %v9173_v16  ;;  %7299 = vmatpush.bf16.msrb.mxu0 %v8920_v35 }
 0x594   : > { %v9429_v2 = vld [vmem:[%s13231_s6 + $0x8b8] sm:$0xf0] }
 0x595   : > { %v12242_v27 = vld [vmem:[%s13231_s6 + $0xa9c] sm:$0xf]  ;;  %v9432_v31 = vor.u32 %v12178_v32, %v9429_v2  ;;  %7312 = vmatpush.bf16.msrb.mxu1 %v9176_v30 }
 0x596   : > { %v9685_v3 = vld [vmem:[%s13231_s6 + $0xab8] sm:$0xf0] }
 0x597   : > { %v12042_v12 = vld [vmem:[%s13231_s6 + $0x45c] sm:$0xf]  ;;  %v9688_v34 = vor.u32 %v12242_v27, %v9685_v3  ;;  %7325 = vmatpush.bf16.msrb.mxu2 %v9432_v31 }
 0x598   : > { %v8885_v33 = vld [vmem:[%s13231_s6 + $0x478] sm:$0xf0] }
 0x599   : > { %v12106_v15 = vld [vmem:[%s13231_s6 + $0x65c] sm:$0xf]  ;;  %v8888_v40 = vor.u32 %v12042_v12, %v8885_v33  ;;  %7338 = vmatpush.bf16.msrb.mxu3 %v9688_v34 }
 0x59a   : > { %v9141_v39 = vld [vmem:[%s13231_s6 + $0x678] sm:$0xf0] }
 0x59b   : > { %v12170_v48 = vld [vmem:[%s13231_s6 + $0x85c] sm:$0xf]  ;;  %v9144_v23 = vor.u32 %v12106_v15, %v9141_v39  ;;  %7300 = vmatpush.bf16.msrb.mxu0 %v8888_v40 }
 0x59c   : > { %v9397_v36 = vld [vmem:[%s13231_s6 + $0x878] sm:$0xf0] }
 0x59d   : > { %v12234_v47 = vld [vmem:[%s13231_s6 + $0xa5c] sm:$0xf]  ;;  %v9400_v41 = vor.u32 %v12170_v48, %v9397_v36  ;;  %7313 = vmatpush.bf16.msrb.mxu1 %v9144_v23 }
 0x59e   : > { %v9653_v38 = vld [vmem:[%s13231_s6 + $0xa78] sm:$0xf0] }
 0x59f   : > { %v12034_v46 = vld [vmem:[%s13231_s6 + $0x41c] sm:$0xf]  ;;  %v9656_v42 = vor.u32 %v12234_v47, %v9653_v38  ;;  %7326 = vmatpush.bf16.msrb.mxu2 %v9400_v41 }
 0x5a0   : > { %v8853_v24 = vld [vmem:[%s13231_s6 + $0x438] sm:$0xf0] }
 0x5a1   : > { %v12098_v28 = vld [vmem:[%s13231_s6 + $0x61c] sm:$0xf]  ;;  %v8856_v18 = vor.u32 %v12034_v46, %v8853_v24  ;;  %7339 = vmatpush.bf16.msrb.mxu3 %v9656_v42  ;;  %v7095_v42 = vpop.f32.mrf.mxu0 }
 0x5a2   : > { %v9109_v19 = vld [vmem:[%s13231_s6 + $0x638] sm:$0xf0] }
 0x5a3   : > { %v12162_v52 = vld [vmem:[%s13231_s6 + $0x81c] sm:$0xf]  ;;  %v9112_v4 = vor.u32 %v12098_v28, %v9109_v19  ;;  %7301 = vmatpush.bf16.msrb.mxu0 %v8856_v18 }
 0x5a4   : > { %v9365_v6 = vld [vmem:[%s13231_s6 + $0x838] sm:$0xf0] }
 0x5a5   : > { %v12226_v43 = vld [vmem:[%s13231_s6 + $0xa1c] sm:$0xf]  ;;  %v9368_v61 = vor.u32 %v12162_v52, %v9365_v6  ;;  %7314 = vmatpush.bf16.msrb.mxu1 %v9112_v4 }
 0x5a6   : > { %v9621_v51 = vld [vmem:[%s13231_s6 + $0xa38] sm:$0xf0]  ;;  %7302 = vmatmul.bf16.vlgmr.msrb.gmra.mxu0 %v13570_v11 }
 0x5a7   : > { %v12346_v55 = vld [vmem:[%s13231_s6 + $0xddc] sm:$0xf]  ;;  %v9624_v49 = vor.u32 %v12226_v43, %v9621_v51  ;;  %7327 = vmatpush.bf16.msrb.mxu2 %v9368_v61  ;;  %v7108_v51 = vpop.f32.mrf.mxu1 }
 0x5a8   : > { %v10101_v57 = vld [vmem:[%s13231_s6 + $0xdf8] sm:$0xf0]  ;;  %7315 = vmatmul.bf16.vlgmr.msrb.gmra.mxu1 %v13586_v22 }
 0x5a9   : > { %v12410_v56 = vld [vmem:[%s13231_s6 + $0xfdc] sm:$0xf]  ;;  %v10104_v25 = vor.u32 %v12346_v55, %v10101_v57  ;;  %7340 = vmatpush.bf16.msrb.mxu3 %v9624_v49 }
 0x5aa   : > { %v10357_v63 = vld [vmem:[%s13231_s6 + $0xff8] sm:$0xf0]  ;;  %7328 = vmatmul.bf16.vlgmr.msrb.gmra.mxu2 %v13668_v1 }
 0x5ab   : > { %v12474_v9 = vld [vmem:[%s13231_s6 + $0x11dc] sm:$0xf]  ;;  %v10360_v62 = vor.u32 %v12410_v56, %v10357_v63  ;;  %7346 = vmatpush.bf16.msra.mxu0 %v10104_v25 }
 0x5ac   : > { %v10613_v7 = vld [vmem:[%s13231_s6 + $0x11f8] sm:$0xf0]  ;;  %7341 = vmatmul.bf16.vlgmr.msrb.gmra.mxu3 %v13672_v10 }
 0x5ad   : > { %v12538_v5 = vld [vmem:[%s13231_s6 + $0x13dc] sm:$0xf]  ;;  %v10616_v17 = vor.u32 %v12474_v9, %v10613_v7  ;;  %7359 = vmatpush.bf16.msra.mxu1 %v10360_v62  ;;  %v7109_v9 = vadd.f32 %v7108_v51, %v7095_v42 }
 0x5ae   : > { %v10869_v13 = vld [vmem:[%s13231_s6 + $0x13f8] sm:$0xf0] }
 0x5af   : > { %v12338_v16 = vld [vmem:[%s13231_s6 + $0xd9c] sm:$0xf]  ;;  %v10872_v21 = vor.u32 %v12538_v5, %v10869_v13  ;;  %7372 = vmatpush.bf16.msra.mxu2 %v10616_v17 }
 0x5b0   : > { %v10069_v32 = vld [vmem:[%s13231_s6 + $0xdb8] sm:$0xf0] }
 0x5b1   : > { %v12402_v2 = vld [vmem:[%s13231_s6 + $0xf9c] sm:$0xf]  ;;  %v10072_v30 = vor.u32 %v12338_v16, %v10069_v32  ;;  %7385 = vmatpush.bf16.msra.mxu3 %v10872_v21  ;;  %v7121_v21 = vpop.f32.mrf.mxu2 }
 0x5b2   : > { %v10325_v27 = vld [vmem:[%s13231_s6 + $0xfb8] sm:$0xf0] }
 0x5b3   : > { %v12466_v3 = vld [vmem:[%s13231_s6 + $0x119c] sm:$0xf]  ;;  %v10328_v12 = vor.u32 %v12402_v2, %v10325_v27  ;;  %7347 = vmatpush.bf16.msra.mxu0 %v10072_v30 }
 0x5b4   : > { %v10581_v26 = vld [vmem:[%s13231_s6 + $0x11b8] sm:$0xf0] }
 0x5b5   : > { %v12530_v29 = vld [vmem:[%s13231_s6 + $0x139c] sm:$0xf]  ;;  %v10584_v50 = vor.u32 %v12466_v3, %v10581_v26  ;;  %7360 = vmatpush.bf16.msra.mxu1 %v10328_v12  ;;  %v7122_v26 = vadd.f32 %v7121_v21, %v7109_v9 }
 0x5b6   : > { %v10837_v35 = vld [vmem:[%s13231_s6 + $0x13b8] sm:$0xf0] }
 0x5b7   : > { %v12330_v33 = vld [vmem:[%s13231_s6 + $0xd5c] sm:$0xf]  ;;  %v10840_v31 = vor.u32 %v12530_v29, %v10837_v35  ;;  %7373 = vmatpush.bf16.msra.mxu2 %v10584_v50  ;;  %v7134_v29 = vpop.f32.mrf.mxu3  ;;  %v7097_v35 = vpop.f32.mrf.mxu0 }
 0x5b8   : > { %v10037_v15 = vld [vmem:[%s13231_s6 + $0xd78] sm:$0xf0]  ;;  %v15408_v50 = vadd.f32 %v7134_v29, %v7122_v26 }
 0x5b9   : > { %v12394_v34 = vld [vmem:[%s13231_s6 + $0xf5c] sm:$0xf]  ;;  %v10040_v38 = vor.u32 %v12330_v33, %v10037_v15  ;;  %7386 = vmatpush.bf16.msra.mxu3 %v10840_v31  ;;  %v7110_v31 = vpop.f32.mrf.mxu1 }
 0x5ba   : > { %v10293_v39 = vld [vmem:[%s13231_s6 + $0xf78] sm:$0xf0] }
 0x5bb   : > { %v12458_v48 = vld [vmem:[%s13231_s6 + $0x115c] sm:$0xf]  ;;  %v10296_v46 = vor.u32 %v12394_v34, %v10293_v39  ;;  %7348 = vmatpush.bf16.msra.mxu0 %v10040_v38 }
 0x5bc   : > { %v10549_v36 = vld [vmem:[%s13231_s6 + $0x1178] sm:$0xf0] }
 0x5bd   : > { %v12522_v37 = vld [vmem:[%s13231_s6 + $0x135c] sm:$0xf]  ;;  %v10552_v11 = vor.u32 %v12458_v48, %v10549_v36  ;;  %7361 = vmatpush.bf16.msra.mxu1 %v10296_v46 }
 0x5be   : > { %v10805_v47 = vld [vmem:[%s13231_s6 + $0x1378] sm:$0xf0] }
 0x5bf   : > { %v12322_v1 = vld [vmem:[%s13231_s6 + $0xd1c] sm:$0xf]  ;;  %v10808_v23 = vor.u32 %v12522_v37, %v10805_v47  ;;  %7374 = vmatpush.bf16.msra.mxu2 %v10552_v11  ;;  %v7136_v51 = vpop.f32.mrf.mxu3 }
 0x5c0   : > { %v10005_v40 = vld [vmem:[%s13231_s6 + $0xd38] sm:$0xf0] }
 0x5c1   : > { %v12386_v24 = vld [vmem:[%s13231_s6 + $0xf1c] sm:$0xf]  ;;  %v10008_v52 = vor.u32 %v12322_v1, %v10005_v40  ;;  %7387 = vmatpush.bf16.msra.mxu3 %v10808_v23 }
 0x5c2   : > { %v10261_v28 = vld [vmem:[%s13231_s6 + $0xf38] sm:$0xf0] }
 0x5c3   : > { %v12450_v19 = vld [vmem:[%s13231_s6 + $0x111c] sm:$0xf]  ;;  %v10264_v6 = vor.u32 %v12386_v24, %v10261_v28  ;;  %7349 = vmatpush.bf16.msra.mxu0 %v10008_v52  ;;  %v7123_v52 = vpop.f32.mrf.mxu2 }
 0x5c4   : > { %v10517_v10 = vld [vmem:[%s13231_s6 + $0x1138] sm:$0xf0] }
 0x5c5   : > { %v12514_v22 = vld [vmem:[%s13231_s6 + $0x131c] sm:$0xf]  ;;  %v10520_v55 = vor.u32 %v12450_v19, %v10517_v10  ;;  %7362 = vmatpush.bf16.msra.mxu1 %v10264_v6 }
 0x5c6   : > { %v10773_v41 = vld [vmem:[%s13231_s6 + $0x1338] sm:$0xf0] }
 0x5c7   : > { %v12314_v43 = vld [vmem:[%s13231_s6 + $0xcdc] sm:$0xf]  ;;  %v10776_v57 = vor.u32 %v12514_v22, %v10773_v41  ;;  %7375 = vmatpush.bf16.msra.mxu2 %v10520_v55 }
 0x5c8   : > { %v9973_v44 = vld [vmem:[%s13231_s6 + $0xcf8] sm:$0xf0] }
 0x5c9   : > { %v12378_v60 = vld [vmem:[%s13231_s6 + $0xedc] sm:$0xf]  ;;  %v9976_v5 = vor.u32 %v12314_v43, %v9973_v44  ;;  %7388 = vmatpush.bf16.msra.mxu3 %v10776_v57 }
 0x5ca   : > { %v10229_v56 = vld [vmem:[%s13231_s6 + $0xef8] sm:$0xf0] }
 0x5cb   : > { %v12442_v63 = vld [vmem:[%s13231_s6 + $0x10dc] sm:$0xf]  ;;  %v10232_v13 = vor.u32 %v12378_v60, %v10229_v56  ;;  %7350 = vmatpush.bf16.msra.mxu0 %v9976_v5 }
 0x5cc   : > { %v10485_v18 = vld [vmem:[%s13231_s6 + $0x10f8] sm:$0xf0] }
 0x5cd   : > { %v12506_v4 = vld [vmem:[%s13231_s6 + $0x12dc] sm:$0xf]  ;;  %v10488_v25 = vor.u32 %v12442_v63, %v10485_v18  ;;  %7363 = vmatpush.bf16.msra.mxu1 %v10232_v13 }
 0x5ce   : > { %v10741_v7 = vld [vmem:[%s13231_s6 + $0x12f8] sm:$0xf0] }
 0x5cf   : > { %v12306_v61 = vld [vmem:[%s13231_s6 + $0xc9c] sm:$0xf]  ;;  %v10744_v62 = vor.u32 %v12506_v4, %v10741_v7  ;;  %7376 = vmatpush.bf16.msra.mxu2 %v10488_v25 }
 0x5d0   : > { %v9941_v49 = vld [vmem:[%s13231_s6 + $0xcb8] sm:$0xf0] }
 0x5d1   : > { %v12370_v16 = vld [vmem:[%s13231_s6 + $0xe9c] sm:$0xf]  ;;  %v9944_v30 = vor.u32 %v12306_v61, %v9941_v49  ;;  %7389 = vmatpush.bf16.msra.mxu3 %v10744_v62 }
 0x5d2   : > { %v10197_v32 = vld [vmem:[%s13231_s6 + $0xeb8] sm:$0xf0] }
 0x5d3   : > { %v12434_v17 = vld [vmem:[%s13231_s6 + $0x109c] sm:$0xf]  ;;  %v10200_v12 = vor.u32 %v12370_v16, %v10197_v32  ;;  %7351 = vmatpush.bf16.msra.mxu0 %v9944_v30 }
 0x5d4   : > { %v10453_v2 = vld [vmem:[%s13231_s6 + $0x10b8] sm:$0xf0] }
 0x5d5   : > { %v12498_v27 = vld [vmem:[%s13231_s6 + $0x129c] sm:$0xf]  ;;  %v10456_v34 = vor.u32 %v12434_v17, %v10453_v2  ;;  %7364 = vmatpush.bf16.msra.mxu1 %v10200_v12 }
 0x5d6   : > { %v10709_v3 = vld [vmem:[%s13231_s6 + $0x12b8] sm:$0xf0] }
 0x5d7   : > { %v12298_v33 = vld [vmem:[%s13231_s6 + $0xc5c] sm:$0xf]  ;;  %v10712_v39 = vor.u32 %v12498_v27, %v10709_v3  ;;  %7377 = vmatpush.bf16.msra.mxu2 %v10456_v34 }
 0x5d8   : > { %v9909_v15 = vld [vmem:[%s13231_s6 + $0xc78] sm:$0xf0] }
 0x5d9   : > { %v12362_v48 = vld [vmem:[%s13231_s6 + $0xe5c] sm:$0xf]  ;;  %v9912_v40 = vor.u32 %v12298_v33, %v9909_v15  ;;  %7390 = vmatpush.bf16.msra.mxu3 %v10712_v39 }
 0x5da   : > { %v10165_v36 = vld [vmem:[%s13231_s6 + $0xe78] sm:$0xf0] }
 0x5db   : > { %v12426_v37 = vld [vmem:[%s13231_s6 + $0x105c] sm:$0xf]  ;;  %v10168_v11 = vor.u32 %v12362_v48, %v10165_v36  ;;  %7352 = vmatpush.bf16.msra.mxu0 %v9912_v40 }
 0x5dc   : > { %v10421_v47 = vld [vmem:[%s13231_s6 + $0x1078] sm:$0xf0] }
 0x5dd   : > { %v12490_v38 = vld [vmem:[%s13231_s6 + $0x125c] sm:$0xf]  ;;  %v10424_v19 = vor.u32 %v12426_v37, %v10421_v47  ;;  %7365 = vmatpush.bf16.msra.mxu1 %v10168_v11 }
 0x5de   : > { %v10677_v46 = vld [vmem:[%s13231_s6 + $0x1278] sm:$0xf0] }
 0x5df   : > { %v12290_v1 = vld [vmem:[%s13231_s6 + $0xc1c] sm:$0xf]  ;;  %v10680_v10 = vor.u32 %v12490_v38, %v10677_v46  ;;  %7378 = vmatpush.bf16.msra.mxu2 %v10424_v19 }
 0x5e0   : > { %v9877_v23 = vld [vmem:[%s13231_s6 + $0xc38] sm:$0xf0] }
 0x5e1   : > { %v12354_v24 = vld [vmem:[%s13231_s6 + $0xe1c] sm:$0xf]  ;;  %v9880_v56 = vor.u32 %v12290_v1, %v9877_v23  ;;  %7391 = vmatpush.bf16.msra.mxu3 %v10680_v10 }
 0x5e2   : > { %v10133_v28 = vld [vmem:[%s13231_s6 + $0xe38] sm:$0xf0] }
 0x5e3   : > { %v12418_v22 = vld [vmem:[%s13231_s6 + $0x101c] sm:$0xf]  ;;  %v10136_v63 = vor.u32 %v12354_v24, %v10133_v28  ;;  %7353 = vmatpush.bf16.msra.mxu0 %v9880_v56  ;;  %v7147_v24 = vpop.f32.mrf.mxu0 }
 0x5e4   : > { %v10389_v41 = vld [vmem:[%s13231_s6 + $0x1038] sm:$0xf0] }
 0x5e5   : > { %v12482_v42 = vld [vmem:[%s13231_s6 + $0x121c] sm:$0xf]  ;;  %v10392_v7 = vor.u32 %v12418_v22, %v10389_v41  ;;  %7366 = vmatpush.bf16.msra.mxu1 %v10136_v63  ;;  %v7148_v41 = vadd.f32 %v7147_v24, %v15408_v50 }
 0x5e6   : > { %v10645_v6 = vld [vmem:[%s13231_s6 + $0x1238] sm:$0xf0]  ;;  %7354 = vmatmul.bf16.vlgmr.msra.gmra.mxu0 %v13666_v0 }
 0x5e7   : > { %v12602_v43 = vld [vmem:[%s13231_s6 + $0x15dc] sm:$0xf]  ;;  %v10648_v5 = vor.u32 %v12482_v42, %v10645_v6  ;;  %7379 = vmatpush.bf16.msra.mxu2 %v10392_v7  ;;  %v7160_v42 = vpop.f32.mrf.mxu1 }
 0x5e8   : > { %v11125_v44 = vld [vmem:[%s13231_s6 + $0x15f8] sm:$0xf0]  ;;  %7367 = vmatmul.bf16.vlgmr.msra.gmra.mxu1 %v13670_v8  ;;  %v7161_v56 = vadd.f32 %v7160_v42, %v7148_v41 }
 0x5e9   : > { %v12666_v55 = vld [vmem:[%s13231_s6 + $0x17dc] sm:$0xf]  ;;  %v11128_v13 = vor.u32 %v12602_v43, %v11125_v44  ;;  %7392 = vmatpush.bf16.msra.mxu3 %v10648_v5 }
 0x5ea   : > { %v11381_v57 = vld [vmem:[%s13231_s6 + $0x17f8] sm:$0xf0]  ;;  %7380 = vmatmul.bf16.vlgmr.msra.gmra.mxu2 %v13704_v53 }
 0x5eb   : > { %v12730_v60 = vld [vmem:[%s13231_s6 + $0x19dc] sm:$0xf]  ;;  %v11384_v61 = vor.u32 %v12666_v55, %v11381_v57  ;;  %7398 = vmatpush.bf16.msrb.mxu0 %v11128_v13 }
 0x5ec   : > { %v11637_v9 = vld [vmem:[%s13231_s6 + $0x19f8] sm:$0xf0]  ;;  %7393 = vmatmul.bf16.vlgmr.msra.gmra.mxu3 %v13711_v58 }
 0x5ed   : > { %v12794_v18 = vld [vmem:[%s13231_s6 + $0x1bdc] sm:$0xf]  ;;  %v11640_v62 = vor.u32 %v12730_v60, %v11637_v9  ;;  %7411 = vmatpush.bf16.msrb.mxu1 %v11384_v61 }
 0x5ee   : > { %v11893_v4 = vld [vmem:[%s13231_s6 + $0x1bf8] sm:$0xf0] }
 0x5ef   : > { %v12594_v49 = vld [vmem:[%s13231_s6 + $0x159c] sm:$0xf]  ;;  %v11896_v16 = vor.u32 %v12794_v18, %v11893_v4  ;;  %7424 = vmatpush.bf16.msrb.mxu2 %v11640_v62 }
 0x5f0   : > { %v11093_v25 = vld [vmem:[%s13231_s6 + $0x15b8] sm:$0xf0] }
 0x5f1   : > { %v12658_v32 = vld [vmem:[%s13231_s6 + $0x179c] sm:$0xf]  ;;  %v11096_v26 = vor.u32 %v12594_v49, %v11093_v25  ;;  %7437 = vmatpush.bf16.msrb.mxu3 %v11896_v16  ;;  %v7173_v49 = vpop.f32.mrf.mxu2 }
 0x5f2   : > { %v11349_v17 = vld [vmem:[%s13231_s6 + $0x17b8] sm:$0xf0] }
 0x5f3   : > { %v12722_v21 = vld [vmem:[%s13231_s6 + $0x199c] sm:$0xf]  ;;  %v11352_v29 = vor.u32 %v12658_v32, %v11349_v17  ;;  %7399 = vmatpush.bf16.msrb.mxu0 %v11096_v26  ;;  %v7174_v32 = vadd.f32 %v7173_v49, %v7161_v56  ;;  %v7186_v17 = vpop.f32.mrf.mxu3 }
 0x5f4   : > { %v11605_v2 = vld [vmem:[%s13231_s6 + $0x19b8] sm:$0xf0] }
 0x5f5   : > { %v12786_v27 = vld [vmem:[%s13231_s6 + $0x1b9c] sm:$0xf]  ;;  %v11608_v12 = vor.u32 %v12722_v21, %v11605_v2  ;;  %7412 = vmatpush.bf16.msrb.mxu1 %v11352_v29  ;;  %v7149_v21 = vpop.f32.mrf.mxu0 }
 0x5f6   : > { %v11861_v3 = vld [vmem:[%s13231_s6 + $0x1bb8] sm:$0xf0] }
 0x5f7   : > { %v12586_v35 = vld [vmem:[%s13231_s6 + $0x155c] sm:$0xf]  ;;  %v11864_v33 = vor.u32 %v12786_v27, %v11861_v3  ;;  %7425 = vmatpush.bf16.msrb.mxu2 %v11608_v12  ;;  %v7187_v3 = vadd.f32 %v7186_v17, %v7174_v32 }
 0x5f8   : > { %v11061_v30 = vld [vmem:[%s13231_s6 + $0x1578] sm:$0xf0] }
 0x5f9   : > { %v12650_v15 = vld [vmem:[%s13231_s6 + $0x175c] sm:$0xf]  ;;  %v11064_v37 = vor.u32 %v12586_v35, %v11061_v30  ;;  %7438 = vmatpush.bf16.msrb.mxu3 %v11864_v33  ;;  %v7162_v35 = vpop.f32.mrf.mxu1 }
 0x5fa   : > { %v11317_v31 = vld [vmem:[%s13231_s6 + $0x1778] sm:$0xf0] }
 0x5fb   : > { %v12714_v34 = vld [vmem:[%s13231_s6 + $0x195c] sm:$0xf]  ;;  %v11320_v47 = vor.u32 %v12650_v15, %v11317_v31  ;;  %7400 = vmatpush.bf16.msrb.mxu0 %v11064_v37  ;;  %v7188_v24 = vpop.f32.mrf.mxu3 }
 0x5fc   : > { %v11573_v39 = vld [vmem:[%s13231_s6 + $0x1978] sm:$0xf0] }
 0x5fd   : > { %v12778_v48 = vld [vmem:[%s13231_s6 + $0x1b5c] sm:$0xf]  ;;  %v11576_v53 = vor.u32 %v12714_v34, %v11573_v39  ;;  %7413 = vmatpush.bf16.msrb.mxu1 %v11320_v47  ;;  %v7199_v41 = vpop.f32.mrf.mxu0 }
 0x5fe   : > { %v11829_v36 = vld [vmem:[%s13231_s6 + $0x1b78] sm:$0xf0]  ;;  %v7200_v42 = vadd.f32 %v7199_v41, %v7187_v3 }
 0x5ff   : > { %v12578_v0 = vld [vmem:[%s13231_s6 + $0x151c] sm:$0xf]  ;;  %v11832_v46 = vor.u32 %v12778_v48, %v11829_v36  ;;  %7426 = vmatpush.bf16.msrb.mxu2 %v11576_v53 }
 0x600   : > { %v11029_v38 = vld [vmem:[%s13231_s6 + $0x1538] sm:$0xf0] }
 0x601   : > { %v12642_v1 = vld [vmem:[%s13231_s6 + $0x171c] sm:$0xf]  ;;  %v11032_v28 = vor.u32 %v12578_v0, %v11029_v38  ;;  %7439 = vmatpush.bf16.msrb.mxu3 %v11832_v46 }
 0x602   : > { %v11285_v40 = vld [vmem:[%s13231_s6 + $0x1738] sm:$0xf0] }
 0x603   : > { %v12706_v11 = vld [vmem:[%s13231_s6 + $0x191c] sm:$0xf]  ;;  %v11288_v19 = vor.u32 %v12642_v1, %v11285_v40  ;;  %7401 = vmatpush.bf16.msrb.mxu0 %v11032_v28 }
 0x604   : > { %v11541_v8 = vld [vmem:[%s13231_s6 + $0x1938] sm:$0xf0] }
 0x605   : > { %v12770_v23 = vld [vmem:[%s13231_s6 + $0x1b1c] sm:$0xf]  ;;  %v11544_v52 = vor.u32 %v12706_v11, %v11541_v8  ;;  %7414 = vmatpush.bf16.msrb.mxu1 %v11288_v19  ;;  %v7175_v11 = vpop.f32.mrf.mxu2 }
 0x606   : > { %v11797_v58 = vld [vmem:[%s13231_s6 + $0x1b38] sm:$0xf0] }
 0x607   : > { %v12570_v10 = vld [vmem:[%s13231_s6 + $0x14dc] sm:$0xf]  ;;  %v11800_v6 = vor.u32 %v12770_v23, %v11797_v58  ;;  %7427 = vmatpush.bf16.msrb.mxu2 %v11544_v52  ;;  %v7212_v52 = vpop.f32.mrf.mxu1 }
 0x608   : > { %v10997_v22 = vld [vmem:[%s13231_s6 + $0x14f8] sm:$0xf0] }
 0x609   : > { %v12634_v43 = vld [vmem:[%s13231_s6 + $0x16dc] sm:$0xf]  ;;  %v11000_v50 = vor.u32 %v12570_v10, %v10997_v22  ;;  %7440 = vmatpush.bf16.msrb.mxu3 %v11800_v6  ;;  %v7213_v6 = vadd.f32 %v7212_v52, %v7200_v42 }
 0x60a   : > { %v11253_v44 = vld [vmem:[%s13231_s6 + $0x16f8] sm:$0xf0] }
 0x60b   : > { %v12698_v51 = vld [vmem:[%s13231_s6 + $0x18dc] sm:$0xf]  ;;  %v11256_v63 = vor.u32 %v12634_v43, %v11253_v44  ;;  %7402 = vmatpush.bf16.msrb.mxu0 %v11000_v50 }
 0x60c   : > { %v11509_v55 = vld [vmem:[%s13231_s6 + $0x18f8] sm:$0xf0] }
 0x60d   : > { %v12762_v57 = vld [vmem:[%s13231_s6 + $0x1adc] sm:$0xf]  ;;  %v11512_v4 = vor.u32 %v12698_v51, %v11509_v55  ;;  %7415 = vmatpush.bf16.msrb.mxu1 %v11256_v63  ;;  %v7225_v43 = vpop.f32.mrf.mxu2  ;;  %v7238_v51 = vpop.f32.mrf.mxu3 }
 0x60e   : > { %v11765_v60 = vld [vmem:[%s13231_s6 + $0x1af8] sm:$0xf0]  ;;  %v7226_v44 = vadd.f32 %v7225_v43, %v7213_v6  ;;  %v7201_v55 = vpop.f32.mrf.mxu0 }
 0x60f   : > { %v12562_v9 = vld [vmem:[%s13231_s6 + $0x149c] sm:$0xf]  ;;  %v11768_v7 = vor.u32 %v12762_v57, %v11765_v60  ;;  %7428 = vmatpush.bf16.msrb.mxu2 %v11512_v4  ;;  %v7214_v60 = vpop.f32.mrf.mxu1 }
 0x610   : > { %v10965_v18 = vld [vmem:[%s13231_s6 + $0x14b8] sm:$0xf0]  ;;  %v7239_v57 = vadd.f32 %v7238_v51, %v7226_v44 }
 0x611   : > { %v12626_v5 = vld [vmem:[%s13231_s6 + $0x169c] sm:$0xf]  ;;  %v10968_v2 = vor.u32 %v12562_v9, %v10965_v18  ;;  %7441 = vmatpush.bf16.msrb.mxu3 %v11768_v7 }
 0x612   : > { %v11221_v13 = vld [vmem:[%s13231_s6 + $0x16b8] sm:$0xf0] }
 0x613   : > { %v12690_v61 = vld [vmem:[%s13231_s6 + $0x189c] sm:$0xf]  ;;  %v11224_v27 = vor.u32 %v12626_v5, %v11221_v13  ;;  %7403 = vmatpush.bf16.msrb.mxu0 %v10968_v2 }
 0x614   : > { %v11477_v25 = vld [vmem:[%s13231_s6 + $0x18b8] sm:$0xf0] }
 0x615   : > { %v12754_v62 = vld [vmem:[%s13231_s6 + $0x1a9c] sm:$0xf]  ;;  %v11480_v30 = vor.u32 %v12690_v61, %v11477_v25  ;;  %7416 = vmatpush.bf16.msrb.mxu1 %v11224_v27  ;;  %v7227_v56 = vpop.f32.mrf.mxu2  ;;  %v7240_v50 = vpop.f32.mrf.mxu3 }
 0x616   : > { %v11733_v16 = vld [vmem:[%s13231_s6 + $0x1ab8] sm:$0xf0]  ;;  %v7251_v63 = vpop.f32.mrf.mxu0 }
 0x617   : > { %v12554_v26 = vld [vmem:[%s13231_s6 + $0x145c] sm:$0xf]  ;;  %v11736_v12 = vor.u32 %v12754_v62, %v11733_v16  ;;  %7429 = vmatpush.bf16.msrb.mxu2 %v11480_v30  ;;  %v7252_v9 = vadd.f32 %v7251_v63, %v7239_v57 }
 0x618   : > { %v10933_v29 = vld [vmem:[%s13231_s6 + $0x1478] sm:$0xf0] }
 0x619   : > { %v12618_v33 = vld [vmem:[%s13231_s6 + $0x165c] sm:$0xf]  ;;  %v10936_v36 = vor.u32 %v12554_v26, %v10933_v29  ;;  %7442 = vmatpush.bf16.msrb.mxu3 %v11736_v12 }
 0x61a   : > { %v11189_v15 = vld [vmem:[%s13231_s6 + $0x1678] sm:$0xf0] }
 0x61b   : > { %v12682_v31 = vld [vmem:[%s13231_s6 + $0x185c] sm:$0xf]  ;;  %v11192_v37 = vor.u32 %v12618_v33, %v11189_v15  ;;  %7404 = vmatpush.bf16.msrb.mxu0 %v10936_v36 }
 0x61c   : > { %v11445_v34 = vld [vmem:[%s13231_s6 + $0x1878] sm:$0xf0] }
 0x61d   : > { %v12746_v39 = vld [vmem:[%s13231_s6 + $0x1a5c] sm:$0xf]  ;;  %v11448_v38 = vor.u32 %v12682_v31, %v11445_v34  ;;  %7417 = vmatpush.bf16.msrb.mxu1 %v11192_v37  ;;  %v7277_v18 = vpop.f32.mrf.mxu2 }
 0x61e   : > { %v11701_v48 = vld [vmem:[%s13231_s6 + $0x1a78] sm:$0xf0] }
 0x61f   : > { %v12546_v47 = vld [vmem:[%s13231_s6 + $0x141c] sm:$0xf]  ;;  %v11704_v53 = vor.u32 %v12746_v39, %v11701_v48  ;;  %7430 = vmatpush.bf16.msrb.mxu2 %v11448_v38 }
 0x620   : > { %v10901_v0 = vld [vmem:[%s13231_s6 + $0x1438] sm:$0xf0] }
 0x621   : > { %v12610_v46 = vld [vmem:[%s13231_s6 + $0x161c] sm:$0xf]  ;;  %v10904_v28 = vor.u32 %v12546_v47, %v10901_v0  ;;  %7443 = vmatpush.bf16.msrb.mxu3 %v11704_v53 }
 0x622   : > { %v11157_v1 = vld [vmem:[%s13231_s6 + $0x1638] sm:$0xf0] }
 0x623   : > { %v12674_v40 = vld [vmem:[%s13231_s6 + $0x181c] sm:$0xf]  ;;  %v11160_v19 = vor.u32 %v12610_v46, %v11157_v1  ;;  %7405 = vmatpush.bf16.msrb.mxu0 %v10904_v28 }
 0x624   : > { %v11413_v8 = vld [vmem:[%s13231_s6 + $0x1838] sm:$0xf0] }
 0x625   : > { %v12738_v23 = vld [vmem:[%s13231_s6 + $0x1a1c] sm:$0xf]  ;;  %v11416_v10 = vor.u32 %v12674_v40, %v11413_v8  ;;  %7418 = vmatpush.bf16.msrb.mxu1 %v11160_v19  ;;  %v7279_v5 = vpop.f32.mrf.mxu2 }
 0x626   : > { %v11669_v58 = vld [vmem:[%s13231_s6 + $0x1a38] sm:$0xf0]  ;;  %7406 = vmatmul.bf16.vlgmr.msrb.gmra.mxu0 %v13706_v54  ;;  %v7264_v54 = vpop.f32.mrf.mxu1 }
 0x627   : > { %v11672_v22 = vor.u32 %v12738_v23, %v11669_v58  ;;  %7431 = vmatpush.bf16.msrb.mxu2 %v11416_v10  ;;  %v566_v28 = vld [vmem:[#allocation2 + $0x8] sm:$0xff] }
 0x628   : > { %7419 = vmatmul.bf16.vlgmr.msrb.gmra.mxu1 %v13713_v59  ;;  %v7265_v59 = vadd.f32 %v7264_v54, %v7252_v9 }
 0x629   : > { %7444 = vmatpush.bf16.msrb.mxu3 %v11672_v22 }
 0x62a   : > { %7432 = vmatmul.bf16.vlgmr.msrb.gmra.mxu2 %v13780_v20  ;;  %v7290_v20 = vpop.f32.mrf.mxu3  ;;  %v7462_v58 = vrot.slane %v7265_v59, 4 }
 0x62b   : > { %v7291_v4 = vadd.f32 %v7290_v20, %v7277_v18 }
 0x62c   : > { %7445 = vmatmul.bf16.vlgmr.msrb.gmra.mxu3 %v13782_v45  ;;  %v7253_v45 = vpop.f32.mrf.mxu0 }
 0x62d   : > { %v7329_v25 = vpop.f32.mrf.mxu2 }
 0x62e   : > { %v7266_v7 = vpop.f32.mrf.mxu1 }
 0x632   : > { %v7292_v13 = vpop.f32.mrf.mxu3 }
 0x634   : > { %v7303_v61 = vpop.f32.mrf.mxu0 }
 0x635   : > { %v7331_v17 = vpop.f32.mrf.mxu2  ;;  %v7304_v3 = vadd.f32 %v7303_v61, %v7291_v4 }
 0x636   : > { %v7316_v49 = vpop.f32.mrf.mxu1 }
 0x637   : > { %v7317_v30 = vadd.f32 %v7316_v49, %v7304_v3 }
 0x639   : > { %v7330_v33 = vadd.f32 %v7329_v25, %v7317_v30 }
 0x63a   : > { %v7342_v62 = vpop.f32.mrf.mxu3 }
 0x63b   : > { %v7343_v34 = vadd.f32 %v7342_v62, %v7330_v33 }
 0x63c   : > { %v7305_v16 = vpop.f32.mrf.mxu0 }
 0x63e   : > { %v7318_v32 = vpop.f32.mrf.mxu1 }
 0x642   : > { %v7344_v21 = vpop.f32.mrf.mxu3 }
 0x663   : > { %v7355_v2 = vpop.f32.mrf.mxu0 }
 0x664   : > { %v7356_v39 = vadd.f32 %v7355_v2, %v7343_v34 }
 0x665   : > { %v7368_v27 = vpop.f32.mrf.mxu1 }
 0x666   : > { %v7369_v48 = vadd.f32 %v7368_v27, %v7356_v39 }
 0x66b   : > { %v7357_v35 = vpop.f32.mrf.mxu0 }
 0x66d   : > { %v7381_v26 = vpop.f32.mrf.mxu2  ;;  %v7370_v12 = vpop.f32.mrf.mxu1 }
 0x66e   : > { %v7382_v36 = vadd.f32 %v7381_v26, %v7369_v48 }
 0x66f   : > { %v7394_v29 = vpop.f32.mrf.mxu3 }
 0x670   : > { %v7395_v37 = vadd.f32 %v7394_v29, %v7382_v36 }
 0x675   : > { %v7383_v15 = vpop.f32.mrf.mxu2 }
 0x677   : > { %v7396_v31 = vpop.f32.mrf.mxu3 }
 0x6a3   : > { %v7407_v47 = vpop.f32.mrf.mxu0 }
 0x6a4   : > { %v7408_v38 = vadd.f32 %v7407_v47, %v7395_v37 }
 0x6a5   : > { %v7420_v0 = vpop.f32.mrf.mxu1 }
 0x6a6   : > { %v7421_v53 = vadd.f32 %v7420_v0, %v7408_v38 }
 0x6ab   : > { %v7409_v11 = vpop.f32.mrf.mxu0 }
 0x6ad   : > { %v7433_v46 = vpop.f32.mrf.mxu2  ;;  %v7422_v8 = vpop.f32.mrf.mxu1 }
 0x6ae   : > { %v7434_v40 = vadd.f32 %v7433_v46, %v7421_v53 }
 0x6af   : > { %v7446_v1 = vpop.f32.mrf.mxu3 }
 0x6b0   : > { %v7447_v23 = vadd.f32 %v7446_v1, %v7434_v40 }
 0x6b2   : > { %v7463_v24 = vrot.slane %v7447_v23, 2 }
 0x6b4   : > { %v7468_v19 = vsel %vm488_vm1, %v7462_v58, %v7463_v24  ;;  %7479 = sbr.rel (%p11897_p3) target bundleno = 2002 (0x7d2), region = 72 }
 0x6b5   : > { %v7469_v10 = vsel %vm490_vm2, %v15345_v14, %v7468_v19  ;;  %v7435_v22 = vpop.f32.mrf.mxu2 }
 0x6b6   : > { %v7473_v42 = vadd.f32 %v7469_v10, %v566_v28 }
 0x6b7   : > { %v7448_v41 = vpop.f32.mrf.mxu3 }
 0x6b8   : > { %7475 = vst [vmem:[#allocation2 + $0x8] sm:$0xff] %v7473_v42 }
 0x6b9   : > { %v7902_v52 = vld [vmem:[#allocation8 + $0x178] sm:$0xff]  ;;  %v7901_v43 = vld [vmem:[#allocation8 + $0x170] sm:$0xff]  ;;  %v7900_v57 = vld [vmem:[#allocation8 + $0x168] sm:$0xff]  ;;  %v13100_v40 = vmov 2.0  }
 0x6ba   : > { %v7870_v6 = vld [vmem:[#allocation8 + $0x78] sm:$0xff]  ;;  %8044 = vmatpush.msra.mxu2 %v7902_v52  ;;  %v7869_v51 = vld [vmem:[#allocation8 + $0x70] sm:$0xff]  ;;  %v7868_v14 = vld [vmem:[#allocation8 + $0x68] sm:$0xff]  ;;  %12894 = vrcp.f32 %v13100_v40 }
 0x6bb   : > { %8004 = vmatpush.msra.mxu0 %v7870_v6  ;;  %v7918_v44 = vld [vmem:[#allocation8 + $0x1f8] sm:$0xff]  ;;  %v7917_v60 = vld [vmem:[#allocation8 + $0x1f0] sm:$0xff]  ;;  %v7916_v50 = vld [vmem:[#allocation8 + $0x1e8] sm:$0xff] }
 0x6bc   : > { %v7886_v55 = vld [vmem:[#allocation8 + $0xf8] sm:$0xff]  ;;  %8064 = vmatpush.msra.mxu3 %v7918_v44  ;;  %8045 = vmatpush.msra.mxu2 %v7901_v43  ;;  %v7885_v56 = vld [vmem:[#allocation8 + $0xf0] sm:$0xff]  ;;  %v7899_v63 = vld [vmem:[#allocation8 + $0x160] sm:$0xff] }
 0x6bd   : > { %8024 = vmatpush.msra.mxu1 %v7886_v55  ;;  %8005 = vmatpush.msra.mxu0 %v7869_v51  ;;  %v7867_v54 = vld [vmem:[#allocation8 + $0x60] sm:$0xff]  ;;  %v7884_v9 = vld [vmem:[#allocation8 + $0xe8] sm:$0xff]  ;;  %v7898_v20 = vld [vmem:[#allocation8 + $0x158] sm:$0xff] }
 0x6be   : > { %8065 = vmatpush.msra.mxu3 %v7917_v60  ;;  %8046 = vmatpush.msra.mxu2 %v7900_v57  ;;  %v7915_v59 = vld [vmem:[#allocation8 + $0x1e0] sm:$0xff]  ;;  %v7866_v4 = vld [vmem:[#allocation8 + $0x58] sm:$0xff]  ;;  %v7897_v5 = vld [vmem:[#allocation8 + $0x150] sm:$0xff] }
 0x6bf   : > { %8025 = vmatpush.msra.mxu1 %v7885_v56  ;;  %8006 = vmatpush.msra.mxu0 %v7868_v14  ;;  %v7883_v18 = vld [vmem:[#allocation8 + $0xe0] sm:$0xff]  ;;  %v7914_v45 = vld [vmem:[#allocation8 + $0x1d8] sm:$0xff]  ;;  %v7865_v13 = vld [vmem:[#allocation8 + $0x50] sm:$0xff] }
 0x6c0   : > { %8066 = vmatpush.msra.mxu3 %v7916_v50  ;;  %8047 = vmatpush.msra.mxu2 %v7899_v63  ;;  %v7882_v7 = vld [vmem:[#allocation8 + $0xd8] sm:$0xff]  ;;  %v7913_v61 = vld [vmem:[#allocation8 + $0x1d0] sm:$0xff]  ;;  %v7896_v25 = vld [vmem:[#allocation8 + $0x148] sm:$0xff]  ;;  %v15501_v42 = vpop.eup %12894 }
 0x6c1   : > { %8026 = vmatpush.msra.mxu1 %v7884_v9  ;;  %8007 = vmatpush.msra.mxu0 %v7867_v54  ;;  %v7881_v49 = vld [vmem:[#allocation8 + $0xd0] sm:$0xff]  ;;  %v7864_v62 = vld [vmem:[#allocation8 + $0x48] sm:$0xff]  ;;  %v7895_v17 = vld [vmem:[#allocation8 + $0x140] sm:$0xff]  ;;  %v7560_v14 = vmul.f32 2.0, %v15501_v42  ;;  %vm7564_vm7 = vweird.f32 %v15501_v42 }
 0x6c2   : > { %8067 = vmatpush.msra.mxu3 %v7915_v59  ;;  %8048 = vmatpush.msra.mxu2 %v7898_v20  ;;  %v7912_v16 = vld [vmem:[#allocation8 + $0x1c8] sm:$0xff]  ;;  %v7863_v21 = vld [vmem:[#allocation8 + $0x40] sm:$0xff]  ;;  %v7894_v3 = vld [vmem:[#allocation8 + $0x138] sm:$0xff] }
 0x6c3   : > { %8027 = vmatpush.msra.mxu1 %v7883_v18  ;;  %8008 = vmatpush.msra.mxu0 %v7866_v4  ;;  %v7880_v32 = vld [vmem:[#allocation8 + $0xc8] sm:$0xff]  ;;  %v7911_v2 = vld [vmem:[#allocation8 + $0x1c0] sm:$0xff]  ;;  %v7862_v26 = vld [vmem:[#allocation8 + $0x38] sm:$0xff] }
 0x6c4   : > { %8068 = vmatpush.msra.mxu3 %v7914_v45  ;;  %8049 = vmatpush.msra.mxu2 %v7897_v5  ;;  %v7879_v27 = vld [vmem:[#allocation8 + $0xc0] sm:$0xff]  ;;  %v7910_v29 = vld [vmem:[#allocation8 + $0x1b8] sm:$0xff]  ;;  %v7893_v30 = vld [vmem:[#allocation8 + $0x130] sm:$0xff]  ;;  %v7561_v45 = vsub.f32 1.0, %v7560_v14 }
 0x6c5   : > { %8028 = vmatpush.msra.mxu1 %v7882_v7  ;;  %8009 = vmatpush.msra.mxu0 %v7865_v13  ;;  %v7878_v35 = vld [vmem:[#allocation8 + $0xb8] sm:$0xff]  ;;  %v7861_v12 = vld [vmem:[#allocation8 + $0x30] sm:$0xff]  ;;  %v7892_v31 = vld [vmem:[#allocation8 + $0x128] sm:$0xff] }
 0x6c6   : > { %8069 = vmatpush.msra.mxu3 %v7913_v61  ;;  %8050 = vmatpush.msra.mxu2 %v7896_v25  ;;  %v7909_v33 = vld [vmem:[#allocation8 + $0x1b0] sm:$0xff]  ;;  %v7860_v34 = vld [vmem:[#allocation8 + $0x28] sm:$0xff]  ;;  %v7891_v36 = vld [vmem:[#allocation8 + $0x120] sm:$0xff] }
 0x6c7   : > { %8029 = vmatpush.msra.mxu1 %v7881_v49  ;;  %8010 = vmatpush.msra.mxu0 %v7864_v62  ;;  %v7877_v15 = vld [vmem:[#allocation8 + $0xb0] sm:$0xff]  ;;  %v7908_v39 = vld [vmem:[#allocation8 + $0x1a8] sm:$0xff]  ;;  %v7859_v37 = vld [vmem:[#allocation8 + $0x20] sm:$0xff] }
 0x6c8   : > { %8070 = vmatpush.msra.mxu3 %v7912_v16  ;;  %8051 = vmatpush.msra.mxu2 %v7895_v17  ;;  %v7876_v48 = vld [vmem:[#allocation8 + $0xa8] sm:$0xff]  ;;  %v7907_v47 = vld [vmem:[#allocation8 + $0x1a0] sm:$0xff]  ;;  %v7890_v38 = vld [vmem:[#allocation8 + $0x118] sm:$0xff] }
 0x6c9   : > { %8030 = vmatpush.msra.mxu1 %v7880_v32  ;;  %8011 = vmatpush.msra.mxu0 %v7863_v21  ;;  %v7875_v0 = vld [vmem:[#allocation8 + $0xa0] sm:$0xff]  ;;  %v7858_v53 = vld [vmem:[#allocation8 + $0x18] sm:$0xff]  ;;  %v7889_v11 = vld [vmem:[#allocation8 + $0x110] sm:$0xff]  ;;  %v7562_v21 = vmul.f32 %v15501_v42, %v7561_v45 }
 0x6ca   : > { %8071 = vmatpush.msra.mxu3 %v7911_v2  ;;  %8052 = vmatpush.msra.mxu2 %v7894_v3  ;;  %v7906_v46 = vld [vmem:[#allocation8 + $0x198] sm:$0xff]  ;;  %v7857_v8 = vld [vmem:[#allocation8 + $0x10] sm:$0xff]  ;;  %v7888_v24 = vld [vmem:[#allocation8 + $0x108] sm:$0xff] }
 0x6cb   : > { %8031 = vmatpush.msra.mxu1 %v7879_v27  ;;  %8012 = vmatpush.msra.mxu0 %v7862_v26  ;;  %v7874_v1 = vld [vmem:[#allocation8 + $0x98] sm:$0xff]  ;;  %v7905_v23 = vld [vmem:[#allocation8 + $0x190] sm:$0xff]  ;;  %v7856_v28 = vld [vmem:[#allocation8 + $0x8] sm:$0xff] }
 0x6cc   : > { %8072 = vmatpush.msra.mxu3 %v7910_v29  ;;  %8053 = vmatpush.msra.mxu2 %v7893_v30  ;;  %v7873_v58 = vld [vmem:[#allocation8 + $0x90] sm:$0xff]  ;;  %v7904_v19 = vld [vmem:[#allocation8 + $0x188] sm:$0xff]  ;;  %v7887_v22 = vld [vmem:[#allocation8 + $0x100] sm:$0xff] }
 0x6cd   : > { %8032 = vmatpush.msra.mxu1 %v7878_v35  ;;  %8013 = vmatpush.msra.mxu0 %v7861_v12  ;;  %v7872_v10 = vld [vmem:[#allocation8 + $0x88] sm:$0xff]  ;;  %v7855_v41 = vld [vmem:[#allocation8] sm:$0xff]  ;;  %v7966_v52 = vld [vmem:[#allocation8 + $0x378] sm:$0xff] }
 0x6ce   : > { %8073 = vmatpush.msra.mxu3 %v7909_v33  ;;  %8054 = vmatpush.msra.mxu2 %v7892_v31  ;;  %v7903_v6 = vld [vmem:[#allocation8 + $0x180] sm:$0xff]  ;;  %v7934_v43 = vld [vmem:[#allocation8 + $0x278] sm:$0xff]  ;;  %v7965_v51 = vld [vmem:[#allocation8 + $0x370] sm:$0xff] }
 0x6cf   : > { %8033 = vmatpush.msra.mxu1 %v7877_v15  ;;  %8014 = vmatpush.msra.mxu0 %v7860_v34  ;;  %v7982_v44 = vld [vmem:[#allocation8 + $0x3f8] sm:$0xff]  ;;  %v7871_v55 = vld [vmem:[#allocation8 + $0x80] sm:$0xff]  ;;  %v7933_v57 = vld [vmem:[#allocation8 + $0x270] sm:$0xff] }
 0x6d0   : > { %8074 = vmatpush.msra.mxu3 %v7908_v39  ;;  %8055 = vmatpush.msra.mxu2 %v7891_v36  ;;  %v7950_v60 = vld [vmem:[#allocation8 + $0x2f8] sm:$0xff]  ;;  %v7964_v56 = vld [vmem:[#allocation8 + $0x368] sm:$0xff]  ;;  %v7981_v50 = vld [vmem:[#allocation8 + $0x3f0] sm:$0xff] }
 0x6d1   : > { %8034 = vmatpush.msra.mxu1 %v7876_v48  ;;  %8015 = vmatpush.msra.mxu0 %v7859_v37  ;;  %v7932_v63 = vld [vmem:[#allocation8 + $0x268] sm:$0xff]  ;;  %v7949_v54 = vld [vmem:[#allocation8 + $0x2f0] sm:$0xff]  ;;  %v7963_v9 = vld [vmem:[#allocation8 + $0x360] sm:$0xff]  ;;  %v7563_v48 = vadd.f32 %v15501_v42, %v7562_v21 }
 0x6d2   : > { %8075 = vmatpush.msra.mxu3 %v7907_v47  ;;  %8056 = vmatpush.msra.mxu2 %v7890_v38  ;;  %v7980_v59 = vld [vmem:[#allocation8 + $0x3e8] sm:$0xff]  ;;  %v7931_v18 = vld [vmem:[#allocation8 + $0x260] sm:$0xff]  ;;  %v7962_v5 = vld [vmem:[#allocation8 + $0x358] sm:$0xff] }
 0x6d3   : > { %8035 = vmatpush.msra.mxu1 %v7875_v0  ;;  %8016 = vmatpush.msra.mxu0 %v7858_v53  ;;  %v7948_v20 = vld [vmem:[#allocation8 + $0x2e8] sm:$0xff]  ;;  %v15504_v4 = vld [vmem:[#allocation2] sm:$0xff]  ;;  %v7930_v61 = vld [vmem:[#allocation8 + $0x258] sm:$0xff] }
 0x6d4   : > { %8076 = vmatpush.msra.mxu3 %v7906_v46  ;;  %8057 = vmatpush.msra.mxu2 %v7889_v11  ;;  %v15506_v7 = vld [vmem:[#allocation2 + $0x8] sm:$0xff]  ;;  %v7979_v13 = vld [vmem:[#allocation8 + $0x3e0] sm:$0xff]  ;;  %7484 = vst [vmem:[#allocation1] ss:$4 sm:$0xff] %v15504_v4  ;;  %v7961_v25 = vld [vmem:[#allocation8 + $0x350] sm:$0xff] }
 0x6d5   : > { %8036 = vmatpush.msra.mxu1 %v7874_v1  ;;  %8017 = vmatpush.msra.mxu0 %v7857_v8  ;;  %v7947_v49 = vld [vmem:[#allocation8 + $0x2e0] sm:$0xff]  ;;  %7486 = vst [vmem:[#allocation1 + $0x20] ss:$4 sm:$0xff] %v15506_v7  ;;  %v7978_v62 = vld [vmem:[#allocation8 + $0x3d8] sm:$0xff]  ;;  %v7929_v16 = vld [vmem:[#allocation8 + $0x250] sm:$0xff] }
 0x6d6   : > { %8077 = vmatpush.msra.mxu3 %v7905_v23  ;;  %8058 = vmatpush.msra.mxu2 %v7888_v24  ;;  %v7946_v32 = vld [vmem:[#allocation8 + $0x2d8] sm:$0xff]  ;;  %v7960_v17 = vld [vmem:[#allocation8 + $0x348] sm:$0xff]  ;;  %v7977_v2 = vld [vmem:[#allocation8 + $0x3d0] sm:$0xff] }
 0x6d7   : > { %8037 = vmatpush.msra.mxu1 %v7873_v58  ;;  %8018 = vmatpush.msra.mxu0 %v7856_v28  ;;  %v7928_v27 = vld [vmem:[#allocation8 + $0x248] sm:$0xff]  ;;  %v7945_v3 = vld [vmem:[#allocation8 + $0x2d0] sm:$0xff]  ;;  %v7959_v26 = vld [vmem:[#allocation8 + $0x340] sm:$0xff] }
 0x6d8   : > { %8078 = vmatpush.msra.mxu3 %v7904_v19  ;;  %8059 = vmatpush.msra.mxu2 %v7887_v22  ;;  %v7976_v29 = vld [vmem:[#allocation8 + $0x3c8] sm:$0xff]  ;;  %v7927_v35 = vld [vmem:[#allocation8 + $0x240] sm:$0xff]  ;;  %v7958_v12 = vld [vmem:[#allocation8 + $0x338] sm:$0xff] }
 0x6d9   : > { %8038 = vmatpush.msra.mxu1 %v7872_v10  ;;  %8019 = vmatpush.msra.mxu0 %v7855_v41  ;;  %v7944_v30 = vld [vmem:[#allocation8 + $0x2c8] sm:$0xff]  ;;  %v7975_v33 = vld [vmem:[#allocation8 + $0x3c0] sm:$0xff]  ;;  %v7926_v15 = vld [vmem:[#allocation8 + $0x238] sm:$0xff]  ;;  %v15520_v10 = vsel %vm7564_vm7, %v15501_v42, %v7563_v48 }
 0x6da   : > { %8124 = vmatpush.msrb.mxu2 %v7966_v52  ;;  %8079 = vmatpush.msra.mxu3 %v7903_v6  ;;  %v7943_v31 = vld [vmem:[#allocation8 + $0x2c0] sm:$0xff]  ;;  %v7957_v36 = vld [vmem:[#allocation8 + $0x330] sm:$0xff]  ;;  %v7974_v37 = vld [vmem:[#allocation8 + $0x3b8] sm:$0xff] }
 0x6db   : > { %8084 = vmatpush.msrb.mxu0 %v7934_v43  ;;  %8039 = vmatpush.msra.mxu1 %v7871_v55  ;;  %v7487_v34 = vld.sshfl [vmem:[#allocation1] sm:$0xff pattern:$0x73625140]  ;;  %v7488_v39 = vld.sshfl [vmem:[#allocation1 + $0x8] sm:$0xff pattern:$0x73625140] }
 0x6dc   : > { %8144 = vmatpush.msrb.mxu3 %v7982_v44  ;;  %8125 = vmatpush.msrb.mxu2 %v7965_v51  ;;  %v7489_v47 = vld.sshfl [vmem:[#allocation1 + $0x10] sm:$0xff pattern:$0x73625140]  ;;  %v7490_v0 = vld.sshfl [vmem:[#allocation1 + $0x18] sm:$0xff pattern:$0x73625140] }
 0x6dd   : > { %8085 = vmatpush.msrb.mxu0 %v7933_v57  ;;  %8104 = vmatpush.msrb.mxu1 %v7950_v60  ;;  %v7925_v38 = vld [vmem:[#allocation8 + $0x230] sm:$0xff]  ;;  %v7942_v53 = vld [vmem:[#allocation8 + $0x2b8] sm:$0xff]  ;;  %v7503_v46 = vsel %vm486_vm0, %v7487_v34, 0.0  ;;  %v7510_v1 = vsel %vm486_vm0, %v7488_v39, 0.0  ;;  %v7517_v40 = vsel %vm486_vm0, %v7489_v47, 0.0  ;;  %v7524_v11 = vsel %vm486_vm0, %v7490_v0, 0.0 }
 0x6de   : > { %8126 = vmatpush.msrb.mxu2 %v7964_v56  ;;  %8145 = vmatpush.msrb.mxu3 %v7981_v50  ;;  %v7956_v8 = vld [vmem:[#allocation8 + $0x328] sm:$0xff]  ;;  %v7973_v23 = vld [vmem:[#allocation8 + $0x3b0] sm:$0xff]  ;;  %v7504_v58 = vrot.slane %v7503_v46, 4  ;;  %v7511_v24 = vrot.slane %v7510_v1, 4  ;;  %v7518_v28 = vrot.slane %v7517_v40, 4  ;;  %v7525_v19 = vrot.slane %v7524_v11, 4 }
 0x6df   : > { %8086 = vmatpush.msrb.mxu0 %v7932_v63  ;;  %8105 = vmatpush.msrb.mxu1 %v7949_v54  ;;  %v7491_v22 = vld.sshfl [vmem:[#allocation1 + $0x20] sm:$0xff pattern:$0x73625140]  ;;  %v7492_v41 = vld.sshfl [vmem:[#allocation1 + $0x28] sm:$0xff pattern:$0x73625140] }
 0x6e0   : > { %8127 = vmatpush.msrb.mxu2 %v7963_v9  ;;  %8146 = vmatpush.msrb.mxu3 %v7980_v59  ;;  %v7505_v52 = vadd.f32 %v7504_v58, %v7503_v46  ;;  %v7512_v6 = vadd.f32 %v7511_v24, %v7510_v1  ;;  %v7519_v43 = vadd.f32 %v7518_v28, %v7517_v40  ;;  %v7493_v44 = vld.sshfl [vmem:[#allocation1 + $0x30] sm:$0xff pattern:$0x73625140]  ;;  %v7494_v51 = vld.sshfl [vmem:[#allocation1 + $0x38] sm:$0xff pattern:$0x73625140] }
 0x6e1   : > { %8087 = vmatpush.msrb.mxu0 %v7931_v18  ;;  %8106 = vmatpush.msrb.mxu1 %v7948_v20  ;;  %v7924_v55 = vld [vmem:[#allocation8 + $0x228] sm:$0xff]  ;;  %v7941_v57 = vld [vmem:[#allocation8 + $0x2b0] sm:$0xff]  ;;  %v7526_v60 = vadd.f32 %v7525_v19, %v7524_v11  ;;  %v7531_v14 = vsel %vm486_vm0, %v7491_v22, 0.0  ;;  %v7538_v56 = vsel %vm486_vm0, %v7492_v41, 0.0  ;;  %v7545_v42 = vsel %vm486_vm0, %v7493_v44, 0.0  ;;  %v7955_v50 = vld [vmem:[#allocation8 + $0x320] sm:$0xff] }
 0x6e2   : > { %8128 = vmatpush.msrb.mxu2 %v7962_v5  ;;  %8147 = vmatpush.msrb.mxu3 %v7979_v13  ;;  %v7972_v63 = vld [vmem:[#allocation8 + $0x3a8] sm:$0xff]  ;;  %v7506_v54 = vrot.slane %v7505_v52, 2  ;;  %v7513_v9 = vrot.slane %v7512_v6, 2  ;;  %v7520_v59 = vrot.slane %v7519_v43, 2  ;;  %v7532_v18 = vrot.slane %v7531_v14, 4 }
 0x6e3   : > { %8088 = vmatpush.msrb.mxu0 %v7930_v61  ;;  %8107 = vmatpush.msrb.mxu1 %v7947_v49  ;;  %v7527_v20 = vrot.slane %v7526_v60, 2  ;;  %v7539_v45 = vrot.slane %v7538_v56, 4  ;;  %v7546_v5 = vrot.slane %v7545_v42, 4  ;;  %v7552_v13 = vsel %vm486_vm0, %v7494_v51, 0.0 }
 0x6e4   : > { %8129 = vmatpush.msrb.mxu2 %v7961_v25  ;;  %8148 = vmatpush.msrb.mxu3 %v7978_v62  ;;  %v7507_v61 = vadd.f32 %v7506_v54, %v7505_v52  ;;  %v7514_v49 = vadd.f32 %v7513_v9, %v7512_v6  ;;  %v7521_v25 = vadd.f32 %v7520_v59, %v7519_v43  ;;  %v7553_v62 = vrot.slane %v7552_v13, 4 }
 0x6e5   : > { %8089 = vmatpush.msrb.mxu0 %v7929_v16  ;;  %8108 = vmatpush.msrb.mxu1 %v7946_v32  ;;  %v7528_v16 = vadd.f32 %v7527_v20, %v7526_v60  ;;  %v7533_v32 = vadd.f32 %v7532_v18, %v7531_v14 }
 0x6e6   : > { %8130 = vmatpush.msrb.mxu2 %v7960_v17  ;;  %8149 = vmatpush.msrb.mxu3 %v7977_v2  ;;  %v7540_v17 = vadd.f32 %v7539_v45, %v7538_v56  ;;  %v7508_v21 = vrot.slane %v7507_v61, 1  ;;  %v7515_v2 = vrot.slane %v7514_v49, 1 }
 0x6e7   : > { %8090 = vmatpush.msrb.mxu0 %v7928_v27  ;;  %8109 = vmatpush.msrb.mxu1 %v7945_v3  ;;  %v7522_v27 = vrot.slane %v7521_v25, 1  ;;  %v7547_v3 = vadd.f32 %v7546_v5, %v7545_v42 }
 0x6e8   : > { %8131 = vmatpush.msrb.mxu2 %v7959_v26  ;;  %8150 = vmatpush.msrb.mxu3 %v7976_v29  ;;  %v7529_v26 = vrot.slane %v7528_v16, 1  ;;  %v7534_v29 = vrot.slane %v7533_v32, 2 }
 0x6e9   : > { %8091 = vmatpush.msrb.mxu0 %v7927_v35  ;;  %8110 = vmatpush.msrb.mxu1 %v7944_v30  ;;  %v7541_v35 = vrot.slane %v7540_v17, 2  ;;  %v7554_v30 = vadd.f32 %v7553_v62, %v7552_v13 }
 0x6ea   : > { %8132 = vmatpush.msrb.mxu2 %v7958_v12  ;;  %8151 = vmatpush.msrb.mxu3 %v7975_v33  ;;  %v7509_v12 = vadd.f32 %v7508_v21, %v7507_v61  ;;  %v7516_v33 = vadd.f32 %v7515_v2, %v7514_v49  ;;  %v7530_v34 = vadd.f32 %v7529_v26, %v7528_v16 }
 0x6eb   : > { %8092 = vmatpush.msrb.mxu0 %v7926_v15  ;;  %8111 = vmatpush.msrb.mxu1 %v7943_v31  ;;  %v7523_v15 = vadd.f32 %v7522_v27, %v7521_v25  ;;  %v7548_v31 = vrot.slane %v7547_v3, 2  ;;  %v7535_v39 = vadd.f32 %v7534_v29, %v7533_v32  ;;  %v7542_v48 = vadd.f32 %v7541_v35, %v7540_v17 }
 0x6ec   : > { %8133 = vmatpush.msrb.mxu2 %v7957_v36  ;;  %8152 = vmatpush.msrb.mxu3 %v7974_v37  ;;  %v7555_v36 = vrot.slane %v7554_v30, 2  ;;  %v7566_v37 = vmul.f32 %v15520_v10, %v7509_v12  ;;  %v7567_v47 = vmul.f32 %v15520_v10, %v7516_v33 }
 0x6ed   : > { %8093 = vmatpush.msrb.mxu0 %v7925_v38  ;;  %8112 = vmatpush.msrb.mxu1 %v7942_v53  ;;  %v7568_v0 = vmul.f32 %v15520_v10, %v7523_v15  ;;  %v7549_v38 = vadd.f32 %v7548_v31, %v7547_v3  ;;  %v7569_v53 = vmul.f32 %v15520_v10, %v7530_v34  ;;  %v7536_v46 = vrot.slane %v7535_v39, 1 }
 0x6ee   : > { %8134 = vmatpush.msrb.mxu2 %v7956_v8  ;;  %8153 = vmatpush.msrb.mxu3 %v7973_v23  ;;  %v7543_v1 = vrot.slane %v7542_v48, 1  ;;  %v7556_v40 = vadd.f32 %v7555_v36, %v7554_v30  ;;  %v7582_v11 = vrot.slane %v7567_v47, 6  ;;  %v15554_v36 = vld [vmem:[#allocation5] sm:$0xff] }
 0x6ef   : > { %8094 = vmatpush.msrb.mxu0 %v7924_v55  ;;  %8113 = vmatpush.msrb.mxu1 %v7941_v57  ;;  %v7583_v8 = vrot.slane %v7568_v0, 4  ;;  %v7550_v23 = vrot.slane %v7549_v38, 1  ;;  %v7584_v58 = vrot.slane %v7569_v53, 2  ;;  %v7537_v24 = vadd.f32 %v7536_v46, %v7535_v39 }
 0x6f0   : > { %8135 = vmatpush.msrb.mxu2 %v7955_v50  ;;  %8154 = vmatpush.msrb.mxu3 %v7972_v63  ;;  %v7544_v28 = vadd.f32 %v7543_v1, %v7542_v48  ;;  %v7557_v19 = vrot.slane %v7556_v40, 1  ;;  %v7588_v22 = vsel %vm486_vm0, %v7566_v37, %v7582_v11  ;;  %v7800_v46 = vperm.slane %v15554_v36, 1 }
 0x6f1   : > { %v7551_v41 = vadd.f32 %v7550_v23, %v7549_v38  ;;  %v7589_v52 = vsel %vm488_vm1, %v7583_v8, %v7584_v58  ;;  %v7570_v43 = vmul.f32 %v15520_v10, %v7537_v24  ;;  %v7801_v1 = vperm.slane %v15554_v36, 2 }
 0x6f2   : > { %v7558_v6 = vadd.f32 %v7557_v19, %v7556_v40  ;;  %v7571_v44 = vmul.f32 %v15520_v10, %v7544_v28  ;;  %v7590_v51 = vsel %vm490_vm2, %v7588_v22, %v7589_v52  ;;  %v7802_v24 = vperm.slane %v15554_v36, 3  ;;  %v15563_v28 = vld [vmem:[#allocation7] sm:$0xff] }
 0x6f3   : > { %v7572_v55 = vmul.f32 %v15520_v10, %v7551_v41  ;;  %v15537_v57 = vsub.f32 %v15504_v4, %v7590_v51  ;;  %v7799_v51 = vperm.slane %v15554_v36, 0 }
 0x6f4   : > { %v7573_v60 = vmul.f32 %v15520_v10, %v7558_v6  ;;  %v7585_v14 = vrot.slane %v7571_v44, 6 }
 0x6f5   : > { %v7586_v56 = vrot.slane %v7572_v55, 4  ;;  %v7598_v42 = vmul.f32 %v15537_v57, %v15537_v57 }
 0x6f6   : > { %v7587_v50 = vrot.slane %v7573_v60, 2  ;;  %v7591_v63 = vsel %vm486_vm0, %v7570_v43, %v7585_v14  ;;  %v15572_v14 = vrot.slane %v7800_v46, 6 }
 0x6f7   : > { %7602 = vst [vmem:[#allocation1] ss:$4 sm:$0xff] %v7598_v42  ;;  %v7826_v42 = vperm.slane %v15563_v28, 1 }
 0x6f8   : > { %v7592_v54 = vsel %vm488_vm1, %v7586_v56, %v7587_v50  ;;  %v15574_v56 = vrot.slane %v7801_v1, 4  ;;  %v15577_v50 = vrot.slane %v7802_v24, 2 }
 0x6f9   : > { %v7593_v9 = vsel %vm490_vm2, %v7591_v63, %v7592_v54  ;;  %v7827_v63 = vperm.slane %v15563_v28, 2 }
 0x6fa   : > { %v15546_v59 = vsub.f32 %v15506_v7, %v7593_v9 }
 0x6fc   : > { %v7599_v4 = vmul.f32 %v15546_v59, %v15546_v59 }
 0x6fe   : > { %7604 = vst [vmem:[#allocation1 + $0x20] ss:$4 sm:$0xff] %v7599_v4  ;;  %v7605_v18 = vld.sshfl [vmem:[#allocation1] sm:$0xff pattern:$0x73625140] }
 0x6ff   : > { %v7606_v20 = vld.sshfl [vmem:[#allocation1 + $0x8] sm:$0xff pattern:$0x73625140]  ;;  %v7607_v45 = vld.sshfl [vmem:[#allocation1 + $0x10] sm:$0xff pattern:$0x73625140] }
 0x700   : > { %v7608_v5 = vld.sshfl [vmem:[#allocation1 + $0x18] sm:$0xff pattern:$0x73625140]  ;;  %v7621_v13 = vsel %vm486_vm0, %v7605_v18, 0.0  ;;  %v7628_v61 = vsel %vm486_vm0, %v7606_v20, 0.0  ;;  %v7635_v49 = vsel %vm486_vm0, %v7607_v45, 0.0 }
 0x701   : > { %v7642_v25 = vsel %vm486_vm0, %v7608_v5, 0.0  ;;  %v7622_v62 = vrot.slane %v7621_v13, 4  ;;  %v7629_v16 = vrot.slane %v7628_v61, 4  ;;  %v7636_v7 = vrot.slane %v7635_v49, 4 }
 0x702   : > { %v7643_v32 = vrot.slane %v7642_v25, 4 }
 0x703   : > { %v7623_v17 = vadd.f32 %v7622_v62, %v7621_v13  ;;  %v7630_v21 = vadd.f32 %v7629_v16, %v7628_v61  ;;  %v7637_v2 = vadd.f32 %v7636_v7, %v7635_v49  ;;  %v7825_v13 = vperm.slane %v15563_v28, 0 }
 0x704   : > { %v7644_v27 = vadd.f32 %v7643_v32, %v7642_v25  ;;  %v7828_v61 = vperm.slane %v15563_v28, 3  ;;  %v15586_v49 = vrot.slane %v7826_v42, 6  ;;  %v15588_v62 = vrot.slane %v7827_v63, 4  ;;  %v7970_v42 = vld [vmem:[#allocation8 + $0x398] sm:$0xff]  ;;  %v7921_v63 = vld [vmem:[#allocation8 + $0x210] sm:$0xff] }
 0x705   : > { %v7624_v3 = vrot.slane %v7623_v17, 2  ;;  %v7631_v26 = vrot.slane %v7630_v21, 2  ;;  %v7638_v29 = vrot.slane %v7637_v2, 2  ;;  %v7609_v53 = vld.sshfl [vmem:[#allocation1 + $0x20] sm:$0xff pattern:$0x73625140] }
 0x706   : > { %v7645_v35 = vrot.slane %v7644_v27, 2  ;;  %v7610_v58 = vld.sshfl [vmem:[#allocation1 + $0x28] sm:$0xff pattern:$0x73625140]  ;;  %v7649_v41 = vsel %vm486_vm0, %v7609_v53, 0.0 }
 0x707   : > { %v7625_v30 = vadd.f32 %v7624_v3, %v7623_v17  ;;  %v7632_v12 = vadd.f32 %v7631_v26, %v7630_v21  ;;  %v7639_v33 = vadd.f32 %v7638_v29, %v7637_v2  ;;  %v7611_v19 = vld.sshfl [vmem:[#allocation1 + $0x30] sm:$0xff pattern:$0x73625140]  ;;  %v7612_v22 = vld.sshfl [vmem:[#allocation1 + $0x38] sm:$0xff pattern:$0x73625140] }
 0x708   : > { %v7646_v15 = vadd.f32 %v7645_v35, %v7644_v27  ;;  %v7650_v55 = vrot.slane %v7649_v41, 4  ;;  %v7656_v60 = vsel %vm486_vm0, %v7610_v58, 0.0  ;;  %v7663_v4 = vsel %vm486_vm0, %v7611_v19, 0.0  ;;  %v7922_v19 = vld [vmem:[#allocation8 + $0x218] sm:$0xff] }
 0x709   : > { %v7626_v31 = vrot.slane %v7625_v30, 1  ;;  %v7633_v34 = vrot.slane %v7632_v12, 1  ;;  %v7640_v39 = vrot.slane %v7639_v33, 1  ;;  %v7657_v9 = vrot.slane %v7656_v60, 4 }
 0x70a   : > { %v7647_v48 = vrot.slane %v7646_v15, 1  ;;  %v7651_v54 = vadd.f32 %v7650_v55, %v7649_v41  ;;  %v7670_v18 = vsel %vm486_vm0, %v7612_v22, 0.0  ;;  %v7664_v45 = vrot.slane %v7663_v4, 4  ;;  %v7939_v22 = vld [vmem:[#allocation8 + $0x2a0] sm:$0xff]  ;;  %v7953_v41 = vld [vmem:[#allocation8 + $0x310] sm:$0xff] }
 0x70b   : > { %v7627_v37 = vadd.f32 %v7626_v31, %v7625_v30  ;;  %v7634_v47 = vadd.f32 %v7633_v34, %v7632_v12  ;;  %v7641_v0 = vadd.f32 %v7640_v39, %v7639_v33  ;;  %v7671_v5 = vrot.slane %v7670_v18, 4 }
 0x70c   : > { %v7648_v38 = vadd.f32 %v7647_v48, %v7646_v15  ;;  %v7652_v20 = vrot.slane %v7651_v54, 2  ;;  %v7658_v25 = vadd.f32 %v7657_v9, %v7656_v60  ;;  %v7665_v7 = vadd.f32 %v7664_v45, %v7663_v4  ;;  %v7969_v45 = vld [vmem:[#allocation8 + $0x390] sm:$0xff] }
 0x70d   : > { %v7677_v40 = vmul.f32 %v7627_v37, %v15520_v10  ;;  %v7678_v11 = vmul.f32 %v7634_v47, %v15520_v10  ;;  %v7679_v8 = vmul.f32 %v7641_v0, %v15520_v10  ;;  %v7672_v32 = vadd.f32 %v7671_v5, %v7670_v18  ;;  %v7923_v47 = vld [vmem:[#allocation8 + $0x220] sm:$0xff]  ;;  %v7940_v0 = vld [vmem:[#allocation8 + $0x2a8] sm:$0xff] }
 0x70e   : > { %v7680_v23 = vmul.f32 %v7648_v38, %v15520_v10  ;;  %v7653_v16 = vadd.f32 %v7652_v20, %v7651_v54  ;;  %v7659_v21 = vrot.slane %v7658_v25, 2  ;;  %v7666_v26 = vrot.slane %v7665_v7, 2  ;;  %8095 = vmatpush.msrb.mxu0 %v7923_v47  ;;  %8114 = vmatpush.msrb.mxu1 %v7940_v0  ;;  %v7938_v54 = vld [vmem:[#allocation8 + $0x298] sm:$0xff]  ;;  %v7952_v20 = vld [vmem:[#allocation8 + $0x308] sm:$0xff] }
 0x70f   : > { %v7685_v52 = vadd.f32 1e-05, %v7677_v40  ;;  %v7686_v6 = vadd.f32 1e-05, %v7678_v11  ;;  %v15566_v43 = vadd.f32 1e-05, %v7679_v8 }
 0x710   : > { %v15568_v44 = vadd.f32 1e-05, %v7680_v23  ;;  %v7654_v3 = vrot.slane %v7653_v16, 1  ;;  %v7660_v30 = vadd.f32 %v7659_v21, %v7658_v25  ;;  %v7673_v12 = vrot.slane %v7672_v32, 2  ;;  %v7954_v40 = vld [vmem:[#allocation8 + $0x318] sm:$0xff]  ;;  %v7971_v11 = vld [vmem:[#allocation8 + $0x3a0] sm:$0xff]  ;;  %8096 = vmatpush.msrb.mxu0 %v7922_v19  ;;  %8115 = vmatpush.msrb.mxu1 %v7939_v22 }
 0x711   : > { %12896 = vrsqrt.f32 %v7685_v52  ;;  %vm7699_vm8 = vweird.f32 %v7685_v52  ;;  %vm7709_vm9 = vweird.f32 %v7686_v6  ;;  %vm7719_vm10 = vweird.f32 %v15566_v43  ;;  %8136 = vmatpush.msrb.mxu2 %v7954_v40  ;;  %8155 = vmatpush.msrb.mxu3 %v7971_v11  ;;  %v7920_v5 = vld [vmem:[#allocation8 + $0x208] sm:$0xff]  ;;  %v7937_v21 = vld [vmem:[#allocation8 + $0x290] sm:$0xff] }
 0x712   : > { %12898 = vrsqrt.f32 %v7686_v6  ;;  %vm7729_vm13 = vweird.f32 %v15568_v44  ;;  %v7655_v34 = vadd.f32 %v7654_v3, %v7653_v16  ;;  %v7661_v38 = vrot.slane %v7660_v30, 1  ;;  %8097 = vmatpush.msrb.mxu0 %v7921_v63  ;;  %8116 = vmatpush.msrb.mxu1 %v7938_v54  ;;  %v7968_v3 = vld [vmem:[#allocation8 + $0x388] sm:$0xff] }
 0x713   : > { %12900 = vrsqrt.f32 %v15566_v43  ;;  %v7667_v8 = vadd.f32 %v7666_v26, %v7665_v7  ;;  %v7674_v23 = vadd.f32 %v7673_v12, %v7672_v32  ;;  %8137 = vmatpush.msrb.mxu2 %v7953_v41  ;;  %8156 = vmatpush.msrb.mxu3 %v7970_v42  ;;  %v7835_v0 = vrot.slane %v7828_v61, 2 }
 0x714   : > { %12902 = vrsqrt.f32 %v15568_v44  ;;  %8098 = vmatpush.msrb.mxu0 %v7920_v5  ;;  %8117 = vmatpush.msrb.mxu1 %v7937_v21  ;;  %v7813_v61 = vsel %vm486_vm0, %v7799_v51, %v15572_v14  ;;  %v7814_v11 = vsel %vm488_vm1, %v15574_v56, %v15577_v50  ;;  %v7839_v51 = vsel %vm486_vm0, %v7825_v13, %v15586_v49  ;;  %v7967_v5 = vld [vmem:[#allocation8 + $0x380] sm:$0xff] }
 0x715   : > { %v7668_v9 = vrot.slane %v7667_v8, 1  ;;  %v7675_v25 = vrot.slane %v7674_v23, 1  ;;  %8138 = vmatpush.msrb.mxu2 %v7952_v20  ;;  %8157 = vmatpush.msrb.mxu3 %v7969_v45  ;;  %v7840_v14 = vsel %vm488_vm1, %v15588_v62, %v7835_v0  ;;  %v7815_v56 = vsel %vm490_vm2, %v7813_v61, %v7814_v11 }
 0x716   : > { %v7841_v19 = vsel %vm490_vm2, %v7839_v51, %v7840_v14  ;;  %v7805_v63 = vperm.slane %v15554_v36, 6  ;;  %v7806_v54 = vperm.slane %v15554_v36, 7 }
 0x717   : > { %v15590_v17 = vpop.eup %12896  ;;  %v7669_v26 = vadd.f32 %v7668_v9, %v7667_v8  ;;  %8158 = vmatpush.msrb.mxu3 %v7968_v3  ;;  %v7919_v9 = vld [vmem:[#allocation8 + $0x200] sm:$0xff] }
 0x718   : > { %v15593_v2 = vpop.eup %12898  ;;  %v7694_v27 = vmul.f32 %v15590_v17, %v7685_v52  ;;  %vm7700_vm11 = vweird.f32 %v15590_v17  ;;  %v7662_v52 = vadd.f32 %v7661_v38, %v7660_v30  ;;  %8099 = vmatpush.msrb.mxu0 %v7919_v9 }
 0x719   : > { %v15597_v29 = vpop.eup %12900  ;;  %v7704_v35 = vmul.f32 %v15593_v2, %v7686_v6  ;;  %vm7710_vm12 = vweird.f32 %v15593_v2  ;;  %vm15608_vm14 = vmor %vm7699_vm8, %vm7700_vm11  ;;  %v7681_v6 = vmul.f32 %v7655_v34, %v15520_v10  ;;  %v7683_v47 = vmul.f32 %v7669_v26, %v15520_v10  ;;  %8159 = vmatpush.msrb.mxu3 %v7967_v5 }
 0x71a   : > { %v15601_v33 = vpop.eup %12902  ;;  %v7695_v15 = vmul.f32 %v15590_v17, %v7694_v27  ;;  %v7714_v31 = vmul.f32 %v15597_v29, %v15566_v43  ;;  %vm7720_vm15 = vweird.f32 %v15597_v29  ;;  %vm15619_vm3 = vmor %vm7709_vm9, %vm7710_vm12  ;;  %v7682_v16 = vmul.f32 %v7662_v52, %v15520_v10  ;;  %v7951_v27 = vld [vmem:[#allocation8 + $0x300] sm:$0xff] }
 0x71b   : > { %v7705_v48 = vmul.f32 %v15593_v2, %v7704_v35  ;;  %v7724_v37 = vmul.f32 %v15601_v33, %v15568_v44  ;;  %vm7730_vm4 = vweird.f32 %v15601_v33  ;;  %v15629_v35 = vadd.f32 1e-05, %v7681_v6  ;;  %vm15636_vm5 = vmor %vm7719_vm10, %vm7720_vm15  ;;  %8139 = vmatpush.msrb.mxu2 %v7951_v27 }
 0x71c   : > { %v7696_v53 = vmul.f32 0.5, %v7695_v15  ;;  %v7715_v1 = vmul.f32 %v15597_v29, %v7714_v31  ;;  %v7676_v31 = vadd.f32 %v7675_v25, %v7674_v23  ;;  %v15640_v34 = vadd.f32 1e-05, %v7682_v16  ;;  %vm15650_vm6 = vmor %vm7729_vm13, %vm7730_vm4  ;;  %v7935_v25 = vld [vmem:[#allocation8 + $0x280] sm:$0xff] }
 0x71d   : > { %v7706_v58 = vmul.f32 0.5, %v7705_v48  ;;  %v7725_v24 = vmul.f32 %v15601_v33, %v7724_v37  ;;  %12904 = vrsqrt.f32 %v15629_v35  ;;  %vm7739_vm7 = vweird.f32 %v15629_v35 }
 0x71e   : > { %v7697_v55 = vsub.f32 1.5, %v7696_v53  ;;  %v7716_v60 = vmul.f32 0.5, %v7715_v1  ;;  %v7684_v44 = vmul.f32 %v7676_v31, %v15520_v10  ;;  %v15666_v1 = vadd.f32 1e-05, %v7683_v47 }
 0x71f   : > { %v7707_v4 = vsub.f32 1.5, %v7706_v58  ;;  %v7726_v18 = vmul.f32 0.5, %v7725_v24  ;;  %12906 = vrsqrt.f32 %v15640_v34  ;;  %vm7749_vm8 = vweird.f32 %v15640_v34 }
 0x720   : > { %v7698_v7 = vmul.f32 %v15590_v17, %v7697_v55  ;;  %v7717_v32 = vsub.f32 1.5, %v7716_v60  ;;  %v15676_v10 = vadd.f32 1e-05, %v7684_v44  ;;  %12908 = vrsqrt.f32 %v15666_v1 }
 0x721   : > { %v7708_v30 = vmul.f32 %v15593_v2, %v7707_v4  ;;  %v7727_v15 = vsub.f32 1.5, %v7726_v18  ;;  %vm7759_vm9 = vweird.f32 %v15666_v1  ;;  %v7804_v55 = vperm.slane %v15554_v36, 5  ;;  %v7936_v4 = vld [vmem:[#allocation8 + $0x288] sm:$0xff] }
 0x722   : > { %v7702_v48 = vsel %vm15608_vm14, %v15590_v17, %v7698_v7  ;;  %v7718_v37 = vmul.f32 %v15597_v29, %v7717_v32  ;;  %12910 = vrsqrt.f32 %v15676_v10  ;;  %vm7769_vm10 = vweird.f32 %v15676_v10  ;;  %8118 = vmatpush.msrb.mxu1 %v7936_v4 }
 0x723   : > { %v7712_v17 = vsel %vm15619_vm3, %v15593_v2, %v7708_v30  ;;  %v7728_v39 = vmul.f32 %v15601_v33, %v7727_v15  ;;  %v7830_v27 = vperm.slane %v15563_v28, 5  ;;  %v7832_v43 = vperm.slane %v15563_v28, 7 }
 0x724   : > { %v7722_v38 = vsel %vm15636_vm5, %v15597_v29, %v7718_v37  ;;  %v7781_v53 = vrot.slane %v7712_v17, 6  ;;  %8119 = vmatpush.msrb.mxu1 %v7935_v25  ;;  %v7831_v37 = vperm.slane %v15563_v28, 6  ;;  %v7803_v17 = vperm.slane %v15554_v36, 4 }
 0x725   : > { %v7732_v2 = vsel %vm15650_vm6, %v15601_v33, %v7728_v39  ;;  %v7782_v46 = vrot.slane %v7722_v38, 4  ;;  %v15684_v33 = vpop.eup %12904  ;;  %v7811_v44 = vrot.slane %v7805_v63, 4  ;;  %v7812_v38 = vrot.slane %v7806_v54, 2 }
 0x726   : > { %v7783_v40 = vrot.slane %v7732_v2, 2  ;;  %v7787_v29 = vsel %vm486_vm0, %v7702_v48, %v7781_v53  ;;  %v7734_v50 = vmul.f32 %v15684_v33, %v15629_v35  ;;  %v12907_v58 = vpop.eup %12906  ;;  %vm7740_vm13 = vweird.f32 %v15684_v33 }
 0x727   : > { %v7744_v13 = vmul.f32 %v12907_v58, %v15640_v34  ;;  %v15702_v49 = vpop.eup %12908  ;;  %vm7750_vm11 = vweird.f32 %v12907_v58  ;;  %vm15727_vm4 = vmor %vm7739_vm7, %vm7740_vm13  ;;  %v7810_v35 = vrot.slane %v7804_v55, 6  ;;  %v7836_v61 = vrot.slane %v7830_v27, 6 }
 0x728   : > { %v7788_v8 = vsel %vm488_vm1, %v7782_v46, %v7783_v40  ;;  %v7735_v22 = vmul.f32 %v15684_v33, %v7734_v50  ;;  %v12911_v41 = vpop.eup %12910  ;;  %v7754_v6 = vmul.f32 %v15702_v49, %v15666_v1  ;;  %vm7760_vm14 = vweird.f32 %v15702_v49  ;;  %vm15721_vm15 = vmor %vm7749_vm8, %vm7750_vm11 }
 0x729   : > { %v7789_v23 = vsel %vm490_vm2, %v7787_v29, %v7788_v8  ;;  %v7764_v42 = vmul.f32 %v12911_v41, %v15676_v10  ;;  %vm7770_vm3 = vweird.f32 %v12911_v41  ;;  %vm15735_vm5 = vmor %vm7759_vm9, %vm7760_vm14  ;;  %v7829_v46 = vperm.slane %v15563_v28, 4 }
 0x72a   : > { %v7795_v24 = vmul.f32 %v7789_v23, %v15537_v57  ;;  %v7736_v52 = vmul.f32 0.5, %v7735_v22  ;;  %v7745_v57 = vmul.f32 %v12907_v58, %v7744_v13  ;;  %v7755_v45 = vmul.f32 %v15702_v49, %v7754_v6  ;;  %vm7771_vm6 = vmor %vm7769_vm10, %vm7770_vm3 }
 0x72b   : > { %v7765_v7 = vmul.f32 %v12911_v41, %v7764_v42  ;;  %v7837_v40 = vrot.slane %v7831_v37, 4  ;;  %v7838_v29 = vrot.slane %v7832_v43, 2  ;;  %v7816_v14 = vsel %vm486_vm0, %v7803_v17, %v7810_v35 }
 0x72c   : > { %v7821_v62 = vmul.f32 %v7815_v56, %v7795_v24  ;;  %v7737_v18 = vsub.f32 1.5, %v7736_v52  ;;  %v7746_v20 = vmul.f32 0.5, %v7745_v57  ;;  %v7756_v21 = vmul.f32 0.5, %v7755_v45 }
 0x72d   : > { %v7766_v12 = vmul.f32 0.5, %v7765_v7  ;;  %v7842_v24 = vsel %vm486_vm0, %v7829_v46, %v7836_v61 }
 0x72e   : > { %v7847_v60 = vadd.f32 %v7841_v19, %v7821_v62  ;;  %v7747_v32 = vsub.f32 1.5, %v7746_v20  ;;  %v7738_v26 = vmul.f32 %v15684_v33, %v7737_v18  ;;  %v7757_v48 = vsub.f32 1.5, %v7756_v21 }
 0x72f   : > { %v7767_v47 = vsub.f32 1.5, %v7766_v12  ;;  %v7843_v19 = vsel %vm488_vm1, %v7837_v40, %v7838_v29 }
 0x730   : > { %vm7849_vm12 = vcmp.gt.f32.partialorder %v7847_v60, 0.0  ;;  %v7851_v16 = vmul.f32 0.2, %v7847_v60  ;;  %v7748_v31 = vmul.f32 %v12907_v58, %v7747_v32  ;;  %v7758_v0 = vmul.f32 %v15702_v49, %v7757_v48 }
 0x731   : > { %v7742_v53 = vsel %vm15727_vm4, %v15684_v33, %v7738_v26  ;;  %v7768_v1 = vmul.f32 %v12911_v41, %v7767_v47  ;;  %v7817_v33 = vsel %vm488_vm1, %v7811_v44, %v7812_v38  ;;  %v7844_v62 = vsel %vm490_vm2, %v7842_v24, %v7843_v19 }
 0x732   : > { %v7853_v3 = vsel %vm7849_vm12, %v7847_v60, %v7851_v16  ;;  %v7752_v39 = vsel %vm15721_vm15, %v12907_v58, %v7748_v31  ;;  %v7762_v36 = vsel %vm15735_vm5, %v15702_v49, %v7758_v0  ;;  %v7818_v13 = vsel %vm490_vm2, %v7816_v14, %v7817_v33 }
 0x733   : > { %7985 = vst [vmem:[#allocation1] ss:$4 sm:$0xff] %v7853_v3  ;;  %v7784_v2 = vrot.slane %v7752_v39, 6  ;;  %v7772_v11 = vsel %vm7771_vm6, %v12911_v41, %v7768_v1  ;;  %v7785_v10 = vrot.slane %v7762_v36, 4 }
 0x734   : > { %v7786_v8 = vrot.slane %v7772_v11, 2 }
 0x735   : > { %v7790_v51 = vsel %vm486_vm0, %v7742_v53, %v7784_v2 }
 0x736   : > { %v7791_v58 = vsel %vm488_vm1, %v7785_v10, %v7786_v8 }
 0x737   : > { %v7792_v22 = vsel %vm490_vm2, %v7790_v51, %v7791_v58 }
 0x738   : > { %v7796_v49 = vmul.f32 %v7792_v22, %v15546_v59 }
 0x73a   : > { %v7990_v23 = vld.sshfl [vmem:[#allocation1 + $0x10] sm:$0xff pattern:$0x73625140]  ;;  %v7988_v56 = vld.sshfl [vmem:[#allocation1] sm:$0xff pattern:$0x73625140]  ;;  %v7822_v41 = vmul.f32 %v7818_v13, %v7796_v49 }
 0x73b   : > { %8060 = vmatmul.f32.vlgmr.msra.gmra.mxu2 %v7990_v23  ;;  %8020 = vmatmul.f32.vlgmr.msra.gmra.mxu0 %v7988_v56  ;;  %v7989_v28 = vld.sshfl [vmem:[#allocation1 + $0x8] sm:$0xff pattern:$0x73625140]  ;;  %v7991_v50 = vld.sshfl [vmem:[#allocation1 + $0x18] sm:$0xff pattern:$0x73625140] }
 0x73c   : > { %8040 = vmatmul.f32.vlgmr.msra.gmra.mxu1 %v7989_v28  ;;  %8080 = vmatmul.f32.vlgmr.msra.gmra.mxu3 %v7991_v50  ;;  %v7848_v52 = vadd.f32 %v7844_v62, %v7822_v41 }
 0x73e   : > { %vm7850_vm7 = vcmp.gt.f32.partialorder %v7848_v52, 0.0  ;;  %v7852_v57 = vmul.f32 0.2, %v7848_v52 }
 0x740   : > { %v7854_v6 = vsel %vm7850_vm7, %v7848_v52, %v7852_v57 }
 0x741   : > { %7987 = vst [vmem:[#allocation1 + $0x20] ss:$4 sm:$0xff] %v7854_v6 }
 0x748   : > { %v7994_v55 = vld.sshfl [vmem:[#allocation1 + $0x30] sm:$0xff pattern:$0x73625140]  ;;  %v7992_v60 = vld.sshfl [vmem:[#allocation1 + $0x20] sm:$0xff pattern:$0x73625140] }
 0x749   : > { %8140 = vmatmul.f32.vlgmr.msrb.gmra.mxu2 %v7994_v55  ;;  %8100 = vmatmul.f32.vlgmr.msrb.gmra.mxu0 %v7992_v60  ;;  %v7995_v42 = vld.sshfl [vmem:[#allocation1 + $0x38] sm:$0xff pattern:$0x73625140]  ;;  %v7993_v63 = vld.sshfl [vmem:[#allocation1 + $0x28] sm:$0xff pattern:$0x73625140] }
 0x74a   : > { %8160 = vmatmul.f32.vlgmr.msrb.gmra.mxu3 %v7995_v42  ;;  %8120 = vmatmul.f32.vlgmr.msrb.gmra.mxu1 %v7993_v63 }
 0x7b8   : > { %v8021_v54 = vpop.f32.mrf.mxu0 }
 0x7b9   : > { %v8041_v9 = vpop.f32.mrf.mxu1 }
 0x7ba   : > { %v8042_v59 = vadd.f32 %v8041_v9, %v8021_v54 }
 0x7be   : > { %v8061_v4 = vpop.f32.mrf.mxu2 }
 0x7bf   : > { %v8062_v18 = vadd.f32 %v8061_v4, %v8042_v59  ;;  %v8081_v20 = vpop.f32.mrf.mxu3 }
 0x7c1   : > { %v8082_v45 = vadd.f32 %v8081_v20, %v8062_v18 }
 0x7c6   : > { %v8101_v5 = vpop.f32.mrf.mxu0 }
 0x7c7   : > { %v8102_v25 = vadd.f32 %v8101_v5, %v8082_v45  ;;  %v8121_v16 = vpop.f32.mrf.mxu1 }
 0x7c9   : > { %v8122_v7 = vadd.f32 %v8121_v16, %v8102_v25 }
 0x7cc   : > { %v8141_v32 = vpop.f32.mrf.mxu2 }
 0x7cd   : > { %v8142_v21 = vadd.f32 %v8141_v32, %v8122_v7  ;;  %v8161_v27 = vpop.f32.mrf.mxu3 }
 0x7cf   : > { %v8162_v3 = vadd.f32 %v8161_v27, %v8142_v21 }
 0x7d1   : > { %8164 = vst [vmem:[%s15790_s7] sm:$0x3] %v8162_v3 }
 0x7d2 PF: > { %s22_s29 = sadd.s32 1, %s13090_s29   ;;  %s15815_s24 = smov %s13074_s25 }
 0x7d3   : > { %p19_p4 = scmp.ge.s32.totalorder %s22_s29, 6   ;;  %s15816_s25 = smov %s13078_s26 }
 0x7d4   : > { %s15817_s26 = smov %s13223_s21  ;;  %s15818_s27 = smov %s13086_s28 }
 0x7d5   : > { %s15819_s28 = smov %s15821_s17  ;;  %21 = sbr.rel (!%p19_p4) target bundleno = 10 (0xa), region = 124 }
 0x7da   :  { %8184 = vsyncpa [#allocation4], 1 }
 0x7db   :  { %8186 = vsyncpa [#allocation4 + $0x1], 1 }
 0x7dc   :  { %8187 = vsyncpa [#allocation6], 1 }
 0x7dd   :  { %8188 = vsyncpa [#allocation9], 1 }

</bundles_post_ra>
